<compile_context>
chip_gen: v5e
topology: v5e:2x2
jax: 0.10.0
libtpu: 0.0.40
codegen_flags: <defaults>
</compile_context>

<pallas_src>
import jax
import jax.numpy as jnp
from jax.experimental import pallas as pl
from jax.experimental.pallas import tpu as pltpu

HIDDEN = 768      # DistilBERT hidden size
MLP = 1024        # head hidden size
VOCAB = 1000      # synthetic vocab for the embedding stub

_VMEM_LIMIT = 24 << 20   # actual footprint ~11 MiB at tm=512; leaves v7x headroom
_BATCH_TILE = 512        # batch tile for the gridded path (sweep 512/1024)


def _small_batch_threshold():
    """Below this batch size, run a single un-pipelined invocation (no grid).

    v7x has 2 TensorCores per chip: drop the threshold so mid-size batches get
    a >=2-tile grid with 'parallel' semantics and engage both cores. v5e/v6e
    have a single TC, so the no-grid path stays preferable up to larger B.
    """
    try:
        kind = jax.devices()[0].device_kind.lower()
    except Exception:  # no device info available (e.g. AOT); be conservative
        kind = ""
    if "v7" in kind or "7x" in kind:
        return 128
    return 512


def regressor_head_kernel(x_ref, w1_ref, b1_ref, w2_ref, b2_ref,
                          w3_ref, b3_ref, o_ref):
    """(TM,768) f32 -> linear1+ReLU -> linear2+ReLU -> final_linear -> sigmoid*999+1."""
    # In-kernel bf16 cast of the activation (free VPU work under the MXU-bound
    # schedule; avoids a separate XLA cast pass over x in HBM).
    x = x_ref[...].astype(jnp.bfloat16)                                # (TM, 768) bf16

    # linear1 + ReLU: bf16 operands into the MXU, f32 accumulate, f32 elementwise.
    h1 = jnp.dot(x, w1_ref[...], preferred_element_type=jnp.float32)   # (TM, 1024) f32
    h1 = jnp.maximum(h1 + b1_ref[...], 0.0)

    # linear2 + ReLU: cast activation to bf16 for the MXU, keep f32 accumulation.
    h2 = jnp.dot(h1.astype(jnp.bfloat16), w2_ref[...],
                 preferred_element_type=jnp.float32)                   # (TM, 1024) f32
    h2 = jnp.maximum(h2 + b2_ref[...], 0.0)

    # final_linear (1024 -> 1) as a lane-dense VPU/XLU reduction, w3 is (1, 1024).
    logit = jnp.sum(h2 * w3_ref[...], axis=-1, keepdims=True) + b3_ref[...]  # (TM, 1)

    o_ref[...] = jax.nn.sigmoid(logit) * 999.0 + 1.0                   # Sigmoid()*999+1


def bert_regressor_head(cls_embedding, params):
    """Fused MLP head: (B, 768) f32 -> (B, 1) f32 in [1, 1000]."""
    B = cls_embedding.shape[0]
    w1, b1, w2, b2, w3, b3 = params

    # Weights are stored bf16 at init; guard only for callers passing f32 masters.
    w1_bf = w1 if w1.dtype == jnp.bfloat16 else w1.astype(jnp.bfloat16)   # (768, 1024)
    w2_bf = w2 if w2.dtype == jnp.bfloat16 else w2.astype(jnp.bfloat16)   # (1024, 1024)
    w3_row = w3.reshape(1, MLP)                                           # lane-dense (1, 1024) f32

    flops = 2 * B * (HIDDEN * MLP + MLP * MLP + MLP)
    bytes_accessed = (w1_bf.size + w2_bf.size) * 2 \
        + (cls_embedding.size + w3_row.size + b1.size + b2.size + b3.size) * 4 + B * 4
    cost = pl.CostEstimate(flops=flops, transcendentals=B,
                           bytes_accessed=bytes_accessed)

    args = (cls_embedding, w1_bf, b1, w2_bf, b2, w3_row, b3)
    out_shape = jax.ShapeDtypeStruct((B, 1), jnp.float32)

    if B <= _small_batch_threshold():
        # Single invocation, whole arrays in VMEM, no pipelining machinery
        # (avoids double-buffering weights that are used exactly once).
        return pl.pallas_call(
            regressor_head_kernel,
            out_shape=out_shape,
            compiler_params=pltpu.CompilerParams(vmem_limit_bytes=_VMEM_LIMIT),
            cost_estimate=cost,
        )(*args)

    # Large batch: tile the batch dimension. Weights/biases use a constant
    # index_map so they stay VMEM-resident across grid steps and are
    # single-buffered (Buffered(1)) since they're fetched exactly once; the
    # batch axis is "parallel" so v7x can split tiles across its two
    # TensorCores (note: each TC then holds its own weight copy in its private
    # 64 MiB VMEM -- accounted for in _VMEM_LIMIT / tile sizing).
    tm = _BATCH_TILE
    grid = (pl.cdiv(B, tm),)
    const = lambda shape: pl.BlockSpec(shape, lambda i: (0, 0),
                                       pipeline_mode=pl.Buffered(1))
    return pl.pallas_call(
        regressor_head_kernel,
        out_shape=out_shape,
        grid=grid,
        in_specs=[
            pl.BlockSpec((tm, HIDDEN), lambda i: (i, 0)),   # x tile (f32, cast in-kernel)
            const((HIDDEN, MLP)),                           # w1 (resident, single-buffered)
            const((1, MLP)),                                # b1
            const((MLP, MLP)),                              # w2 (resident, single-buffered)
            const((1, MLP)),                                # b2
            const((1, MLP)),                                # w3 (lane-dense)
            const((1, 1)),                                  # b3
        ],
        out_specs=pl.BlockSpec((tm, 1), lambda i: (i, 0)),
        compiler_params=pltpu.CompilerParams(
            dimension_semantics=("parallel",),
            vmem_limit_bytes=_VMEM_LIMIT,
        ),
        cost_estimate=cost,
    )(*args)


def init_params(key):
    """Deterministic synthetic parameters matching the module's shapes.

    w1/w2 are stored in bf16 (MXU operand dtype) so the per-call path never
    re-casts the ~7 MiB of f32 weights; biases / w3 stay f32 (elementwise path).
    """
    k = jax.random.split(key, 7)
    emb = jax.random.normal(k[0], (VOCAB, HIDDEN), jnp.float32) * 0.02
    w1 = (jax.random.normal(k[1], (HIDDEN, MLP), jnp.float32)
          * (1.0 / HIDDEN ** 0.5)).astype(jnp.bfloat16)
    b1 = jax.random.normal(k[2], (1, MLP), jnp.float32) * 0.01
    w2 = (jax.random.normal(k[3], (MLP, MLP), jnp.float32)
          * (1.0 / MLP ** 0.5)).astype(jnp.bfloat16)
    b2 = jax.random.normal(k[4], (1, MLP), jnp.float32) * 0.01
    # Stored lane-dense as (1, 1024) -- same layout as PyTorch's Linear(1024, 1).weight.
    w3 = jax.random.normal(k[5], (1, MLP), jnp.float32) * (1.0 / MLP ** 0.5)
    b3 = jax.random.normal(k[6], (1, 1), jnp.float32) * 0.01
    return emb, (w1, b1, w2, b2, w3, b3)


def bert_regressor_forward(input_ids, attention_mask, emb, head_params):
    # --- backbone stub (glue, plain JAX): deterministic embedding lookup, CLS token ---
    # TODO(synk): attention_mask is unused by the stub backbone (no real encoder here).
    del attention_mask
    cls_embedding = emb[input_ids[:, 0]]             # (B, 768) f32, mimics last_hidden_state[:, 0, :]
    # --- regressor head: fused Pallas kernel (hot path) ---
    return bert_regressor_head(cls_embedding, head_params)


if __name__ == "__main__":
    key = jax.random.PRNGKey(0)
    k_params, k_ids = jax.random.split(key)

    emb, head_params = init_params(k_params)

    B, SEQ = 2, 8
    input_ids = jax.random.randint(k_ids, (B, SEQ), 0, VOCAB, dtype=jnp.int32)
    attention_mask = jnp.ones((B, SEQ), dtype=jnp.int32)

    out = bert_regressor_forward(input_ids, attention_mask, emb, head_params)
    out = jax.block_until_ready(out)

    assert out.shape == (B, 1)
    assert bool(jnp.all(out >= 1.0)) and bool(jnp.all(out <= 1000.0))
    assert bool(jnp.all(jnp.isfinite(out)))
    print("KERNEL_OK")
</pallas_src>

<mosaic_0001>
module attributes {stable_mosaic.version = 11 : i64} {
  func.func @regressor_head_kernel(%arg0: memref<2x768xf32, #tpu.memory_space<vmem>>, %arg1: memref<768x1024xbf16, #tpu.memory_space<vmem>>, %arg2: memref<1x1024xf32, #tpu.memory_space<vmem>>, %arg3: memref<1024x1024xbf16, #tpu.memory_space<vmem>>, %arg4: memref<1x1024xf32, #tpu.memory_space<vmem>>, %arg5: memref<1x1024xf32, #tpu.memory_space<vmem>>, %arg6: memref<1x1xf32, #tpu.memory_space<vmem>>, %arg7: memref<2x1xf32, #tpu.memory_space<vmem>>) attributes {dimension_semantics = [], scalar_prefetch = 0 : i64, scratch_operands = 0 : i64, tpu.core_type = #tpu.core_type<tc>} {
    %c0 = arith.constant 0 : index
    %c0_0 = arith.constant 0 : index
    %0 = vector.load %arg0[%c0, %c0_0] : memref<2x768xf32, #tpu.memory_space<vmem>>, vector<2x768xf32>
    %1 = arith.truncf %0 : vector<2x768xf32> to vector<2x768xbf16>
    %c0_1 = arith.constant 0 : index
    %c0_2 = arith.constant 0 : index
    %2 = vector.load %arg1[%c0_1, %c0_2] : memref<768x1024xbf16, #tpu.memory_space<vmem>>, vector<768x1024xbf16>
    %cst = arith.constant dense<0.000000e+00> : vector<2x1024xf32>
    %3 = tpu.matmul %1, %2, %cst {dimension_numbers = #tpu.dot_dimension_numbers<[1], [0], [0], [1], [0, 0, 1, 1], [], []>} : vector<2x768xbf16>, vector<768x1024xbf16>, vector<2x1024xf32> -> vector<2x1024xf32>
    %c0_3 = arith.constant 0 : index
    %c0_4 = arith.constant 0 : index
    %4 = vector.load %arg2[%c0_3, %c0_4] : memref<1x1024xf32, #tpu.memory_space<vmem>>, vector<1x1024xf32>
    %5 = vector.broadcast %4 : vector<1x1024xf32> to vector<2x1024xf32>
    %6 = arith.addf %3, %5 : vector<2x1024xf32>
    %cst_5 = arith.constant 0.000000e+00 : f32
    %7 = vector.broadcast %cst_5 : f32 to vector<2x1024xf32>
    %8 = arith.maximumf %6, %7 : vector<2x1024xf32>
    %9 = arith.truncf %8 : vector<2x1024xf32> to vector<2x1024xbf16>
    %c0_6 = arith.constant 0 : index
    %c0_7 = arith.constant 0 : index
    %10 = vector.load %arg3[%c0_6, %c0_7] : memref<1024x1024xbf16, #tpu.memory_space<vmem>>, vector<1024x1024xbf16>
    %cst_8 = arith.constant dense<0.000000e+00> : vector<2x1024xf32>
    %11 = tpu.matmul %9, %10, %cst_8 {dimension_numbers = #tpu.dot_dimension_numbers<[1], [0], [0], [1], [0, 0, 1, 1], [], []>} : vector<2x1024xbf16>, vector<1024x1024xbf16>, vector<2x1024xf32> -> vector<2x1024xf32>
    %c0_9 = arith.constant 0 : index
    %c0_10 = arith.constant 0 : index
    %12 = vector.load %arg4[%c0_9, %c0_10] : memref<1x1024xf32, #tpu.memory_space<vmem>>, vector<1x1024xf32>
    %13 = vector.broadcast %12 : vector<1x1024xf32> to vector<2x1024xf32>
    %14 = arith.addf %11, %13 : vector<2x1024xf32>
    %cst_11 = arith.constant 0.000000e+00 : f32
    %15 = vector.broadcast %cst_11 : f32 to vector<2x1024xf32>
    %16 = arith.maximumf %14, %15 : vector<2x1024xf32>
    %c0_12 = arith.constant 0 : index
    %c0_13 = arith.constant 0 : index
    %17 = vector.load %arg5[%c0_12, %c0_13] : memref<1x1024xf32, #tpu.memory_space<vmem>>, vector<1x1024xf32>
    %18 = vector.broadcast %17 : vector<1x1024xf32> to vector<2x1024xf32>
    %19 = arith.mulf %16, %18 : vector<2x1024xf32>
    %cst_14 = arith.constant dense<0.000000e+00> : vector<2xf32>
    %20 = vector.multi_reduction <add>, %19, %cst_14 [1] : vector<2x1024xf32> to vector<2xf32>
    %21 = vector.shape_cast %20 : vector<2xf32> to vector<2x1xf32>
    %c0_15 = arith.constant 0 : index
    %c0_16 = arith.constant 0 : index
    %22 = vector.load %arg6[%c0_15, %c0_16] : memref<1x1xf32, #tpu.memory_space<vmem>>, vector<1x1xf32>
    %23 = vector.broadcast %22 : vector<1x1xf32> to vector<2x1xf32>
    %24 = arith.addf %21, %23 : vector<2x1xf32>
    %25 = arith.negf %24 : vector<2x1xf32>
    %26 = math.exp %25 : vector<2x1xf32>
    %cst_17 = arith.constant 1.000000e+00 : f32
    %27 = vector.broadcast %cst_17 : f32 to vector<2x1xf32>
    %28 = arith.addf %27, %26 : vector<2x1xf32>
    %29 = arith.divf %27, %28 : vector<2x1xf32>
    %cst_18 = arith.constant 9.990000e+02 : f32
    %30 = vector.broadcast %cst_18 : f32 to vector<2x1xf32>
    %31 = arith.mulf %29, %30 : vector<2x1xf32>
    %cst_19 = arith.constant 1.000000e+00 : f32
    %32 = vector.broadcast %cst_19 : f32 to vector<2x1xf32>
    %33 = arith.addf %31, %32 : vector<2x1xf32>
    %c0_20 = arith.constant 0 : index
    %c0_21 = arith.constant 0 : index
    %34 = vector.load %arg7[%c0_20, %c0_21] : memref<2x1xf32, #tpu.memory_space<vmem>>, vector<2x1xf32>
    tpu.vector_store %arg7[%c0_20, %c0_21], %33 {strides = array<i32>} : memref<2x1xf32, #tpu.memory_space<vmem>>, vector<2x1xf32>,
    return
  }
}

</mosaic_0001>

<bundles_post_ra>
// kernel: tpu_custom_call.1
= control target key start
LH: loop header
LB: loop body
LE: loop exit
PB: predicated region body
PF: predicated region fallthrough
CT: control target
= control target key end

     0   :  { %s12178_s0 = inlined_call_operand.hbm [shape: f32[2,768], index: 0, kind: input, shape index: {}]   ;;  %s12179_s1 = inlined_call_operand.hbm [shape: bf16[768,1024], index: 1, kind: input, shape index: {}]   ;;  %s12180_s2 = inlined_call_operand.hbm [shape: f32[1,1024], index: 2, kind: input, shape index: {}]   ;;  %s12181_s3 = inlined_call_operand.hbm [shape: bf16[1024,1024], index: 3, kind: input, shape index: {}]   ;;  %s12182_s4 = inlined_call_operand.hbm [shape: f32[1,1024], index: 4, kind: input, shape index: {}]   ;;  %s12183_s5 = inlined_call_operand.hbm [shape: f32[1,1024], index: 5, kind: input, shape index: {}]   ;;  %s12184_s6 = inlined_call_operand.<no memory space> [shape: f32[1,1], index: 6, kind: input, shape index: {}]   ;;  %s12185_s7 = inlined_call_operand.vmem [shape: f32[2,1], index: 7, kind: output, shape index: {}]  }
   0x1   :  { %v12_v0 = vstv %s12184_s6 }
   0x2   :  { %13 = vst [vmem:[#allocation2] sm:$0x1] %v12_v0 }
   0x3   :  { %14 = vsyncpa [#allocation4], 0 }
   0x4   :  { %15 = vsyncpa [#allocation6], 0 }
   0x5   :  { %16 = vsyncpa [#allocation9], 0  ;;  %s33_s28 = sshll.u32 %s12179_s1, 4  ;;  %s34_s28 = int_to_ptr.hbm [resolvable:$true] %s33_s28 }
   0x6   :  { %17 = vsyncpa [#allocation12], 0  ;;  %s11763_s29 = smov [#allocation5]   ;;  %s57_s10 = sshll.u32 %s12181_s3, 4  ;;  %s58_s10 = int_to_ptr.hbm [resolvable:$true] %s57_s10 }
   0x7   :  { %s35_s30 = sshll.u32 %s11763_s29, 4  ;;  %s11764_s11 = smov 512   ;;  %s36_s30 = int_to_ptr.vmem [resolvable:$true] %s35_s30 }
   0x8   :  { %s11765_s12 = smov 32   ;;  %s11766_s6 = smov [#allocation8]  }
   0x9   :  { %41 = dma.hbm_to_vmem [thread:$0]  %s34_s28, 49152, %s36_s30, [#allocation6], %s11764_s11, %s11764_s11, %s11765_s12  }
   0xa   :  { %s59_s13 = sshll.u32 %s11766_s6, 4  ;;  %s23_s16 = sshll.u32 %s12178_s0, 4  ;;  %s60_s13 = int_to_ptr.vmem [resolvable:$true] %s59_s13  ;;  %s24_s16 = int_to_ptr.hbm [resolvable:$true] %s23_s16 }
   0xb   :  { %65 = dma.hbm_to_vmem [thread:$0]  %s58_s10, 65536, %s60_s13, [#allocation9], %s11764_s11, %s11764_s11, %s11765_s12  }
   0xc   :  { %s47_s18 = sshll.u32 %s12180_s2, 4  ;;  %s11767_s19 = smov [#allocation3]   ;;  %s48_s18 = int_to_ptr.hbm [resolvable:$true] %s47_s18 }
   0xd   :  { %s25_s20 = sshll.u32 %s11767_s19, 4  ;;  %s11768_s3 = smov [#allocation7]   ;;  %s26_s20 = int_to_ptr.vmem [resolvable:$true] %s25_s20 }
   0xe   :  { %28 = dma.hbm_to_vmem [thread:$0]  %s24_s16, 192, %s26_s20, [#allocation4]  }
   0xf   :  { %s49_s21 = sshll.u32 %s11768_s3, 4  ;;  %s71_s24 = sshll.u32 %s12182_s4, 4  ;;  %s50_s21 = int_to_ptr.vmem [resolvable:$true] %s49_s21  ;;  %s72_s24 = int_to_ptr.hbm [resolvable:$true] %s71_s24 }
  0x10   :  { %52 = dma.hbm_to_vmem [thread:$0]  %s48_s18, 128, %s50_s21, [#allocation6]  }
  0x11   :  { %s82_s26 = sshll.u32 %s12183_s5, 4  ;;  %s11769_s27 = smov [#allocation10]   ;;  %s83_s26 = int_to_ptr.hbm [resolvable:$true] %s82_s26 }
  0x12   :  { %s73_s2 = sshll.u32 %s11769_s27, 4  ;;  %s11770_s28 = smov [#allocation11]   ;;  %s74_s2 = int_to_ptr.vmem [resolvable:$true] %s73_s2 }
  0x13   :  { %76 = dma.hbm_to_vmem [thread:$0]  %s72_s24, 128, %s74_s2, [#allocation9]  }
  0x14   :  { %s84_s29 = sshll.u32 %s11770_s28, 4  ;;  %s85_s29 = int_to_ptr.vmem [resolvable:$true] %s84_s29 }
  0x15   :  { %87 = dma.hbm_to_vmem [thread:$0]  %s83_s26, 128, %s85_s29, [#allocation12]  }
  0x16   :  { %11755 = dma.done.wait [#allocation4], 192  }
  0x17   :  { %11756 = vsyncadd [#allocation4], 4294967104 }
  0x18   :  { %11757 = dma.done.wait [#allocation6], 49280  }
  0x19   :  { %11758 = vsyncadd [#allocation6], 4294918016 }
  0x1a   :  { %11759 = dma.done.wait [#allocation9], 65664  }
  0x1b   :  { %11760 = vsyncadd [#allocation9], 4294901632 }
  0x1c   :  { %11761 = dma.done.wait [#allocation12], 128  }
  0x1d   :  { %11762 = vsyncadd [#allocation12], 4294967168  ;;  %v7337_v1 = vld [vmem:[#allocation5 + $0x1c0] sm:$0xf]  ;;  %vm7057_vm0 = vcmask 1041408   ;;  %vm7101_vm5 = vcmask 1024  }
  0x1e   :  { %v10756_v2 = vld [vmem:[#allocation5 + $0x1dc] sm:$0xf0] }
  0x1f   :  { %v7593_v3 = vld [vmem:[#allocation5 + $0x3c0] sm:$0xf]  ;;  %v7338_v4 = vor.u32 %v10756_v2, %v7337_v1 }
  0x20   :  { %v10820_v5 = vld [vmem:[#allocation5 + $0x3dc] sm:$0xf0] }
  0x21   :  { %v7849_v6 = vld [vmem:[#allocation5 + $0x5c0] sm:$0xf]  ;;  %v7594_v8 = vor.u32 %v10820_v5, %v7593_v3  ;;  %2461 = vmatpush.bf16.msra.mxu0 %v7338_v4 }
  0x22   :  { %v10884_v7 = vld [vmem:[#allocation5 + $0x5dc] sm:$0xf0] }
  0x23   :  { %v7850_v9 = vor.u32 %v10884_v7, %v7849_v6  ;;  %v8105_v10 = vld [vmem:[#allocation5 + $0x7c0] sm:$0xf]  ;;  %2474 = vmatpush.bf16.msra.mxu1 %v7594_v8 }
  0x24   :  { %v10948_v11 = vld [vmem:[#allocation5 + $0x7dc] sm:$0xf0] }
  0x25   :  { %v7305_v12 = vld [vmem:[#allocation5 + $0x180] sm:$0xf]  ;;  %v8106_v13 = vor.u32 %v10948_v11, %v8105_v10  ;;  %2487 = vmatpush.bf16.msra.mxu2 %v7850_v9 }
  0x26   :  { %v10748_v14 = vld [vmem:[#allocation5 + $0x19c] sm:$0xf0] }
  0x27   :  { %v7561_v15 = vld [vmem:[#allocation5 + $0x380] sm:$0xf]  ;;  %v7306_v17 = vor.u32 %v10748_v14, %v7305_v12  ;;  %2500 = vmatpush.bf16.msra.mxu3 %v8106_v13 }
  0x28   :  { %v10812_v16 = vld [vmem:[#allocation5 + $0x39c] sm:$0xf0] }
  0x29   :  { %v7562_v18 = vor.u32 %v10812_v16, %v7561_v15  ;;  %v7817_v19 = vld [vmem:[#allocation5 + $0x580] sm:$0xf]  ;;  %2462 = vmatpush.bf16.msra.mxu0 %v7306_v17 }
  0x2a   :  { %v10876_v20 = vld [vmem:[#allocation5 + $0x59c] sm:$0xf0] }
  0x2b   :  { %v8073_v21 = vld [vmem:[#allocation5 + $0x780] sm:$0xf]  ;;  %v7818_v22 = vor.u32 %v10876_v20, %v7817_v19  ;;  %2475 = vmatpush.bf16.msra.mxu1 %v7562_v18 }
  0x2c   :  { %v10940_v23 = vld [vmem:[#allocation5 + $0x79c] sm:$0xf0] }
  0x2d   :  { %v7273_v24 = vld [vmem:[#allocation5 + $0x140] sm:$0xf]  ;;  %v8074_v26 = vor.u32 %v10940_v23, %v8073_v21  ;;  %2488 = vmatpush.bf16.msra.mxu2 %v7818_v22 }
  0x2e   :  { %v10740_v25 = vld [vmem:[#allocation5 + $0x15c] sm:$0xf0] }
  0x2f   :  { %v7529_v27 = vld [vmem:[#allocation5 + $0x340] sm:$0xf]  ;;  %v7274_v30 = vor.u32 %v10740_v25, %v7273_v24  ;;  %2501 = vmatpush.bf16.msra.mxu3 %v8074_v26 }
  0x30   :  { %v10804_v28 = vld [vmem:[#allocation5 + $0x35c] sm:$0xf0] }
  0x31   :  { %v7785_v29 = vld [vmem:[#allocation5 + $0x540] sm:$0xf]  ;;  %v7530_v34 = vor.u32 %v10804_v28, %v7529_v27  ;;  %2463 = vmatpush.bf16.msra.mxu0 %v7274_v30 }
  0x32   :  { %v10868_v31 = vld [vmem:[#allocation5 + $0x55c] sm:$0xf0] }
  0x33   :  { %v8041_v32 = vld [vmem:[#allocation5 + $0x740] sm:$0xf]  ;;  %v7786_v35 = vor.u32 %v10868_v31, %v7785_v29  ;;  %2476 = vmatpush.bf16.msra.mxu1 %v7530_v34  ;;  %v10752_v34 = vld [vmem:[#allocation5 + $0x1c4] sm:$0xf] }
  0x34   :  { %v10932_v33 = vld [vmem:[#allocation5 + $0x75c] sm:$0xf0] }
  0x35   :  { %v7241_v36 = vld [vmem:[#allocation5 + $0x100] sm:$0xf]  ;;  %v8042_v39 = vor.u32 %v10932_v33, %v8041_v32  ;;  %2489 = vmatpush.bf16.msra.mxu2 %v7786_v35  ;;  %v7339_v35 = vld [vmem:[#allocation5 + $0x1e0] sm:$0xf0] }
  0x36   :  { %v10732_v37 = vld [vmem:[#allocation5 + $0x11c] sm:$0xf0] }
  0x37   :  { %v7497_v38 = vld [vmem:[#allocation5 + $0x300] sm:$0xf]  ;;  %v7242_v45 = vor.u32 %v10732_v37, %v7241_v36  ;;  %2502 = vmatpush.bf16.msra.mxu3 %v8042_v39  ;;  %v7595_v39 = vld [vmem:[#allocation5 + $0x3e0] sm:$0xf0] }
  0x38   :  { %v10796_v40 = vld [vmem:[#allocation5 + $0x31c] sm:$0xf0] }
  0x39   :  { %v7753_v41 = vld [vmem:[#allocation5 + $0x500] sm:$0xf]  ;;  %v7498_v46 = vor.u32 %v10796_v40, %v7497_v38  ;;  %2464 = vmatpush.bf16.msra.mxu0 %v7242_v45  ;;  %v10816_v38 = vld [vmem:[#allocation5 + $0x3c4] sm:$0xf] }
  0x3a   :  { %v10860_v42 = vld [vmem:[#allocation5 + $0x51c] sm:$0xf0] }
  0x3b   :  { %v8009_v43 = vld [vmem:[#allocation5 + $0x700] sm:$0xf]  ;;  %v7754_v47 = vor.u32 %v10860_v42, %v7753_v41  ;;  %2477 = vmatpush.bf16.msra.mxu1 %v7498_v46 }
  0x3c   :  { %v10924_v44 = vld [vmem:[#allocation5 + $0x71c] sm:$0xf0] }
  0x3d   :  { %v7209_v48 = vld [vmem:[#allocation5 + $0xc0] sm:$0xf]  ;;  %v8010_v51 = vor.u32 %v10924_v44, %v8009_v43  ;;  %2490 = vmatpush.bf16.msra.mxu2 %v7754_v47  ;;  %v7342_v43 = vor.u32 %v10752_v34, %v7339_v35  ;;  %v7598_v47 = vor.u32 %v10816_v38, %v7595_v39 }
  0x3e   :  { %v10724_v49 = vld [vmem:[#allocation5 + $0xdc] sm:$0xf0] }
  0x3f   :  { %v7465_v50 = vld [vmem:[#allocation5 + $0x2c0] sm:$0xf]  ;;  %v7210_v57 = vor.u32 %v10724_v49, %v7209_v48  ;;  %2503 = vmatpush.bf16.msra.mxu3 %v8010_v51  ;;  %v10744_v49 = vld [vmem:[#allocation5 + $0x184] sm:$0xf] }
  0x40   :  { %v10788_v52 = vld [vmem:[#allocation5 + $0x2dc] sm:$0xf0]  ;;  %v10808_v51 = vld [vmem:[#allocation5 + $0x384] sm:$0xf] }
  0x41   :  { %v7721_v53 = vld [vmem:[#allocation5 + $0x4c0] sm:$0xf]  ;;  %v7466_v58 = vor.u32 %v10788_v52, %v7465_v50  ;;  %2465 = vmatpush.bf16.msra.mxu0 %v7210_v57  ;;  %v7307_v50 = vld [vmem:[#allocation5 + $0x1a0] sm:$0xf0] }
  0x42   :  { %v10852_v54 = vld [vmem:[#allocation5 + $0x4dc] sm:$0xf0]  ;;  %v7563_v52 = vld [vmem:[#allocation5 + $0x3a0] sm:$0xf0] }
  0x43   :  { %v7977_v55 = vld [vmem:[#allocation5 + $0x6c0] sm:$0xf]  ;;  %v7722_v59 = vor.u32 %v10852_v54, %v7721_v53  ;;  %2478 = vmatpush.bf16.msra.mxu1 %v7466_v58 }
  0x44   :  { %v10916_v56 = vld [vmem:[#allocation5 + $0x6dc] sm:$0xf0] }
  0x45   :  { %v7177_v60 = vld [vmem:[#allocation5 + $0x80] sm:$0xf]  ;;  %v7978_v63 = vor.u32 %v10916_v56, %v7977_v55  ;;  %2491 = vmatpush.bf16.msra.mxu2 %v7722_v59  ;;  %v7310_v55 = vor.u32 %v10744_v49, %v7307_v50  ;;  %v7566_v59 = vor.u32 %v10808_v51, %v7563_v52 }
  0x46   :  { %v10716_v61 = vld [vmem:[#allocation5 + $0x9c] sm:$0xf0] }
  0x47   :  { %v7433_v62 = vld [vmem:[#allocation5 + $0x280] sm:$0xf]  ;;  %v7178_v5 = vor.u32 %v10716_v61, %v7177_v60  ;;  %2504 = vmatpush.bf16.msra.mxu3 %v7978_v63  ;;  %v10736_v61 = vld [vmem:[#allocation5 + $0x144] sm:$0xf] }
  0x48   :  { %v10780_v0 = vld [vmem:[#allocation5 + $0x29c] sm:$0xf0]  ;;  %v10800_v63 = vld [vmem:[#allocation5 + $0x344] sm:$0xf] }
  0x49   :  { %v7689_v1 = vld [vmem:[#allocation5 + $0x480] sm:$0xf]  ;;  %v7434_v6 = vor.u32 %v10780_v0, %v7433_v62  ;;  %2466 = vmatpush.bf16.msra.mxu0 %v7178_v5  ;;  %v7275_v62 = vld [vmem:[#allocation5 + $0x160] sm:$0xf0] }
  0x4a   :  { %v10844_v2 = vld [vmem:[#allocation5 + $0x49c] sm:$0xf0]  ;;  %v7531_v0 = vld [vmem:[#allocation5 + $0x360] sm:$0xf0]  ;;  %v7278_v5 = vor.u32 %v10736_v61, %v7275_v62  ;;  %v115_v62 = vld [vmem:[#allocation3 + $0x8] sm:$0xf] }
  0x4b   :  { %v7945_v3 = vld [vmem:[#allocation5 + $0x680] sm:$0xf]  ;;  %v7690_v7 = vor.u32 %v10844_v2, %v7689_v1  ;;  %2479 = vmatpush.bf16.msra.mxu1 %v7434_v6  ;;  %120 = vst [vmem:[#allocation1 + $0x20] ss:$4 sm:$0xff] %v115_v62  ;;  %v8523_v62 = vld [vmem:[#allocation5 + $0xb20] sm:$0xf0] }
  0x4c   :  { %v10908_v4 = vld [vmem:[#allocation5 + $0x69c] sm:$0xf0] }
  0x4d   :  { %v7145_v8 = vld [vmem:[#allocation5 + $0x40] sm:$0xf]  ;;  %v7946_v11 = vor.u32 %v10908_v4, %v7945_v3  ;;  %2492 = vmatpush.bf16.msra.mxu2 %v7690_v7  ;;  %v114_v3 = vld [vmem:[#allocation3] sm:$0xff] }
  0x4e   :  { %v10708_v9 = vld [vmem:[#allocation5 + $0x5c] sm:$0xf0]  ;;  %118 = vst [vmem:[#allocation1] ss:$4 sm:$0xff] %v114_v3 }
  0x4f   :  { %v7401_v10 = vld [vmem:[#allocation5 + $0x240] sm:$0xf]  ;;  %v7146_v17 = vor.u32 %v10708_v9, %v7145_v8  ;;  %2505 = vmatpush.bf16.msra.mxu3 %v7946_v11  ;;  %v7534_v8 = vor.u32 %v10800_v63, %v7531_v0  ;;  %v7243_v11 = vld [vmem:[#allocation5 + $0x120] sm:$0xf0] }
  0x50   :  { %v10772_v12 = vld [vmem:[#allocation5 + $0x25c] sm:$0xf0] }
  0x51   :  { %v7657_v13 = vld [vmem:[#allocation5 + $0x440] sm:$0xf]  ;;  %v7402_v20 = vor.u32 %v10772_v12, %v7401_v10  ;;  %2467 = vmatpush.bf16.msra.mxu0 %v7146_v17  ;;  %v10728_v10 = vld [vmem:[#allocation5 + $0x104] sm:$0xf] }
  0x52   :  { %v10836_v14 = vld [vmem:[#allocation5 + $0x45c] sm:$0xf0]  ;;  %v10792_v12 = vld [vmem:[#allocation5 + $0x304] sm:$0xf]  ;;  %v7246_v17 = vor.u32 %v10728_v10, %v7243_v11 }
  0x53   :  { %v7913_v15 = vld [vmem:[#allocation5 + $0x640] sm:$0xf]  ;;  %v7658_v21 = vor.u32 %v10836_v14, %v7657_v13  ;;  %2480 = vmatpush.bf16.msra.mxu1 %v7402_v20  ;;  %v7499_v13 = vld [vmem:[#allocation5 + $0x320] sm:$0xf0] }
  0x54   :  { %v10900_v16 = vld [vmem:[#allocation5 + $0x65c] sm:$0xf0]  ;;  %v8107_v11 = vld [vmem:[#allocation5 + $0x7e0] sm:$0xf0] }
  0x55   :  { %v7113_v18 = vld [vmem:[#allocation5] sm:$0xf]  ;;  %v7914_v25 = vor.u32 %v10900_v16, %v7913_v15  ;;  %2493 = vmatpush.bf16.msra.mxu2 %v7658_v21  ;;  %v7502_v21 = vor.u32 %v10792_v12, %v7499_v13  ;;  %v11008_v12 = vld [vmem:[#allocation5 + $0x9c4] sm:$0xf] }
  0x56   :  { %v10700_v19 = vld [vmem:[#allocation5 + $0x1c] sm:$0xf0]  ;;  %v8363_v13 = vld [vmem:[#allocation5 + $0x9e0] sm:$0xf0] }
  0x57   :  { %v7369_v22 = vld [vmem:[#allocation5 + $0x200] sm:$0xf]  ;;  %v7114_v32 = vor.u32 %v10700_v19, %v7113_v18  ;;  %2506 = vmatpush.bf16.msra.mxu3 %v7914_v25  ;;  %v7467_v25 = vld [vmem:[#allocation5 + $0x2e0] sm:$0xf0] }
  0x58   :  { %v10764_v23 = vld [vmem:[#allocation5 + $0x21c] sm:$0xf0] }
  0x59   :  { %v7625_v24 = vld [vmem:[#allocation5 + $0x400] sm:$0xf]  ;;  %v7370_v36 = vor.u32 %v10764_v23, %v7369_v22  ;;  %2468 = vmatpush.bf16.msra.mxu0 %v7114_v32  ;;  %v10720_v22 = vld [vmem:[#allocation5 + $0xc4] sm:$0xf] }
  0x5a   :  { %v10828_v26 = vld [vmem:[#allocation5 + $0x41c] sm:$0xf0]  ;;  %v7211_v23 = vld [vmem:[#allocation5 + $0xe0] sm:$0xf0] }
  0x5b   :  { %v7881_v27 = vld [vmem:[#allocation5 + $0x600] sm:$0xf]  ;;  %v7626_v37 = vor.u32 %v10828_v26, %v7625_v24  ;;  %2481 = vmatpush.bf16.msra.mxu1 %v7370_v36  ;;  %v10784_v24 = vld [vmem:[#allocation5 + $0x2c4] sm:$0xf] }
  0x5c   :  { %v10892_v28 = vld [vmem:[#allocation5 + $0x61c] sm:$0xf0]  ;;  %v121_v32 = vld.sshfl [vmem:[#allocation1] sm:$0xff pattern:$0x73625140]  ;;  %v7470_v38 = vor.u32 %v10784_v24, %v7467_v25  ;;  %v8366_v24 = vor.u32 %v11008_v12, %v8363_v13 }
  0x5d   :  { %v8361_v29 = vld [vmem:[#allocation5 + $0x9c0] sm:$0xf]  ;;  %v7882_v40 = vor.u32 %v10892_v28, %v7881_v27  ;;  %2494 = vmatpush.bf16.msra.mxu2 %v7626_v37  ;;  %v11834_v35 = vpack.c.bf16 %v121_v32, %v121_v32  ;;  %v122_v37 = vld.sshfl [vmem:[#allocation1 + $0x8] sm:$0xff pattern:$0x73625140] }
  0x5e   :  { %v11012_v30 = vld [vmem:[#allocation5 + $0x9dc] sm:$0xf0]  ;;  %v8075_v25 = vld [vmem:[#allocation5 + $0x7a0] sm:$0xf0] }
  0x5f   :  { %v8617_v31 = vld [vmem:[#allocation5 + $0xbc0] sm:$0xf]  ;;  %v8362_v41 = vor.u32 %v11012_v30, %v8361_v29  ;;  %2507 = vmatpush.bf16.msra.mxu3 %v7882_v40  ;;  %v10712_v40 = vld [vmem:[#allocation5 + $0x84] sm:$0xf]  ;;  %2469 = vmatmul.bf16.vlgmr.msra.gmra.mxu0 %v11834_v35 }
  0x60   :  { %v11076_v33 = vld [vmem:[#allocation5 + $0xbdc] sm:$0xf0]  ;;  %v8587_v32 = vld [vmem:[#allocation5 + $0xba0] sm:$0xf0] }
  0x61   :  { %v8618_v42 = vor.u32 %v11076_v33, %v8617_v31  ;;  %v8329_v44 = vld [vmem:[#allocation5 + $0x980] sm:$0xf]  ;;  %2513 = vmatpush.bf16.msrb.mxu0 %v8362_v41  ;;  %2539 = vmatpush.bf16.msrb.mxu2 %v7342_v43  ;;  %v7214_v33 = vor.u32 %v10720_v22, %v7211_v23  ;;  %v7179_v41 = vld [vmem:[#allocation5 + $0xa0] sm:$0xf0]  ;;  %v11838_v43 = vpack.c.bf16 %v122_v37, %v122_v37 }
  0x62   :  { %v11004_v45 = vld [vmem:[#allocation5 + $0x99c] sm:$0xf0]  ;;  %v10936_v22 = vld [vmem:[#allocation5 + $0x784] sm:$0xf] }
  0x63   :  { %v8585_v46 = vld [vmem:[#allocation5 + $0xb80] sm:$0xf]  ;;  %v8330_v53 = vor.u32 %v11004_v45, %v8329_v44  ;;  %2526 = vmatpush.bf16.msrb.mxu1 %v8618_v42  ;;  %2552 = vmatpush.bf16.msrb.mxu3 %v7598_v47  ;;  %v10776_v44 = vld [vmem:[#allocation5 + $0x284] sm:$0xf] }
  0x64   :  { %v11068_v48 = vld [vmem:[#allocation5 + $0xb9c] sm:$0xf0]  ;;  %v7435_v45 = vld [vmem:[#allocation5 + $0x2a0] sm:$0xf0]  ;;  %2482 = vmatmul.bf16.vlgmr.msra.gmra.mxu1 %v11838_v43 }
  0x65   :  { %v8586_v54 = vor.u32 %v11068_v48, %v8585_v46  ;;  %v8297_v56 = vld [vmem:[#allocation5 + $0x940] sm:$0xf]  ;;  %2514 = vmatpush.bf16.msrb.mxu0 %v8330_v53  ;;  %2540 = vmatpush.bf16.msrb.mxu2 %v7310_v55  ;;  %v7182_v48 = vor.u32 %v10712_v40, %v7179_v41  ;;  %v7438_v52 = vor.u32 %v10776_v44, %v7435_v45  ;;  %v7147_v55 = vld [vmem:[#allocation5 + $0x60] sm:$0xf0] }
  0x66   :  { %v10996_v57 = vld [vmem:[#allocation5 + $0x95c] sm:$0xf0]  ;;  %v10864_v40 = vld [vmem:[#allocation5 + $0x544] sm:$0xf] }
  0x67   :  { %v8553_v58 = vld [vmem:[#allocation5 + $0xb40] sm:$0xf]  ;;  %v8298_v1 = vor.u32 %v10996_v57, %v8297_v56  ;;  %2527 = vmatpush.bf16.msrb.mxu1 %v8586_v54  ;;  %2553 = vmatpush.bf16.msrb.mxu3 %v7566_v59  ;;  %v10704_v54 = vld [vmem:[#allocation5 + $0x44] sm:$0xf] }
  0x68   :  { %v11060_v60 = vld [vmem:[#allocation5 + $0xb5c] sm:$0xf0]  ;;  %v10768_v56 = vld [vmem:[#allocation5 + $0x244] sm:$0xf]  ;;  %v7150_v0 = vor.u32 %v10704_v54, %v7147_v55 }
  0x69   :  { %v8265_v2 = vld [vmem:[#allocation5 + $0x900] sm:$0xf]  ;;  %v8554_v4 = vor.u32 %v11060_v60, %v8553_v58  ;;  %2515 = vmatpush.bf16.msrb.mxu0 %v8298_v1  ;;  %2541 = vmatpush.bf16.msrb.mxu2 %v7278_v5  ;;  %v7403_v57 = vld [vmem:[#allocation5 + $0x260] sm:$0xf0] }
  0x6a   :  { %v10988_v6 = vld [vmem:[#allocation5 + $0x91c] sm:$0xf0]  ;;  %v7406_v3 = vor.u32 %v10768_v56, %v7403_v57  ;;  %v10760_v5 = vld [vmem:[#allocation5 + $0x204] sm:$0xf] }
  0x6b   :  { %v8521_v7 = vld [vmem:[#allocation5 + $0xb00] sm:$0xf]  ;;  %v8266_v14 = vor.u32 %v10988_v6, %v8265_v2  ;;  %2528 = vmatpush.bf16.msrb.mxu1 %v8554_v4  ;;  %2554 = vmatpush.bf16.msrb.mxu3 %v7534_v8  ;;  %v10696_v2 = vld [vmem:[#allocation5 + $0x4] sm:$0xf] }
  0x6c   :  { %v11052_v9 = vld [vmem:[#allocation5 + $0xb1c] sm:$0xf0]  ;;  %v7115_v4 = vld [vmem:[#allocation5 + $0x20] sm:$0xf0] }
  0x6d   :  { %v8233_v15 = vld [vmem:[#allocation5 + $0x8c0] sm:$0xf]  ;;  %v8522_v16 = vor.u32 %v11052_v9, %v8521_v7  ;;  %2516 = vmatpush.bf16.msrb.mxu0 %v8266_v14  ;;  %2542 = vmatpush.bf16.msrb.mxu2 %v7246_v17  ;;  %v7371_v6 = vld [vmem:[#allocation5 + $0x220] sm:$0xf0] }
  0x6e   :  { %v10980_v18 = vld [vmem:[#allocation5 + $0x8dc] sm:$0xf0]  ;;  %v10880_v7 = vld [vmem:[#allocation5 + $0x5c4] sm:$0xf] }
  0x6f   :  { %v8489_v19 = vld [vmem:[#allocation5 + $0xac0] sm:$0xf]  ;;  %v8234_v28 = vor.u32 %v10980_v18, %v8233_v15  ;;  %2529 = vmatpush.bf16.msrb.mxu1 %v8522_v16  ;;  %2555 = vmatpush.bf16.msrb.mxu3 %v7502_v21  ;;  %v7851_v8 = vld [vmem:[#allocation5 + $0x5e0] sm:$0xf0]  ;;  %v7118_v15 = vor.u32 %v10696_v2, %v7115_v4  ;;  %v7374_v18 = vor.u32 %v10760_v5, %v7371_v6 }
  0x70   :  { %v11044_v20 = vld [vmem:[#allocation5 + $0xadc] sm:$0xf0]  ;;  %v10944_v9 = vld [vmem:[#allocation5 + $0x7c4] sm:$0xf] }
  0x71   :  { %v8201_v26 = vld [vmem:[#allocation5 + $0x880] sm:$0xf]  ;;  %v8490_v29 = vor.u32 %v11044_v20, %v8489_v19  ;;  %2517 = vmatpush.bf16.msrb.mxu0 %v8234_v28  ;;  %2543 = vmatpush.bf16.msrb.mxu2 %v7214_v33  ;;  %v11072_v16 = vld [vmem:[#allocation5 + $0xbc4] sm:$0xf]  ;;  %v7854_v19 = vor.u32 %v10880_v7, %v7851_v8  ;;  %v8110_v23 = vor.u32 %v10944_v9, %v8107_v11 }
  0x72   :  { %v10972_v27 = vld [vmem:[#allocation5 + $0x89c] sm:$0xf0]  ;;  %v8619_v17 = vld [vmem:[#allocation5 + $0xbe0] sm:$0xf0] }
  0x73   :  { %v8457_v30 = vld [vmem:[#allocation5 + $0xa80] sm:$0xf]  ;;  %v8202_v46 = vor.u32 %v10972_v27, %v8201_v26  ;;  %2530 = vmatpush.bf16.msrb.mxu1 %v8490_v29  ;;  %2556 = vmatpush.bf16.msrb.mxu3 %v7470_v38  ;;  %v10872_v20 = vld [vmem:[#allocation5 + $0x584] sm:$0xf]  ;;  %v8622_v28 = vor.u32 %v11072_v16, %v8619_v17  ;;  %v8078_v38 = vor.u32 %v10936_v22, %v8075_v25 }
  0x74   :  { %v123_v31 = vld.sshfl [vmem:[#allocation1 + $0x10] sm:$0xff pattern:$0x73625140]  ;;  %v124_v36 = vld.sshfl [vmem:[#allocation1 + $0x18] sm:$0xff pattern:$0x73625140] }
  0x75   :  { %v11832_v34 = vpack.c.bf16 %v123_v31, %v123_v31  ;;  %v11036_v39 = vld [vmem:[#allocation5 + $0xa9c] sm:$0xf0]  ;;  %v11836_v42 = vpack.c.bf16 %v124_v36, %v124_v36  ;;  %2518 = vmatpush.bf16.msrb.mxu0 %v8202_v46  ;;  %2544 = vmatpush.bf16.msrb.mxu2 %v7182_v48  ;;  %v7819_v21 = vld [vmem:[#allocation5 + $0x5a0] sm:$0xf0] }
  0x76   :  { %v8458_v47 = vor.u32 %v11036_v39, %v8457_v30  ;;  %v8169_v49 = vld [vmem:[#allocation5 + $0x840] sm:$0xf]  ;;  %v11000_v26 = vld [vmem:[#allocation5 + $0x984] sm:$0xf]  ;;  %v7822_v36 = vor.u32 %v10872_v20, %v7819_v21 }
  0x77   :  { %2495 = vmatmul.bf16.vlgmr.msra.gmra.mxu2 %v11832_v34  ;;  %2508 = vmatmul.bf16.vlgmr.msra.gmra.mxu3 %v11836_v42  ;;  %v10964_v50 = vld [vmem:[#allocation5 + $0x85c] sm:$0xf0]  ;;  %v8331_v27 = vld [vmem:[#allocation5 + $0x9a0] sm:$0xf0] }
  0x78   :  { %v8425_v51 = vld [vmem:[#allocation5 + $0xa40] sm:$0xf]  ;;  %v8170_v59 = vor.u32 %v10964_v50, %v8169_v49  ;;  %2531 = vmatpush.bf16.msrb.mxu1 %v8458_v47  ;;  %2557 = vmatpush.bf16.msrb.mxu3 %v7438_v52  ;;  %v125_v29 = vld.sshfl [vmem:[#allocation1 + $0x20] sm:$0xff pattern:$0x73625140]  ;;  %v8334_v39 = vor.u32 %v11000_v26, %v8331_v27 }
  0x79   :  { %v11028_v53 = vld [vmem:[#allocation5 + $0xa5c] sm:$0xf0]  ;;  %2545 = vmatpush.bf16.msrb.mxu2 %v7150_v0  ;;  %v126_v30 = vld.sshfl [vmem:[#allocation1 + $0x28] sm:$0xff pattern:$0x73625140]  ;;  %v11844_v33 = vpack.c.bf16 %v125_v29, %v125_v29 }
  0x7a   :  { %v8137_v58 = vld [vmem:[#allocation5 + $0x800] sm:$0xf]  ;;  %v8426_v63 = vor.u32 %v11028_v53, %v8425_v51  ;;  %2519 = vmatpush.bf16.msrb.mxu0 %v8170_v59  ;;  %v11064_v31 = vld [vmem:[#allocation5 + $0xb84] sm:$0xf]  ;;  %v11846_v37 = vpack.c.bf16 %v126_v30, %v126_v30 }
  0x7b   :  { %v10956_v60 = vld [vmem:[#allocation5 + $0x81c] sm:$0xf0]  ;;  %v7787_v41 = vld [vmem:[#allocation5 + $0x560] sm:$0xf0]  ;;  %v8590_v45 = vor.u32 %v11064_v31, %v8587_v32 }
  0x7c   :  { %v8393_v61 = vld [vmem:[#allocation5 + $0xa00] sm:$0xf]  ;;  %v8138_v10 = vor.u32 %v10956_v60, %v8137_v58  ;;  %2532 = vmatpush.bf16.msrb.mxu1 %v8426_v63  ;;  %2558 = vmatpush.bf16.msrb.mxu3 %v7406_v3  ;;  %v10928_v44 = vld [vmem:[#allocation5 + $0x744] sm:$0xf]  ;;  %v7790_v51 = vor.u32 %v10864_v40, %v7787_v41 }
  0x7d   :  { %v11020_v1 = vld [vmem:[#allocation5 + $0xa1c] sm:$0xf0]  ;;  %2546 = vmatpush.bf16.msrb.mxu2 %v7118_v15  ;;  %v8043_v46 = vld [vmem:[#allocation5 + $0x760] sm:$0xf0] }
  0x7e   :  { %v8394_v14 = vor.u32 %v11020_v1, %v8393_v61  ;;  %2520 = vmatpush.bf16.msrb.mxu0 %v8138_v10  ;;  %v10992_v47 = vld [vmem:[#allocation5 + $0x944] sm:$0xf]  ;;  %v8046_v52 = vor.u32 %v10928_v44, %v8043_v46 }
  0x7f   :  { %v8299_v48 = vld [vmem:[#allocation5 + $0x960] sm:$0xf0] }
  0x80   :  { %2533 = vmatpush.bf16.msrb.mxu1 %v8394_v14  ;;  %2559 = vmatpush.bf16.msrb.mxu3 %v7374_v18  ;;  %v11056_v49 = vld [vmem:[#allocation5 + $0xb44] sm:$0xf]  ;;  %v8302_v53 = vor.u32 %v10992_v47, %v8299_v48 }
  0x81   :  { %2591 = vmatpush.bf16.msra.mxu2 %v8366_v24  ;;  %2521 = vmatmul.bf16.vlgmr.msrb.gmra.mxu0 %v11844_v33  ;;  %v8555_v50 = vld [vmem:[#allocation5 + $0xb60] sm:$0xf0] }
  0x82   :  { %2565 = vmatpush.bf16.msra.mxu0 %v7854_v19  ;;  %v10856_v54 = vld [vmem:[#allocation5 + $0x504] sm:$0xf]  ;;  %v8558_v57 = vor.u32 %v11056_v49, %v8555_v50 }
  0x83   :  { %2534 = vmatmul.bf16.vlgmr.msrb.gmra.mxu1 %v11846_v37  ;;  %v7755_v55 = vld [vmem:[#allocation5 + $0x520] sm:$0xf0] }
  0x84   :  { %2578 = vmatpush.bf16.msra.mxu1 %v8110_v23  ;;  %2604 = vmatpush.bf16.msra.mxu3 %v8622_v28  ;;  %v10920_v56 = vld [vmem:[#allocation5 + $0x704] sm:$0xf]  ;;  %v7758_v63 = vor.u32 %v10856_v54, %v7755_v55  ;;  %v10757_v54 = vld [vmem:[#allocation5 + $0x1e4] sm:$0xf0] }
  0x85   :  { %2592 = vmatpush.bf16.msra.mxu2 %v8334_v39  ;;  %v8011_v58 = vld [vmem:[#allocation5 + $0x720] sm:$0xf0]  ;;  %v7601_v55 = vld [vmem:[#allocation5 + $0x3c8] sm:$0xf] }
  0x86   :  { %2566 = vmatpush.bf16.msra.mxu0 %v7822_v36  ;;  %v10984_v59 = vld [vmem:[#allocation5 + $0x904] sm:$0xf]  ;;  %v8014_v0 = vor.u32 %v10920_v56, %v8011_v58  ;;  %v10821_v56 = vld [vmem:[#allocation5 + $0x3e4] sm:$0xf0] }
  0x87   :  { %2547 = vmatmul.bf16.vlgmr.msrb.gmra.mxu2 %v11834_v35  ;;  %2560 = vmatmul.bf16.vlgmr.msrb.gmra.mxu3 %v11838_v43  ;;  %v8267_v60 = vld [vmem:[#allocation5 + $0x920] sm:$0xf0]  ;;  %v7857_v58 = vld [vmem:[#allocation5 + $0x5c8] sm:$0xf] }
  0x88   :  { %2579 = vmatpush.bf16.msra.mxu1 %v8078_v38  ;;  %2605 = vmatpush.bf16.msra.mxu3 %v8590_v45  ;;  %v11048_v61 = vld [vmem:[#allocation5 + $0xb04] sm:$0xf]  ;;  %v8270_v1 = vor.u32 %v10984_v59, %v8267_v60  ;;  %v10885_v59 = vld [vmem:[#allocation5 + $0x5e4] sm:$0xf0] }
  0x89   :  { %2593 = vmatpush.bf16.msra.mxu2 %v8302_v53  ;;  %v10848_v2 = vld [vmem:[#allocation5 + $0x4c4] sm:$0xf]  ;;  %v8526_v5 = vor.u32 %v11048_v61, %v8523_v62  ;;  %v7345_v53 = vld [vmem:[#allocation5 + $0x1c8] sm:$0xf] }
  0x8a   :  { %2567 = vmatpush.bf16.msra.mxu0 %v7790_v51  ;;  %v7723_v3 = vld [vmem:[#allocation5 + $0x4e0] sm:$0xf0]  ;;  %v8113_v62 = vld [vmem:[#allocation5 + $0x7c8] sm:$0xf] }
  0x8b   :  { %v10912_v4 = vld [vmem:[#allocation5 + $0x6c4] sm:$0xf]  ;;  %v7726_v11 = vor.u32 %v10848_v2, %v7723_v3  ;;  %v7602_v2 = vor.u32 %v10821_v56, %v7601_v55  ;;  %v7858_v3 = vor.u32 %v10885_v59, %v7857_v58  ;;  %v7185_v58 = vld [vmem:[#allocation5 + $0x88] sm:$0xf] }
  0x8c   :  { %2580 = vmatpush.bf16.msra.mxu1 %v8046_v52  ;;  %2606 = vmatpush.bf16.msra.mxu3 %v8558_v57  ;;  %v7979_v6 = vld [vmem:[#allocation5 + $0x6e0] sm:$0xf0]  ;;  %v10717_v59 = vld [vmem:[#allocation5 + $0xa4] sm:$0xf0] }
  0x8d   :  { %v10976_v7 = vld [vmem:[#allocation5 + $0x8c4] sm:$0xf]  ;;  %2594 = vmatpush.bf16.msra.mxu2 %v8270_v1  ;;  %v7982_v12 = vor.u32 %v10912_v4, %v7979_v6  ;;  %v7346_v1 = vor.u32 %v10757_v54, %v7345_v53  ;;  %v7313_v4 = vld [vmem:[#allocation5 + $0x188] sm:$0xf] }
  0x8e   :  { %v8235_v8 = vld [vmem:[#allocation5 + $0x8e0] sm:$0xf0]  ;;  %2568 = vmatpush.bf16.msra.mxu0 %v7758_v63  ;;  %v10949_v63 = vld [vmem:[#allocation5 + $0x7e4] sm:$0xf0] }
  0x8f   :  { %v11040_v9 = vld [vmem:[#allocation5 + $0xac4] sm:$0xf]  ;;  %v8238_v13 = vor.u32 %v10976_v7, %v8235_v8  ;;  %v7569_v6 = vld [vmem:[#allocation5 + $0x388] sm:$0xf]  ;;  %v8114_v7 = vor.u32 %v10949_v63, %v8113_v62 }
  0x90   :  { %v8491_v10 = vld [vmem:[#allocation5 + $0xae0] sm:$0xf0]  ;;  %2581 = vmatpush.bf16.msra.mxu1 %v8014_v0  ;;  %2607 = vmatpush.bf16.msra.mxu3 %v8526_v5  ;;  %v10749_v5 = vld [vmem:[#allocation5 + $0x1a4] sm:$0xf0] }
  0x91   :  { %v10840_v14 = vld [vmem:[#allocation5 + $0x484] sm:$0xf]  ;;  %v8494_v17 = vor.u32 %v11040_v9, %v8491_v10  ;;  %2595 = vmatpush.bf16.msra.mxu2 %v8238_v13  ;;  %v10813_v8 = vld [vmem:[#allocation5 + $0x3a4] sm:$0xf0]  ;;  %v7314_v13 = vor.u32 %v10749_v5, %v7313_v4 }
  0x92   :  { %v7691_v15 = vld [vmem:[#allocation5 + $0x4a0] sm:$0xf0]  ;;  %2569 = vmatpush.bf16.msra.mxu0 %v7726_v11  ;;  %v7825_v9 = vld [vmem:[#allocation5 + $0x588] sm:$0xf] }
  0x93   :  { %v10904_v16 = vld [vmem:[#allocation5 + $0x684] sm:$0xf]  ;;  %v7694_v23 = vor.u32 %v10840_v14, %v7691_v15  ;;  %v10877_v10 = vld [vmem:[#allocation5 + $0x5a4] sm:$0xf0]  ;;  %v7570_v14 = vor.u32 %v10813_v8, %v7569_v6 }
  0x94   :  { %v7947_v18 = vld [vmem:[#allocation5 + $0x6a0] sm:$0xf0]  ;;  %2582 = vmatpush.bf16.msra.mxu1 %v7982_v12  ;;  %2608 = vmatpush.bf16.msra.mxu3 %v8494_v17  ;;  %v8081_v11 = vld [vmem:[#allocation5 + $0x788] sm:$0xf]  ;;  %v7826_v15 = vor.u32 %v10877_v10, %v7825_v9 }
  0x95   :  { %v10968_v19 = vld [vmem:[#allocation5 + $0x884] sm:$0xf]  ;;  %v7950_v24 = vor.u32 %v10904_v16, %v7947_v18  ;;  %v10941_v12 = vld [vmem:[#allocation5 + $0x7a4] sm:$0xf0] }
  0x96   :  { %v8203_v20 = vld [vmem:[#allocation5 + $0x8a0] sm:$0xf0]  ;;  %2570 = vmatpush.bf16.msra.mxu0 %v7694_v23  ;;  %v7281_v16 = vld [vmem:[#allocation5 + $0x148] sm:$0xf] }
  0x97   :  { %v11032_v21 = vld [vmem:[#allocation5 + $0xa84] sm:$0xf]  ;;  %v8206_v25 = vor.u32 %v10968_v19, %v8203_v20  ;;  %v10741_v17 = vld [vmem:[#allocation5 + $0x164] sm:$0xf0]  ;;  %v8082_v19 = vor.u32 %v10941_v12, %v8081_v11 }
  0x98   :  { %v8459_v22 = vld [vmem:[#allocation5 + $0xaa0] sm:$0xf0]  ;;  %2583 = vmatpush.bf16.msra.mxu1 %v7950_v24  ;;  %v7537_v18 = vld [vmem:[#allocation5 + $0x348] sm:$0xf] }
  0x99   :  { %v10832_v26 = vld [vmem:[#allocation5 + $0x444] sm:$0xf]  ;;  %v8462_v29 = vor.u32 %v11032_v21, %v8459_v22  ;;  %2596 = vmatpush.bf16.msra.mxu2 %v8206_v25  ;;  %v10805_v20 = vld [vmem:[#allocation5 + $0x364] sm:$0xf0]  ;;  %v7282_v25 = vor.u32 %v10741_v17, %v7281_v16 }
  0x9a   :  { %v7659_v27 = vld [vmem:[#allocation5 + $0x460] sm:$0xf0]  ;;  %v7793_v21 = vld [vmem:[#allocation5 + $0x548] sm:$0xf] }
  0x9b   :  { %v10896_v28 = vld [vmem:[#allocation5 + $0x644] sm:$0xf]  ;;  %v7662_v39 = vor.u32 %v10832_v26, %v7659_v27  ;;  %2609 = vmatpush.bf16.msra.mxu3 %v8462_v29  ;;  %v10869_v22 = vld [vmem:[#allocation5 + $0x564] sm:$0xf0]  ;;  %v7538_v26 = vor.u32 %v10805_v20, %v7537_v18 }
  0x9c   :  { %v7915_v30 = vld [vmem:[#allocation5 + $0x660] sm:$0xf0]  ;;  %v8049_v23 = vld [vmem:[#allocation5 + $0x748] sm:$0xf]  ;;  %v7794_v27 = vor.u32 %v10869_v22, %v7793_v21 }
  0x9d   :  { %v10960_v31 = vld [vmem:[#allocation5 + $0x844] sm:$0xf]  ;;  %v7918_v45 = vor.u32 %v10896_v28, %v7915_v30  ;;  %2571 = vmatpush.bf16.msra.mxu0 %v7662_v39  ;;  %v10933_v24 = vld [vmem:[#allocation5 + $0x764] sm:$0xf0] }
  0x9e   :  { %v8171_v32 = vld [vmem:[#allocation5 + $0x860] sm:$0xf0]  ;;  %v7249_v28 = vld [vmem:[#allocation5 + $0x108] sm:$0xf] }
  0x9f   :  { %v11024_v36 = vld [vmem:[#allocation5 + $0xa44] sm:$0xf]  ;;  %v8174_v46 = vor.u32 %v10960_v31, %v8171_v32  ;;  %2584 = vmatpush.bf16.msra.mxu1 %v7918_v45  ;;  %v10733_v29 = vld [vmem:[#allocation5 + $0x124] sm:$0xf0]  ;;  %v8050_v31 = vor.u32 %v10933_v24, %v8049_v23 }
  0xa0   :  { %v8427_v38 = vld [vmem:[#allocation5 + $0xa60] sm:$0xf0]  ;;  %v7505_v30 = vld [vmem:[#allocation5 + $0x308] sm:$0xf] }
  0xa1   :  { %v10824_v40 = vld [vmem:[#allocation5 + $0x404] sm:$0xf]  ;;  %v8430_v50 = vor.u32 %v11024_v36, %v8427_v38  ;;  %2597 = vmatpush.bf16.msra.mxu2 %v8174_v46  ;;  %v10797_v32 = vld [vmem:[#allocation5 + $0x324] sm:$0xf0] }
  0xa2   :  { %v7627_v41 = vld [vmem:[#allocation5 + $0x420] sm:$0xf0]  ;;  %v7761_v36 = vld [vmem:[#allocation5 + $0x508] sm:$0xf] }
  0xa3   :  { %v10888_v44 = vld [vmem:[#allocation5 + $0x604] sm:$0xf]  ;;  %v7630_v57 = vor.u32 %v10824_v40, %v7627_v41  ;;  %2610 = vmatpush.bf16.msra.mxu3 %v8430_v50  ;;  %v10861_v38 = vld [vmem:[#allocation5 + $0x524] sm:$0xf0]  ;;  %v7250_v41 = vor.u32 %v10733_v29, %v7249_v28 }
  0xa4   :  { %v7883_v47 = vld [vmem:[#allocation5 + $0x620] sm:$0xf0]  ;;  %v8017_v39 = vld [vmem:[#allocation5 + $0x708] sm:$0xf]  ;;  %v7762_v45 = vor.u32 %v10861_v38, %v7761_v36  ;;  %v7347_v36 = vld [vmem:[#allocation5 + $0x1e8] sm:$0xf0] }
  0xa5   :  { %v10952_v48 = vld [vmem:[#allocation5 + $0x804] sm:$0xf]  ;;  %v7886_v60 = vor.u32 %v10888_v44, %v7883_v47  ;;  %2572 = vmatpush.bf16.msra.mxu0 %v7630_v57  ;;  %v10925_v40 = vld [vmem:[#allocation5 + $0x724] sm:$0xf0]  ;;  %v7506_v44 = vor.u32 %v10797_v32, %v7505_v30  ;;  %v10753_v32 = vld [vmem:[#allocation5 + $0x1cc] sm:$0xf] }
  0xa6   :  { %v8139_v49 = vld [vmem:[#allocation5 + $0x820] sm:$0xf0]  ;;  %v7217_v46 = vld [vmem:[#allocation5 + $0xc8] sm:$0xf] }
  0xa7   :  { %v11016_v51 = vld [vmem:[#allocation5 + $0xa04] sm:$0xf]  ;;  %v8142_v61 = vor.u32 %v10952_v48, %v8139_v49  ;;  %2585 = vmatpush.bf16.msra.mxu1 %v7886_v60  ;;  %v10725_v47 = vld [vmem:[#allocation5 + $0xe4] sm:$0xf0]  ;;  %v8018_v49 = vor.u32 %v10925_v40, %v8017_v39  ;;  %v10817_v40 = vld [vmem:[#allocation5 + $0x3cc] sm:$0xf] }
  0xa8   :  { %v8395_v52 = vld [vmem:[#allocation5 + $0xa20] sm:$0xf0]  ;;  %2573 = vmatmul.bf16.vlgmr.msra.gmra.mxu0 %v11832_v34  ;;  %v7473_v48 = vld [vmem:[#allocation5 + $0x2c8] sm:$0xf]  ;;  %v7218_v55 = vor.u32 %v10725_v47, %v7217_v46  ;;  %v7350_v47 = vor.u32 %v10753_v32, %v7347_v36 }
  0xa9   :  { %v8398_v0 = vor.u32 %v11016_v51, %v8395_v52  ;;  %2598 = vmatpush.bf16.msra.mxu2 %v8142_v61  ;;  %2617 = vmatpush.bf16.msrb.mxu0 %v7346_v1  ;;  %v10789_v50 = vld [vmem:[#allocation5 + $0x2e4] sm:$0xf0] }
  0xaa   :  { %2586 = vmatmul.bf16.vlgmr.msra.gmra.mxu1 %v11836_v42  ;;  %v7729_v51 = vld [vmem:[#allocation5 + $0x4c8] sm:$0xf]  ;;  %v7474_v56 = vor.u32 %v10789_v50, %v7473_v48 }
  0xab   :  { %2611 = vmatpush.bf16.msra.mxu3 %v8398_v0  ;;  %2630 = vmatpush.bf16.msrb.mxu1 %v7602_v2  ;;  %v10853_v52 = vld [vmem:[#allocation5 + $0x4e4] sm:$0xf0] }
  0xac   :  { %2599 = vmatmul.bf16.vlgmr.msra.gmra.mxu2 %v11844_v33  ;;  %v7985_v53 = vld [vmem:[#allocation5 + $0x6c8] sm:$0xf]  ;;  %v7730_v57 = vor.u32 %v10853_v52, %v7729_v51 }
  0xad   :  { %2643 = vmatpush.bf16.msrb.mxu2 %v7858_v3  ;;  %2618 = vmatpush.bf16.msrb.mxu0 %v7314_v13  ;;  %v10917_v54 = vld [vmem:[#allocation5 + $0x6e4] sm:$0xf0]  ;;  %v7186_v3 = vor.u32 %v10717_v59, %v7185_v58 }
  0xae   :  { %2612 = vmatmul.bf16.vlgmr.msra.gmra.mxu3 %v11846_v37  ;;  %v7441_v60 = vld [vmem:[#allocation5 + $0x288] sm:$0xf]  ;;  %v7986_v61 = vor.u32 %v10917_v54, %v7985_v53  ;;  %v10745_v53 = vld [vmem:[#allocation5 + $0x18c] sm:$0xf] }
  0xaf   :  { %2656 = vmatpush.bf16.msrb.mxu3 %v8114_v7  ;;  %2631 = vmatpush.bf16.msrb.mxu1 %v7570_v14  ;;  %v10781_v62 = vld [vmem:[#allocation5 + $0x2a4] sm:$0xf0]  ;;  %v7315_v54 = vld [vmem:[#allocation5 + $0x1a8] sm:$0xf0] }
  0xb0   :  { %v7697_v63 = vld [vmem:[#allocation5 + $0x488] sm:$0xf]  ;;  %v7442_v4 = vor.u32 %v10781_v62, %v7441_v60  ;;  %v7318_v59 = vor.u32 %v10745_v53, %v7315_v54 }
  0xb1   :  { %2644 = vmatpush.bf16.msrb.mxu2 %v7826_v15  ;;  %2619 = vmatpush.bf16.msrb.mxu0 %v7282_v25  ;;  %v10845_v0 = vld [vmem:[#allocation5 + $0x4a4] sm:$0xf0] }
  0xb2   :  { %v7953_v1 = vld [vmem:[#allocation5 + $0x688] sm:$0xf]  ;;  %v7698_v5 = vor.u32 %v10845_v0, %v7697_v63 }
  0xb3   :  { %2657 = vmatpush.bf16.msrb.mxu3 %v8082_v19  ;;  %2632 = vmatpush.bf16.msrb.mxu1 %v7538_v26  ;;  %v10909_v2 = vld [vmem:[#allocation5 + $0x6a4] sm:$0xf0] }
  0xb4   :  { %v7153_v6 = vld [vmem:[#allocation5 + $0x48] sm:$0xf]  ;;  %v7954_v9 = vor.u32 %v10909_v2, %v7953_v1  ;;  %v10737_v1 = vld [vmem:[#allocation5 + $0x14c] sm:$0xf] }
  0xb5   :  { %2645 = vmatpush.bf16.msrb.mxu2 %v7794_v27  ;;  %2620 = vmatpush.bf16.msrb.mxu0 %v7250_v41  ;;  %v10709_v7 = vld [vmem:[#allocation5 + $0x64] sm:$0xf0]  ;;  %v7603_v41 = vld [vmem:[#allocation5 + $0x3e8] sm:$0xf0] }
  0xb6   :  { %v7409_v8 = vld [vmem:[#allocation5 + $0x248] sm:$0xf]  ;;  %v7154_v15 = vor.u32 %v10709_v7, %v7153_v6  ;;  %v7606_v51 = vor.u32 %v10817_v40, %v7603_v41  ;;  %v7283_v2 = vld [vmem:[#allocation5 + $0x168] sm:$0xf0] }
  0xb7   :  { %2658 = vmatpush.bf16.msrb.mxu3 %v8050_v31  ;;  %2633 = vmatpush.bf16.msrb.mxu1 %v7506_v44  ;;  %v10773_v10 = vld [vmem:[#allocation5 + $0x264] sm:$0xf0]  ;;  %v7286_v7 = vor.u32 %v10737_v1, %v7283_v2  ;;  %v10713_v41 = vld [vmem:[#allocation5 + $0x8c] sm:$0xf] }
  0xb8   :  { %v7665_v11 = vld [vmem:[#allocation5 + $0x448] sm:$0xf]  ;;  %v7410_v18 = vor.u32 %v10773_v10, %v7409_v8  ;;  %v10697_v2 = vld [vmem:[#allocation5 + $0xc] sm:$0xf] }
  0xb9   :  { %2646 = vmatpush.bf16.msrb.mxu2 %v7762_v45  ;;  %2621 = vmatpush.bf16.msrb.mxu0 %v7218_v55  ;;  %v10837_v12 = vld [vmem:[#allocation5 + $0x464] sm:$0xf0]  ;;  %v10809_v55 = vld [vmem:[#allocation5 + $0x38c] sm:$0xf] }
  0xba   :  { %v7921_v13 = vld [vmem:[#allocation5 + $0x648] sm:$0xf]  ;;  %v7666_v19 = vor.u32 %v10837_v12, %v7665_v11 }
  0xbb   :  { %2659 = vmatpush.bf16.msrb.mxu3 %v8018_v49  ;;  %2634 = vmatpush.bf16.msrb.mxu1 %v7474_v56  ;;  %v10901_v14 = vld [vmem:[#allocation5 + $0x664] sm:$0xf0]  ;;  %v7571_v56 = vld [vmem:[#allocation5 + $0x3a8] sm:$0xf0] }
  0xbc   :  { %v7121_v16 = vld [vmem:[#allocation5 + $0x8] sm:$0xf]  ;;  %v7922_v23 = vor.u32 %v10901_v14, %v7921_v13  ;;  %v7574_v63 = vor.u32 %v10809_v55, %v7571_v56  ;;  %v10729_v13 = vld [vmem:[#allocation5 + $0x10c] sm:$0xf] }
  0xbd   :  { %2647 = vmatpush.bf16.msrb.mxu2 %v7730_v57  ;;  %2622 = vmatpush.bf16.msrb.mxu0 %v7186_v3  ;;  %v10701_v17 = vld [vmem:[#allocation5 + $0x24] sm:$0xf0]  ;;  %v10801_v3 = vld [vmem:[#allocation5 + $0x34c] sm:$0xf] }
  0xbe   :  { %v7377_v20 = vld [vmem:[#allocation5 + $0x208] sm:$0xf]  ;;  %v7122_v30 = vor.u32 %v10701_v17, %v7121_v16  ;;  %v7251_v14 = vld [vmem:[#allocation5 + $0x128] sm:$0xf0] }
  0xbf   :  { %2660 = vmatpush.bf16.msrb.mxu3 %v7986_v61  ;;  %2635 = vmatpush.bf16.msrb.mxu1 %v7442_v4  ;;  %v10765_v21 = vld [vmem:[#allocation5 + $0x224] sm:$0xf0]  ;;  %v7539_v4 = vld [vmem:[#allocation5 + $0x368] sm:$0xf0] }
  0xc0   :  { %v7633_v22 = vld [vmem:[#allocation5 + $0x408] sm:$0xf]  ;;  %v7378_v38 = vor.u32 %v10765_v21, %v7377_v20  ;;  %v7542_v11 = vor.u32 %v10801_v3, %v7539_v4  ;;  %v7507_v16 = vld [vmem:[#allocation5 + $0x328] sm:$0xf0] }
  0xc1   :  { %2648 = vmatpush.bf16.msrb.mxu2 %v7698_v5  ;;  %v10829_v24 = vld [vmem:[#allocation5 + $0x424] sm:$0xf0]  ;;  %2623 = vmatpush.bf16.msrb.mxu0 %v7154_v15  ;;  %v10793_v15 = vld [vmem:[#allocation5 + $0x30c] sm:$0xf] }
  0xc2   :  { %v7889_v25 = vld [vmem:[#allocation5 + $0x608] sm:$0xf]  ;;  %v7634_v39 = vor.u32 %v10829_v24, %v7633_v22  ;;  %v10705_v55 = vld [vmem:[#allocation5 + $0x4c] sm:$0xf] }
  0xc3   :  { %2661 = vmatpush.bf16.msrb.mxu3 %v7954_v9  ;;  %v10893_v26 = vld [vmem:[#allocation5 + $0x624] sm:$0xf0]  ;;  %2636 = vmatpush.bf16.msrb.mxu1 %v7410_v18  ;;  %v7155_v56 = vld [vmem:[#allocation5 + $0x68] sm:$0xf0] }
  0xc4   :  { %v8369_v27 = vld [vmem:[#allocation5 + $0x9c8] sm:$0xf]  ;;  %v7890_v44 = vor.u32 %v10893_v26, %v7889_v25  ;;  %v10721_v25 = vld [vmem:[#allocation5 + $0xcc] sm:$0xf] }
  0xc5   :  { %v11013_v28 = vld [vmem:[#allocation5 + $0x9e4] sm:$0xf0]  ;;  %2649 = vmatpush.bf16.msrb.mxu2 %v7666_v19  ;;  %2624 = vmatpush.bf16.msrb.mxu0 %v7122_v30  ;;  %v7254_v19 = vor.u32 %v10729_v13, %v7251_v14  ;;  %v7219_v26 = vld [vmem:[#allocation5 + $0xe8] sm:$0xf0] }
  0xc6   :  { %v8625_v29 = vld [vmem:[#allocation5 + $0xbc8] sm:$0xf]  ;;  %v8370_v45 = vor.u32 %v11013_v28, %v8369_v27  ;;  %v10785_v27 = vld [vmem:[#allocation5 + $0x2cc] sm:$0xf] }
  0xc7   :  { %v11077_v31 = vld [vmem:[#allocation5 + $0xbe4] sm:$0xf0]  ;;  %2662 = vmatpush.bf16.msrb.mxu3 %v7922_v23  ;;  %2637 = vmatpush.bf16.msrb.mxu1 %v7378_v38  ;;  %v7510_v23 = vor.u32 %v10793_v15, %v7507_v16  ;;  %v7475_v28 = vld [vmem:[#allocation5 + $0x2e8] sm:$0xf0] }
  0xc8   :  { %v8626_v46 = vor.u32 %v11077_v31, %v8625_v29  ;;  %v8337_v48 = vld [vmem:[#allocation5 + $0x988] sm:$0xf]  ;;  %2625 = vmatmul.bf16.vlgmr.msrb.gmra.mxu0 %v11834_v35  ;;  %v7222_v31 = vor.u32 %v10721_v25, %v7219_v26  ;;  %v7123_v4 = vld [vmem:[#allocation5 + $0x28] sm:$0xf0] }
  0xc9   :  { %v11005_v49 = vld [vmem:[#allocation5 + $0x9a4] sm:$0xf0]  ;;  %2650 = vmatpush.bf16.msrb.mxu2 %v7634_v39  ;;  %2669 = vmatpush.bf16.msra.mxu0 %v8370_v45  ;;  %v7478_v39 = vor.u32 %v10785_v27, %v7475_v28  ;;  %v10777_v45 = vld [vmem:[#allocation5 + $0x28c] sm:$0xf]  ;;  %v7126_v15 = vor.u32 %v10697_v2, %v7123_v4 }
  0xca   :  { %v8593_v50 = vld [vmem:[#allocation5 + $0xb88] sm:$0xf]  ;;  %v8338_v57 = vor.u32 %v11005_v49, %v8337_v48  ;;  %2638 = vmatmul.bf16.vlgmr.msrb.gmra.mxu1 %v11838_v43  ;;  %v8371_v13 = vld [vmem:[#allocation5 + $0x9e8] sm:$0xf0] }
  0xcb   :  { %v11069_v52 = vld [vmem:[#allocation5 + $0xba4] sm:$0xf0]  ;;  %2663 = vmatpush.bf16.msrb.mxu3 %v7890_v44  ;;  %2682 = vmatpush.bf16.msra.mxu1 %v8626_v46  ;;  %v7187_v44 = vld [vmem:[#allocation5 + $0xa8] sm:$0xf0] }
  0xcc   :  { %v8594_v58 = vor.u32 %v11069_v52, %v8593_v50  ;;  %v8305_v60 = vld [vmem:[#allocation5 + $0x948] sm:$0xf]  ;;  %2651 = vmatmul.bf16.vlgmr.msrb.gmra.mxu2 %v11832_v34  ;;  %v7443_v46 = vld [vmem:[#allocation5 + $0x2a8] sm:$0xf0]  ;;  %v7190_v49 = vor.u32 %v10713_v41, %v7187_v44 }
  0xcd   :  { %2695 = vmatpush.bf16.msra.mxu2 %v7350_v47  ;;  %v10997_v61 = vld [vmem:[#allocation5 + $0x964] sm:$0xf0]  ;;  %2670 = vmatpush.bf16.msra.mxu0 %v8338_v57  ;;  %v7446_v53 = vor.u32 %v10777_v45, %v7443_v46  ;;  %v10769_v57 = vld [vmem:[#allocation5 + $0x24c] sm:$0xf] }
  0xce   :  { %v8561_v62 = vld [vmem:[#allocation5 + $0xb48] sm:$0xf]  ;;  %2664 = vmatmul.bf16.vlgmr.msrb.gmra.mxu3 %v11836_v42  ;;  %v8306_v5 = vor.u32 %v10997_v61, %v8305_v60  ;;  %v11073_v16 = vld [vmem:[#allocation5 + $0xbcc] sm:$0xf] }
  0xcf   :  { %2708 = vmatpush.bf16.msra.mxu3 %v7606_v51  ;;  %v11061_v0 = vld [vmem:[#allocation5 + $0xb64] sm:$0xf0]  ;;  %2683 = vmatpush.bf16.msra.mxu1 %v8594_v58  ;;  %v7411_v58 = vld [vmem:[#allocation5 + $0x268] sm:$0xf0] }
  0xd0   :  { %v8562_v6 = vor.u32 %v11061_v0, %v8561_v62  ;;  %v8273_v8 = vld [vmem:[#allocation5 + $0x908] sm:$0xf]  ;;  %v7414_v3 = vor.u32 %v10769_v57, %v7411_v58  ;;  %v8083_v26 = vld [vmem:[#allocation5 + $0x7a8] sm:$0xf0] }
  0xd1   :  { %2696 = vmatpush.bf16.msra.mxu2 %v7318_v59  ;;  %v10989_v9 = vld [vmem:[#allocation5 + $0x924] sm:$0xf0]  ;;  %2671 = vmatpush.bf16.msra.mxu0 %v8306_v5  ;;  %v10761_v5 = vld [vmem:[#allocation5 + $0x20c] sm:$0xf] }
  0xd2   :  { %v8529_v10 = vld [vmem:[#allocation5 + $0xb08] sm:$0xf]  ;;  %v8274_v17 = vor.u32 %v10989_v9, %v8273_v8  ;;  %v7859_v8 = vld [vmem:[#allocation5 + $0x5e8] sm:$0xf0] }
  0xd3   :  { %2709 = vmatpush.bf16.msra.mxu3 %v7574_v63  ;;  %v11053_v12 = vld [vmem:[#allocation5 + $0xb24] sm:$0xf0]  ;;  %2684 = vmatpush.bf16.msra.mxu1 %v8562_v6  ;;  %v7158_v63 = vor.u32 %v10705_v55, %v7155_v56  ;;  %v7379_v6 = vld [vmem:[#allocation5 + $0x228] sm:$0xf0] }
  0xd4   :  { %v8530_v18 = vor.u32 %v11053_v12, %v8529_v10  ;;  %v8241_v20 = vld [vmem:[#allocation5 + $0x8c8] sm:$0xf]  ;;  %v10945_v9 = vld [vmem:[#allocation5 + $0x7cc] sm:$0xf] }
  0xd5   :  { %2697 = vmatpush.bf16.msra.mxu2 %v7286_v7  ;;  %v10981_v21 = vld [vmem:[#allocation5 + $0x8e4] sm:$0xf0]  ;;  %2672 = vmatpush.bf16.msra.mxu0 %v8274_v17  ;;  %v10881_v7 = vld [vmem:[#allocation5 + $0x5cc] sm:$0xf] }
  0xd6   :  { %v8497_v22 = vld [vmem:[#allocation5 + $0xac8] sm:$0xf]  ;;  %v8242_v29 = vor.u32 %v10981_v21, %v8241_v20  ;;  %v11009_v12 = vld [vmem:[#allocation5 + $0x9cc] sm:$0xf] }
  0xd7   :  { %2710 = vmatpush.bf16.msra.mxu3 %v7542_v11  ;;  %v11045_v24 = vld [vmem:[#allocation5 + $0xae4] sm:$0xf0]  ;;  %2685 = vmatpush.bf16.msra.mxu1 %v8530_v18  ;;  %v8115_v11 = vld [vmem:[#allocation5 + $0x7e8] sm:$0xf0]  ;;  %v7382_v18 = vor.u32 %v10761_v5, %v7379_v6  ;;  %v8374_v21 = vor.u32 %v11009_v12, %v8371_v13 }
  0xd8   :  { %v8498_v30 = vor.u32 %v11045_v24, %v8497_v22  ;;  %v8209_v32 = vld [vmem:[#allocation5 + $0x888] sm:$0xf]  ;;  %v8627_v17 = vld [vmem:[#allocation5 + $0xbe8] sm:$0xf0]  ;;  %v8118_v20 = vor.u32 %v10945_v9, %v8115_v11 }
  0xd9   :  { %2698 = vmatpush.bf16.msra.mxu2 %v7254_v19  ;;  %v10973_v36 = vld [vmem:[#allocation5 + $0x8a4] sm:$0xf0]  ;;  %2673 = vmatpush.bf16.msra.mxu0 %v8242_v29  ;;  %v7862_v19 = vor.u32 %v10881_v7, %v7859_v8  ;;  %v10873_v22 = vld [vmem:[#allocation5 + $0x58c] sm:$0xf]  ;;  %v8630_v25 = vor.u32 %v11073_v16, %v8627_v17 }
  0xda   :  { %v8465_v38 = vld [vmem:[#allocation5 + $0xa88] sm:$0xf]  ;;  %v8210_v47 = vor.u32 %v10973_v36, %v8209_v32  ;;  %v10937_v24 = vld [vmem:[#allocation5 + $0x78c] sm:$0xf] }
  0xdb   :  { %2711 = vmatpush.bf16.msra.mxu3 %v7510_v23  ;;  %v11037_v40 = vld [vmem:[#allocation5 + $0xaa4] sm:$0xf0]  ;;  %2686 = vmatpush.bf16.msra.mxu1 %v8498_v30  ;;  %v7827_v23 = vld [vmem:[#allocation5 + $0x5a8] sm:$0xf0]  ;;  %v8086_v32 = vor.u32 %v10937_v24, %v8083_v26 }
  0xdc   :  { %v8466_v48 = vor.u32 %v11037_v40, %v8465_v38  ;;  %v8177_v50 = vld [vmem:[#allocation5 + $0x848] sm:$0xf]  ;;  %v11001_v27 = vld [vmem:[#allocation5 + $0x98c] sm:$0xf] }
  0xdd   :  { %2699 = vmatpush.bf16.msra.mxu2 %v7222_v31  ;;  %v10965_v51 = vld [vmem:[#allocation5 + $0x864] sm:$0xf0]  ;;  %2674 = vmatpush.bf16.msra.mxu0 %v8210_v47  ;;  %v8339_v28 = vld [vmem:[#allocation5 + $0x9a8] sm:$0xf0]  ;;  %v7830_v31 = vor.u32 %v10873_v22, %v7827_v23 }
  0xde   :  { %v8433_v52 = vld [vmem:[#allocation5 + $0xa48] sm:$0xf]  ;;  %v8178_v59 = vor.u32 %v10965_v51, %v8177_v50  ;;  %v11065_v29 = vld [vmem:[#allocation5 + $0xb8c] sm:$0xf]  ;;  %v8342_v36 = vor.u32 %v11001_v27, %v8339_v28 }
  0xdf   :  { %2712 = vmatpush.bf16.msra.mxu3 %v7478_v39  ;;  %v11029_v54 = vld [vmem:[#allocation5 + $0xa64] sm:$0xf0]  ;;  %2687 = vmatpush.bf16.msra.mxu1 %v8466_v48  ;;  %v8595_v30 = vld [vmem:[#allocation5 + $0xba8] sm:$0xf0] }
  0xe0   :  { %v8145_v60 = vld [vmem:[#allocation5 + $0x808] sm:$0xf]  ;;  %v8434_v62 = vor.u32 %v11029_v54, %v8433_v52  ;;  %v10865_v38 = vld [vmem:[#allocation5 + $0x54c] sm:$0xf]  ;;  %v8598_v41 = vor.u32 %v11065_v29, %v8595_v30 }
  0xe1   :  { %v10957_v61 = vld [vmem:[#allocation5 + $0x824] sm:$0xf0]  ;;  %2700 = vmatpush.bf16.msra.mxu2 %v7190_v49  ;;  %2675 = vmatpush.bf16.msra.mxu0 %v8178_v59  ;;  %v7795_v39 = vld [vmem:[#allocation5 + $0x568] sm:$0xf0] }
  0xe2   :  { %v8401_v0 = vld [vmem:[#allocation5 + $0xa08] sm:$0xf]  ;;  %v8146_v10 = vor.u32 %v10957_v61, %v8145_v60  ;;  %v10929_v40 = vld [vmem:[#allocation5 + $0x74c] sm:$0xf]  ;;  %v7798_v49 = vor.u32 %v10865_v38, %v7795_v39 }
  0xe3   :  { %v11021_v1 = vld [vmem:[#allocation5 + $0xa24] sm:$0xf0]  ;;  %2713 = vmatpush.bf16.msra.mxu3 %v7446_v53  ;;  %2688 = vmatpush.bf16.msra.mxu1 %v8434_v62  ;;  %v8051_v44 = vld [vmem:[#allocation5 + $0x768] sm:$0xf0] }
  0xe4   :  { %v8402_v14 = vor.u32 %v11021_v1, %v8401_v0  ;;  %v10993_v45 = vld [vmem:[#allocation5 + $0x94c] sm:$0xf]  ;;  %v8054_v50 = vor.u32 %v10929_v40, %v8051_v44  ;;  %v2470_v44 = vpop.f32.mrf.mxu0 }
  0xe5   :  { %2701 = vmatpush.bf16.msra.mxu2 %v7158_v63  ;;  %2676 = vmatpush.bf16.msra.mxu0 %v8146_v10  ;;  %v8307_v46 = vld [vmem:[#allocation5 + $0x968] sm:$0xf0] }
  0xe6   :  { %v11057_v47 = vld [vmem:[#allocation5 + $0xb4c] sm:$0xf]  ;;  %v8310_v51 = vor.u32 %v10993_v45, %v8307_v46 }
  0xe7   :  { %2714 = vmatpush.bf16.msra.mxu3 %v7414_v3  ;;  %2689 = vmatpush.bf16.msra.mxu1 %v8402_v14  ;;  %v8563_v48 = vld [vmem:[#allocation5 + $0xb68] sm:$0xf0] }
  0xe8   :  { %2677 = vmatmul.bf16.vlgmr.msra.gmra.mxu0 %v11844_v33  ;;  %v10857_v52 = vld [vmem:[#allocation5 + $0x50c] sm:$0xf]  ;;  %v8566_v55 = vor.u32 %v11057_v47, %v8563_v48 }
  0xe9   :  { %2702 = vmatpush.bf16.msra.mxu2 %v7126_v15  ;;  %2721 = vmatpush.bf16.msrb.mxu0 %v7862_v19  ;;  %v7763_v53 = vld [vmem:[#allocation5 + $0x528] sm:$0xf0]  ;;  %v11864_v19 = vld [vmem:[#allocation7] sm:$0xff] }
  0xea   :  { %2690 = vmatmul.bf16.vlgmr.msra.gmra.mxu1 %v11846_v37  ;;  %v10921_v54 = vld [vmem:[#allocation5 + $0x70c] sm:$0xf]  ;;  %v7766_v61 = vor.u32 %v10857_v52, %v7763_v53  ;;  %v525_v28 = vperm.slane %v11864_v19, 0 }
  0xeb   :  { %2715 = vmatpush.bf16.msra.mxu3 %v7382_v18  ;;  %2734 = vmatpush.bf16.msrb.mxu1 %v8118_v20  ;;  %v8019_v56 = vld [vmem:[#allocation5 + $0x728] sm:$0xf0] }
  0xec   :  { %2703 = vmatmul.bf16.vlgmr.msra.gmra.mxu2 %v11834_v35  ;;  %v10985_v57 = vld [vmem:[#allocation5 + $0x90c] sm:$0xf]  ;;  %v8022_v62 = vor.u32 %v10921_v54, %v8019_v56  ;;  %v10758_v56 = vld [vmem:[#allocation5 + $0x1ec] sm:$0xf0] }
  0xed   :  { %2747 = vmatpush.bf16.msrb.mxu2 %v8374_v21  ;;  %2722 = vmatpush.bf16.msrb.mxu0 %v7830_v31  ;;  %v8275_v58 = vld [vmem:[#allocation5 + $0x928] sm:$0xf0] }
  0xee   :  { %2716 = vmatmul.bf16.vlgmr.msra.gmra.mxu3 %v11838_v43  ;;  %v11049_v59 = vld [vmem:[#allocation5 + $0xb0c] sm:$0xf]  ;;  %v8278_v63 = vor.u32 %v10985_v57, %v8275_v58  ;;  %v7609_v57 = vld [vmem:[#allocation5 + $0x3d0] sm:$0xf]  ;;  %v2483_v58 = vpop.f32.mrf.mxu1 }
  0xef   :  { %2760 = vmatpush.bf16.msrb.mxu3 %v8630_v25  ;;  %2735 = vmatpush.bf16.msrb.mxu1 %v8086_v32  ;;  %v8531_v60 = vld [vmem:[#allocation5 + $0xb28] sm:$0xf0] }
  0xf0   :  { %v10849_v0 = vld [vmem:[#allocation5 + $0x4cc] sm:$0xf]  ;;  %v8534_v3 = vor.u32 %v11049_v59, %v8531_v60  ;;  %v10822_v60 = vld [vmem:[#allocation5 + $0x3ec] sm:$0xf0] }
  0xf1   :  { %2748 = vmatpush.bf16.msrb.mxu2 %v8342_v36  ;;  %2723 = vmatpush.bf16.msrb.mxu0 %v7798_v49  ;;  %v7731_v1 = vld [vmem:[#allocation5 + $0x4e8] sm:$0xf0] }
  0xf2   :  { %v10913_v2 = vld [vmem:[#allocation5 + $0x6cc] sm:$0xf]  ;;  %v7734_v9 = vor.u32 %v10849_v0, %v7731_v1 }
  0xf3   :  { %2761 = vmatpush.bf16.msrb.mxu3 %v8598_v41  ;;  %2736 = vmatpush.bf16.msrb.mxu1 %v8054_v50  ;;  %v7987_v4 = vld [vmem:[#allocation5 + $0x6e8] sm:$0xf0]  ;;  %v2471_v50 = vadd.f32 %v2470_v44, %v525_v28  ;;  %v7545_v28 = vld [vmem:[#allocation5 + $0x350] sm:$0xf] }
  0xf4   :  { %v10977_v5 = vld [vmem:[#allocation5 + $0x8cc] sm:$0xf]  ;;  %v7990_v11 = vor.u32 %v10913_v2, %v7987_v4  ;;  %v8121_v2 = vld [vmem:[#allocation5 + $0x7d0] sm:$0xf] }
  0xf5   :  { %2749 = vmatpush.bf16.msrb.mxu2 %v8310_v51  ;;  %v8243_v6 = vld [vmem:[#allocation5 + $0x8e8] sm:$0xf0]  ;;  %2724 = vmatpush.bf16.msrb.mxu0 %v7766_v61  ;;  %v7865_v61 = vld [vmem:[#allocation5 + $0x5d0] sm:$0xf] }
  0xf6   :  { %v11041_v7 = vld [vmem:[#allocation5 + $0xacc] sm:$0xf]  ;;  %v8246_v12 = vor.u32 %v10977_v5, %v8243_v6 }
  0xf7   :  { %2762 = vmatpush.bf16.msrb.mxu3 %v8566_v55  ;;  %v8499_v8 = vld [vmem:[#allocation5 + $0xae8] sm:$0xf0]  ;;  %2737 = vmatpush.bf16.msrb.mxu1 %v8022_v62  ;;  %v7353_v55 = vld [vmem:[#allocation5 + $0x1d0] sm:$0xf] }
  0xf8   :  { %v10841_v10 = vld [vmem:[#allocation5 + $0x48c] sm:$0xf]  ;;  %v8502_v16 = vor.u32 %v11041_v7, %v8499_v8  ;;  %v10886_v62 = vld [vmem:[#allocation5 + $0x5ec] sm:$0xf0]  ;;  %v7354_v5 = vor.u32 %v10758_v56, %v7353_v55  ;;  %v7610_v7 = vor.u32 %v10822_v60, %v7609_v57 }
  0xf9   :  { %2750 = vmatpush.bf16.msrb.mxu2 %v8278_v63  ;;  %v7699_v13 = vld [vmem:[#allocation5 + $0x4a8] sm:$0xf0]  ;;  %2725 = vmatpush.bf16.msrb.mxu0 %v7734_v9  ;;  %v2484_v63 = vadd.f32 %v2483_v58, %v2471_v50  ;;  %v7866_v8 = vor.u32 %v10886_v62, %v7865_v61  ;;  %v7321_v9 = vld [vmem:[#allocation5 + $0x190] sm:$0xf] }
  0xfa   :  { %v10905_v14 = vld [vmem:[#allocation5 + $0x68c] sm:$0xf]  ;;  %v7702_v22 = vor.u32 %v10841_v10, %v7699_v13  ;;  %v2496_v6 = vpop.f32.mrf.mxu2  ;;  %v10750_v10 = vld [vmem:[#allocation5 + $0x1ac] sm:$0xf0]  ;;  %v2509_v13 = vpop.f32.mrf.mxu3 }
  0xfb   :  { %v7955_v15 = vld [vmem:[#allocation5 + $0x6a8] sm:$0xf0]  ;;  %2763 = vmatpush.bf16.msrb.mxu3 %v8534_v3  ;;  %2738 = vmatpush.bf16.msrb.mxu1 %v7990_v11  ;;  %v10950_v3 = vld [vmem:[#allocation5 + $0x7ec] sm:$0xf0] }
  0xfc   :  { %v10969_v17 = vld [vmem:[#allocation5 + $0x88c] sm:$0xf]  ;;  %v7958_v24 = vor.u32 %v10905_v14, %v7955_v15  ;;  %v7577_v11 = vld [vmem:[#allocation5 + $0x390] sm:$0xf]  ;;  %v8122_v14 = vor.u32 %v10950_v3, %v8121_v2 }
  0xfd   :  { %v8211_v18 = vld [vmem:[#allocation5 + $0x8a8] sm:$0xf0]  ;;  %2751 = vmatpush.bf16.msrb.mxu2 %v8246_v12  ;;  %2726 = vmatpush.bf16.msrb.mxu0 %v7702_v22  ;;  %v2497_v12 = vadd.f32 %v2496_v6, %v2484_v63  ;;  %v10814_v15 = vld [vmem:[#allocation5 + $0x3ac] sm:$0xf0] }
  0xfe   :  { %v11033_v20 = vld [vmem:[#allocation5 + $0xa8c] sm:$0xf]  ;;  %v8214_v25 = vor.u32 %v10969_v17, %v8211_v18  ;;  %v10878_v17 = vld [vmem:[#allocation5 + $0x5ac] sm:$0xf0]  ;;  %v2472_v18 = vpop.f32.mrf.mxu0 }
  0xff   :  { %v8467_v21 = vld [vmem:[#allocation5 + $0xaa8] sm:$0xf0]  ;;  %2764 = vmatpush.bf16.msrb.mxu3 %v8502_v16  ;;  %2739 = vmatpush.bf16.msrb.mxu1 %v7958_v24  ;;  %v7833_v16 = vld [vmem:[#allocation5 + $0x590] sm:$0xf]  ;;  %v2510_v22 = vadd.f32 %v2509_v13, %v2497_v12  ;;  %v7578_v24 = vor.u32 %v10814_v15, %v7577_v11 }
 0x100   :  { %v10833_v23 = vld [vmem:[#allocation5 + $0x44c] sm:$0xf]  ;;  %v8470_v29 = vor.u32 %v11033_v20, %v8467_v21  ;;  %v8089_v20 = vld [vmem:[#allocation5 + $0x790] sm:$0xf] }
 0x101   :  { %v7667_v26 = vld [vmem:[#allocation5 + $0x468] sm:$0xf0]  ;;  %2752 = vmatpush.bf16.msrb.mxu2 %v8214_v25  ;;  %v10942_v21 = vld [vmem:[#allocation5 + $0x7ac] sm:$0xf0]  ;;  %v7834_v25 = vor.u32 %v10878_v17, %v7833_v16 }
 0x102   :  { %v10897_v27 = vld [vmem:[#allocation5 + $0x64c] sm:$0xf]  ;;  %v7670_v39 = vor.u32 %v10833_v23, %v7667_v26  ;;  %v7322_v23 = vor.u32 %v10750_v10, %v7321_v9  ;;  %v7289_v26 = vld [vmem:[#allocation5 + $0x150] sm:$0xf] }
 0x103   :  { %v7923_v30 = vld [vmem:[#allocation5 + $0x668] sm:$0xf0]  ;;  %2765 = vmatpush.bf16.msrb.mxu3 %v8470_v29  ;;  %v2485_v29 = vpop.f32.mrf.mxu1  ;;  %v10926_v55 = vld [vmem:[#allocation5 + $0x72c] sm:$0xf0] }
 0x104   :  { %v10961_v31 = vld [vmem:[#allocation5 + $0x84c] sm:$0xf]  ;;  %v7926_v45 = vor.u32 %v10897_v27, %v7923_v30  ;;  %2727 = vmatpush.bf16.msrb.mxu0 %v7670_v39  ;;  %v10742_v27 = vld [vmem:[#allocation5 + $0x16c] sm:$0xf0]  ;;  %v8090_v30 = vor.u32 %v10942_v21, %v8089_v20 }
 0x105   :  { %v8179_v32 = vld [vmem:[#allocation5 + $0x868] sm:$0xf0]  ;;  %v10934_v39 = vld [vmem:[#allocation5 + $0x76c] sm:$0xf0] }
 0x106   :  { %v11025_v36 = vld [vmem:[#allocation5 + $0xa4c] sm:$0xf]  ;;  %v8182_v46 = vor.u32 %v10961_v31, %v8179_v32  ;;  %2740 = vmatpush.bf16.msrb.mxu1 %v7926_v45  ;;  %v10806_v31 = vld [vmem:[#allocation5 + $0x36c] sm:$0xf0]  ;;  %v2522_v56 = vpop.f32.mrf.mxu0 }
 0x107   :  { %v8435_v38 = vld [vmem:[#allocation5 + $0xa68] sm:$0xf0]  ;;  %v7801_v32 = vld [vmem:[#allocation5 + $0x550] sm:$0xf]  ;;  %v7546_v44 = vor.u32 %v10806_v31, %v7545_v28  ;;  %v2523_v58 = vadd.f32 %v2522_v56, %v2510_v22 }
 0x108   :  { %v10825_v40 = vld [vmem:[#allocation5 + $0x40c] sm:$0xf]  ;;  %v8438_v51 = vor.u32 %v11025_v36, %v8435_v38  ;;  %2753 = vmatpush.bf16.msrb.mxu2 %v8182_v46  ;;  %v10870_v36 = vld [vmem:[#allocation5 + $0x56c] sm:$0xf0] }
 0x109   :  { %v7635_v41 = vld [vmem:[#allocation5 + $0x428] sm:$0xf0]  ;;  %v8057_v38 = vld [vmem:[#allocation5 + $0x750] sm:$0xf]  ;;  %v7802_v45 = vor.u32 %v10870_v36, %v7801_v32 }
 0x10a   :  { %v10889_v47 = vld [vmem:[#allocation5 + $0x60c] sm:$0xf]  ;;  %v7638_v59 = vor.u32 %v10825_v40, %v7635_v41  ;;  %2766 = vmatpush.bf16.msrb.mxu3 %v8438_v51  ;;  %v7290_v40 = vor.u32 %v10742_v27, %v7289_v26  ;;  %v2498_v41 = vpop.f32.mrf.mxu2  ;;  %v7257_v46 = vld [vmem:[#allocation5 + $0x110] sm:$0xf]  ;;  %v8058_v50 = vor.u32 %v10934_v39, %v8057_v38 }
 0x10b   :  { %v7891_v48 = vld [vmem:[#allocation5 + $0x628] sm:$0xf0]  ;;  %v10798_v51 = vld [vmem:[#allocation5 + $0x32c] sm:$0xf0] }
 0x10c   :  { %v10953_v49 = vld [vmem:[#allocation5 + $0x80c] sm:$0xf]  ;;  %v7894_v0 = vor.u32 %v10889_v47, %v7891_v48  ;;  %2728 = vmatpush.bf16.msrb.mxu0 %v7638_v59  ;;  %v10734_v47 = vld [vmem:[#allocation5 + $0x12c] sm:$0xf0] }
 0x10d   :  { %v8147_v52 = vld [vmem:[#allocation5 + $0x828] sm:$0xf0]  ;;  %v7513_v48 = vld [vmem:[#allocation5 + $0x310] sm:$0xf]  ;;  %v7258_v57 = vor.u32 %v10734_v47, %v7257_v46 }
 0x10e   :  { %v11017_v53 = vld [vmem:[#allocation5 + $0xa0c] sm:$0xf]  ;;  %v8150_v1 = vor.u32 %v10953_v49, %v8147_v52  ;;  %2741 = vmatpush.bf16.msrb.mxu1 %v7894_v0  ;;  %v2511_v49 = vpop.f32.mrf.mxu3  ;;  %v7769_v52 = vld [vmem:[#allocation5 + $0x510] sm:$0xf]  ;;  %v7514_v59 = vor.u32 %v10798_v51, %v7513_v48  ;;  %v2535_v0 = vpop.f32.mrf.mxu1 }
 0x10f   :  { %v8403_v54 = vld [vmem:[#allocation5 + $0xa28] sm:$0xf0]  ;;  %2729 = vmatmul.bf16.vlgmr.msrb.gmra.mxu0 %v11832_v34  ;;  %v7225_v61 = vld [vmem:[#allocation5 + $0xd0] sm:$0xf] }
 0x110   :  { %v8406_v4 = vor.u32 %v11017_v53, %v8403_v54  ;;  %2754 = vmatpush.bf16.msrb.mxu2 %v8150_v1  ;;  %2773 = vmatpush.bf16.msra.mxu0 %v7354_v5  ;;  %v10862_v53 = vld [vmem:[#allocation5 + $0x52c] sm:$0xf0]  ;;  %v11871_v5 = vadd.f32 %v2535_v0, %v2523_v58 }
 0x111   :  { %2742 = vmatmul.bf16.vlgmr.msrb.gmra.mxu1 %v11836_v42  ;;  %v8025_v54 = vld [vmem:[#allocation5 + $0x710] sm:$0xf]  ;;  %v7770_v60 = vor.u32 %v10862_v53, %v7769_v52 }
 0x112   :  { %2767 = vmatpush.bf16.msrb.mxu3 %v8406_v4  ;;  %2786 = vmatpush.bf16.msra.mxu1 %v7610_v7  ;;  %v10726_v62 = vld [vmem:[#allocation5 + $0xec] sm:$0xf0]  ;;  %v8026_v1 = vor.u32 %v10926_v55, %v8025_v54  ;;  %v2548_v20 = vpop.f32.mrf.mxu2 }
 0x113   :  { %2755 = vmatmul.bf16.vlgmr.msrb.gmra.mxu2 %v11844_v33  ;;  %v7481_v63 = vld [vmem:[#allocation5 + $0x2d0] sm:$0xf]  ;;  %v7226_v9 = vor.u32 %v10726_v62, %v7225_v61 }
 0x114   :  { %2799 = vmatpush.bf16.msra.mxu2 %v7866_v8  ;;  %2774 = vmatpush.bf16.msra.mxu0 %v7322_v23  ;;  %v10790_v2 = vld [vmem:[#allocation5 + $0x2ec] sm:$0xf0]  ;;  %v526_v8 = vperm.slane %v11864_v19, 1 }
 0x115   :  { %2768 = vmatmul.bf16.vlgmr.msrb.gmra.mxu3 %v11846_v37  ;;  %v7737_v3 = vld [vmem:[#allocation5 + $0x4d0] sm:$0xf]  ;;  %v7482_v10 = vor.u32 %v10790_v2, %v7481_v63  ;;  %v7355_v2 = vld [vmem:[#allocation5 + $0x1f0] sm:$0xf0] }
 0x116   :  { %2812 = vmatpush.bf16.msra.mxu3 %v8122_v14  ;;  %2787 = vmatpush.bf16.msra.mxu1 %v7578_v24  ;;  %v10854_v4 = vld [vmem:[#allocation5 + $0x4ec] sm:$0xf0]  ;;  %v2561_v21 = vpop.f32.mrf.mxu3  ;;  %v2549_v24 = vadd.f32 %v2548_v20, %v526_v8  ;;  %v2537_v36 = vpop.f32.mrf.mxu1  ;;  %v10810_v20 = vld [vmem:[#allocation5 + $0x394] sm:$0xf] }
 0x117   :  { %v7993_v6 = vld [vmem:[#allocation5 + $0x6d0] sm:$0xf]  ;;  %v7738_v11 = vor.u32 %v10854_v4, %v7737_v3  ;;  %v10802_v36 = vld [vmem:[#allocation5 + $0x354] sm:$0xf] }
 0x118   :  { %2800 = vmatpush.bf16.msra.mxu2 %v7834_v25  ;;  %2775 = vmatpush.bf16.msra.mxu0 %v7290_v40  ;;  %v10918_v7 = vld [vmem:[#allocation5 + $0x6ec] sm:$0xf0]  ;;  %v2524_v25 = vpop.f32.mrf.mxu0  ;;  %v11874_v32 = vadd.f32 %v2561_v21, %v2549_v24  ;;  %v7579_v21 = vld [vmem:[#allocation5 + $0x3b0] sm:$0xf0] }
 0x119   :  { %v7193_v12 = vld [vmem:[#allocation5 + $0x90] sm:$0xf]  ;;  %v7994_v15 = vor.u32 %v10918_v7, %v7993_v6  ;;  %v10818_v6 = vld [vmem:[#allocation5 + $0x3d4] sm:$0xf] }
 0x11a   :  { %2813 = vmatpush.bf16.msra.mxu3 %v8090_v30  ;;  %2788 = vmatpush.bf16.msra.mxu1 %v7546_v44  ;;  %v10718_v13 = vld [vmem:[#allocation5 + $0xac] sm:$0xf0]  ;;  %v2550_v58 = vpop.f32.mrf.mxu2  ;;  %v7611_v7 = vld [vmem:[#allocation5 + $0x3f0] sm:$0xf0] }
 0x11b   :  { %v7449_v14 = vld [vmem:[#allocation5 + $0x290] sm:$0xf]  ;;  %v7194_v26 = vor.u32 %v10718_v13, %v7193_v12 }
 0x11c   :  { %2801 = vmatpush.bf16.msra.mxu2 %v7802_v45  ;;  %2776 = vmatpush.bf16.msra.mxu0 %v7258_v57  ;;  %v10782_v16 = vld [vmem:[#allocation5 + $0x2ac] sm:$0xf0] }
 0x11d   :  { %v7705_v17 = vld [vmem:[#allocation5 + $0x490] sm:$0xf]  ;;  %v7450_v27 = vor.u32 %v10782_v16, %v7449_v14 }
 0x11e   :  { %2814 = vmatpush.bf16.msra.mxu3 %v8058_v50  ;;  %2789 = vmatpush.bf16.msra.mxu1 %v7514_v59  ;;  %v10846_v18 = vld [vmem:[#allocation5 + $0x4ac] sm:$0xf0]  ;;  %v2563_v59 = vpop.f32.mrf.mxu3 }
 0x11f   :  { %v7961_v22 = vld [vmem:[#allocation5 + $0x690] sm:$0xf]  ;;  %v7706_v28 = vor.u32 %v10846_v18, %v7705_v17  ;;  %v10746_v17 = vld [vmem:[#allocation5 + $0x194] sm:$0xf] }
 0x120   :  { %2802 = vmatpush.bf16.msra.mxu2 %v7770_v60  ;;  %v10910_v23 = vld [vmem:[#allocation5 + $0x6ac] sm:$0xf0]  ;;  %2777 = vmatpush.bf16.msra.mxu0 %v7226_v9  ;;  %v7323_v18 = vld [vmem:[#allocation5 + $0x1b0] sm:$0xf0] }
 0x121   :  { %v7161_v29 = vld [vmem:[#allocation5 + $0x50] sm:$0xf]  ;;  %v7962_v38 = vor.u32 %v10910_v23, %v7961_v22  ;;  %v7326_v24 = vor.u32 %v10746_v17, %v7323_v18  ;;  %v10778_v18 = vld [vmem:[#allocation5 + $0x294] sm:$0xf] }
 0x122   :  { %2815 = vmatpush.bf16.msra.mxu3 %v8026_v1  ;;  %2790 = vmatpush.bf16.msra.mxu1 %v7482_v10  ;;  %v10710_v30 = vld [vmem:[#allocation5 + $0x6c] sm:$0xf0]  ;;  %v10754_v1 = vld [vmem:[#allocation5 + $0x1d4] sm:$0xf] }
 0x123   :  { %v7417_v31 = vld [vmem:[#allocation5 + $0x250] sm:$0xf]  ;;  %v7162_v46 = vor.u32 %v10710_v30, %v7161_v29  ;;  %v10738_v30 = vld [vmem:[#allocation5 + $0x154] sm:$0xf] }
 0x124   :  { %2803 = vmatpush.bf16.msra.mxu2 %v7738_v11  ;;  %v10774_v39 = vld [vmem:[#allocation5 + $0x26c] sm:$0xf0]  ;;  %2778 = vmatpush.bf16.msra.mxu0 %v7194_v26  ;;  %v7358_v11 = vor.u32 %v10754_v1, %v7355_v2  ;;  %v7227_v1 = vld [vmem:[#allocation5 + $0xf0] sm:$0xf0] }
 0x125   :  { %v7673_v40 = vld [vmem:[#allocation5 + $0x450] sm:$0xf]  ;;  %v7418_v49 = vor.u32 %v10774_v39, %v7417_v31  ;;  %v7291_v31 = vld [vmem:[#allocation5 + $0x170] sm:$0xf0] }
 0x126   :  { %2816 = vmatpush.bf16.msra.mxu3 %v7994_v15  ;;  %v10838_v41 = vld [vmem:[#allocation5 + $0x46c] sm:$0xf0]  ;;  %2791 = vmatpush.bf16.msra.mxu1 %v7450_v27  ;;  %v7614_v15 = vor.u32 %v10818_v6, %v7611_v7  ;;  %v10786_v2 = vld [vmem:[#allocation5 + $0x2d4] sm:$0xf] }
 0x127   :  { %v7929_v44 = vld [vmem:[#allocation5 + $0x650] sm:$0xf]  ;;  %v7674_v50 = vor.u32 %v10838_v41, %v7673_v40  ;;  %v7294_v41 = vor.u32 %v10738_v30, %v7291_v31 }
 0x128   :  { %v10902_v45 = vld [vmem:[#allocation5 + $0x66c] sm:$0xf0]  ;;  %2804 = vmatpush.bf16.msra.mxu2 %v7706_v28  ;;  %2779 = vmatpush.bf16.msra.mxu0 %v7162_v46  ;;  %v7582_v28 = vor.u32 %v10810_v20, %v7579_v21  ;;  %v7451_v20 = vld [vmem:[#allocation5 + $0x2b0] sm:$0xf0] }
 0x129   :  { %v7129_v47 = vld [vmem:[#allocation5 + $0x10] sm:$0xf]  ;;  %v7930_v54 = vor.u32 %v10902_v45, %v7929_v44  ;;  %v7454_v30 = vor.u32 %v10778_v18, %v7451_v20 }
 0x12a   :  { %v10702_v48 = vld [vmem:[#allocation5 + $0x2c] sm:$0xf0]  ;;  %2817 = vmatpush.bf16.msra.mxu3 %v7962_v38  ;;  %2792 = vmatpush.bf16.msra.mxu1 %v7418_v49  ;;  %v7547_v38 = vld [vmem:[#allocation5 + $0x370] sm:$0xf0] }
 0x12b   :  { %v7385_v51 = vld [vmem:[#allocation5 + $0x210] sm:$0xf]  ;;  %v7130_v63 = vor.u32 %v10702_v48, %v7129_v47  ;;  %v7550_v47 = vor.u32 %v10802_v36, %v7547_v38  ;;  %v10730_v49 = vld [vmem:[#allocation5 + $0x114] sm:$0xf] }
 0x12c   :  { %v10766_v52 = vld [vmem:[#allocation5 + $0x22c] sm:$0xf0]  ;;  %2805 = vmatpush.bf16.msra.mxu2 %v7674_v50  ;;  %v7259_v50 = vld [vmem:[#allocation5 + $0x130] sm:$0xf0] }
 0x12d   :  { %v7641_v53 = vld [vmem:[#allocation5 + $0x410] sm:$0xf]  ;;  %v7386_v3 = vor.u32 %v10766_v52, %v7385_v51  ;;  %2780 = vmatpush.bf16.msra.mxu0 %v7130_v63  ;;  %v10794_v51 = vld [vmem:[#allocation5 + $0x314] sm:$0xf] }
 0x12e   :  { %v10830_v55 = vld [vmem:[#allocation5 + $0x42c] sm:$0xf0]  ;;  %2818 = vmatpush.bf16.msra.mxu3 %v7930_v54  ;;  %v7515_v52 = vld [vmem:[#allocation5 + $0x330] sm:$0xf0]  ;;  %v2574_v54 = vpop.f32.mrf.mxu0 }
 0x12f   :  { %v7897_v56 = vld [vmem:[#allocation5 + $0x610] sm:$0xf]  ;;  %v7642_v4 = vor.u32 %v10830_v55, %v7641_v53  ;;  %2793 = vmatpush.bf16.msra.mxu1 %v7386_v3  ;;  %v7483_v3 = vld [vmem:[#allocation5 + $0x2f0] sm:$0xf0] }
 0x130   :  { %v10894_v57 = vld [vmem:[#allocation5 + $0x62c] sm:$0xf0]  ;;  %2781 = vmatmul.bf16.vlgmr.msra.gmra.mxu0 %v11834_v35  ;;  %v10706_v36 = vld [vmem:[#allocation5 + $0x54] sm:$0xf] }
 0x131   :  { %v8377_v60 = vld [vmem:[#allocation5 + $0x9d0] sm:$0xf]  ;;  %v7898_v8 = vor.u32 %v10894_v57, %v7897_v56  ;;  %2806 = vmatpush.bf16.msra.mxu2 %v7642_v4  ;;  %v7262_v56 = vor.u32 %v10730_v49, %v7259_v50  ;;  %v2613_v17 = vpop.f32.mrf.mxu3  ;;  %v7163_v38 = vld [vmem:[#allocation5 + $0x70] sm:$0xf0] }
 0x132   :  { %v11014_v61 = vld [vmem:[#allocation5 + $0x9ec] sm:$0xf0]  ;;  %2794 = vmatmul.bf16.vlgmr.msra.gmra.mxu1 %v11838_v43  ;;  %v10698_v50 = vld [vmem:[#allocation5 + $0x14] sm:$0xf] }
 0x133   :  { %v8633_v62 = vld [vmem:[#allocation5 + $0xbd0] sm:$0xf]  ;;  %v8378_v9 = vor.u32 %v11014_v61, %v8377_v60  ;;  %2819 = vmatpush.bf16.msra.mxu3 %v7898_v8  ;;  %v2575_v60 = vadd.f32 %v2574_v54, %v11874_v32  ;;  %v2587_v61 = vpop.f32.mrf.mxu1  ;;  %v7486_v32 = vor.u32 %v10786_v2, %v7483_v3  ;;  %v10762_v54 = vld [vmem:[#allocation5 + $0x214] sm:$0xf] }
 0x134   :  { %v11078_v0 = vld [vmem:[#allocation5 + $0xbec] sm:$0xf0]  ;;  %2807 = vmatmul.bf16.vlgmr.msra.gmra.mxu2 %v11832_v34  ;;  %v11074_v2 = vld [vmem:[#allocation5 + $0xbd4] sm:$0xf] }
 0x135   :  { %v8634_v10 = vor.u32 %v11078_v0, %v8633_v62  ;;  %v8345_v12 = vld [vmem:[#allocation5 + $0x990] sm:$0xf]  ;;  %2825 = vmatpush.bf16.msrb.mxu0 %v8378_v9  ;;  %2851 = vmatpush.bf16.msrb.mxu2 %v7358_v11  ;;  %v7518_v62 = vor.u32 %v10794_v51, %v7515_v52  ;;  %v10722_v0 = vld [vmem:[#allocation5 + $0xd4] sm:$0xf]  ;;  %v2588_v4 = vadd.f32 %v2587_v61, %v2575_v60 }
 0x136   :  { %v11006_v13 = vld [vmem:[#allocation5 + $0x9ac] sm:$0xf0]  ;;  %2820 = vmatmul.bf16.vlgmr.msra.gmra.mxu3 %v11836_v42  ;;  %v7230_v8 = vor.u32 %v10722_v0, %v7227_v1  ;;  %v8123_v61 = vld [vmem:[#allocation5 + $0x7f0] sm:$0xf0] }
 0x137   :  { %v8601_v14 = vld [vmem:[#allocation5 + $0xb90] sm:$0xf]  ;;  %v8346_v22 = vor.u32 %v11006_v13, %v8345_v12  ;;  %2838 = vmatpush.bf16.msrb.mxu1 %v8634_v10  ;;  %2864 = vmatpush.bf16.msrb.mxu3 %v7614_v15  ;;  %v2600_v12 = vpop.f32.mrf.mxu2  ;;  %v7195_v15 = vld [vmem:[#allocation5 + $0xb0] sm:$0xf0] }
 0x138   :  { %v11070_v16 = vld [vmem:[#allocation5 + $0xbac] sm:$0xf0]  ;;  %v8635_v3 = vld [vmem:[#allocation5 + $0xbf0] sm:$0xf0] }
 0x139   :  { %v8602_v23 = vor.u32 %v11070_v16, %v8601_v14  ;;  %v8313_v25 = vld [vmem:[#allocation5 + $0x950] sm:$0xf]  ;;  %2826 = vmatpush.bf16.msrb.mxu0 %v8346_v22  ;;  %2852 = vmatpush.bf16.msrb.mxu2 %v7326_v24  ;;  %v10714_v14 = vld [vmem:[#allocation5 + $0x94] sm:$0xf]  ;;  %v2601_v16 = vadd.f32 %v2600_v12, %v2588_v4  ;;  %v8638_v12 = vor.u32 %v11074_v2, %v8635_v3 }
 0x13a   :  { %v10998_v26 = vld [vmem:[#allocation5 + $0x96c] sm:$0xf0] }
 0x13b   :  { %v8569_v27 = vld [vmem:[#allocation5 + $0xb50] sm:$0xf]  ;;  %v8314_v39 = vor.u32 %v10998_v26, %v8313_v25  ;;  %2839 = vmatpush.bf16.msrb.mxu1 %v8602_v23  ;;  %2865 = vmatpush.bf16.msrb.mxu3 %v7582_v28  ;;  %v11881_v22 = vadd.f32 %v2613_v17, %v2601_v16  ;;  %v2576_v23 = vpop.f32.mrf.mxu0  ;;  %v7198_v25 = vor.u32 %v10714_v14, %v7195_v15  ;;  %v8347_v14 = vld [vmem:[#allocation5 + $0x9b0] sm:$0xf0] }
 0x13c   :  { %v11062_v29 = vld [vmem:[#allocation5 + $0xb6c] sm:$0xf0]  ;;  %v11066_v15 = vld [vmem:[#allocation5 + $0xb94] sm:$0xf] }
 0x13d   :  { %v8570_v40 = vor.u32 %v11062_v29, %v8569_v27  ;;  %v8281_v44 = vld [vmem:[#allocation5 + $0x910] sm:$0xf]  ;;  %2827 = vmatpush.bf16.msrb.mxu0 %v8314_v39  ;;  %2853 = vmatpush.bf16.msrb.mxu2 %v7294_v41  ;;  %v2589_v29 = vpop.f32.mrf.mxu1  ;;  %v10770_v39 = vld [vmem:[#allocation5 + $0x254] sm:$0xf] }
 0x13e   :  { %v10990_v45 = vld [vmem:[#allocation5 + $0x92c] sm:$0xf0]  ;;  %v8603_v16 = vld [vmem:[#allocation5 + $0xbb0] sm:$0xf0] }
 0x13f   :  { %v8537_v46 = vld [vmem:[#allocation5 + $0xb10] sm:$0xf]  ;;  %v8282_v53 = vor.u32 %v10990_v45, %v8281_v44  ;;  %2840 = vmatpush.bf16.msrb.mxu1 %v8570_v40  ;;  %2866 = vmatpush.bf16.msrb.mxu3 %v7550_v47  ;;  %v7419_v40 = vld [vmem:[#allocation5 + $0x270] sm:$0xf0]  ;;  %v7166_v47 = vor.u32 %v10706_v36, %v7163_v38  ;;  %v2602_v51 = vpop.f32.mrf.mxu2 }
 0x140   :  { %v11054_v48 = vld [vmem:[#allocation5 + $0xb2c] sm:$0xf0]  ;;  %v7422_v52 = vor.u32 %v10770_v39, %v7419_v40  ;;  %v7803_v23 = vld [vmem:[#allocation5 + $0x570] sm:$0xf0] }
 0x141   :  { %v8538_v55 = vor.u32 %v11054_v48, %v8537_v46  ;;  %v8249_v57 = vld [vmem:[#allocation5 + $0x8d0] sm:$0xf]  ;;  %2828 = vmatpush.bf16.msrb.mxu0 %v8282_v53  ;;  %2854 = vmatpush.bf16.msrb.mxu2 %v7262_v56  ;;  %v7131_v53 = vld [vmem:[#allocation5 + $0x30] sm:$0xf0]  ;;  %v2615_v56 = vpop.f32.mrf.mxu3 }
 0x142   :  { %v10982_v58 = vld [vmem:[#allocation5 + $0x8ec] sm:$0xf0]  ;;  %v7134_v1 = vor.u32 %v10698_v50, %v7131_v53  ;;  %v11058_v29 = vld [vmem:[#allocation5 + $0xb54] sm:$0xf] }
 0x143   :  { %v8505_v59 = vld [vmem:[#allocation5 + $0xad0] sm:$0xf]  ;;  %v8250_v6 = vor.u32 %v10982_v58, %v8249_v57  ;;  %2841 = vmatpush.bf16.msrb.mxu1 %v8538_v55  ;;  %2867 = vmatpush.bf16.msrb.mxu3 %v7518_v62  ;;  %v7387_v55 = vld [vmem:[#allocation5 + $0x230] sm:$0xf0] }
 0x144   :  { %v11046_v63 = vld [vmem:[#allocation5 + $0xaec] sm:$0xf0]  ;;  %v10882_v57 = vld [vmem:[#allocation5 + $0x5d4] sm:$0xf]  ;;  %v7390_v4 = vor.u32 %v10762_v54, %v7387_v55 }
 0x145   :  { %v8506_v7 = vor.u32 %v11046_v63, %v8505_v59  ;;  %v8217_v9 = vld [vmem:[#allocation5 + $0x890] sm:$0xf]  ;;  %2829 = vmatpush.bf16.msrb.mxu0 %v8250_v6  ;;  %2855 = vmatpush.bf16.msrb.mxu2 %v7230_v8  ;;  %v7867_v58 = vld [vmem:[#allocation5 + $0x5f0] sm:$0xf0] }
 0x146   :  { %v10974_v10 = vld [vmem:[#allocation5 + $0x8ac] sm:$0xf0]  ;;  %v10946_v59 = vld [vmem:[#allocation5 + $0x7d4] sm:$0xf]  ;;  %v7870_v6 = vor.u32 %v10882_v57, %v7867_v58 }
 0x147   :  { %v8473_v11 = vld [vmem:[#allocation5 + $0xa90] sm:$0xf]  ;;  %v8218_v21 = vor.u32 %v10974_v10, %v8217_v9  ;;  %2842 = vmatpush.bf16.msrb.mxu1 %v8506_v7  ;;  %2868 = vmatpush.bf16.msrb.mxu3 %v7486_v32  ;;  %v11010_v62 = vld [vmem:[#allocation5 + $0x9d4] sm:$0xf]  ;;  %v8126_v7 = vor.u32 %v10946_v59, %v8123_v61  ;;  %v2639_v59 = vpop.f32.mrf.mxu1 }
 0x148   :  { %v11038_v13 = vld [vmem:[#allocation5 + $0xaac] sm:$0xf0]  ;;  %v8379_v63 = vld [vmem:[#allocation5 + $0x9f0] sm:$0xf0] }
 0x149   :  { %v8474_v24 = vor.u32 %v11038_v13, %v8473_v11  ;;  %v8185_v26 = vld [vmem:[#allocation5 + $0x850] sm:$0xf]  ;;  %2830 = vmatpush.bf16.msrb.mxu0 %v8218_v21  ;;  %2856 = vmatpush.bf16.msrb.mxu2 %v7198_v25  ;;  %v8382_v8 = vor.u32 %v11010_v62, %v8379_v63  ;;  %v10874_v9 = vld [vmem:[#allocation5 + $0x594] sm:$0xf]  ;;  %v8606_v25 = vor.u32 %v11066_v15, %v8603_v16 }
 0x14a   :  { %v10966_v27 = vld [vmem:[#allocation5 + $0x86c] sm:$0xf0]  ;;  %v7835_v10 = vld [vmem:[#allocation5 + $0x5b0] sm:$0xf0] }
 0x14b   :  { %v8441_v28 = vld [vmem:[#allocation5 + $0xa50] sm:$0xf]  ;;  %v8186_v41 = vor.u32 %v10966_v27, %v8185_v26  ;;  %2843 = vmatpush.bf16.msrb.mxu1 %v8474_v24  ;;  %2869 = vmatpush.bf16.msrb.mxu3 %v7454_v30  ;;  %v10938_v11 = vld [vmem:[#allocation5 + $0x794] sm:$0xf]  ;;  %v7838_v17 = vor.u32 %v10874_v9, %v7835_v10 }
 0x14c   :  { %v11030_v31 = vld [vmem:[#allocation5 + $0xa6c] sm:$0xf0]  ;;  %v8091_v32 = vld [vmem:[#allocation5 + $0x7b0] sm:$0xf0] }
 0x14d   :  { %v8153_v44 = vld [vmem:[#allocation5 + $0x810] sm:$0xf]  ;;  %v8442_v46 = vor.u32 %v11030_v31, %v8441_v28  ;;  %2831 = vmatpush.bf16.msrb.mxu0 %v8186_v41  ;;  %2857 = vmatpush.bf16.msrb.mxu2 %v7166_v47  ;;  %v11002_v13 = vld [vmem:[#allocation5 + $0x994] sm:$0xf]  ;;  %v8094_v18 = vor.u32 %v10938_v11, %v8091_v32 }
 0x14e   :  { %v10958_v45 = vld [vmem:[#allocation5 + $0x82c] sm:$0xf0]  ;;  %v8350_v20 = vor.u32 %v11002_v13, %v8347_v14  ;;  %v10866_v21 = vld [vmem:[#allocation5 + $0x554] sm:$0xf] }
 0x14f   :  { %v8409_v48 = vld [vmem:[#allocation5 + $0xa10] sm:$0xf]  ;;  %v8154_v60 = vor.u32 %v10958_v45, %v8153_v44  ;;  %2844 = vmatpush.bf16.msrb.mxu1 %v8442_v46  ;;  %2870 = vmatpush.bf16.msrb.mxu3 %v7422_v52  ;;  %v10930_v24 = vld [vmem:[#allocation5 + $0x754] sm:$0xf]  ;;  %v7806_v31 = vor.u32 %v10866_v21, %v7803_v23  ;;  %v527_v44 = vperm.slane %v11864_v19, 2  ;;  %v2626_v52 = vpop.f32.mrf.mxu0  ;;  %v2652_v9 = vpop.f32.mrf.mxu2 }
 0x150   :  { %v11022_v49 = vld [vmem:[#allocation5 + $0xa2c] sm:$0xf0]  ;;  %v8059_v26 = vld [vmem:[#allocation5 + $0x770] sm:$0xf0] }
 0x151   :  { %v8410_v0 = vor.u32 %v11022_v49, %v8409_v48  ;;  %2832 = vmatpush.bf16.msrb.mxu0 %v8154_v60  ;;  %2858 = vmatpush.bf16.msrb.mxu2 %v7134_v1  ;;  %v10994_v27 = vld [vmem:[#allocation5 + $0x954] sm:$0xf]  ;;  %v8062_v38 = vor.u32 %v10930_v24, %v8059_v26  ;;  %v2627_v58 = vadd.f32 %v2626_v52, %v527_v44  ;;  %v2665_v14 = vpop.f32.mrf.mxu3 }
 0x152   :  { %v8315_v28 = vld [vmem:[#allocation5 + $0x970] sm:$0xf0] }
 0x153   :  { %2845 = vmatpush.bf16.msrb.mxu1 %v8410_v0  ;;  %2871 = vmatpush.bf16.msrb.mxu3 %v7390_v4  ;;  %v8571_v30 = vld [vmem:[#allocation5 + $0xb70] sm:$0xf0]  ;;  %v8318_v39 = vor.u32 %v10994_v27, %v8315_v28  ;;  %v2640_v1 = vadd.f32 %v2639_v59, %v2627_v58  ;;  %v2641_v27 = vpop.f32.mrf.mxu1  ;;  %v10823_v59 = vld [vmem:[#allocation5 + $0x3f4] sm:$0xf0] }
 0x154   :  { %2833 = vmatmul.bf16.vlgmr.msrb.gmra.mxu0 %v11844_v33  ;;  %2859 = vmatmul.bf16.vlgmr.msrb.gmra.mxu2 %v11834_v35  ;;  %v10858_v36 = vld [vmem:[#allocation5 + $0x514] sm:$0xf]  ;;  %v8574_v45 = vor.u32 %v11058_v29, %v8571_v30  ;;  %v8065_v27 = vld [vmem:[#allocation5 + $0x758] sm:$0xf] }
 0x155   :  { %2877 = vmatpush.bf16.msra.mxu0 %v7870_v6  ;;  %2903 = vmatpush.bf16.msra.mxu2 %v8382_v8  ;;  %v7771_v40 = vld [vmem:[#allocation5 + $0x530] sm:$0xf0]  ;;  %v2653_v13 = vadd.f32 %v2652_v9, %v2640_v1 }
 0x156   :  { %2846 = vmatmul.bf16.vlgmr.msrb.gmra.mxu1 %v11846_v37  ;;  %2872 = vmatmul.bf16.vlgmr.msrb.gmra.mxu3 %v11838_v43  ;;  %v10922_v41 = vld [vmem:[#allocation5 + $0x714] sm:$0xf]  ;;  %v7774_v51 = vor.u32 %v10858_v36, %v7771_v40 }
 0x157   :  { %2890 = vmatpush.bf16.msra.mxu1 %v8126_v7  ;;  %2916 = vmatpush.bf16.msra.mxu3 %v8638_v12  ;;  %v8027_v46 = vld [vmem:[#allocation5 + $0x730] sm:$0xf0] }
 0x158   :  { %v10986_v47 = vld [vmem:[#allocation5 + $0x914] sm:$0xf]  ;;  %v8030_v53 = vor.u32 %v10922_v41, %v8027_v46 }
 0x159   :  { %2878 = vmatpush.bf16.msra.mxu0 %v7838_v17  ;;  %2904 = vmatpush.bf16.msra.mxu2 %v8350_v20  ;;  %v8283_v48 = vld [vmem:[#allocation5 + $0x930] sm:$0xf0]  ;;  %v2628_v20 = vpop.f32.mrf.mxu0 }
 0x15a   :  { %v11050_v49 = vld [vmem:[#allocation5 + $0xb14] sm:$0xf]  ;;  %v8286_v54 = vor.u32 %v10986_v47, %v8283_v48  ;;  %v10743_v20 = vld [vmem:[#allocation5 + $0x174] sm:$0xf0] }
 0x15b   :  { %2891 = vmatpush.bf16.msra.mxu1 %v8094_v18  ;;  %2917 = vmatpush.bf16.msra.mxu3 %v8606_v25  ;;  %v8539_v50 = vld [vmem:[#allocation5 + $0xb30] sm:$0xf0]  ;;  %v11888_v18 = vadd.f32 %v2665_v14, %v2653_v13  ;;  %v10943_v13 = vld [vmem:[#allocation5 + $0x7b4] sm:$0xf0] }
 0x15c   :  { %v10850_v55 = vld [vmem:[#allocation5 + $0x4d4] sm:$0xf]  ;;  %v8542_v19 = vor.u32 %v11050_v49, %v8539_v50  ;;  %v2654_v49 = vpop.f32.mrf.mxu2 }
 0x15d   :  { %2879 = vmatpush.bf16.msra.mxu0 %v7806_v31  ;;  %2905 = vmatpush.bf16.msra.mxu2 %v8318_v39  ;;  %v7739_v56 = vld [vmem:[#allocation5 + $0x4f0] sm:$0xf0] }
 0x15e   :  { %v10914_v57 = vld [vmem:[#allocation5 + $0x6d4] sm:$0xf]  ;;  %v7742_v2 = vor.u32 %v10850_v55, %v7739_v56  ;;  %v7361_v55 = vld [vmem:[#allocation5 + $0x1d8] sm:$0xf] }
 0x15f   :  { %2892 = vmatpush.bf16.msra.mxu1 %v8062_v38  ;;  %2918 = vmatpush.bf16.msra.mxu3 %v8574_v45  ;;  %v7995_v60 = vld [vmem:[#allocation5 + $0x6f0] sm:$0xf0]  ;;  %v10759_v56 = vld [vmem:[#allocation5 + $0x1f4] sm:$0xf0] }
 0x160   :  { %v10978_v61 = vld [vmem:[#allocation5 + $0x8d4] sm:$0xf]  ;;  %v7998_v3 = vor.u32 %v10914_v57, %v7995_v60  ;;  %v7617_v57 = vld [vmem:[#allocation5 + $0x3d8] sm:$0xf] }
 0x161   :  { %v8251_v62 = vld [vmem:[#allocation5 + $0x8f0] sm:$0xf0]  ;;  %2880 = vmatpush.bf16.msra.mxu0 %v7774_v51  ;;  %2906 = vmatpush.bf16.msra.mxu2 %v8286_v54  ;;  %v2667_v54 = vpop.f32.mrf.mxu3  ;;  %v10887_v60 = vld [vmem:[#allocation5 + $0x5f4] sm:$0xf0] }
 0x162   :  { %v11042_v63 = vld [vmem:[#allocation5 + $0xad4] sm:$0xf]  ;;  %v8254_v4 = vor.u32 %v10978_v61, %v8251_v62  ;;  %v7233_v54 = vld [vmem:[#allocation5 + $0xd8] sm:$0xf] }
 0x163   :  { %v8507_v0 = vld [vmem:[#allocation5 + $0xaf0] sm:$0xf0]  ;;  %2893 = vmatpush.bf16.msra.mxu1 %v8030_v53  ;;  %2919 = vmatpush.bf16.msra.mxu3 %v8542_v19  ;;  %v7873_v19 = vld [vmem:[#allocation5 + $0x5d8] sm:$0xf] }
 0x164   :  { %v10842_v6 = vld [vmem:[#allocation5 + $0x494] sm:$0xf]  ;;  %v8510_v10 = vor.u32 %v11042_v63, %v8507_v0  ;;  %v8129_v63 = vld [vmem:[#allocation5 + $0x7d8] sm:$0xf] }
 0x165   :  { %v7707_v7 = vld [vmem:[#allocation5 + $0x4b0] sm:$0xf0]  ;;  %2881 = vmatpush.bf16.msra.mxu0 %v7742_v2  ;;  %2907 = vmatpush.bf16.msra.mxu2 %v8254_v4  ;;  %v10951_v0 = vld [vmem:[#allocation5 + $0x7f4] sm:$0xf0]  ;;  %v7362_v2 = vor.u32 %v10759_v56, %v7361_v55  ;;  %v7874_v4 = vor.u32 %v10887_v60, %v7873_v19 }
 0x166   :  { %v10906_v8 = vld [vmem:[#allocation5 + $0x694] sm:$0xf]  ;;  %v7710_v17 = vor.u32 %v10842_v6, %v7707_v7  ;;  %v7329_v6 = vld [vmem:[#allocation5 + $0x198] sm:$0xf]  ;;  %v8130_v9 = vor.u32 %v10951_v0, %v8129_v63  ;;  %v11897_v63 = vld [vmem:[#allocation7] sm:$0xff] }
 0x167   :  { %v7963_v11 = vld [vmem:[#allocation5 + $0x6b0] sm:$0xf0]  ;;  %2894 = vmatpush.bf16.msra.mxu1 %v7998_v3  ;;  %2920 = vmatpush.bf16.msra.mxu3 %v8510_v10  ;;  %v7618_v3 = vor.u32 %v10823_v59, %v7617_v57  ;;  %v10751_v7 = vld [vmem:[#allocation5 + $0x1b4] sm:$0xf0] }
 0x168   :  { %v10970_v12 = vld [vmem:[#allocation5 + $0x894] sm:$0xf]  ;;  %v7966_v21 = vor.u32 %v10906_v8, %v7963_v11  ;;  %v7585_v8 = vld [vmem:[#allocation5 + $0x398] sm:$0xf]  ;;  %v7330_v14 = vor.u32 %v10751_v7, %v7329_v6 }
 0x169   :  { %v8219_v32 = vld [vmem:[#allocation5 + $0x8b0] sm:$0xf0]  ;;  %2882 = vmatpush.bf16.msra.mxu0 %v7710_v17  ;;  %v10815_v10 = vld [vmem:[#allocation5 + $0x3b4] sm:$0xf0] }
 0x16a   :  { %v11034_v15 = vld [vmem:[#allocation5 + $0xa94] sm:$0xf]  ;;  %v8222_v23 = vor.u32 %v10970_v12, %v8219_v32  ;;  %v7841_v11 = vld [vmem:[#allocation5 + $0x598] sm:$0xf] }
 0x16b   :  { %v8475_v16 = vld [vmem:[#allocation5 + $0xab0] sm:$0xf0]  ;;  %2895 = vmatpush.bf16.msra.mxu1 %v7966_v21  ;;  %v10879_v12 = vld [vmem:[#allocation5 + $0x5b4] sm:$0xf0] }
 0x16c   :  { %v10834_v24 = vld [vmem:[#allocation5 + $0x454] sm:$0xf]  ;;  %v8478_v28 = vor.u32 %v11034_v15, %v8475_v16  ;;  %2908 = vmatpush.bf16.msra.mxu2 %v8222_v23  ;;  %v8097_v32 = vld [vmem:[#allocation5 + $0x798] sm:$0xf]  ;;  %v7586_v15 = vor.u32 %v10815_v10, %v7585_v8  ;;  %v7842_v16 = vor.u32 %v10879_v12, %v7841_v11 }
 0x16d   :  { %v7675_v25 = vld [vmem:[#allocation5 + $0x470] sm:$0xf0]  ;;  %v7297_v17 = vld [vmem:[#allocation5 + $0x158] sm:$0xf]  ;;  %v8098_v23 = vor.u32 %v10943_v13, %v8097_v32 }
 0x16e   :  { %v10898_v26 = vld [vmem:[#allocation5 + $0x654] sm:$0xf]  ;;  %v7678_v39 = vor.u32 %v10834_v24, %v7675_v25  ;;  %2921 = vmatpush.bf16.msra.mxu3 %v8478_v28  ;;  %v7553_v21 = vld [vmem:[#allocation5 + $0x358] sm:$0xf] }
 0x16f   :  { %v7931_v29 = vld [vmem:[#allocation5 + $0x670] sm:$0xf0]  ;;  %v10807_v24 = vld [vmem:[#allocation5 + $0x374] sm:$0xf0]  ;;  %v2704_v11 = vpop.f32.mrf.mxu2 }
 0x170   :  { %v10962_v30 = vld [vmem:[#allocation5 + $0x854] sm:$0xf]  ;;  %v7934_v44 = vor.u32 %v10898_v26, %v7931_v29  ;;  %2883 = vmatpush.bf16.msra.mxu0 %v7678_v39  ;;  %v7809_v25 = vld [vmem:[#allocation5 + $0x558] sm:$0xf]  ;;  %v7298_v29 = vor.u32 %v10743_v20, %v7297_v17 }
 0x171   :  { %v8187_v31 = vld [vmem:[#allocation5 + $0x870] sm:$0xf0]  ;;  %v10871_v26 = vld [vmem:[#allocation5 + $0x574] sm:$0xf0] }
 0x172   :  { %v11026_v36 = vld [vmem:[#allocation5 + $0xa54] sm:$0xf]  ;;  %v8190_v45 = vor.u32 %v10962_v30, %v8187_v31  ;;  %2896 = vmatpush.bf16.msra.mxu1 %v7934_v44  ;;  %v10935_v28 = vld [vmem:[#allocation5 + $0x774] sm:$0xf0]  ;;  %v7554_v30 = vor.u32 %v10807_v24, %v7553_v21  ;;  %v7810_v31 = vor.u32 %v10871_v26, %v7809_v25 }
 0x173   :  { %v8443_v38 = vld [vmem:[#allocation5 + $0xa70] sm:$0xf0]  ;;  %v7521_v39 = vld [vmem:[#allocation5 + $0x318] sm:$0xf] }
 0x174   :  { %v10826_v40 = vld [vmem:[#allocation5 + $0x414] sm:$0xf]  ;;  %v8446_v50 = vor.u32 %v11026_v36, %v8443_v38  ;;  %2909 = vmatpush.bf16.msra.mxu2 %v8190_v45  ;;  %v7265_v36 = vld [vmem:[#allocation5 + $0x118] sm:$0xf] }
 0x175   :  { %v7643_v41 = vld [vmem:[#allocation5 + $0x430] sm:$0xf0]  ;;  %v10735_v38 = vld [vmem:[#allocation5 + $0x134] sm:$0xf0] }
 0x176   :  { %v10890_v46 = vld [vmem:[#allocation5 + $0x614] sm:$0xf]  ;;  %v7646_v58 = vor.u32 %v10826_v40, %v7643_v41  ;;  %2922 = vmatpush.bf16.msra.mxu3 %v8446_v50  ;;  %v8066_v40 = vor.u32 %v10935_v28, %v8065_v27  ;;  %v10799_v41 = vld [vmem:[#allocation5 + $0x334] sm:$0xf0]  ;;  %v7266_v49 = vor.u32 %v10735_v38, %v7265_v36 }
 0x177   :  { %v7899_v47 = vld [vmem:[#allocation5 + $0x630] sm:$0xf0]  ;;  %v7777_v44 = vld [vmem:[#allocation5 + $0x518] sm:$0xf] }
 0x178   :  { %v10954_v48 = vld [vmem:[#allocation5 + $0x814] sm:$0xf]  ;;  %v7902_v61 = vor.u32 %v10890_v46, %v7899_v47  ;;  %2884 = vmatpush.bf16.msra.mxu0 %v7646_v58  ;;  %v10863_v45 = vld [vmem:[#allocation5 + $0x534] sm:$0xf0] }
 0x179   :  { %v8155_v51 = vld [vmem:[#allocation5 + $0x830] sm:$0xf0]  ;;  %v8033_v46 = vld [vmem:[#allocation5 + $0x718] sm:$0xf] }
 0x17a   :  { %v11018_v52 = vld [vmem:[#allocation5 + $0xa14] sm:$0xf]  ;;  %v8158_v62 = vor.u32 %v10954_v48, %v8155_v51  ;;  %2897 = vmatpush.bf16.msra.mxu1 %v7902_v61  ;;  %v10927_v47 = vld [vmem:[#allocation5 + $0x734] sm:$0xf0]  ;;  %v2678_v48 = vpop.f32.mrf.mxu0  ;;  %v2691_v51 = vpop.f32.mrf.mxu1 }
 0x17b   :  { %v8411_v53 = vld [vmem:[#allocation5 + $0xa30] sm:$0xf0]  ;;  %2885 = vmatmul.bf16.vlgmr.msra.gmra.mxu0 %v11832_v34  ;;  %v2679_v50 = vadd.f32 %v2678_v48, %v11888_v18  ;;  %v10727_v55 = vld [vmem:[#allocation5 + $0xf4] sm:$0xf0]  ;;  %v8034_v57 = vor.u32 %v10927_v47, %v8033_v46  ;;  %v528_v18 = vperm.slane %v11897_v63, 3 }
 0x17c   :  { %v8414_v1 = vor.u32 %v11018_v52, %v8411_v53  ;;  %2910 = vmatpush.bf16.msra.mxu2 %v8158_v62  ;;  %2929 = vmatpush.bf16.msrb.mxu0 %v7362_v2  ;;  %v7522_v52 = vor.u32 %v10799_v41, %v7521_v39  ;;  %v7778_v53 = vor.u32 %v10863_v45, %v7777_v44  ;;  %v7489_v56 = vld [vmem:[#allocation5 + $0x2d8] sm:$0xf] }
 0x17d   :  { %2898 = vmatmul.bf16.vlgmr.msra.gmra.mxu1 %v11836_v42  ;;  %v10791_v58 = vld [vmem:[#allocation5 + $0x2f4] sm:$0xf0]  ;;  %v11895_v60 = vadd.f32 %v2691_v51, %v2679_v50  ;;  %v7234_v0 = vor.u32 %v10727_v55, %v7233_v54  ;;  %v2705_v13 = vadd.f32 %v2704_v11, %v528_v18  ;;  %v10819_v18 = vld [vmem:[#allocation5 + $0x3dc] sm:$0xf] }
 0x17e   :  { %2923 = vmatpush.bf16.msra.mxu3 %v8414_v1  ;;  %2942 = vmatpush.bf16.msrb.mxu1 %v7618_v3  ;;  %v7745_v59 = vld [vmem:[#allocation5 + $0x4d8] sm:$0xf]  ;;  %v7490_v1 = vor.u32 %v10791_v58, %v7489_v56  ;;  %v10747_v11 = vld [vmem:[#allocation5 + $0x19c] sm:$0xf] }
 0x17f   :  { %2911 = vmatmul.bf16.vlgmr.msra.gmra.mxu2 %v11844_v33  ;;  %v10855_v19 = vld [vmem:[#allocation5 + $0x4f4] sm:$0xf0] }
 0x180   :  { %2955 = vmatpush.bf16.msrb.mxu2 %v7874_v4  ;;  %2930 = vmatpush.bf16.msrb.mxu0 %v7330_v14  ;;  %v8001_v61 = vld [vmem:[#allocation5 + $0x6d8] sm:$0xf]  ;;  %v7746_v2 = vor.u32 %v10855_v19, %v7745_v59  ;;  %v2717_v14 = vpop.f32.mrf.mxu3  ;;  %v10755_v59 = vld [vmem:[#allocation5 + $0x1dc] sm:$0xf] }
 0x181   :  { %2924 = vmatmul.bf16.vlgmr.msra.gmra.mxu3 %v11846_v37  ;;  %v10919_v62 = vld [vmem:[#allocation5 + $0x6f4] sm:$0xf0]  ;;  %v11900_v26 = vadd.f32 %v2717_v14, %v2705_v13  ;;  %v7363_v19 = vld [vmem:[#allocation5 + $0x1f8] sm:$0xf0] }
 0x182   :  { %2968 = vmatpush.bf16.msrb.mxu3 %v8130_v9  ;;  %2943 = vmatpush.bf16.msrb.mxu1 %v7586_v15  ;;  %v7201_v3 = vld [vmem:[#allocation5 + $0x98] sm:$0xf]  ;;  %v8002_v7 = vor.u32 %v10919_v62, %v8001_v61  ;;  %v2680_v15 = vpop.f32.mrf.mxu0  ;;  %v2693_v17 = vpop.f32.mrf.mxu1  ;;  %v7587_v13 = vld [vmem:[#allocation5 + $0x3b8] sm:$0xf0] }
 0x183   :  { %v10719_v4 = vld [vmem:[#allocation5 + $0xb4] sm:$0xf0] }
 0x184   :  { %2956 = vmatpush.bf16.msrb.mxu2 %v7842_v16  ;;  %2931 = vmatpush.bf16.msrb.mxu0 %v7298_v29  ;;  %v7457_v6 = vld [vmem:[#allocation5 + $0x298] sm:$0xf]  ;;  %v7202_v16 = vor.u32 %v10719_v4, %v7201_v3  ;;  %v7366_v4 = vor.u32 %v10755_v59, %v7363_v19  ;;  %v10723_v19 = vld [vmem:[#allocation5 + $0xdc] sm:$0xf] }
 0x185   :  { %v10783_v8 = vld [vmem:[#allocation5 + $0x2b4] sm:$0xf0] }
 0x186   :  { %2969 = vmatpush.bf16.msrb.mxu3 %v8098_v23  ;;  %2944 = vmatpush.bf16.msrb.mxu1 %v7554_v30  ;;  %v7713_v9 = vld [vmem:[#allocation5 + $0x498] sm:$0xf]  ;;  %v7458_v20 = vor.u32 %v10783_v8, %v7457_v6 }
 0x187   :  { %v10847_v10 = vld [vmem:[#allocation5 + $0x4b4] sm:$0xf0] }
 0x188   :  { %2957 = vmatpush.bf16.msrb.mxu2 %v7810_v31  ;;  %2932 = vmatpush.bf16.msrb.mxu0 %v7266_v49  ;;  %v7969_v12 = vld [vmem:[#allocation5 + $0x698] sm:$0xf]  ;;  %v7714_v21 = vor.u32 %v10847_v10, %v7713_v9  ;;  %v2719_v56 = vpop.f32.mrf.mxu3 }
 0x189   :  { %v10911_v32 = vld [vmem:[#allocation5 + $0x6b4] sm:$0xf0] }
 0x18a   :  { %2970 = vmatpush.bf16.msrb.mxu3 %v8066_v40  ;;  %2945 = vmatpush.bf16.msrb.mxu1 %v7522_v52  ;;  %v7169_v23 = vld [vmem:[#allocation5 + $0x58] sm:$0xf]  ;;  %v7970_v27 = vor.u32 %v10911_v32, %v7969_v12  ;;  %v2706_v52 = vpop.f32.mrf.mxu2  ;;  %v7331_v12 = vld [vmem:[#allocation5 + $0x1b8] sm:$0xf0] }
 0x18b   :  { %v10711_v24 = vld [vmem:[#allocation5 + $0x74] sm:$0xf0]  ;;  %v10811_v32 = vld [vmem:[#allocation5 + $0x39c] sm:$0xf] }
 0x18c   :  { %2958 = vmatpush.bf16.msrb.mxu2 %v7778_v53  ;;  %2933 = vmatpush.bf16.msrb.mxu0 %v7234_v0  ;;  %v7425_v25 = vld [vmem:[#allocation5 + $0x258] sm:$0xf]  ;;  %v7170_v38 = vor.u32 %v10711_v24, %v7169_v23  ;;  %v7619_v0 = vld [vmem:[#allocation5 + $0x3f8] sm:$0xf0]  ;;  %v7590_v23 = vor.u32 %v10811_v32, %v7587_v13 }
 0x18d   :  { %v10775_v28 = vld [vmem:[#allocation5 + $0x274] sm:$0xf0]  ;;  %v7622_v9 = vor.u32 %v10819_v18, %v7619_v0  ;;  %v7491_v18 = vld [vmem:[#allocation5 + $0x2f8] sm:$0xf0] }
 0x18e   :  { %2971 = vmatpush.bf16.msrb.mxu3 %v8034_v57  ;;  %2946 = vmatpush.bf16.msrb.mxu1 %v7490_v1  ;;  %v7681_v29 = vld [vmem:[#allocation5 + $0x458] sm:$0xf]  ;;  %v7426_v41 = vor.u32 %v10775_v28, %v7425_v25  ;;  %v10739_v25 = vld [vmem:[#allocation5 + $0x15c] sm:$0xf] }
 0x18f   :  { %v10839_v30 = vld [vmem:[#allocation5 + $0x474] sm:$0xf0]  ;;  %v10803_v28 = vld [vmem:[#allocation5 + $0x35c] sm:$0xf] }
 0x190   :  { %2959 = vmatpush.bf16.msrb.mxu2 %v7746_v2  ;;  %v7937_v31 = vld [vmem:[#allocation5 + $0x658] sm:$0xf]  ;;  %2934 = vmatpush.bf16.msrb.mxu0 %v7202_v16  ;;  %v7682_v44 = vor.u32 %v10839_v30, %v7681_v29  ;;  %v7334_v16 = vor.u32 %v10747_v11, %v7331_v12  ;;  %v7555_v29 = vld [vmem:[#allocation5 + $0x378] sm:$0xf0] }
 0x191   :  { %v10903_v36 = vld [vmem:[#allocation5 + $0x674] sm:$0xf0]  ;;  %v7203_v11 = vld [vmem:[#allocation5 + $0xb8] sm:$0xf0] }
 0x192   :  { %2972 = vmatpush.bf16.msrb.mxu3 %v8002_v7  ;;  %v7137_v39 = vld [vmem:[#allocation5 + $0x18] sm:$0xf]  ;;  %2947 = vmatpush.bf16.msrb.mxu1 %v7458_v20  ;;  %v7938_v48 = vor.u32 %v10903_v36, %v7937_v31  ;;  %v10779_v13 = vld [vmem:[#allocation5 + $0x29c] sm:$0xf] }
 0x193   :  { %v10703_v40 = vld [vmem:[#allocation5 + $0x34] sm:$0xf0] }
 0x194   :  { %2960 = vmatpush.bf16.msrb.mxu2 %v7714_v21  ;;  %v7393_v45 = vld [vmem:[#allocation5 + $0x218] sm:$0xf]  ;;  %2935 = vmatpush.bf16.msrb.mxu0 %v7170_v38  ;;  %v7138_v57 = vor.u32 %v10703_v40, %v7137_v39 }
 0x195   :  { %v10767_v46 = vld [vmem:[#allocation5 + $0x234] sm:$0xf0] }
 0x196   :  { %v7649_v47 = vld [vmem:[#allocation5 + $0x418] sm:$0xf]  ;;  %2973 = vmatpush.bf16.msrb.mxu3 %v7970_v27  ;;  %2948 = vmatpush.bf16.msrb.mxu1 %v7426_v41  ;;  %v7394_v61 = vor.u32 %v10767_v46, %v7393_v45  ;;  %v7299_v27 = vld [vmem:[#allocation5 + $0x178] sm:$0xf0]  ;;  %v7558_v41 = vor.u32 %v10803_v28, %v7555_v29 }
 0x197   :  { %v10831_v49 = vld [vmem:[#allocation5 + $0x434] sm:$0xf0]  ;;  %v7302_v36 = vor.u32 %v10739_v25, %v7299_v27  ;;  %v10731_v45 = vld [vmem:[#allocation5 + $0x11c] sm:$0xf] }
 0x198   :  { %v7905_v50 = vld [vmem:[#allocation5 + $0x618] sm:$0xf]  ;;  %2961 = vmatpush.bf16.msrb.mxu2 %v7682_v44  ;;  %v7650_v62 = vor.u32 %v10831_v49, %v7649_v47  ;;  %2936 = vmatpush.bf16.msrb.mxu0 %v7138_v57  ;;  %v7267_v46 = vld [vmem:[#allocation5 + $0x138] sm:$0xf0]  ;;  %v2743_v57 = vpop.f32.mrf.mxu1  ;;  %v2769_v32 = vpop.f32.mrf.mxu3 }
 0x199   :  { %v10895_v51 = vld [vmem:[#allocation5 + $0x634] sm:$0xf0]  ;;  %v10795_v47 = vld [vmem:[#allocation5 + $0x31c] sm:$0xf]  ;;  %v7270_v52 = vor.u32 %v10731_v45, %v7267_v46 }
 0x19a   :  { %v8385_v53 = vld [vmem:[#allocation5 + $0x9d8] sm:$0xf]  ;;  %2974 = vmatpush.bf16.msrb.mxu3 %v7938_v48  ;;  %v7906_v1 = vor.u32 %v10895_v51, %v7905_v50  ;;  %2949 = vmatpush.bf16.msrb.mxu1 %v7394_v61  ;;  %v7523_v48 = vld [vmem:[#allocation5 + $0x338] sm:$0xf0]  ;;  %v2730_v50 = vpop.f32.mrf.mxu0 }
 0x19b   :  { %v11015_v54 = vld [vmem:[#allocation5 + $0x9f4] sm:$0xf0]  ;;  %2937 = vmatmul.bf16.vlgmr.msrb.gmra.mxu0 %v11834_v35  ;;  %v2731_v56 = vadd.f32 %v2730_v50, %v11900_v26  ;;  %v7235_v61 = vld [vmem:[#allocation5 + $0xf8] sm:$0xf0] }
 0x19c   :  { %v8641_v55 = vld [vmem:[#allocation5 + $0xbd8] sm:$0xf]  ;;  %v8386_v2 = vor.u32 %v11015_v54, %v8385_v53  ;;  %2962 = vmatpush.bf16.msrb.mxu2 %v7650_v62  ;;  %v10787_v62 = vld [vmem:[#allocation5 + $0x2dc] sm:$0xf] }
 0x19d   :  { %v11079_v58 = vld [vmem:[#allocation5 + $0xbf4] sm:$0xf0]  ;;  %2950 = vmatmul.bf16.vlgmr.msrb.gmra.mxu1 %v11838_v43  ;;  %v2744_v0 = vadd.f32 %v2743_v57, %v2731_v56  ;;  %v7494_v26 = vor.u32 %v10787_v62, %v7491_v18  ;;  %v7875_v56 = vld [vmem:[#allocation5 + $0x5f8] sm:$0xf0] }
 0x19e   :  { %v8642_v3 = vor.u32 %v11079_v58, %v8641_v55  ;;  %v8353_v6 = vld [vmem:[#allocation5 + $0x998] sm:$0xf]  ;;  %2975 = vmatpush.bf16.msrb.mxu3 %v7906_v1  ;;  %2981 = vmatpush.bf16.msra.mxu0 %v8386_v2  ;;  %v7526_v58 = vor.u32 %v10795_v47, %v7523_v48  ;;  %v10699_v48 = vld [vmem:[#allocation5 + $0x1c] sm:$0xf] }
 0x19f   :  { %v11007_v7 = vld [vmem:[#allocation5 + $0x9b4] sm:$0xf0]  ;;  %2963 = vmatmul.bf16.vlgmr.msrb.gmra.mxu2 %v11832_v34  ;;  %v10947_v57 = vld [vmem:[#allocation5 + $0x7dc] sm:$0xf] }
 0x1a0   :  { %v8609_v8 = vld [vmem:[#allocation5 + $0xb98] sm:$0xf]  ;;  %v8354_v14 = vor.u32 %v11007_v7, %v8353_v6  ;;  %2994 = vmatpush.bf16.msra.mxu1 %v8642_v3  ;;  %3007 = vmatpush.bf16.msra.mxu2 %v7366_v4  ;;  %v7238_v3 = vor.u32 %v10723_v19, %v7235_v61  ;;  %v2745_v27 = vpop.f32.mrf.mxu1  ;;  %v11011_v19 = vld [vmem:[#allocation5 + $0x9dc] sm:$0xf] }
 0x1a1   :  { %v11071_v10 = vld [vmem:[#allocation5 + $0xbb4] sm:$0xf0]  ;;  %2976 = vmatmul.bf16.vlgmr.msrb.gmra.mxu3 %v11836_v42  ;;  %v8387_v61 = vld [vmem:[#allocation5 + $0x9f8] sm:$0xf0] }
 0x1a2   :  { %v8610_v15 = vor.u32 %v11071_v10, %v8609_v8  ;;  %v8321_v17 = vld [vmem:[#allocation5 + $0x958] sm:$0xf]  ;;  %3020 = vmatpush.bf16.msra.mxu3 %v7622_v9  ;;  %2982 = vmatpush.bf16.msra.mxu0 %v8354_v14  ;;  %v2756_v8 = vpop.f32.mrf.mxu2  ;;  %v10715_v10 = vld [vmem:[#allocation5 + $0x9c] sm:$0xf] }
 0x1a3   :  { %v10999_v20 = vld [vmem:[#allocation5 + $0x974] sm:$0xf0]  ;;  %v2757_v12 = vadd.f32 %v2756_v8, %v2744_v0  ;;  %v7459_v14 = vld [vmem:[#allocation5 + $0x2b8] sm:$0xf0] }
 0x1a4   :  { %v8577_v21 = vld [vmem:[#allocation5 + $0xb58] sm:$0xf]  ;;  %v8322_v30 = vor.u32 %v10999_v20, %v8321_v17  ;;  %2995 = vmatpush.bf16.msra.mxu1 %v8610_v15  ;;  %3008 = vmatpush.bf16.msra.mxu2 %v7334_v16  ;;  %v2732_v17 = vpop.f32.mrf.mxu0  ;;  %v7462_v28 = vor.u32 %v10779_v13, %v7459_v14  ;;  %v11075_v0 = vld [vmem:[#allocation5 + $0xbdc] sm:$0xf] }
 0x1a5   :  { %v11063_v24 = vld [vmem:[#allocation5 + $0xb74] sm:$0xf0]  ;;  %v11907_v16 = vadd.f32 %v2769_v32, %v2757_v12  ;;  %v7843_v8 = vld [vmem:[#allocation5 + $0x5b8] sm:$0xf0] }
 0x1a6   :  { %v8578_v31 = vor.u32 %v11063_v24, %v8577_v21  ;;  %v8289_v38 = vld [vmem:[#allocation5 + $0x918] sm:$0xf]  ;;  %3021 = vmatpush.bf16.msra.mxu3 %v7590_v23  ;;  %2983 = vmatpush.bf16.msra.mxu0 %v8322_v30  ;;  %v7206_v21 = vor.u32 %v10715_v10, %v7203_v11  ;;  %v10707_v30 = vld [vmem:[#allocation5 + $0x5c] sm:$0xf] }
 0x1a7   :  { %v10991_v39 = vld [vmem:[#allocation5 + $0x934] sm:$0xf0]  ;;  %v8099_v10 = vld [vmem:[#allocation5 + $0x7b8] sm:$0xf0] }
 0x1a8   :  { %v8545_v40 = vld [vmem:[#allocation5 + $0xb18] sm:$0xf]  ;;  %v8290_v49 = vor.u32 %v10991_v39, %v8289_v38  ;;  %2996 = vmatpush.bf16.msra.mxu1 %v8578_v31  ;;  %3009 = vmatpush.bf16.msra.mxu2 %v7302_v36  ;;  %v7171_v31 = vld [vmem:[#allocation5 + $0x78] sm:$0xf0] }
 0x1a9   :  { %v11055_v44 = vld [vmem:[#allocation5 + $0xb34] sm:$0xf0]  ;;  %v10771_v36 = vld [vmem:[#allocation5 + $0x25c] sm:$0xf]  ;;  %v7174_v45 = vor.u32 %v10707_v30, %v7171_v31 }
 0x1aa   :  { %v8546_v51 = vor.u32 %v11055_v44, %v8545_v40  ;;  %v8257_v53 = vld [vmem:[#allocation5 + $0x8d8] sm:$0xf]  ;;  %3022 = vmatpush.bf16.msra.mxu3 %v7558_v41  ;;  %2984 = vmatpush.bf16.msra.mxu0 %v8290_v49  ;;  %v7427_v38 = vld [vmem:[#allocation5 + $0x278] sm:$0xf0]  ;;  %v2758_v49 = vpop.f32.mrf.mxu2 }
 0x1ab   :  { %v10983_v54 = vld [vmem:[#allocation5 + $0x8f4] sm:$0xf0]  ;;  %v7430_v50 = vor.u32 %v10771_v36, %v7427_v38  ;;  %v11003_v11 = vld [vmem:[#allocation5 + $0x99c] sm:$0xf] }
 0x1ac   :  { %v8513_v55 = vld [vmem:[#allocation5 + $0xad8] sm:$0xf]  ;;  %v8258_v1 = vor.u32 %v10983_v54, %v8257_v53  ;;  %2997 = vmatpush.bf16.msra.mxu1 %v8546_v51  ;;  %3010 = vmatpush.bf16.msra.mxu2 %v7270_v52  ;;  %v7139_v51 = vld [vmem:[#allocation5 + $0x38] sm:$0xf0]  ;;  %v2771_v54 = vpop.f32.mrf.mxu3 }
 0x1ad   :  { %v11047_v59 = vld [vmem:[#allocation5 + $0xaf4] sm:$0xf0]  ;;  %v10763_v52 = vld [vmem:[#allocation5 + $0x21c] sm:$0xf]  ;;  %v7142_v18 = vor.u32 %v10699_v48, %v7139_v51  ;;  %v2782_v51 = vpop.f32.mrf.mxu0 }
 0x1ae   :  { %v8514_v2 = vor.u32 %v11047_v59, %v8513_v55  ;;  %v8225_v4 = vld [vmem:[#allocation5 + $0x898] sm:$0xf]  ;;  %3023 = vmatpush.bf16.msra.mxu3 %v7526_v58  ;;  %2985 = vmatpush.bf16.msra.mxu0 %v8258_v1  ;;  %v7395_v53 = vld [vmem:[#allocation5 + $0x238] sm:$0xf0] }
 0x1af   :  { %v10975_v6 = vld [vmem:[#allocation5 + $0x8b4] sm:$0xf0]  ;;  %v10883_v55 = vld [vmem:[#allocation5 + $0x5dc] sm:$0xf] }
 0x1b0   :  { %v8481_v7 = vld [vmem:[#allocation5 + $0xa98] sm:$0xf]  ;;  %v8226_v15 = vor.u32 %v10975_v6, %v8225_v4  ;;  %2998 = vmatpush.bf16.msra.mxu1 %v8514_v2  ;;  %3011 = vmatpush.bf16.msra.mxu2 %v7238_v3  ;;  %v8131_v59 = vld [vmem:[#allocation5 + $0x7f8] sm:$0xf0]  ;;  %v7398_v2 = vor.u32 %v10763_v52, %v7395_v53  ;;  %v7878_v3 = vor.u32 %v10883_v55, %v7875_v56 }
 0x1b1   :  { %v11039_v9 = vld [vmem:[#allocation5 + $0xab4] sm:$0xf0]  ;;  %v8643_v1 = vld [vmem:[#allocation5 + $0xbf8] sm:$0xf0]  ;;  %v8134_v4 = vor.u32 %v10947_v57, %v8131_v59  ;;  %v8390_v6 = vor.u32 %v11011_v19, %v8387_v61  ;;  %v2795_v57 = vpop.f32.mrf.mxu1 }
 0x1b2   :  { %v8482_v20 = vor.u32 %v11039_v9, %v8481_v7  ;;  %v8193_v23 = vld [vmem:[#allocation5 + $0x858] sm:$0xf]  ;;  %3024 = vmatpush.bf16.msra.mxu3 %v7494_v26  ;;  %2986 = vmatpush.bf16.msra.mxu0 %v8226_v15  ;;  %v10875_v7 = vld [vmem:[#allocation5 + $0x59c] sm:$0xf]  ;;  %v8646_v9 = vor.u32 %v11075_v0, %v8643_v1 }
 0x1b3   :  { %v10967_v24 = vld [vmem:[#allocation5 + $0x874] sm:$0xf0]  ;;  %v10939_v26 = vld [vmem:[#allocation5 + $0x79c] sm:$0xf]  ;;  %v7846_v14 = vor.u32 %v10875_v7, %v7843_v8 }
 0x1b4   :  { %v8449_v25 = vld [vmem:[#allocation5 + $0xa58] sm:$0xf]  ;;  %v8194_v39 = vor.u32 %v10967_v24, %v8193_v23  ;;  %2999 = vmatpush.bf16.msra.mxu1 %v8482_v20  ;;  %3012 = vmatpush.bf16.msra.mxu2 %v7206_v21  ;;  %v8355_v12 = vld [vmem:[#allocation5 + $0x9b8] sm:$0xf0]  ;;  %v8102_v15 = vor.u32 %v10939_v26, %v8099_v10 }
 0x1b5   :  { %v11031_v29 = vld [vmem:[#allocation5 + $0xa74] sm:$0xf0]  ;;  %v11067_v32 = vld [vmem:[#allocation5 + $0xb9c] sm:$0xf]  ;;  %v8358_v17 = vor.u32 %v11003_v11, %v8355_v12 }
 0x1b6   :  { %v8161_v40 = vld [vmem:[#allocation5 + $0x818] sm:$0xf]  ;;  %v8450_v44 = vor.u32 %v11031_v29, %v8449_v25  ;;  %3025 = vmatpush.bf16.msra.mxu3 %v7462_v28  ;;  %2987 = vmatpush.bf16.msra.mxu0 %v8194_v39  ;;  %v8611_v13 = vld [vmem:[#allocation5 + $0xbb8] sm:$0xf0] }
 0x1b7   :  { %v10959_v41 = vld [vmem:[#allocation5 + $0x834] sm:$0xf0]  ;;  %v10867_v20 = vld [vmem:[#allocation5 + $0x55c] sm:$0xf]  ;;  %v8614_v24 = vor.u32 %v11067_v32, %v8611_v13  ;;  %v2808_v8 = vpop.f32.mrf.mxu2 }
 0x1b8   :  { %v8417_v46 = vld [vmem:[#allocation5 + $0xa18] sm:$0xf]  ;;  %v8162_v58 = vor.u32 %v10959_v41, %v8161_v40  ;;  %3000 = vmatpush.bf16.msra.mxu1 %v8450_v44  ;;  %3013 = vmatpush.bf16.msra.mxu2 %v7174_v45  ;;  %v7811_v21 = vld [vmem:[#allocation5 + $0x578] sm:$0xf0]  ;;  %v529_v44 = vperm.slane %v11897_v63, 4 }
 0x1b9   :  { %v11023_v47 = vld [vmem:[#allocation5 + $0xa34] sm:$0xf0]  ;;  %v10931_v23 = vld [vmem:[#allocation5 + $0x75c] sm:$0xf]  ;;  %v7814_v31 = vor.u32 %v10867_v20, %v7811_v21  ;;  %v2821_v32 = vpop.f32.mrf.mxu3  ;;  %v2784_v20 = vpop.f32.mrf.mxu0 }
 0x1ba   :  { %v8418_v62 = vor.u32 %v11023_v47, %v8417_v46  ;;  %3026 = vmatpush.bf16.msra.mxu3 %v7430_v50  ;;  %2988 = vmatpush.bf16.msra.mxu0 %v8162_v58  ;;  %v8067_v25 = vld [vmem:[#allocation5 + $0x778] sm:$0xf0]  ;;  %v2783_v56 = vadd.f32 %v2782_v51, %v529_v44  ;;  %v8809_v20 = vld [vmem:[#allocation8 + $0x140] sm:$0xf] }
 0x1bb   :  { %v10995_v27 = vld [vmem:[#allocation5 + $0x95c] sm:$0xf]  ;;  %v8070_v38 = vor.u32 %v10931_v23, %v8067_v25 }
 0x1bc   :  { %3001 = vmatpush.bf16.msra.mxu1 %v8418_v62  ;;  %3014 = vmatpush.bf16.msra.mxu2 %v7142_v18  ;;  %v8323_v28 = vld [vmem:[#allocation5 + $0x978] sm:$0xf0]  ;;  %v2796_v0 = vadd.f32 %v2795_v57, %v2783_v56  ;;  %v9129_v56 = vld [vmem:[#allocation8 + $0x3c0] sm:$0xf] }
 0x1bd   :  { %2989 = vmatmul.bf16.vlgmr.msra.gmra.mxu0 %v11844_v33  ;;  %v11059_v29 = vld [vmem:[#allocation5 + $0xb5c] sm:$0xf]  ;;  %v8326_v39 = vor.u32 %v10995_v27, %v8323_v28  ;;  %v2797_v28 = vpop.f32.mrf.mxu1 }
 0x1be   :  { %3027 = vmatpush.bf16.msra.mxu3 %v7398_v2  ;;  %3033 = vmatpush.bf16.msrb.mxu0 %v7878_v3  ;;  %v8579_v30 = vld [vmem:[#allocation5 + $0xb78] sm:$0xf0]  ;;  %v2809_v12 = vadd.f32 %v2808_v8, %v2796_v0  ;;  %v11332_v0 = vld [vmem:[#allocation8 + $0x7dc] sm:$0xf0] }
 0x1bf   :  { %3002 = vmatmul.bf16.vlgmr.msra.gmra.mxu1 %v11846_v37  ;;  %3015 = vmatmul.bf16.vlgmr.msra.gmra.mxu2 %v11834_v35  ;;  %v10859_v36 = vld [vmem:[#allocation5 + $0x51c] sm:$0xf]  ;;  %v8582_v45 = vor.u32 %v11059_v29, %v8579_v30  ;;  %v9097_v8 = vld [vmem:[#allocation8 + $0x380] sm:$0xf] }
 0x1c0   :  { %3046 = vmatpush.bf16.msrb.mxu1 %v8134_v4  ;;  %3059 = vmatpush.bf16.msrb.mxu2 %v8390_v6  ;;  %v7779_v40 = vld [vmem:[#allocation5 + $0x538] sm:$0xf0]  ;;  %v11252_v28 = vld [vmem:[#allocation8 + $0x55c] sm:$0xf0] }
 0x1c1   :  { %3028 = vmatmul.bf16.vlgmr.msra.gmra.mxu3 %v11838_v43  ;;  %v10923_v41 = vld [vmem:[#allocation5 + $0x71c] sm:$0xf]  ;;  %v7782_v50 = vor.u32 %v10859_v36, %v7779_v40 }
 0x1c2   :  { %3072 = vmatpush.bf16.msrb.mxu3 %v8646_v9  ;;  %3034 = vmatpush.bf16.msrb.mxu0 %v7846_v14  ;;  %v8035_v46 = vld [vmem:[#allocation5 + $0x738] sm:$0xf0] }
 0x1c3   :  { %v10987_v47 = vld [vmem:[#allocation5 + $0x91c] sm:$0xf]  ;;  %v8038_v43 = vor.u32 %v10923_v41, %v8035_v46 }
 0x1c4   :  { %3047 = vmatpush.bf16.msrb.mxu1 %v8102_v15  ;;  %3060 = vmatpush.bf16.msrb.mxu2 %v8358_v17  ;;  %v8291_v35 = vld [vmem:[#allocation5 + $0x938] sm:$0xf0]  ;;  %v11914_v17 = vadd.f32 %v2821_v32, %v2809_v12  ;;  %v9609_v12 = vld [vmem:[#allocation8 + $0x780] sm:$0xf] }
 0x1c5   :  { %v11051_v48 = vld [vmem:[#allocation5 + $0xb1c] sm:$0xf]  ;;  %v8294_v52 = vor.u32 %v10987_v47, %v8291_v35  ;;  %v11324_v32 = vld [vmem:[#allocation8 + $0x79c] sm:$0xf0] }
 0x1c6   :  { %3073 = vmatpush.bf16.msrb.mxu3 %v8614_v24  ;;  %v8547_v49 = vld [vmem:[#allocation5 + $0xb38] sm:$0xf0]  ;;  %3035 = vmatpush.bf16.msrb.mxu0 %v7814_v31 }
 0x1c7   :  { %v10851_v53 = vld [vmem:[#allocation5 + $0x4dc] sm:$0xf]  ;;  %v8550_v58 = vor.u32 %v11051_v48, %v8547_v49  ;;  %v2810_v49 = vpop.f32.mrf.mxu2 }
 0x1c8   :  { %3048 = vmatpush.bf16.msrb.mxu1 %v8070_v38  ;;  %3061 = vmatpush.bf16.msrb.mxu2 %v8326_v39  ;;  %v7747_v54 = vld [vmem:[#allocation5 + $0x4f8] sm:$0xf0] }
 0x1c9   :  { %v10915_v55 = vld [vmem:[#allocation5 + $0x6dc] sm:$0xf]  ;;  %v7750_v1 = vor.u32 %v10851_v53, %v7747_v54  ;;  %v2823_v53 = vpop.f32.mrf.mxu3  ;;  %v8873_v54 = vld [vmem:[#allocation8 + $0x1c0] sm:$0xf] }
 0x1ca   :  { %3074 = vmatpush.bf16.msrb.mxu3 %v8582_v45  ;;  %v8003_v59 = vld [vmem:[#allocation5 + $0x6f8] sm:$0xf0]  ;;  %3036 = vmatpush.bf16.msrb.mxu0 %v7782_v50  ;;  %v11172_v53 = vld [vmem:[#allocation8 + $0x2dc] sm:$0xf0] }
 0x1cb   :  { %v10979_v19 = vld [vmem:[#allocation5 + $0x8dc] sm:$0xf]  ;;  %v8006_v2 = vor.u32 %v10915_v55, %v8003_v59  ;;  %v11140_v55 = vld [vmem:[#allocation8 + $0x1dc] sm:$0xf0] }
 0x1cc   :  { %v8259_v61 = vld [vmem:[#allocation5 + $0x8f8] sm:$0xf0]  ;;  %3049 = vmatpush.bf16.msrb.mxu1 %v8038_v43  ;;  %3062 = vmatpush.bf16.msrb.mxu2 %v8294_v52  ;;  %v9385_v59 = vld [vmem:[#allocation8 + $0x5c0] sm:$0xf] }
 0x1cd   :  { %v11043_v62 = vld [vmem:[#allocation5 + $0xadc] sm:$0xf]  ;;  %v8262_v3 = vor.u32 %v10979_v19, %v8259_v61  ;;  %v11268_v19 = vld [vmem:[#allocation8 + $0x5dc] sm:$0xf0] }
 0x1ce   :  { %v8515_v18 = vld [vmem:[#allocation5 + $0xaf8] sm:$0xf0]  ;;  %3075 = vmatpush.bf16.msrb.mxu3 %v8550_v58  ;;  %3037 = vmatpush.bf16.msrb.mxu0 %v7750_v1  ;;  %v11204_v58 = vld [vmem:[#allocation8 + $0x3dc] sm:$0xf0] }
 0x1cf   :  { %v10843_v4 = vld [vmem:[#allocation5 + $0x49c] sm:$0xf]  ;;  %v8518_v26 = vor.u32 %v11043_v62, %v8515_v18  ;;  %v9641_v18 = vld [vmem:[#allocation8 + $0x7c0] sm:$0xf] }
 0x1d0   :  { %v7715_v6 = vld [vmem:[#allocation5 + $0x4b8] sm:$0xf0]  ;;  %3050 = vmatpush.bf16.msrb.mxu1 %v8006_v2  ;;  %3063 = vmatpush.bf16.msrb.mxu2 %v8262_v3  ;;  %v8874_v2 = vor.u32 %v11140_v55, %v8873_v54  ;;  %v9130_v3 = vor.u32 %v11204_v58, %v9129_v56  ;;  %v9257_v54 = vld [vmem:[#allocation8 + $0x4c0] sm:$0xf] }
 0x1d1   :  { %v10907_v7 = vld [vmem:[#allocation5 + $0x69c] sm:$0xf]  ;;  %v7718_v15 = vor.u32 %v10843_v4, %v7715_v6  ;;  %v9386_v4 = vor.u32 %v11268_v19, %v9385_v59  ;;  %v8841_v6 = vld [vmem:[#allocation8 + $0x180] sm:$0xf] }
 0x1d2   :  { %v7971_v9 = vld [vmem:[#allocation5 + $0x6b8] sm:$0xf0]  ;;  %3076 = vmatpush.bf16.msrb.mxu3 %v8518_v26  ;;  %v9642_v26 = vor.u32 %v11332_v0, %v9641_v18  ;;  %v11236_v55 = vld [vmem:[#allocation8 + $0x4dc] sm:$0xf0] }
 0x1d3   :  { %v10971_v10 = vld [vmem:[#allocation5 + $0x89c] sm:$0xf]  ;;  %v7974_v21 = vor.u32 %v10907_v7, %v7971_v9  ;;  %3038 = vmatpush.bf16.msrb.mxu0 %v7718_v15  ;;  %v11132_v7 = vld [vmem:[#allocation8 + $0x19c] sm:$0xf0]  ;;  %v9258_v19 = vor.u32 %v11236_v55, %v9257_v54 }
 0x1d4   :  { %v8227_v11 = vld [vmem:[#allocation5 + $0x8b8] sm:$0xf0]  ;;  %v11196_v9 = vld [vmem:[#allocation8 + $0x39c] sm:$0xf0] }
 0x1d5   :  { %v11035_v13 = vld [vmem:[#allocation5 + $0xa9c] sm:$0xf]  ;;  %v8230_v23 = vor.u32 %v10971_v10, %v8227_v11  ;;  %3051 = vmatpush.bf16.msrb.mxu1 %v7974_v21  ;;  %v9353_v10 = vld [vmem:[#allocation8 + $0x580] sm:$0xf] }
 0x1d6   :  { %v8483_v14 = vld [vmem:[#allocation5 + $0xab8] sm:$0xf0]  ;;  %v11260_v11 = vld [vmem:[#allocation8 + $0x59c] sm:$0xf0] }
 0x1d7   :  { %v10835_v24 = vld [vmem:[#allocation5 + $0x45c] sm:$0xf]  ;;  %v8486_v29 = vor.u32 %v11035_v13, %v8483_v14  ;;  %3064 = vmatpush.bf16.msrb.mxu2 %v8230_v23  ;;  %v8842_v13 = vor.u32 %v11132_v7, %v8841_v6  ;;  %v9098_v14 = vor.u32 %v11196_v9, %v9097_v8  ;;  %v9354_v15 = vor.u32 %v11260_v11, %v9353_v10  ;;  %v11124_v21 = vld [vmem:[#allocation8 + $0x15c] sm:$0xf0] }
 0x1d8   :  { %v7683_v25 = vld [vmem:[#allocation5 + $0x478] sm:$0xf0]  ;;  %v9065_v23 = vld [vmem:[#allocation8 + $0x340] sm:$0xf] }
 0x1d9   :  { %v10899_v27 = vld [vmem:[#allocation5 + $0x65c] sm:$0xf]  ;;  %v7686_v40 = vor.u32 %v10835_v24, %v7683_v25  ;;  %3077 = vmatpush.bf16.msrb.mxu3 %v8486_v29  ;;  %v9610_v24 = vor.u32 %v11324_v32, %v9609_v12  ;;  %v11188_v25 = vld [vmem:[#allocation8 + $0x35c] sm:$0xf0]  ;;  %v11926_v8 = vpop.f32.mrf.mxu3 }
 0x1da   :  { %v7939_v30 = vld [vmem:[#allocation5 + $0x678] sm:$0xf0]  ;;  %v9577_v29 = vld [vmem:[#allocation8 + $0x740] sm:$0xf] }
 0x1db   :  { %v10963_v31 = vld [vmem:[#allocation5 + $0x85c] sm:$0xf]  ;;  %v7942_v45 = vor.u32 %v10899_v27, %v7939_v30  ;;  %3039 = vmatpush.bf16.msrb.mxu0 %v7686_v40  ;;  %v9321_v27 = vld [vmem:[#allocation8 + $0x540] sm:$0xf] }
 0x1dc   :  { %v8195_v36 = vld [vmem:[#allocation5 + $0x878] sm:$0xf0]  ;;  %v11316_v30 = vld [vmem:[#allocation8 + $0x75c] sm:$0xf0] }
 0x1dd   :  { %v11027_v38 = vld [vmem:[#allocation5 + $0xa5c] sm:$0xf]  ;;  %v8198_v46 = vor.u32 %v10963_v31, %v8195_v36  ;;  %3052 = vmatpush.bf16.msrb.mxu1 %v7942_v45  ;;  %v8810_v31 = vor.u32 %v11124_v21, %v8809_v20  ;;  %v9066_v36 = vor.u32 %v11188_v25, %v9065_v23  ;;  %v9033_v40 = vld [vmem:[#allocation8 + $0x300] sm:$0xf] }
 0x1de   :  { %v8451_v39 = vld [vmem:[#allocation5 + $0xa78] sm:$0xf0]  ;;  %v9289_v45 = vld [vmem:[#allocation8 + $0x500] sm:$0xf] }
 0x1df   :  { %v10827_v41 = vld [vmem:[#allocation5 + $0x41c] sm:$0xf]  ;;  %v8454_v50 = vor.u32 %v11027_v38, %v8451_v39  ;;  %3065 = vmatpush.bf16.msrb.mxu2 %v8198_v46  ;;  %v9322_v38 = vor.u32 %v11252_v28, %v9321_v27  ;;  %v8777_v39 = vld [vmem:[#allocation8 + $0x100] sm:$0xf] }
 0x1e0   :  { %v7651_v44 = vld [vmem:[#allocation5 + $0x438] sm:$0xf0]  ;;  %v9545_v46 = vld [vmem:[#allocation8 + $0x700] sm:$0xf] }
 0x1e1   :  { %v10891_v47 = vld [vmem:[#allocation5 + $0x61c] sm:$0xf]  ;;  %v7654_v57 = vor.u32 %v10827_v41, %v7651_v44  ;;  %3078 = vmatpush.bf16.msrb.mxu3 %v8454_v50  ;;  %v9578_v41 = vor.u32 %v11316_v30, %v9577_v29  ;;  %v11180_v44 = vld [vmem:[#allocation8 + $0x31c] sm:$0xf0] }
 0x1e2   :  { %v7907_v35 = vld [vmem:[#allocation5 + $0x638] sm:$0xf0]  ;;  %v8745_v50 = vld [vmem:[#allocation8 + $0xc0] sm:$0xf] }
 0x1e3   :  { %v10955_v48 = vld [vmem:[#allocation5 + $0x81c] sm:$0xf]  ;;  %v7910_v61 = vor.u32 %v10891_v47, %v7907_v35  ;;  %3040 = vmatpush.bf16.msrb.mxu0 %v7654_v57  ;;  %v11920_v47 = vpop.f32.mrf.mxu0  ;;  %v11922_v35 = vpop.f32.mrf.mxu1  ;;  %v9513_v56 = vld [vmem:[#allocation8 + $0x6c0] sm:$0xf] }
 0x1e4   :  { %v8163_v51 = vld [vmem:[#allocation5 + $0x838] sm:$0xf0]  ;;  %v11300_v57 = vld [vmem:[#allocation8 + $0x6dc] sm:$0xf0] }
 0x1e5   :  { %v11019_v43 = vld [vmem:[#allocation5 + $0xa1c] sm:$0xf]  ;;  %v8166_v62 = vor.u32 %v10955_v48, %v8163_v51  ;;  %3053 = vmatpush.bf16.msrb.mxu1 %v7910_v61  ;;  %v9034_v48 = vor.u32 %v11180_v44, %v9033_v40  ;;  %v11108_v51 = vld [vmem:[#allocation8 + $0xdc] sm:$0xf0]  ;;  %v9514_v0 = vor.u32 %v11300_v57, %v9513_v56 }
 0x1e6   :  { %v8419_v52 = vld [vmem:[#allocation5 + $0xa38] sm:$0xf0]  ;;  %3041 = vmatmul.bf16.vlgmr.msrb.gmra.mxu0 %v11832_v34  ;;  %v11116_v34 = vld [vmem:[#allocation8 + $0x11c] sm:$0xf0]  ;;  %v8746_v58 = vor.u32 %v11108_v51, %v8745_v50  ;;  %v3085_v50 = vmax.f32 %v11871_v5, 0.0  ;;  %v530_v5 = vperm.slane %v11897_v63, 5 }
 0x1e7   :  { %v8422_v1 = vor.u32 %v11019_v43, %v8419_v52  ;;  %3066 = vmatpush.bf16.msrb.mxu2 %v8166_v62  ;;  %6191 = vmatpush.bf16.msra.mxu0 %v8874_v2  ;;  %v9001_v43 = vld [vmem:[#allocation8 + $0x2c0] sm:$0xf] }
 0x1e8   :  { %3054 = vmatmul.bf16.vlgmr.msrb.gmra.mxu1 %v11836_v42  ;;  %v11244_v42 = vld [vmem:[#allocation8 + $0x51c] sm:$0xf0]  ;;  %v9002_v59 = vor.u32 %v11172_v53, %v9001_v43  ;;  %v3087_v53 = vmax.f32 %v11895_v60, 0.0 }
 0x1e9   :  { %3079 = vmatpush.bf16.msrb.mxu3 %v8422_v1  ;;  %6204 = vmatpush.bf16.msra.mxu1 %v9130_v3  ;;  %v9290_v49 = vor.u32 %v11244_v42, %v9289_v45  ;;  %v8713_v61 = vld [vmem:[#allocation8 + $0x80] sm:$0xf] }
 0x1ea   :  { %3067 = vmatmul.bf16.vlgmr.msrb.gmra.mxu2 %v11844_v33  ;;  %v11308_v33 = vld [vmem:[#allocation8 + $0x71c] sm:$0xf0] }
 0x1eb   :  { %6217 = vmatpush.bf16.msra.mxu2 %v9386_v4  ;;  %6192 = vmatpush.bf16.msra.mxu0 %v8842_v13  ;;  %v9546_v52 = vor.u32 %v11308_v33, %v9545_v46  ;;  %v11100_v62 = vld [vmem:[#allocation8 + $0x9c] sm:$0xf0]  ;;  %v11924_v4 = vpop.f32.mrf.mxu2  ;;  %v2849_v10 = vpop.f32.mrf.mxu1 }
 0x1ec   :  { %3080 = vmatmul.bf16.vlgmr.msrb.gmra.mxu3 %v11846_v37  ;;  %v8778_v37 = vor.u32 %v11116_v34, %v8777_v39  ;;  %v8969_v18 = vld [vmem:[#allocation8 + $0x280] sm:$0xf]  ;;  %v8714_v9 = vor.u32 %v11100_v62, %v8713_v61  ;;  %v2875_v33 = vpop.f32.mrf.mxu3 }
 0x1ed   :  { %6230 = vmatpush.bf16.msra.mxu3 %v9642_v26  ;;  %6205 = vmatpush.bf16.msra.mxu1 %v9098_v14  ;;  %v11164_v1 = vld [vmem:[#allocation8 + $0x29c] sm:$0xf0]  ;;  %v2836_v26 = vpop.f32.mrf.mxu0 }
 0x1ee   :  { %v9225_v2 = vld [vmem:[#allocation8 + $0x480] sm:$0xf]  ;;  %v8970_v11 = vor.u32 %v11164_v1, %v8969_v18  ;;  %v11937_v1 = vpack.c.bf16 %v3087_v53, %v3087_v53  ;;  %v2835_v53 = vadd.f32 %v11920_v47, %v11914_v17 }
 0x1ef   :  { %6218 = vmatpush.bf16.msra.mxu2 %v9354_v15  ;;  %6193 = vmatpush.bf16.msra.mxu0 %v8810_v31  ;;  %v11228_v3 = vld [vmem:[#allocation8 + $0x49c] sm:$0xf0] }
 0x1f0   :  { %v9481_v6 = vld [vmem:[#allocation8 + $0x680] sm:$0xf]  ;;  %v9226_v12 = vor.u32 %v11228_v3, %v9225_v2 }
 0x1f1   :  { %6231 = vmatpush.bf16.msra.mxu3 %v9610_v24  ;;  %6206 = vmatpush.bf16.msra.mxu1 %v9066_v36  ;;  %v11292_v7 = vld [vmem:[#allocation8 + $0x69c] sm:$0xf0] }
 0x1f2   :  { %v8681_v32 = vld [vmem:[#allocation8 + $0x40] sm:$0xf]  ;;  %v9482_v15 = vor.u32 %v11292_v7, %v9481_v6  ;;  %v2861_v7 = vadd.f32 %v11924_v4, %v530_v5 }
 0x1f3   :  { %6219 = vmatpush.bf16.msra.mxu2 %v9322_v38  ;;  %6194 = vmatpush.bf16.msra.mxu0 %v8778_v37  ;;  %v11092_v13 = vld [vmem:[#allocation8 + $0x5c] sm:$0xf0]  ;;  %v2862_v44 = vpop.f32.mrf.mxu2 }
 0x1f4   :  { %v8937_v14 = vld [vmem:[#allocation8 + $0x240] sm:$0xf]  ;;  %v8682_v27 = vor.u32 %v11092_v13, %v8681_v32 }
 0x1f5   :  { %6232 = vmatpush.bf16.msra.mxu3 %v9578_v41  ;;  %6207 = vmatpush.bf16.msra.mxu1 %v9034_v48  ;;  %v11156_v20 = vld [vmem:[#allocation8 + $0x25c] sm:$0xf0] }
 0x1f6   :  { %v9193_v21 = vld [vmem:[#allocation8 + $0x440] sm:$0xf]  ;;  %v8938_v29 = vor.u32 %v11156_v20, %v8937_v14 }
 0x1f7   :  { %6220 = vmatpush.bf16.msra.mxu2 %v9290_v49  ;;  %6195 = vmatpush.bf16.msra.mxu0 %v8746_v58  ;;  %v11220_v23 = vld [vmem:[#allocation8 + $0x45c] sm:$0xf0]  ;;  %v3088_v58 = vmax.f32 %v11907_v16, 0.0 }
 0x1f8   :  { %v9449_v24 = vld [vmem:[#allocation8 + $0x640] sm:$0xf]  ;;  %v9194_v30 = vor.u32 %v11220_v23, %v9193_v21 }
 0x1f9   :  { %6233 = vmatpush.bf16.msra.mxu3 %v9546_v52  ;;  %6208 = vmatpush.bf16.msra.mxu1 %v9002_v59  ;;  %v11284_v25 = vld [vmem:[#allocation8 + $0x65c] sm:$0xf0]  ;;  %v3086_v52 = vmax.f32 %v11881_v22, 0.0  ;;  %v11939_v6 = vpack.c.bf16 %v3088_v58, %v3088_v58 }
 0x1fa   :  { %v8649_v28 = vld [vmem:[#allocation8] sm:$0xf]  ;;  %v9450_v39 = vor.u32 %v11284_v25, %v9449_v24 }
 0x1fb   :  { %6221 = vmatpush.bf16.msra.mxu2 %v9258_v19  ;;  %6196 = vmatpush.bf16.msra.mxu0 %v8714_v9  ;;  %v11084_v31 = vld [vmem:[#allocation8 + $0x1c] sm:$0xf0]  ;;  %v11935_v60 = vpack.c.bf16 %v3086_v52, %v3086_v52 }
 0x1fc   :  { %v8905_v36 = vld [vmem:[#allocation8 + $0x200] sm:$0xf]  ;;  %v8650_v37 = vor.u32 %v11084_v31, %v8649_v28  ;;  %v2886_v28 = vpop.f32.mrf.mxu0 }
 0x1fd   :  { %6234 = vmatpush.bf16.msra.mxu3 %v9514_v0  ;;  %6209 = vmatpush.bf16.msra.mxu1 %v8970_v11  ;;  %v11148_v38 = vld [vmem:[#allocation8 + $0x21c] sm:$0xf0]  ;;  %v11933_v0 = vpack.c.bf16 %v3085_v50, %v3085_v50 }
 0x1fe   :  { %v9161_v34 = vld [vmem:[#allocation8 + $0x400] sm:$0xf]  ;;  %v8906_v51 = vor.u32 %v11148_v38, %v8905_v36 }
 0x1ff   :  { %6222 = vmatpush.bf16.msra.mxu2 %v9226_v12  ;;  %v11212_v40 = vld [vmem:[#allocation8 + $0x41c] sm:$0xf0]  ;;  %6197 = vmatpush.bf16.msra.mxu0 %v8682_v27 }
 0x200   :  { %v9417_v41 = vld [vmem:[#allocation8 + $0x600] sm:$0xf]  ;;  %v9162_v43 = vor.u32 %v11212_v40, %v9161_v34  ;;  %v2899_v34 = vpop.f32.mrf.mxu1 }
 0x201   :  { %6235 = vmatpush.bf16.msra.mxu3 %v9482_v15  ;;  %v11276_v45 = vld [vmem:[#allocation8 + $0x61c] sm:$0xf0]  ;;  %6210 = vmatpush.bf16.msra.mxu1 %v8938_v29  ;;  %v2874_v15 = vadd.f32 %v11926_v8, %v2861_v7 }
 0x202   :  { %v9897_v42 = vld [vmem:[#allocation8 + $0x9c0] sm:$0xf]  ;;  %v9418_v54 = vor.u32 %v11276_v45, %v9417_v41 }
 0x203   :  { %v11396_v46 = vld [vmem:[#allocation8 + $0x9dc] sm:$0xf0]  ;;  %6223 = vmatpush.bf16.msra.mxu2 %v9194_v30  ;;  %6198 = vmatpush.bf16.msra.mxu0 %v8650_v37 }
 0x204   :  { %v10153_v48 = vld [vmem:[#allocation8 + $0xbc0] sm:$0xf]  ;;  %v9898_v55 = vor.u32 %v11396_v46, %v9897_v42 }
 0x205   :  { %v11460_v49 = vld [vmem:[#allocation8 + $0xbdc] sm:$0xf0]  ;;  %6236 = vmatpush.bf16.msra.mxu3 %v9450_v39  ;;  %6211 = vmatpush.bf16.msra.mxu1 %v8906_v51  ;;  %v2887_v39 = vadd.f32 %v2886_v28, %v2874_v15 }
 0x206   :  { %v10409_v56 = vld [vmem:[#allocation8 + $0xdc0] sm:$0xf]  ;;  %v10154_v59 = vor.u32 %v11460_v49, %v10153_v48  ;;  %6199 = vmatmul.bf16.vlgmr.msra.gmra.mxu0 %v11933_v0  ;;  %v2912_v49 = vpop.f32.mrf.mxu2 }
 0x207   :  { %v11524_v57 = vld [vmem:[#allocation8 + $0xddc] sm:$0xf0]  ;;  %6224 = vmatpush.bf16.msra.mxu2 %v9162_v43  ;;  %6243 = vmatpush.bf16.msrb.mxu0 %v9898_v55  ;;  %v2900_v45 = vadd.f32 %v2899_v34, %v2887_v39  ;;  %v2925_v43 = vpop.f32.mrf.mxu3  ;;  %v11128_v34 = vld [vmem:[#allocation8 + $0x184] sm:$0xf] }
 0x208   :  { %v9865_v19 = vld [vmem:[#allocation8 + $0x980] sm:$0xf]  ;;  %v10410_v22 = vor.u32 %v11524_v57, %v10409_v56  ;;  %6212 = vmatmul.bf16.vlgmr.msra.gmra.mxu1 %v11935_v60  ;;  %v2888_v56 = vpop.f32.mrf.mxu0  ;;  %v2901_v5 = vpop.f32.mrf.mxu1 }
 0x209   :  { %v11388_v61 = vld [vmem:[#allocation8 + $0x99c] sm:$0xf0]  ;;  %6237 = vmatpush.bf16.msra.mxu3 %v9418_v54  ;;  %6256 = vmatpush.bf16.msrb.mxu1 %v10154_v59  ;;  %v2913_v55 = vadd.f32 %v2912_v49, %v2900_v45  ;;  %v11184_v56 = vld [vmem:[#allocation8 + $0x344] sm:$0xf] }
 0x20a   :  { %v10121_v62 = vld [vmem:[#allocation8 + $0xb80] sm:$0xf]  ;;  %v9866_v16 = vor.u32 %v11388_v61, %v9865_v19  ;;  %6225 = vmatmul.bf16.vlgmr.msra.gmra.mxu2 %v11937_v1 }
 0x20b   :  { %v11452_v18 = vld [vmem:[#allocation8 + $0xb9c] sm:$0xf0]  ;;  %6269 = vmatpush.bf16.msrb.mxu2 %v10410_v22  ;;  %v2926_v17 = vadd.f32 %v2925_v43, %v2913_v55 }
 0x20c   :  { %v10377_v2 = vld [vmem:[#allocation8 + $0xd80] sm:$0xf]  ;;  %v10122_v63 = vor.u32 %v11452_v18, %v10121_v62  ;;  %6238 = vmatmul.bf16.vlgmr.msra.gmra.mxu3 %v11939_v6  ;;  %6244 = vmatpush.bf16.msrb.mxu0 %v9866_v16 }
 0x20d   :  { %v11516_v3 = vld [vmem:[#allocation8 + $0xd9c] sm:$0xf0] }
 0x20e   :  { %v9833_v26 = vld [vmem:[#allocation8 + $0x940] sm:$0xf]  ;;  %v10378_v12 = vor.u32 %v11516_v3, %v10377_v2  ;;  %6257 = vmatpush.bf16.msrb.mxu1 %v10122_v63  ;;  %v2848_v2 = vadd.f32 %v11922_v35, %v2835_v53  ;;  %v11120_v53 = vld [vmem:[#allocation8 + $0x144] sm:$0xf] }
 0x20f   :  { %v11380_v9 = vld [vmem:[#allocation8 + $0x95c] sm:$0xf0]  ;;  %v2927_v15 = vpop.f32.mrf.mxu3 }
 0x210   :  { %v10089_v10 = vld [vmem:[#allocation8 + $0xb40] sm:$0xf]  ;;  %v9834_v32 = vor.u32 %v11380_v9, %v9833_v26  ;;  %6270 = vmatpush.bf16.msrb.mxu2 %v10378_v12 }
 0x211   :  { %v11444_v11 = vld [vmem:[#allocation8 + $0xb5c] sm:$0xf0] }
 0x212   :  { %v10345_v13 = vld [vmem:[#allocation8 + $0xd40] sm:$0xf]  ;;  %v10090_v4 = vor.u32 %v11444_v11, %v10089_v10  ;;  %6245 = vmatpush.bf16.msrb.mxu0 %v9834_v32  ;;  %v2914_v10 = vpop.f32.mrf.mxu2 }
 0x213   :  { %v11508_v14 = vld [vmem:[#allocation8 + $0xd5c] sm:$0xf0] }
 0x214   :  { %v9801_v20 = vld [vmem:[#allocation8 + $0x900] sm:$0xf]  ;;  %v10346_v25 = vor.u32 %v11508_v14, %v10345_v13  ;;  %6258 = vmatpush.bf16.msrb.mxu1 %v10090_v4  ;;  %v11136_v13 = vld [vmem:[#allocation8 + $0x1c4] sm:$0xf] }
 0x215   :  { %v11372_v21 = vld [vmem:[#allocation8 + $0x91c] sm:$0xf0]  ;;  %v8875_v14 = vld [vmem:[#allocation8 + $0x1e0] sm:$0xf0] }
 0x216   :  { %v10057_v23 = vld [vmem:[#allocation8 + $0xb00] sm:$0xf]  ;;  %v9802_v27 = vor.u32 %v11372_v21, %v9801_v20  ;;  %6271 = vmatpush.bf16.msrb.mxu2 %v10346_v25  ;;  %v11200_v20 = vld [vmem:[#allocation8 + $0x3c4] sm:$0xf] }
 0x217   :  { %v11436_v24 = vld [vmem:[#allocation8 + $0xb1c] sm:$0xf0]  ;;  %v9131_v21 = vld [vmem:[#allocation8 + $0x3e0] sm:$0xf0] }
 0x218   :  { %v10313_v29 = vld [vmem:[#allocation8 + $0xd00] sm:$0xf]  ;;  %v10058_v31 = vor.u32 %v11436_v24, %v10057_v23  ;;  %6246 = vmatpush.bf16.msrb.mxu0 %v9802_v27  ;;  %v3089_v23 = vmax.f32 %v2848_v2, 0.0  ;;  %v3090_v24 = vmax.f32 %v2926_v17, 0.0  ;;  %v9134_v39 = vor.u32 %v11200_v20, %v9131_v21  ;;  %v11176_v17 = vld [vmem:[#allocation8 + $0x304] sm:$0xf] }
 0x219   :  { %v11500_v30 = vld [vmem:[#allocation8 + $0xd1c] sm:$0xf0]  ;;  %v9003_v20 = vld [vmem:[#allocation8 + $0x2e0] sm:$0xf0] }
 0x21a   :  { %v9769_v36 = vld [vmem:[#allocation8 + $0x8c0] sm:$0xf]  ;;  %v10314_v41 = vor.u32 %v11500_v30, %v10313_v29  ;;  %6259 = vmatpush.bf16.msrb.mxu1 %v10058_v31  ;;  %v8878_v30 = vor.u32 %v11136_v13, %v8875_v14  ;;  %v11264_v31 = vld [vmem:[#allocation8 + $0x5c4] sm:$0xf]  ;;  %v11958_v14 = vpop.f32.mrf.mxu1 }
 0x21b   :  { %v11364_v38 = vld [vmem:[#allocation8 + $0x8dc] sm:$0xf0]  ;;  %v8747_v13 = vld [vmem:[#allocation8 + $0xe0] sm:$0xf0] }
 0x21c   :  { %v10025_v40 = vld [vmem:[#allocation8 + $0xac0] sm:$0xf]  ;;  %v9770_v44 = vor.u32 %v11364_v38, %v9769_v36  ;;  %6272 = vmatpush.bf16.msrb.mxu2 %v10314_v41  ;;  %v9387_v36 = vld [vmem:[#allocation8 + $0x5e0] sm:$0xf0] }
 0x21d   :  { %v11428_v8 = vld [vmem:[#allocation8 + $0xadc] sm:$0xf0]  ;;  %v11192_v41 = vld [vmem:[#allocation8 + $0x384] sm:$0xf] }
 0x21e   :  { %v10281_v42 = vld [vmem:[#allocation8 + $0xcc0] sm:$0xf]  ;;  %v10026_v33 = vor.u32 %v11428_v8, %v10025_v40  ;;  %6247 = vmatpush.bf16.msrb.mxu0 %v9770_v44  ;;  %v8843_v40 = vld [vmem:[#allocation8 + $0x1a0] sm:$0xf0] }
 0x21f   :  { %v11492_v46 = vld [vmem:[#allocation8 + $0xcdc] sm:$0xf0]  ;;  %v9099_v44 = vld [vmem:[#allocation8 + $0x3a0] sm:$0xf0]  ;;  %v8846_v49 = vor.u32 %v11128_v34, %v8843_v40 }
 0x220   :  { %v9737_v37 = vld [vmem:[#allocation8 + $0x880] sm:$0xf]  ;;  %v10282_v52 = vor.u32 %v11492_v46, %v10281_v42  ;;  %6260 = vmatpush.bf16.msrb.mxu1 %v10026_v33  ;;  %v11950_v46 = vpack.c.bf16 %v3090_v24, %v3090_v24  ;;  %v9390_v33 = vor.u32 %v11264_v31, %v9387_v36  ;;  %v9259_v24 = vld [vmem:[#allocation8 + $0x4e0] sm:$0xf0] }
 0x221   :  { %v11356_v48 = vld [vmem:[#allocation8 + $0x89c] sm:$0xf0]  ;;  %v11160_v36 = vld [vmem:[#allocation8 + $0x284] sm:$0xf] }
 0x222   :  { %v9993_v50 = vld [vmem:[#allocation8 + $0xa80] sm:$0xf]  ;;  %v9738_v54 = vor.u32 %v11356_v48, %v9737_v37  ;;  %6273 = vmatpush.bf16.msrb.mxu2 %v10282_v52  ;;  %v11256_v37 = vld [vmem:[#allocation8 + $0x584] sm:$0xf]  ;;  %v11952_v48 = vpack.c.bf16 %v3089_v23, %v3089_v23  ;;  %v9102_v52 = vor.u32 %v11192_v41, %v9099_v44 }
 0x223   :  { %v11420_v51 = vld [vmem:[#allocation8 + $0xa9c] sm:$0xf0] }
 0x224   :  { %v10249_v57 = vld [vmem:[#allocation8 + $0xc80] sm:$0xf]  ;;  %v9994_v59 = vor.u32 %v11420_v51, %v9993_v50  ;;  %6248 = vmatpush.bf16.msrb.mxu0 %v9738_v54  ;;  %v9355_v50 = vld [vmem:[#allocation8 + $0x5a0] sm:$0xf0]  ;;  %v11962_v44 = vpop.f32.mrf.mxu3 }
 0x225   :  { %v11484_v58 = vld [vmem:[#allocation8 + $0xc9c] sm:$0xf0]  ;;  %v8811_v54 = vld [vmem:[#allocation8 + $0x160] sm:$0xf0] }
 0x226   :  { %v9705_v19 = vld [vmem:[#allocation8 + $0x840] sm:$0xf]  ;;  %v10250_v16 = vor.u32 %v11484_v58, %v10249_v57  ;;  %6261 = vmatpush.bf16.msrb.mxu1 %v9994_v59  ;;  %v9067_v57 = vld [vmem:[#allocation8 + $0x360] sm:$0xf0]  ;;  %v9358_v58 = vor.u32 %v11256_v37, %v9355_v50 }
 0x227   :  { %v11348_v61 = vld [vmem:[#allocation8 + $0x85c] sm:$0xf0]  ;;  %v11248_v59 = vld [vmem:[#allocation8 + $0x544] sm:$0xf] }
 0x228   :  { %v9961_v62 = vld [vmem:[#allocation8 + $0xa40] sm:$0xf]  ;;  %v9706_v47 = vor.u32 %v11348_v61, %v9705_v19  ;;  %6274 = vmatpush.bf16.msrb.mxu2 %v10250_v16  ;;  %v8814_v19 = vor.u32 %v11120_v53, %v8811_v54  ;;  %v9323_v61 = vld [vmem:[#allocation8 + $0x560] sm:$0xf0] }
 0x229   :  { %v11412_v18 = vld [vmem:[#allocation8 + $0xa5c] sm:$0xf0]  ;;  %v8779_v16 = vld [vmem:[#allocation8 + $0x120] sm:$0xf0] }
 0x22a   :  { %v9673_v22 = vld [vmem:[#allocation8 + $0x800] sm:$0xf]  ;;  %v9962_v26 = vor.u32 %v11412_v18, %v9961_v62  ;;  %6249 = vmatpush.bf16.msrb.mxu0 %v9706_v47  ;;  %v9070_v18 = vor.u32 %v11184_v56, %v9067_v57  ;;  %v9035_v47 = vld [vmem:[#allocation8 + $0x320] sm:$0xf0] }
 0x22b   :  { %v11340_v3 = vld [vmem:[#allocation8 + $0x81c] sm:$0xf0]  ;;  %v8683_v37 = vld [vmem:[#allocation8 + $0x60] sm:$0xf0] }
 0x22c   :  { %v10217_v63 = vld [vmem:[#allocation8 + $0xc40] sm:$0xf]  ;;  %v9674_v25 = vor.u32 %v11340_v3, %v9673_v22  ;;  %6262 = vmatpush.bf16.msrb.mxu1 %v9962_v26  ;;  %v11112_v22 = vld [vmem:[#allocation8 + $0x104] sm:$0xf]  ;;  %v9326_v3 = vor.u32 %v11248_v59, %v9323_v61  ;;  %v11956_v26 = vpop.f32.mrf.mxu0 }
 0x22d   :  { %v11476_v7 = vld [vmem:[#allocation8 + $0xc5c] sm:$0xf0]  ;;  %v11152_v53 = vld [vmem:[#allocation8 + $0x244] sm:$0xf] }
 0x22e   :  { %v9929_v9 = vld [vmem:[#allocation8 + $0xa00] sm:$0xf]  ;;  %v10218_v35 = vor.u32 %v11476_v7, %v10217_v63  ;;  %6250 = vmatpush.bf16.msrb.mxu0 %v9674_v25  ;;  %v11240_v63 = vld [vmem:[#allocation8 + $0x504] sm:$0xf]  ;;  %v8782_v7 = vor.u32 %v11112_v22, %v8779_v16 }
 0x22f   :  { %v10665_v11 = vld [vmem:[#allocation8 + $0xfc0] sm:$0xf]  ;;  %v8939_v54 = vld [vmem:[#allocation8 + $0x260] sm:$0xf0] }
 0x230   :  { %v11588_v12 = vld [vmem:[#allocation8 + $0xfdc] sm:$0xf0]  ;;  %6275 = vmatpush.bf16.msrb.mxu2 %v10218_v35  ;;  %v11232_v35 = vld [vmem:[#allocation8 + $0x4c4] sm:$0xf] }
 0x231   :  { %v11404_v32 = vld [vmem:[#allocation8 + $0xa1c] sm:$0xf0]  ;;  %v10666_v4 = vor.u32 %v11588_v12, %v10665_v11  ;;  %6251 = vmatmul.bf16.vlgmr.msrb.gmra.mxu0 %v11952_v48  ;;  %v9038_v12 = vor.u32 %v11176_v17, %v9035_v47  ;;  %v9262_v34 = vor.u32 %v11232_v35, %v9259_v24  ;;  %v11080_v56 = vld [vmem:[#allocation8 + $0x4] sm:$0xf] }
 0x232   :  { %v10185_v27 = vld [vmem:[#allocation8 + $0xc00] sm:$0xf]  ;;  %v9930_v29 = vor.u32 %v11404_v32, %v9929_v9  ;;  %6295 = vmatpush.bf16.msra.mxu0 %v8878_v30  ;;  %v9291_v9 = vld [vmem:[#allocation8 + $0x520] sm:$0xf0] }
 0x233   :  { %v11468_v28 = vld [vmem:[#allocation8 + $0xc1c] sm:$0xf0]  ;;  %6282 = vmatpush.bf16.msrb.mxu3 %v10666_v4  ;;  %v11104_v32 = vld [vmem:[#allocation8 + $0xc4] sm:$0xf]  ;;  %v9294_v21 = vor.u32 %v11240_v63, %v9291_v9 }
 0x234   :  { %v10633_v38 = vld [vmem:[#allocation8 + $0xf80] sm:$0xf]  ;;  %v10186_v45 = vor.u32 %v11468_v28, %v10185_v27  ;;  %6263 = vmatpush.bf16.msrb.mxu1 %v9930_v29  ;;  %v11168_v4 = vld [vmem:[#allocation8 + $0x2c4] sm:$0xf]  ;;  %v8750_v23 = vor.u32 %v11104_v32, %v8747_v13  ;;  %v2940_v41 = vpop.f32.mrf.mxu0 }
 0x235   :  { %v11580_v8 = vld [vmem:[#allocation8 + $0xf9c] sm:$0xf0]  ;;  %v9006_v28 = vor.u32 %v11168_v4, %v9003_v20  ;;  %v11096_v29 = vld [vmem:[#allocation8 + $0x84] sm:$0xf] }
 0x236   :  { %v10634_v42 = vor.u32 %v11580_v8, %v10633_v38  ;;  %v10601_v51 = vld [vmem:[#allocation8 + $0xf40] sm:$0xf]  ;;  %6276 = vmatpush.bf16.msrb.mxu2 %v10186_v45  ;;  %6296 = vmatpush.bf16.msra.mxu0 %v8846_v49  ;;  %v8715_v30 = vld [vmem:[#allocation8 + $0xa0] sm:$0xf0]  ;;  %v2953_v49 = vpop.f32.mrf.mxu1 }
 0x237   :  { %v11572_v43 = vld [vmem:[#allocation8 + $0xf5c] sm:$0xf0]  ;;  %6264 = vmatmul.bf16.vlgmr.msrb.gmra.mxu1 %v11950_v46  ;;  %v8971_v38 = vld [vmem:[#allocation8 + $0x2a0] sm:$0xf0]  ;;  %v8718_v40 = vor.u32 %v11096_v29, %v8715_v30 }
 0x238   :  { %6308 = vmatpush.bf16.msra.mxu1 %v9134_v39  ;;  %6283 = vmatpush.bf16.msrb.mxu3 %v10634_v42  ;;  %v10602_v55 = vor.u32 %v11572_v43, %v10601_v51  ;;  %v10569_v5 = vld [vmem:[#allocation8 + $0xf00] sm:$0xf]  ;;  %v11960_v39 = vpop.f32.mrf.mxu2  ;;  %v11088_v8 = vld [vmem:[#allocation8 + $0x44] sm:$0xf]  ;;  %v11964_v43 = vld [vmem:[#allocation7] sm:$0xff] }
 0x239   :  { %v11564_v62 = vld [vmem:[#allocation8 + $0xf1c] sm:$0xf0]  ;;  %v11224_v45 = vld [vmem:[#allocation8 + $0x484] sm:$0xf] }
 0x23a   :  { %6321 = vmatpush.bf16.msra.mxu2 %v9390_v33  ;;  %v10570_v2 = vor.u32 %v11564_v62, %v10569_v5  ;;  %6297 = vmatpush.bf16.msra.mxu0 %v8814_v19  ;;  %v10537_v10 = vld [vmem:[#allocation8 + $0xec0] sm:$0xf]  ;;  %v9227_v42 = vld [vmem:[#allocation8 + $0x4a0] sm:$0xf0]  ;;  %v8974_v33 = vor.u32 %v11160_v36, %v8971_v38  ;;  %v8686_v19 = vor.u32 %v11088_v8, %v8683_v37 }
 0x23b   :  { %v11556_v11 = vld [vmem:[#allocation8 + $0xedc] sm:$0xf0]  ;;  %v8651_v57 = vld [vmem:[#allocation8 + $0x20] sm:$0xf0] }
 0x23c   :  { %6309 = vmatpush.bf16.msra.mxu1 %v9102_v52  ;;  %6284 = vmatpush.bf16.msrb.mxu3 %v10602_v55  ;;  %v10538_v15 = vor.u32 %v11556_v11, %v10537_v10  ;;  %v10505_v25 = vld [vmem:[#allocation8 + $0xe80] sm:$0xf]  ;;  %v531_v52 = vperm.slane %v11964_v43, 6  ;;  %v11216_v59 = vld [vmem:[#allocation8 + $0x444] sm:$0xf]  ;;  %v8654_v13 = vor.u32 %v11080_v56, %v8651_v57 }
 0x23d   :  { %v11548_v27 = vld [vmem:[#allocation8 + $0xe9c] sm:$0xf0]  ;;  %v9195_v61 = vld [vmem:[#allocation8 + $0x460] sm:$0xf0] }
 0x23e   :  { %6322 = vmatpush.bf16.msra.mxu2 %v9358_v58  ;;  %6298 = vmatpush.bf16.msra.mxu0 %v8782_v7  ;;  %v10506_v31 = vor.u32 %v11548_v27, %v10505_v25  ;;  %v10473_v50 = vld [vmem:[#allocation8 + $0xe40] sm:$0xf]  ;;  %v9230_v58 = vor.u32 %v11224_v45, %v9227_v42  ;;  %v11144_v22 = vld [vmem:[#allocation8 + $0x204] sm:$0xf]  ;;  %v2939_v9 = vadd.f32 %v11956_v26, %v531_v52 }
 0x23f   :  { %v11540_v51 = vld [vmem:[#allocation8 + $0xe5c] sm:$0xf0]  ;;  %v9643_v17 = vld [vmem:[#allocation8 + $0x7e0] sm:$0xf0]  ;;  %v9198_v32 = vor.u32 %v11216_v59, %v9195_v61  ;;  %v2990_v61 = vpop.f32.mrf.mxu0 }
 0x240   :  { %6310 = vmatpush.bf16.msra.mxu1 %v9070_v18  ;;  %6285 = vmatpush.bf16.msrb.mxu3 %v10570_v2  ;;  %v10474_v55 = vor.u32 %v11540_v51, %v10473_v50  ;;  %v10441_v5 = vld [vmem:[#allocation8 + $0xe00] sm:$0xf]  ;;  %v8942_v18 = vor.u32 %v11152_v53, %v8939_v54  ;;  %v11328_v2 = vld [vmem:[#allocation8 + $0x7c4] sm:$0xf] }
 0x241   :  { %v11532_v62 = vld [vmem:[#allocation8 + $0xe1c] sm:$0xf0]  ;;  %v8907_v47 = vld [vmem:[#allocation8 + $0x220] sm:$0xf0]  ;;  %v9646_v7 = vor.u32 %v11328_v2, %v9643_v17  ;;  %v3003_v2 = vpop.f32.mrf.mxu1 }
 0x242   :  { %6323 = vmatpush.bf16.msra.mxu2 %v9326_v3  ;;  %6299 = vmatpush.bf16.msra.mxu0 %v8750_v23  ;;  %v10442_v16 = vor.u32 %v11532_v62, %v10441_v5  ;;  %v11392_v3 = vld [vmem:[#allocation8 + $0x9c4] sm:$0xf] }
 0x243   :  { %v9899_v63 = vld [vmem:[#allocation8 + $0x9e0] sm:$0xf0] }
 0x244   :  { %6311 = vmatpush.bf16.msra.mxu1 %v9038_v12  ;;  %6286 = vmatpush.bf16.msrb.mxu3 %v10538_v15  ;;  %v11456_v10 = vld [vmem:[#allocation8 + $0xbc4] sm:$0xf]  ;;  %v2966_v12 = vpop.f32.mrf.mxu2  ;;  %v2979_v15 = vpop.f32.mrf.mxu3  ;;  %v9902_v35 = vor.u32 %v11392_v3, %v9899_v63 }
 0x245   :  { %v10155_v11 = vld [vmem:[#allocation8 + $0xbe0] sm:$0xf0] }
 0x246   :  { %6324 = vmatpush.bf16.msra.mxu2 %v9294_v21  ;;  %6300 = vmatpush.bf16.msra.mxu0 %v8718_v40  ;;  %v11208_v4 = vld [vmem:[#allocation8 + $0x404] sm:$0xf]  ;;  %v8910_v21 = vor.u32 %v11144_v22, %v8907_v47  ;;  %v10158_v24 = vor.u32 %v11456_v10, %v10155_v11 }
 0x247   :  { %v9163_v20 = vld [vmem:[#allocation8 + $0x420] sm:$0xf0] }
 0x248   :  { %6312 = vmatpush.bf16.msra.mxu1 %v9006_v28  ;;  %6287 = vmatpush.bf16.msrb.mxu3 %v10506_v31  ;;  %v11320_v23 = vld [vmem:[#allocation8 + $0x784] sm:$0xf]  ;;  %v2952_v28 = vadd.f32 %v11958_v14, %v2939_v9  ;;  %v9166_v31 = vor.u32 %v11208_v4, %v9163_v20 }
 0x249   :  { %v11384_v25 = vld [vmem:[#allocation8 + $0x984] sm:$0xf] }
 0x24a   :  { %6325 = vmatpush.bf16.msra.mxu2 %v9262_v34  ;;  %6301 = vmatpush.bf16.msra.mxu0 %v8686_v19  ;;  %v9867_v27 = vld [vmem:[#allocation8 + $0x9a0] sm:$0xf0]  ;;  %v2965_v14 = vadd.f32 %v11960_v39, %v2952_v28 }
 0x24b   :  { %v9611_v26 = vld [vmem:[#allocation8 + $0x7a0] sm:$0xf0]  ;;  %v9870_v38 = vor.u32 %v11384_v25, %v9867_v27 }
 0x24c   :  { %6313 = vmatpush.bf16.msra.mxu1 %v8974_v33  ;;  %6288 = vmatpush.bf16.msrb.mxu3 %v10474_v55  ;;  %v11448_v29 = vld [vmem:[#allocation8 + $0xb84] sm:$0xf]  ;;  %v9614_v36 = vor.u32 %v11320_v23, %v9611_v26  ;;  %v2978_v56 = vadd.f32 %v11962_v44, %v2965_v14 }
 0x24d   :  { %v10123_v30 = vld [vmem:[#allocation8 + $0xba0] sm:$0xf0] }
 0x24e   :  { %6326 = vmatpush.bf16.msra.mxu2 %v9230_v58  ;;  %6302 = vmatpush.bf16.msra.mxu0 %v8654_v13  ;;  %v11312_v34 = vld [vmem:[#allocation8 + $0x744] sm:$0xf]  ;;  %v10126_v8 = vor.u32 %v11448_v29, %v10123_v30  ;;  %v11977_v29 = vpop.f32.mrf.mxu3 }
 0x24f   :  { %v9579_v40 = vld [vmem:[#allocation8 + $0x760] sm:$0xf0] }
 0x250   :  { %6314 = vmatpush.bf16.msra.mxu1 %v8942_v18  ;;  %6289 = vmatpush.bf16.msrb.mxu3 %v10442_v16  ;;  %v11376_v41 = vld [vmem:[#allocation8 + $0x944] sm:$0xf]  ;;  %v9582_v42 = vor.u32 %v11312_v34, %v9579_v40  ;;  %v2991_v16 = vadd.f32 %v2990_v61, %v2978_v56  ;;  %v11141_v56 = vld [vmem:[#allocation8 + $0x1e4] sm:$0xf0] }
 0x251   :  { %v9835_v45 = vld [vmem:[#allocation8 + $0x960] sm:$0xf0]  ;;  %6303 = vmatmul.bf16.vlgmr.msra.gmra.mxu0 %v11933_v0 }
 0x252   :  { %6327 = vmatpush.bf16.msra.mxu2 %v9198_v32  ;;  %6347 = vmatpush.bf16.msrb.mxu0 %v9902_v35  ;;  %v11440_v33 = vld [vmem:[#allocation8 + $0xb44] sm:$0xf]  ;;  %v9838_v49 = vor.u32 %v11376_v41, %v9835_v45  ;;  %v3004_v44 = vadd.f32 %v3003_v2, %v2991_v16 }
 0x253   :  { %v10091_v37 = vld [vmem:[#allocation8 + $0xb60] sm:$0xf0] }
 0x254   :  { %6334 = vmatpush.bf16.msra.mxu3 %v9646_v7  ;;  %6315 = vmatpush.bf16.msra.mxu1 %v8910_v21  ;;  %v11304_v50 = vld [vmem:[#allocation8 + $0x704] sm:$0xf]  ;;  %v10094_v52 = vor.u32 %v11440_v33, %v10091_v37  ;;  %v3091_v15 = vmax.f32 %v3004_v44, 0.0  ;;  %v9105_v44 = vld [vmem:[#allocation8 + $0x388] sm:$0xf] }
 0x255   :  { %v9547_v51 = vld [vmem:[#allocation8 + $0x720] sm:$0xf0] }
 0x256   :  { %6328 = vmatpush.bf16.msra.mxu2 %v9166_v31  ;;  %6348 = vmatpush.bf16.msrb.mxu0 %v9870_v38  ;;  %v11368_v53 = vld [vmem:[#allocation8 + $0x904] sm:$0xf]  ;;  %v9550_v55 = vor.u32 %v11304_v50, %v9547_v51  ;;  %v11973_v35 = vpack.c.bf16 %v3091_v15, %v3091_v15  ;;  %v2992_v31 = vpop.f32.mrf.mxu0  ;;  %v3031_v16 = vpop.f32.mrf.mxu3 }
 0x257   :  { %6316 = vmatmul.bf16.vlgmr.msra.gmra.mxu1 %v11935_v60  ;;  %v9803_v54 = vld [vmem:[#allocation8 + $0x920] sm:$0xf0]  ;;  %v9041_v31 = vld [vmem:[#allocation8 + $0x308] sm:$0xf] }
 0x258   :  { %6360 = vmatpush.bf16.msrb.mxu1 %v10158_v24  ;;  %6335 = vmatpush.bf16.msra.mxu3 %v9614_v36  ;;  %v11432_v57 = vld [vmem:[#allocation8 + $0xb04] sm:$0xf]  ;;  %v9806_v39 = vor.u32 %v11368_v53, %v9803_v54  ;;  %v11975_v24 = vpop.f32.mrf.mxu2 }
 0x259   :  { %v10059_v58 = vld [vmem:[#allocation8 + $0xb20] sm:$0xf0]  ;;  %6277 = vmatmul.bf16.vlgmr.msrb.gmra.mxu2 %v11973_v35 }
 0x25a   :  { %6349 = vmatpush.bf16.msrb.mxu0 %v9838_v49  ;;  %v11296_v59 = vld [vmem:[#allocation8 + $0x6c4] sm:$0xf]  ;;  %v10062_v5 = vor.u32 %v11432_v57, %v10059_v58 }
 0x25b   :  { %v9515_v19 = vld [vmem:[#allocation8 + $0x6e0] sm:$0xf0] }
 0x25c   :  { %6361 = vmatpush.bf16.msrb.mxu1 %v10126_v8  ;;  %6336 = vmatpush.bf16.msra.mxu3 %v9582_v42  ;;  %v11360_v62 = vld [vmem:[#allocation8 + $0x8c4] sm:$0xf]  ;;  %v9518_v22 = vor.u32 %v11296_v59, %v9515_v19  ;;  %v3005_v8 = vpop.f32.mrf.mxu1  ;;  %v11205_v59 = vld [vmem:[#allocation8 + $0x3e4] sm:$0xf0] }
 0x25d   :  { %v9771_v18 = vld [vmem:[#allocation8 + $0x8e0] sm:$0xf0] }
 0x25e   :  { %v11424_v17 = vld [vmem:[#allocation8 + $0xac4] sm:$0xf]  ;;  %6350 = vmatpush.bf16.msrb.mxu0 %v9806_v39  ;;  %v9774_v63 = vor.u32 %v11360_v62, %v9771_v18  ;;  %v9137_v39 = vld [vmem:[#allocation8 + $0x3c8] sm:$0xf] }
 0x25f   :  { %v10027_v47 = vld [vmem:[#allocation8 + $0xae0] sm:$0xf0]  ;;  %v9138_v2 = vor.u32 %v11205_v59, %v9137_v39  ;;  %v11165_v59 = vld [vmem:[#allocation8 + $0x2a4] sm:$0xf0] }
 0x260   :  { %6362 = vmatpush.bf16.msrb.mxu1 %v10094_v52  ;;  %6337 = vmatpush.bf16.msra.mxu3 %v9550_v55  ;;  %v11520_v3 = vld [vmem:[#allocation8 + $0xdc4] sm:$0xf]  ;;  %v10030_v11 = vor.u32 %v11424_v17, %v10027_v47  ;;  %v8881_v55 = vld [vmem:[#allocation8 + $0x1c8] sm:$0xf]  ;;  %v3018_v61 = vpop.f32.mrf.mxu2 }
 0x261   :  { %v10411_v7 = vld [vmem:[#allocation8 + $0xde0] sm:$0xf0]  ;;  %v8849_v17 = vld [vmem:[#allocation8 + $0x188] sm:$0xf] }
 0x262   :  { %v11288_v9 = vld [vmem:[#allocation8 + $0x684] sm:$0xf]  ;;  %v10414_v21 = vor.u32 %v11520_v3, %v10411_v7  ;;  %6351 = vmatpush.bf16.msrb.mxu0 %v9774_v63  ;;  %v11133_v47 = vld [vmem:[#allocation8 + $0x1a4] sm:$0xf0] }
 0x263   :  { %v9483_v10 = vld [vmem:[#allocation8 + $0x6a0] sm:$0xf0]  ;;  %v11197_v63 = vld [vmem:[#allocation8 + $0x3a4] sm:$0xf0] }
 0x264   :  { %6363 = vmatpush.bf16.msrb.mxu1 %v10062_v5  ;;  %v11352_v12 = vld [vmem:[#allocation8 + $0x884] sm:$0xf]  ;;  %6338 = vmatpush.bf16.msra.mxu3 %v9518_v22  ;;  %v9486_v13 = vor.u32 %v11288_v9, %v9483_v10  ;;  %v8882_v22 = vor.u32 %v11141_v56, %v8881_v55  ;;  %v8850_v10 = vor.u32 %v11133_v47, %v8849_v17  ;;  %v11269_v55 = vld [vmem:[#allocation8 + $0x5e4] sm:$0xf0] }
 0x265   :  { %v9739_v32 = vld [vmem:[#allocation8 + $0x8a0] sm:$0xf0]  ;;  %6373 = vmatpush.bf16.msrb.mxu2 %v10414_v21  ;;  %v11093_v17 = vld [vmem:[#allocation8 + $0x64] sm:$0xf0] }
 0x266   :  { %v11416_v4 = vld [vmem:[#allocation8 + $0xa84] sm:$0xf]  ;;  %v9742_v23 = vor.u32 %v11352_v12, %v9739_v32  ;;  %v8817_v12 = vld [vmem:[#allocation8 + $0x148] sm:$0xf] }
 0x267   :  { %v9995_v20 = vld [vmem:[#allocation8 + $0xaa0] sm:$0xf0]  ;;  %v11125_v32 = vld [vmem:[#allocation8 + $0x164] sm:$0xf0] }
 0x268   :  { %v11344_v25 = vld [vmem:[#allocation8 + $0x844] sm:$0xf]  ;;  %6364 = vmatpush.bf16.msrb.mxu1 %v10030_v11  ;;  %v9998_v28 = vor.u32 %v11416_v4, %v9995_v20  ;;  %6339 = vmatpush.bf16.msra.mxu3 %v9486_v13  ;;  %v9106_v11 = vor.u32 %v11197_v63, %v9105_v44  ;;  %v532_v13 = vperm.slane %v11964_v43, 7  ;;  %v9073_v4 = vld [vmem:[#allocation8 + $0x348] sm:$0xf] }
 0x269   :  { %v11512_v27 = vld [vmem:[#allocation8 + $0xd84] sm:$0xf]  ;;  %6352 = vmatpush.bf16.msrb.mxu0 %v9742_v23  ;;  %v11189_v20 = vld [vmem:[#allocation8 + $0x364] sm:$0xf0]  ;;  %6329 = vmatmul.bf16.vlgmr.msra.gmra.mxu2 %v11937_v1 }
 0x26a   :  { %v10379_v26 = vld [vmem:[#allocation8 + $0xda0] sm:$0xf0]  ;;  %v3017_v43 = vadd.f32 %v11975_v24, %v532_v13  ;;  %v3055_v24 = vpop.f32.mrf.mxu1  ;;  %v8945_v63 = vld [vmem:[#allocation8 + $0x248] sm:$0xf] }
 0x26b   :  { %v9707_v30 = vld [vmem:[#allocation8 + $0x860] sm:$0xf0]  ;;  %v10382_v45 = vor.u32 %v11512_v27, %v10379_v26  ;;  %v9074_v27 = vor.u32 %v11189_v20, %v9073_v4  ;;  %v8785_v26 = vld [vmem:[#allocation8 + $0x108] sm:$0xf] }
 0x26c   :  { %v11280_v36 = vld [vmem:[#allocation8 + $0x644] sm:$0xf]  ;;  %v9710_v14 = vor.u32 %v11344_v25, %v9707_v30  ;;  %6365 = vmatpush.bf16.msrb.mxu1 %v9998_v28  ;;  %v8818_v25 = vor.u32 %v11125_v32, %v8817_v12  ;;  %v11117_v28 = vld [vmem:[#allocation8 + $0x124] sm:$0xf0] }
 0x26d   :  { %v9451_v38 = vld [vmem:[#allocation8 + $0x660] sm:$0xf0]  ;;  %6374 = vmatpush.bf16.msrb.mxu2 %v10382_v45  ;;  %v11109_v45 = vld [vmem:[#allocation8 + $0xe4] sm:$0xf0] }
 0x26e   :  { %v11408_v34 = vld [vmem:[#allocation8 + $0xa44] sm:$0xf]  ;;  %v9454_v41 = vor.u32 %v11280_v36, %v9451_v38  ;;  %6353 = vmatpush.bf16.msrb.mxu0 %v9710_v14  ;;  %v11181_v36 = vld [vmem:[#allocation8 + $0x324] sm:$0xf0]  ;;  %v3042_v14 = vpop.f32.mrf.mxu0 }
 0x26f   :  { %v9963_v40 = vld [vmem:[#allocation8 + $0xa60] sm:$0xf0]  ;;  %v9042_v8 = vor.u32 %v11181_v36, %v9041_v31  ;;  %v9329_v4 = vld [vmem:[#allocation8 + $0x548] sm:$0xf] }
 0x270   :  { %v11336_v42 = vld [vmem:[#allocation8 + $0x804] sm:$0xf]  ;;  %v9966_v50 = vor.u32 %v11408_v34, %v9963_v40  ;;  %6340 = vmatpush.bf16.msra.mxu3 %v9454_v41  ;;  %v8786_v40 = vor.u32 %v11117_v28, %v8785_v26  ;;  %v8753_v41 = vld [vmem:[#allocation8 + $0xc8] sm:$0xf] }
 0x271   :  { %v9675_v33 = vld [vmem:[#allocation8 + $0x820] sm:$0xf0]  ;;  %v11253_v20 = vld [vmem:[#allocation8 + $0x564] sm:$0xf0] }
 0x272   :  { %v11504_v37 = vld [vmem:[#allocation8 + $0xd44] sm:$0xf]  ;;  %v9678_v19 = vor.u32 %v11336_v42, %v9675_v33  ;;  %6366 = vmatpush.bf16.msrb.mxu1 %v9966_v50  ;;  %v3030_v42 = vadd.f32 %v11977_v29, %v3017_v43  ;;  %v8977_v29 = vld [vmem:[#allocation8 + $0x288] sm:$0xf]  ;;  %v9330_v31 = vor.u32 %v11253_v20, %v9329_v4 }
 0x273   :  { %v10347_v49 = vld [vmem:[#allocation8 + $0xd60] sm:$0xf0]  ;;  %v8978_v16 = vor.u32 %v11165_v59, %v8977_v29  ;;  %v9905_v28 = vld [vmem:[#allocation8 + $0x9c8] sm:$0xf] }
 0x274   :  { %v11400_v51 = vld [vmem:[#allocation8 + $0xa04] sm:$0xf]  ;;  %v10350_v58 = vor.u32 %v11504_v37, %v10347_v49  ;;  %6354 = vmatpush.bf16.msrb.mxu0 %v9678_v19  ;;  %v9009_v37 = vld [vmem:[#allocation8 + $0x2c8] sm:$0xf] }
 0x275   :  { %v11272_v52 = vld [vmem:[#allocation8 + $0x604] sm:$0xf]  ;;  %v11173_v49 = vld [vmem:[#allocation8 + $0x2e4] sm:$0xf0] }
 0x276   :  { %v9419_v53 = vld [vmem:[#allocation8 + $0x620] sm:$0xf0]  ;;  %6375 = vmatpush.bf16.msrb.mxu2 %v10350_v58  ;;  %v9010_v56 = vor.u32 %v11173_v49, %v9009_v37  ;;  %v11101_v58 = vld [vmem:[#allocation8 + $0xa4] sm:$0xf0]  ;;  %v3044_v44 = vpop.f32.mrf.mxu0 }
 0x277   :  { %v9931_v54 = vld [vmem:[#allocation8 + $0xa20] sm:$0xf0]  ;;  %v9422_v57 = vor.u32 %v11272_v52, %v9419_v53  ;;  %6355 = vmatmul.bf16.vlgmr.msrb.gmra.mxu0 %v11952_v48  ;;  %v3043_v52 = vadd.f32 %v3042_v14, %v3030_v42  ;;  %v8754_v53 = vor.u32 %v11109_v45, %v8753_v41  ;;  %v11397_v43 = vld [vmem:[#allocation8 + $0x9e4] sm:$0xf0] }
 0x278   :  { %v11496_v5 = vld [vmem:[#allocation8 + $0xd04] sm:$0xf]  ;;  %v9934_v18 = vor.u32 %v11400_v51, %v9931_v54  ;;  %6399 = vmatpush.bf16.msra.mxu0 %v8882_v22  ;;  %v9393_v54 = vld [vmem:[#allocation8 + $0x5c8] sm:$0xf]  ;;  %v3068_v22 = vpop.f32.mrf.mxu2  ;;  %v9906_v14 = vor.u32 %v11397_v43, %v9905_v28 }
 0x279   :  { %v10315_v62 = vld [vmem:[#allocation8 + $0xd20] sm:$0xf0]  ;;  %6341 = vmatpush.bf16.msra.mxu3 %v9422_v57  ;;  %v8721_v57 = vld [vmem:[#allocation8 + $0x88] sm:$0xf]  ;;  %v9394_v19 = vor.u32 %v11269_v55, %v9393_v54  ;;  %v3056_v61 = vadd.f32 %v3055_v24, %v3043_v52 }
 0x27a   :  { %v10318_v3 = vor.u32 %v11496_v5, %v10315_v62  ;;  %v11488_v7 = vld [vmem:[#allocation8 + $0xcc4] sm:$0xf]  ;;  %6367 = vmatpush.bf16.msrb.mxu1 %v9934_v18  ;;  %v8722_v5 = vor.u32 %v11101_v58, %v8721_v57  ;;  %v9361_v62 = vld [vmem:[#allocation8 + $0x588] sm:$0xf] }
 0x27b   :  { %v10283_v9 = vld [vmem:[#allocation8 + $0xce0] sm:$0xf0]  ;;  %v11261_v18 = vld [vmem:[#allocation8 + $0x5a4] sm:$0xf0]  ;;  %v3069_v47 = vadd.f32 %v3068_v22, %v3056_v61 }
 0x27c   :  { %6376 = vmatpush.bf16.msrb.mxu2 %v10318_v3  ;;  %v10286_v15 = vor.u32 %v11488_v7, %v10283_v9  ;;  %v11480_v21 = vld [vmem:[#allocation8 + $0xc84] sm:$0xf]  ;;  %6400 = vmatpush.bf16.msra.mxu0 %v8850_v10  ;;  %v3081_v3 = vpop.f32.mrf.mxu3  ;;  %v11157_v7 = vld [vmem:[#allocation8 + $0x264] sm:$0xf0]  ;;  %v3057_v9 = vpop.f32.mrf.mxu1  ;;  %v9362_v10 = vor.u32 %v11261_v18, %v9361_v62 }
 0x27d   :  { %6368 = vmatmul.bf16.vlgmr.msrb.gmra.mxu1 %v11950_v46  ;;  %v10251_v23 = vld [vmem:[#allocation8 + $0xca0] sm:$0xf0]  ;;  %v3082_v32 = vadd.f32 %v3081_v3, %v3069_v47  ;;  %v10161_v36 = vld [vmem:[#allocation8 + $0xbc8] sm:$0xf] }
 0x27e   :  { %6412 = vmatpush.bf16.msra.mxu1 %v9138_v2  ;;  %v10254_v30 = vor.u32 %v11480_v21, %v10251_v23  ;;  %v11472_v38 = vld [vmem:[#allocation8 + $0xc44] sm:$0xf]  ;;  %v8689_v2 = vld [vmem:[#allocation8 + $0x48] sm:$0xf]  ;;  %v8946_v21 = vor.u32 %v11157_v7, %v8945_v63 }
 0x27f   :  { %v10219_v34 = vld [vmem:[#allocation8 + $0xc60] sm:$0xf0]  ;;  %v8690_v13 = vor.u32 %v11093_v17, %v8689_v2  ;;  %v11085_v23 = vld [vmem:[#allocation8 + $0x24] sm:$0xf0]  ;;  %v3092_v26 = vmax.f32 %v3082_v32, 0.0 }
 0x280   :  { %6377 = vmatpush.bf16.msrb.mxu2 %v10286_v15  ;;  %6401 = vmatpush.bf16.msra.mxu0 %v8818_v25  ;;  %v10222_v33 = vor.u32 %v11472_v38, %v10219_v34  ;;  %v11464_v50 = vld [vmem:[#allocation8 + $0xc04] sm:$0xf]  ;;  %v8657_v15 = vld [vmem:[#allocation8 + $0x8] sm:$0xf]  ;;  %v3070_v45 = vpop.f32.mrf.mxu2 }
 0x281   :  { %v10187_v51 = vld [vmem:[#allocation8 + $0xc20] sm:$0xf0]  ;;  %v8913_v25 = vld [vmem:[#allocation8 + $0x208] sm:$0xf]  ;;  %v11987_v34 = vpack.c.bf16 %v3092_v26, %v3092_v26 }
 0x282   :  { %6413 = vmatpush.bf16.msra.mxu1 %v9106_v11  ;;  %v10190_v39 = vor.u32 %v11464_v50, %v10187_v51  ;;  %v11584_v11 = vld [vmem:[#allocation8 + $0xfc4] sm:$0xf]  ;;  %v11461_v38 = vld [vmem:[#allocation8 + $0xbe4] sm:$0xf0] }
 0x283   :  { %v10667_v12 = vld [vmem:[#allocation8 + $0xfe0] sm:$0xf0]  ;;  %v11245_v37 = vld [vmem:[#allocation8 + $0x524] sm:$0xf0]  ;;  %6290 = vmatmul.bf16.vlgmr.msrb.gmra.mxu3 %v11987_v34  ;;  %v10162_v24 = vor.u32 %v11461_v38, %v10161_v36  ;;  %v6200_v28 = vpop.f32.mrf.mxu0 }
 0x284   :  { %6378 = vmatpush.bf16.msrb.mxu2 %v10254_v30  ;;  %6402 = vmatpush.bf16.msra.mxu0 %v8786_v40  ;;  %v10670_v30 = vor.u32 %v11584_v11, %v10667_v12  ;;  %v8658_v40 = vor.u32 %v11085_v23, %v8657_v15  ;;  %v10635_v41 = vld [vmem:[#allocation8 + $0xfa0] sm:$0xf0]  ;;  %v3083_v49 = vpop.f32.mrf.mxu3  ;;  %v9873_v50 = vld [vmem:[#allocation8 + $0x988] sm:$0xf] }
 0x285   :  { %v11389_v51 = vld [vmem:[#allocation8 + $0x9a4] sm:$0xf0]  ;;  %v10603_v57 = vld [vmem:[#allocation8 + $0xf60] sm:$0xf0]  ;;  %v6213_v38 = vpop.f32.mrf.mxu1 }
 0x286   :  { %6414 = vmatpush.bf16.msra.mxu1 %v9074_v27  ;;  %v11149_v27 = vld [vmem:[#allocation8 + $0x224] sm:$0xf0]  ;;  %6386 = vmatpush.bf16.msrb.mxu3 %v10670_v30  ;;  %v9874_v58 = vor.u32 %v11389_v51, %v9873_v50  ;;  %v10571_v2 = vld [vmem:[#allocation8 + $0xf20] sm:$0xf0] }
 0x287   :  { %v8914_v42 = vor.u32 %v11149_v27, %v8913_v25  ;;  %v11453_v54 = vld [vmem:[#allocation8 + $0xba4] sm:$0xf0]  ;;  %v11992_v47 = vld [vmem:[#allocation10] sm:$0xff] }
 0x288   :  { %6379 = vmatpush.bf16.msrb.mxu2 %v10222_v33  ;;  %6403 = vmatpush.bf16.msra.mxu0 %v8754_v53  ;;  %v9297_v33 = vld [vmem:[#allocation8 + $0x508] sm:$0xf]  ;;  %v3615_v32 = vperm.slane %v11992_v47, 0  ;;  %v11552_v15 = vld [vmem:[#allocation8 + $0xec4] sm:$0xf] }
 0x289   :  { %v10129_v53 = vld [vmem:[#allocation8 + $0xb88] sm:$0xf]  ;;  %v9298_v55 = vor.u32 %v11245_v37, %v9297_v33  ;;  %v10539_v4 = vld [vmem:[#allocation8 + $0xee0] sm:$0xf0] }
 0x28a   :  { %6415 = vmatpush.bf16.msra.mxu1 %v9042_v8  ;;  %v11576_v8 = vld [vmem:[#allocation8 + $0xf84] sm:$0xf]  ;;  %v11237_v29 = vld [vmem:[#allocation8 + $0x4e4] sm:$0xf0]  ;;  %v10130_v59 = vor.u32 %v11453_v54, %v10129_v53  ;;  %v10542_v43 = vor.u32 %v11552_v15, %v10539_v4  ;;  %v6201_v36 = vadd.f32 %v6200_v28, %v3615_v32 }
 0x28b   :  { %v10638_v52 = vor.u32 %v11576_v8, %v10635_v41  ;;  %v11381_v61 = vld [vmem:[#allocation8 + $0x964] sm:$0xf0]  ;;  %v11544_v8 = vld [vmem:[#allocation8 + $0xe84] sm:$0xf] }
 0x28c   :  { %6380 = vmatpush.bf16.msrb.mxu2 %v10190_v39  ;;  %6404 = vmatpush.bf16.msra.mxu0 %v8722_v5  ;;  %v9265_v39 = vld [vmem:[#allocation8 + $0x4c8] sm:$0xf]  ;;  %v10507_v41 = vld [vmem:[#allocation8 + $0xea0] sm:$0xf0]  ;;  %v6214_v37 = vadd.f32 %v6213_v38, %v6201_v36 }
 0x28d   :  { %6387 = vmatpush.bf16.msrb.mxu3 %v10638_v52  ;;  %v10097_v62 = vld [vmem:[#allocation8 + $0xb48] sm:$0xf]  ;;  %v9266_v22 = vor.u32 %v11237_v29, %v9265_v39  ;;  %v10510_v52 = vor.u32 %v11544_v8, %v10507_v41 }
 0x28e   :  { %6416 = vmatpush.bf16.msra.mxu1 %v9010_v56  ;;  %v11568_v56 = vld [vmem:[#allocation8 + $0xf44] sm:$0xf]  ;;  %v11445_v18 = vld [vmem:[#allocation8 + $0xb64] sm:$0xf0] }
 0x28f   :  { %6381 = vmatmul.bf16.vlgmr.msrb.gmra.mxu2 %v11973_v35  ;;  %v10606_v5 = vor.u32 %v11568_v56, %v10603_v57  ;;  %v9233_v3 = vld [vmem:[#allocation8 + $0x488] sm:$0xf]  ;;  %v10098_v63 = vor.u32 %v11445_v18, %v10097_v62  ;;  %v11536_v56 = vld [vmem:[#allocation8 + $0xe44] sm:$0xf] }
 0x290   :  { %6425 = vmatpush.bf16.msra.mxu2 %v9394_v19  ;;  %6405 = vmatpush.bf16.msra.mxu0 %v8690_v13  ;;  %v9841_v19 = vld [vmem:[#allocation8 + $0x948] sm:$0xf]  ;;  %v10475_v57 = vld [vmem:[#allocation8 + $0xe60] sm:$0xf0] }
 0x291   :  { %v9842_v17 = vor.u32 %v11381_v61, %v9841_v19  ;;  %v11229_v44 = vld [vmem:[#allocation8 + $0x4a4] sm:$0xf0]  ;;  %6388 = vmatpush.bf16.msrb.mxu3 %v10606_v5 }
 0x292   :  { %6417 = vmatpush.bf16.msra.mxu1 %v8978_v16  ;;  %v11560_v16 = vld [vmem:[#allocation8 + $0xf04] sm:$0xf]  ;;  %v9809_v7 = vld [vmem:[#allocation8 + $0x908] sm:$0xf]  ;;  %v9234_v13 = vor.u32 %v11229_v44, %v9233_v3  ;;  %v6215_v44 = vpop.f32.mrf.mxu1 }
 0x293   :  { %v11373_v9 = vld [vmem:[#allocation8 + $0x924] sm:$0xf0]  ;;  %6342 = vmatmul.bf16.vlgmr.msra.gmra.mxu3 %v11939_v6 }
 0x294   :  { %6426 = vmatpush.bf16.msra.mxu2 %v9362_v10  ;;  %6406 = vmatpush.bf16.msra.mxu0 %v8658_v40  ;;  %v10574_v10 = vor.u32 %v11560_v16, %v10571_v2  ;;  %v10065_v11 = vld [vmem:[#allocation8 + $0xb08] sm:$0xf]  ;;  %v9810_v20 = vor.u32 %v11373_v9, %v9809_v7  ;;  %v6202_v16 = vpop.f32.mrf.mxu0  ;;  %v10478_v2 = vor.u32 %v11536_v56, %v10475_v57  ;;  %v10443_v7 = vld [vmem:[#allocation8 + $0xe20] sm:$0xf0] }
 0x295   :  { %v11437_v12 = vld [vmem:[#allocation8 + $0xb24] sm:$0xf0] }
 0x296   :  { %6418 = vmatpush.bf16.msra.mxu1 %v8946_v21  ;;  %v9201_v21 = vld [vmem:[#allocation8 + $0x448] sm:$0xf]  ;;  %v10066_v25 = vor.u32 %v11437_v12, %v10065_v11  ;;  %6389 = vmatpush.bf16.msrb.mxu3 %v10574_v10 }
 0x297   :  { %6407 = vmatmul.bf16.vlgmr.msra.gmra.mxu0 %v11933_v0  ;;  %v11221_v23 = vld [vmem:[#allocation8 + $0x464] sm:$0xf0] }
 0x298   :  { %6427 = vmatpush.bf16.msra.mxu2 %v9330_v31  ;;  %6451 = vmatpush.bf16.msrb.mxu0 %v9906_v14  ;;  %v9777_v27 = vld [vmem:[#allocation8 + $0x8c8] sm:$0xf]  ;;  %v9202_v40 = vor.u32 %v11221_v23, %v9201_v21 }
 0x299   :  { %v11365_v26 = vld [vmem:[#allocation8 + $0x8e4] sm:$0xf0] }
 0x29a   :  { %6419 = vmatpush.bf16.msra.mxu1 %v8914_v42  ;;  %v10033_v30 = vld [vmem:[#allocation8 + $0xac8] sm:$0xf]  ;;  %v9778_v45 = vor.u32 %v11365_v26, %v9777_v27  ;;  %6390 = vmatpush.bf16.msrb.mxu3 %v10542_v43  ;;  %v11137_v26 = vld [vmem:[#allocation8 + $0x1cc] sm:$0xf] }
 0x29b   :  { %v11429_v31 = vld [vmem:[#allocation8 + $0xae4] sm:$0xf0]  ;;  %v8883_v43 = vld [vmem:[#allocation8 + $0x1e8] sm:$0xf0] }
 0x29c   :  { %6428 = vmatpush.bf16.msra.mxu2 %v9298_v55  ;;  %6452 = vmatpush.bf16.msrb.mxu0 %v9874_v58  ;;  %v9169_v42 = vld [vmem:[#allocation8 + $0x408] sm:$0xf]  ;;  %v10034_v49 = vor.u32 %v11429_v31, %v10033_v30  ;;  %v11201_v30 = vld [vmem:[#allocation8 + $0x3cc] sm:$0xf] }
 0x29d   :  { %6420 = vmatmul.bf16.vlgmr.msra.gmra.mxu1 %v11935_v60  ;;  %v11213_v14 = vld [vmem:[#allocation8 + $0x424] sm:$0xf0]  ;;  %v9139_v31 = vld [vmem:[#allocation8 + $0x3e8] sm:$0xf0] }
 0x29e   :  { %6464 = vmatpush.bf16.msrb.mxu1 %v10162_v24  ;;  %v9745_v33 = vld [vmem:[#allocation8 + $0x888] sm:$0xf]  ;;  %v9170_v55 = vor.u32 %v11213_v14, %v9169_v42  ;;  %6391 = vmatpush.bf16.msrb.mxu3 %v10510_v52  ;;  %v11193_v52 = vld [vmem:[#allocation8 + $0x38c] sm:$0xf] }
 0x29f   :  { %v11357_v24 = vld [vmem:[#allocation8 + $0x8a4] sm:$0xf0] }
 0x2a0   :  { %6429 = vmatpush.bf16.msra.mxu2 %v9266_v22  ;;  %6453 = vmatpush.bf16.msrb.mxu0 %v9842_v17  ;;  %v10417_v50 = vld [vmem:[#allocation8 + $0xdc8] sm:$0xf]  ;;  %v9746_v58 = vor.u32 %v11357_v24, %v9745_v33  ;;  %v6239_v22 = vpop.f32.mrf.mxu3  ;;  %v11129_v24 = vld [vmem:[#allocation8 + $0x18c] sm:$0xf] }
 0x2a1   :  { %v11525_v51 = vld [vmem:[#allocation8 + $0xde4] sm:$0xf0] }
 0x2a2   :  { %6465 = vmatpush.bf16.msrb.mxu1 %v10130_v59  ;;  %v10001_v53 = vld [vmem:[#allocation8 + $0xa88] sm:$0xf]  ;;  %v10418_v39 = vor.u32 %v11525_v51, %v10417_v50  ;;  %v6226_v59 = vpop.f32.mrf.mxu2  ;;  %6392 = vmatpush.bf16.msrb.mxu3 %v10478_v2  ;;  %v8851_v51 = vld [vmem:[#allocation8 + $0x1a8] sm:$0xf0] }
 0x2a3   :  { %v11421_v54 = vld [vmem:[#allocation8 + $0xaa4] sm:$0xf0]  ;;  %v6227_v18 = vadd.f32 %v6226_v59, %v6214_v37  ;;  %v8886_v37 = vor.u32 %v11137_v26, %v8883_v43  ;;  %v11121_v59 = vld [vmem:[#allocation8 + $0x14c] sm:$0xf] }
 0x2a4   :  { %6430 = vmatpush.bf16.msra.mxu2 %v9234_v13  ;;  %6454 = vmatpush.bf16.msrb.mxu0 %v9810_v20  ;;  %v9713_v29 = vld [vmem:[#allocation8 + $0x848] sm:$0xf]  ;;  %v10002_v19 = vor.u32 %v11421_v54, %v10001_v53  ;;  %v9107_v53 = vld [vmem:[#allocation8 + $0x3a8] sm:$0xf0] }
 0x2a5   :  { %v11349_v61 = vld [vmem:[#allocation8 + $0x864] sm:$0xf0]  ;;  %v11996_v9 = vadd.f32 %v6239_v22, %v6227_v18  ;;  %v8755_v26 = vld [vmem:[#allocation8 + $0xe8] sm:$0xf0] }
 0x2a6   :  { %6466 = vmatpush.bf16.msrb.mxu1 %v10098_v63  ;;  %v10385_v5 = vld [vmem:[#allocation8 + $0xd88] sm:$0xf]  ;;  %v11528_v63 = vld [vmem:[#allocation8 + $0xe04] sm:$0xf]  ;;  %v9714_v10 = vor.u32 %v11349_v61, %v9713_v29  ;;  %v9110_v29 = vor.u32 %v11193_v52, %v9107_v53  ;;  %v8819_v61 = vld [vmem:[#allocation8 + $0x168] sm:$0xf0] }
 0x2a7   :  { %v11517_v62 = vld [vmem:[#allocation8 + $0xda4] sm:$0xf0]  ;;  %v10446_v23 = vor.u32 %v11528_v63, %v10443_v7  ;;  %v11113_v63 = vld [vmem:[#allocation8 + $0x10c] sm:$0xf] }
 0x2a8   :  { %6431 = vmatpush.bf16.msra.mxu2 %v9202_v40  ;;  %6455 = vmatpush.bf16.msrb.mxu0 %v9778_v45  ;;  %v9969_v17 = vld [vmem:[#allocation8 + $0xa48] sm:$0xf]  ;;  %v10386_v11 = vor.u32 %v11517_v62, %v10385_v5  ;;  %v6241_v33 = vpop.f32.mrf.mxu3  ;;  %v11185_v5 = vld [vmem:[#allocation8 + $0x34c] sm:$0xf] }
 0x2a9   :  { %v11413_v3 = vld [vmem:[#allocation8 + $0xa64] sm:$0xf0]  ;;  %6393 = vmatpush.bf16.msrb.mxu3 %v10446_v23  ;;  %v9075_v62 = vld [vmem:[#allocation8 + $0x368] sm:$0xf0] }
 0x2aa   :  { %6467 = vmatpush.bf16.msrb.mxu1 %v10066_v25  ;;  %v9649_v12 = vld [vmem:[#allocation8 + $0x7c8] sm:$0xf]  ;;  %v9970_v15 = vor.u32 %v11413_v3, %v9969_v17  ;;  %v6228_v41 = vpop.f32.mrf.mxu2  ;;  %v8822_v3 = vor.u32 %v11121_v59, %v8819_v61  ;;  %v9078_v44 = vor.u32 %v11185_v5, %v9075_v62  ;;  %v9011_v43 = vld [vmem:[#allocation8 + $0x2e8] sm:$0xf0] }
 0x2ab   :  { %v11333_v32 = vld [vmem:[#allocation8 + $0x7e4] sm:$0xf0]  ;;  %v11097_v33 = vld [vmem:[#allocation8 + $0x8c] sm:$0xf] }
 0x2ac   :  { %6432 = vmatpush.bf16.msra.mxu2 %v9170_v55  ;;  %6456 = vmatpush.bf16.msrb.mxu0 %v9746_v58  ;;  %v9681_v13 = vld [vmem:[#allocation8 + $0x808] sm:$0xf]  ;;  %v9650_v28 = vor.u32 %v11333_v32, %v9649_v12  ;;  %v9043_v12 = vld [vmem:[#allocation8 + $0x328] sm:$0xf0] }
 0x2ad   :  { %v11341_v4 = vld [vmem:[#allocation8 + $0x824] sm:$0xf0]  ;;  %6394 = vmatmul.bf16.vlgmr.msrb.gmra.mxu3 %v11987_v34  ;;  %v11161_v52 = vld [vmem:[#allocation8 + $0x28c] sm:$0xf] }
 0x2ae   :  { %6468 = vmatpush.bf16.msrb.mxu1 %v10034_v49  ;;  %v10353_v20 = vld [vmem:[#allocation8 + $0xd48] sm:$0xf]  ;;  %v9682_v36 = vor.u32 %v11341_v4, %v9681_v13  ;;  %v9142_v49 = vor.u32 %v11201_v30, %v9139_v31  ;;  %6438 = vmatpush.bf16.msra.mxu3 %v9650_v28  ;;  %v11169_v28 = vld [vmem:[#allocation8 + $0x2cc] sm:$0xf]  ;;  %v6252_v30 = vpop.f32.mrf.mxu0 }
 0x2af   :  { %v11509_v21 = vld [vmem:[#allocation8 + $0xd64] sm:$0xf0]  ;;  %6433 = vmatmul.bf16.vlgmr.msra.gmra.mxu2 %v11937_v1  ;;  %v8979_v53 = vld [vmem:[#allocation8 + $0x2a8] sm:$0xf0] }
 0x2b0   :  { %6477 = vmatpush.bf16.msrb.mxu2 %v10418_v39  ;;  %v9937_v25 = vld [vmem:[#allocation8 + $0xa08] sm:$0xf]  ;;  %6457 = vmatpush.bf16.msrb.mxu0 %v9714_v10  ;;  %v10354_v38 = vor.u32 %v11509_v21, %v10353_v20  ;;  %v8854_v39 = vor.u32 %v11129_v24, %v8851_v51  ;;  %v8787_v10 = vld [vmem:[#allocation8 + $0x128] sm:$0xf0] }
 0x2b1   :  { %v11405_v27 = vld [vmem:[#allocation8 + $0xa24] sm:$0xf0]  ;;  %v8790_v21 = vor.u32 %v11113_v63, %v8787_v10  ;;  %v8723_v51 = vld [vmem:[#allocation8 + $0xa8] sm:$0xf0] }
 0x2b2   :  { %6469 = vmatpush.bf16.msrb.mxu1 %v10002_v19  ;;  %v9617_v40 = vld [vmem:[#allocation8 + $0x788] sm:$0xf]  ;;  %v9938_v45 = vor.u32 %v11405_v27, %v9937_v25  ;;  %v11105_v25 = vld [vmem:[#allocation8 + $0xcc] sm:$0xf] }
 0x2b3   :  { %v11325_v8 = vld [vmem:[#allocation8 + $0x7a4] sm:$0xf0]  ;;  %v9363_v59 = vld [vmem:[#allocation8 + $0x5a8] sm:$0xf0] }
 0x2b4   :  { %6478 = vmatpush.bf16.msrb.mxu2 %v10386_v11  ;;  %v10321_v42 = vld [vmem:[#allocation8 + $0xd08] sm:$0xf]  ;;  %v9618_v50 = vor.u32 %v11325_v8, %v9617_v40  ;;  %6458 = vmatpush.bf16.msrb.mxu0 %v9682_v36  ;;  %v11177_v11 = vld [vmem:[#allocation8 + $0x30c] sm:$0xf]  ;;  %v6253_v40 = vadd.f32 %v6252_v30, %v11996_v9  ;;  %v6265_v8 = vpop.f32.mrf.mxu1 }
 0x2b5   :  { %v11501_v14 = vld [vmem:[#allocation8 + $0xd24] sm:$0xf0]  ;;  %v9046_v23 = vor.u32 %v11177_v11, %v9043_v12  ;;  %v8691_v61 = vld [vmem:[#allocation8 + $0x68] sm:$0xf0] }
 0x2b6   :  { %6470 = vmatpush.bf16.msrb.mxu1 %v9970_v15  ;;  %v10322_v54 = vor.u32 %v11501_v14, %v10321_v42  ;;  %v9585_v55 = vld [vmem:[#allocation8 + $0x748] sm:$0xf]  ;;  %6439 = vmatpush.bf16.msra.mxu3 %v9618_v50  ;;  %v8758_v42 = vor.u32 %v11105_v25, %v8755_v26  ;;  %v9014_v14 = vor.u32 %v11169_v28, %v9011_v43  ;;  %v11153_v5 = vld [vmem:[#allocation8 + $0x24c] sm:$0xf] }
 0x2b7   :  { %v11317_v56 = vld [vmem:[#allocation8 + $0x764] sm:$0xf0]  ;;  %6459 = vmatmul.bf16.vlgmr.msrb.gmra.mxu0 %v11952_v48  ;;  %v12003_v24 = vadd.f32 %v6265_v8, %v6253_v40  ;;  %v8947_v62 = vld [vmem:[#allocation8 + $0x268] sm:$0xf0] }
 0x2b8   :  { %6479 = vmatpush.bf16.msrb.mxu2 %v10354_v38  ;;  %v10289_v57 = vld [vmem:[#allocation8 + $0xcc8] sm:$0xf]  ;;  %6503 = vmatpush.bf16.msra.mxu0 %v8886_v37  ;;  %v9586_v19 = vor.u32 %v11317_v56, %v9585_v55  ;;  %v11265_v37 = vld [vmem:[#allocation8 + $0x5cc] sm:$0xf] }
 0x2b9   :  { %v11493_v58 = vld [vmem:[#allocation8 + $0xce4] sm:$0xf0]  ;;  %v11081_v10 = vld [vmem:[#allocation8 + $0xc] sm:$0xf] }
 0x2ba   :  { %6471 = vmatpush.bf16.msrb.mxu1 %v9938_v45  ;;  %v10290_v18 = vor.u32 %v11493_v58, %v10289_v57  ;;  %v9553_v22 = vld [vmem:[#allocation8 + $0x708] sm:$0xf]  ;;  %6440 = vmatpush.bf16.msra.mxu3 %v9586_v19  ;;  %v8726_v57 = vor.u32 %v11097_v33, %v8723_v51  ;;  %v8982_v58 = vor.u32 %v11161_v52, %v8979_v53  ;;  %v11249_v11 = vld [vmem:[#allocation8 + $0x54c] sm:$0xf] }
 0x2bb   :  { %v11309_v16 = vld [vmem:[#allocation8 + $0x724] sm:$0xf0]  ;;  %v9331_v12 = vld [vmem:[#allocation8 + $0x568] sm:$0xf0] }
 0x2bc   :  { %6480 = vmatpush.bf16.msrb.mxu2 %v10322_v54  ;;  %v10257_v2 = vld [vmem:[#allocation8 + $0xc88] sm:$0xf]  ;;  %6504 = vmatpush.bf16.msra.mxu0 %v8854_v39  ;;  %v9554_v7 = vor.u32 %v11309_v16, %v9553_v22  ;;  %v11089_v39 = vld [vmem:[#allocation8 + $0x4c] sm:$0xf] }
 0x2bd   :  { %6472 = vmatmul.bf16.vlgmr.msrb.gmra.mxu1 %v11950_v46  ;;  %v11485_v17 = vld [vmem:[#allocation8 + $0xca4] sm:$0xf0]  ;;  %v8694_v63 = vor.u32 %v11089_v39, %v8691_v61  ;;  %v11457_v25 = vld [vmem:[#allocation8 + $0xbcc] sm:$0xf] }
 0x2be   :  { %6516 = vmatpush.bf16.msra.mxu1 %v9142_v49  ;;  %v10258_v32 = vor.u32 %v11485_v17, %v10257_v2  ;;  %v9521_v13 = vld [vmem:[#allocation8 + $0x6c8] sm:$0xf]  ;;  %6441 = vmatpush.bf16.msra.mxu3 %v9554_v7  ;;  %v9395_v49 = vld [vmem:[#allocation8 + $0x5e8] sm:$0xf0]  ;;  %v6267_v2 = vpop.f32.mrf.mxu1  ;;  %v8950_v7 = vor.u32 %v11153_v5, %v8947_v62 }
 0x2bf   :  { %v11301_v15 = vld [vmem:[#allocation8 + $0x6e4] sm:$0xf0]  ;;  %v9398_v56 = vor.u32 %v11265_v37, %v9395_v49  ;;  %v10163_v26 = vld [vmem:[#allocation8 + $0xbe8] sm:$0xf0] }
 0x2c0   :  { %6481 = vmatpush.bf16.msrb.mxu2 %v10290_v18  ;;  %v10225_v4 = vld [vmem:[#allocation8 + $0xc48] sm:$0xf]  ;;  %6505 = vmatpush.bf16.msra.mxu0 %v8822_v3  ;;  %v9522_v27 = vor.u32 %v11301_v15, %v9521_v13  ;;  %v6254_v18 = vpop.f32.mrf.mxu0  ;;  %v8659_v13 = vld [vmem:[#allocation8 + $0x28] sm:$0xf0]  ;;  %v10166_v8 = vor.u32 %v11457_v25, %v10163_v26 }
 0x2c1   :  { %v11477_v20 = vld [vmem:[#allocation8 + $0xc64] sm:$0xf0]  ;;  %v11145_v15 = vld [vmem:[#allocation8 + $0x20c] sm:$0xf]  ;;  %v8662_v30 = vor.u32 %v11081_v10, %v8659_v13 }
 0x2c2   :  { %6517 = vmatpush.bf16.msra.mxu1 %v9110_v29  ;;  %v10226_v31 = vor.u32 %v11477_v20, %v10225_v4  ;;  %v9489_v36 = vld [vmem:[#allocation8 + $0x688] sm:$0xf]  ;;  %6442 = vmatpush.bf16.msra.mxu3 %v9522_v27  ;;  %v11257_v29 = vld [vmem:[#allocation8 + $0x58c] sm:$0xf]  ;;  %v9334_v27 = vor.u32 %v11249_v11, %v9331_v12 }
 0x2c3   :  { %v11293_v38 = vld [vmem:[#allocation8 + $0x6a4] sm:$0xf0]  ;;  %v9366_v17 = vor.u32 %v11257_v29, %v9363_v59  ;;  %v8915_v4 = vld [vmem:[#allocation8 + $0x228] sm:$0xf0] }
 0x2c4   :  { %6482 = vmatpush.bf16.msrb.mxu2 %v10258_v32  ;;  %v10193_v41 = vld [vmem:[#allocation8 + $0xc08] sm:$0xf]  ;;  %6506 = vmatpush.bf16.msra.mxu0 %v8790_v21  ;;  %v9490_v50 = vor.u32 %v11293_v38, %v9489_v36  ;;  %v11393_v21 = vld [vmem:[#allocation8 + $0x9cc] sm:$0xf]  ;;  %v8918_v38 = vor.u32 %v11145_v15, %v8915_v4 }
 0x2c5   :  { %v11469_v45 = vld [vmem:[#allocation8 + $0xc24] sm:$0xf0]  ;;  %v9299_v36 = vld [vmem:[#allocation8 + $0x528] sm:$0xf0] }
 0x2c6   :  { %6518 = vmatpush.bf16.msra.mxu1 %v9078_v44  ;;  %v10194_v54 = vor.u32 %v11469_v45, %v10193_v41  ;;  %v9457_v9 = vld [vmem:[#allocation8 + $0x648] sm:$0xf]  ;;  %6443 = vmatpush.bf16.msra.mxu3 %v9490_v50  ;;  %v11385_v45 = vld [vmem:[#allocation8 + $0x98c] sm:$0xf] }
 0x2c7   :  { %v11285_v55 = vld [vmem:[#allocation8 + $0x664] sm:$0xf0]  ;;  %v10131_v37 = vld [vmem:[#allocation8 + $0xba8] sm:$0xf0] }
 0x2c8   :  { %6483 = vmatpush.bf16.msrb.mxu2 %v10226_v31  ;;  %6507 = vmatpush.bf16.msra.mxu0 %v8758_v42  ;;  %v9458_v19 = vor.u32 %v11285_v55, %v9457_v9  ;;  %v9425_v22 = vld [vmem:[#allocation8 + $0x608] sm:$0xf]  ;;  %v11241_v31 = vld [vmem:[#allocation8 + $0x50c] sm:$0xf] }
 0x2c9   :  { %v11277_v16 = vld [vmem:[#allocation8 + $0x624] sm:$0xf0]  ;;  %v9875_v42 = vld [vmem:[#allocation8 + $0x9a8] sm:$0xf0]  ;;  %v9302_v33 = vor.u32 %v11241_v31, %v9299_v36 }
 0x2ca   :  { %6519 = vmatpush.bf16.msra.mxu1 %v9046_v23  ;;  %v10673_v3 = vld [vmem:[#allocation8 + $0xfc8] sm:$0xf]  ;;  %6444 = vmatpush.bf16.msra.mxu3 %v9458_v19  ;;  %v9426_v32 = vor.u32 %v11277_v16, %v9425_v22  ;;  %v9907_v23 = vld [vmem:[#allocation8 + $0x9e8] sm:$0xf0]  ;;  %v9878_v53 = vor.u32 %v11385_v45, %v9875_v42 }
 0x2cb   :  { %v11589_v44 = vld [vmem:[#allocation8 + $0xfe4] sm:$0xf0]  ;;  %v9910_v40 = vor.u32 %v11393_v21, %v9907_v23  ;;  %v11233_v51 = vld [vmem:[#allocation8 + $0x4cc] sm:$0xf] }
 0x2cc   :  { %6484 = vmatpush.bf16.msrb.mxu2 %v10194_v54  ;;  %6508 = vmatpush.bf16.msra.mxu0 %v8726_v57  ;;  %v10674_v20 = vor.u32 %v11589_v44, %v10673_v3  ;;  %v10641_v28 = vld [vmem:[#allocation8 + $0xf88] sm:$0xf]  ;;  %v9267_v52 = vld [vmem:[#allocation8 + $0x4e8] sm:$0xf0] }
 0x2cd   :  { %v11581_v43 = vld [vmem:[#allocation8 + $0xfa4] sm:$0xf0]  ;;  %v11377_v55 = vld [vmem:[#allocation8 + $0x94c] sm:$0xf] }
 0x2ce   :  { %6520 = vmatpush.bf16.msra.mxu1 %v9014_v14  ;;  %6445 = vmatpush.bf16.msra.mxu3 %v9426_v32  ;;  %v10642_v41 = vor.u32 %v11581_v43, %v10641_v28  ;;  %v11449_v14 = vld [vmem:[#allocation8 + $0xb8c] sm:$0xf]  ;;  %v10609_v49 = vld [vmem:[#allocation8 + $0xf48] sm:$0xf]  ;;  %v6304_v21 = vpop.f32.mrf.mxu0 }
 0x2cf   :  { %6485 = vmatmul.bf16.vlgmr.msrb.gmra.mxu2 %v11973_v35  ;;  %v11573_v50 = vld [vmem:[#allocation8 + $0xf64] sm:$0xf0]  ;;  %v10134_v54 = vor.u32 %v11449_v14, %v10131_v37  ;;  %v11441_v57 = vld [vmem:[#allocation8 + $0xb4c] sm:$0xf] }
 0x2d0   :  { %6529 = vmatpush.bf16.msra.mxu2 %v9398_v56  ;;  %6509 = vmatpush.bf16.msra.mxu0 %v8694_v63  ;;  %v10610_v9 = vor.u32 %v11573_v50, %v10609_v49  ;;  %v9843_v56 = vld [vmem:[#allocation8 + $0x968] sm:$0xf0]  ;;  %v10577_v29 = vld [vmem:[#allocation8 + $0xf08] sm:$0xf] }
 0x2d1   :  { %6446 = vmatmul.bf16.vlgmr.msra.gmra.mxu3 %v11939_v6  ;;  %v10099_v39 = vld [vmem:[#allocation8 + $0xb68] sm:$0xf0]  ;;  %v11565_v59 = vld [vmem:[#allocation8 + $0xf24] sm:$0xf0]  ;;  %v9846_v5 = vor.u32 %v11377_v55, %v9843_v56 }
 0x2d2   :  { %6521 = vmatpush.bf16.msra.mxu1 %v8982_v58  ;;  %6490 = vmatpush.bf16.msrb.mxu3 %v10674_v20  ;;  %v9270_v58 = vor.u32 %v11233_v51, %v9267_v52  ;;  %v11225_v19 = vld [vmem:[#allocation8 + $0x48c] sm:$0xf]  ;;  %v10102_v62 = vor.u32 %v11441_v57, %v10099_v39  ;;  %v10578_v18 = vor.u32 %v11565_v59, %v10577_v29  ;;  %v10545_v44 = vld [vmem:[#allocation8 + $0xec8] sm:$0xf] }
 0x2d3   :  { %v9235_v61 = vld [vmem:[#allocation8 + $0x4a8] sm:$0xf0]  ;;  %v11557_v63 = vld [vmem:[#allocation8 + $0xee4] sm:$0xf0] }
 0x2d4   :  { %6530 = vmatpush.bf16.msra.mxu2 %v9366_v17  ;;  %6510 = vmatpush.bf16.msra.mxu0 %v8662_v30  ;;  %v11369_v22 = vld [vmem:[#allocation8 + $0x90c] sm:$0xf]  ;;  %v9238_v17 = vor.u32 %v11225_v19, %v9235_v61  ;;  %v10546_v13 = vor.u32 %v11557_v63, %v10545_v44  ;;  %v11549_v26 = vld [vmem:[#allocation8 + $0xea4] sm:$0xf0]  ;;  %v6317_v43 = vpop.f32.mrf.mxu1 }
 0x2d5   :  { %v9811_v16 = vld [vmem:[#allocation8 + $0x928] sm:$0xf0]  ;;  %v10481_v49 = vld [vmem:[#allocation8 + $0xe48] sm:$0xf] }
 0x2d6   :  { %6522 = vmatpush.bf16.msra.mxu1 %v8950_v7  ;;  %6491 = vmatpush.bf16.msrb.mxu3 %v10642_v41  ;;  %v11433_v2 = vld [vmem:[#allocation8 + $0xb0c] sm:$0xf]  ;;  %v3616_v7 = vperm.slane %v11992_v47, 1  ;;  %v9814_v12 = vor.u32 %v11369_v22, %v9811_v16  ;;  %v11541_v50 = vld [vmem:[#allocation8 + $0xe64] sm:$0xf0]  ;;  %v6306_v39 = vpop.f32.mrf.mxu0 }
 0x2d7   :  { %6511 = vmatmul.bf16.vlgmr.msra.gmra.mxu0 %v11933_v0  ;;  %v10067_v3 = vld [vmem:[#allocation8 + $0xb28] sm:$0xf0]  ;;  %v10482_v55 = vor.u32 %v11541_v50, %v10481_v49  ;;  %v10449_v59 = vld [vmem:[#allocation8 + $0xe08] sm:$0xf]  ;;  %v8825_v50 = vld [vmem:[#allocation8 + $0x150] sm:$0xf] }
 0x2d8   :  { %6531 = vmatpush.bf16.msra.mxu2 %v9334_v27  ;;  %6555 = vmatpush.bf16.msrb.mxu0 %v9910_v40  ;;  %v11217_v10 = vld [vmem:[#allocation8 + $0x44c] sm:$0xf]  ;;  %v10070_v32 = vor.u32 %v11433_v2, %v10067_v3  ;;  %v10513_v27 = vld [vmem:[#allocation8 + $0xe88] sm:$0xf]  ;;  %v6305_v28 = vadd.f32 %v6304_v21, %v3616_v7 }
 0x2d9   :  { %v9203_v11 = vld [vmem:[#allocation8 + $0x468] sm:$0xf0]  ;;  %v10514_v41 = vor.u32 %v11549_v26, %v10513_v27  ;;  %v11533_v19 = vld [vmem:[#allocation8 + $0xe24] sm:$0xf0] }
 0x2da   :  { %6523 = vmatpush.bf16.msra.mxu1 %v8918_v38  ;;  %6492 = vmatpush.bf16.msrb.mxu3 %v10610_v9  ;;  %v11361_v15 = vld [vmem:[#allocation8 + $0x8cc] sm:$0xf]  ;;  %v9206_v23 = vor.u32 %v11217_v10, %v9203_v11  ;;  %v12010_v40 = vadd.f32 %v6317_v43, %v6305_v28  ;;  %v10450_v44 = vor.u32 %v11533_v19, %v10449_v59 }
 0x2db   :  { %v9779_v4 = vld [vmem:[#allocation8 + $0x8e8] sm:$0xf0] }
 0x2dc   :  { %6532 = vmatpush.bf16.msra.mxu2 %v9302_v33  ;;  %6556 = vmatpush.bf16.msrb.mxu0 %v9878_v53  ;;  %v11425_v20 = vld [vmem:[#allocation8 + $0xacc] sm:$0xf]  ;;  %v9782_v31 = vor.u32 %v11361_v15, %v9779_v4  ;;  %v6319_v61 = vpop.f32.mrf.mxu1  ;;  %v11206_v4 = vld [vmem:[#allocation8 + $0x3ec] sm:$0xf0] }
 0x2dd   :  { %6524 = vmatmul.bf16.vlgmr.msra.gmra.mxu1 %v11935_v60  ;;  %v10035_v25 = vld [vmem:[#allocation8 + $0xae8] sm:$0xf0]  ;;  %v8793_v61 = vld [vmem:[#allocation8 + $0x110] sm:$0xf] }
 0x2de   :  { %6568 = vmatpush.bf16.msrb.mxu1 %v10166_v8  ;;  %6493 = vmatpush.bf16.msrb.mxu3 %v10578_v18  ;;  %v11209_v47 = vld [vmem:[#allocation8 + $0x40c] sm:$0xf]  ;;  %v10038_v8 = vor.u32 %v11425_v20, %v10035_v25 }
 0x2df   :  { %v9171_v30 = vld [vmem:[#allocation8 + $0x428] sm:$0xf0] }
 0x2e0   :  { %6533 = vmatpush.bf16.msra.mxu2 %v9270_v58  ;;  %6557 = vmatpush.bf16.msrb.mxu0 %v9846_v5  ;;  %v11521_v36 = vld [vmem:[#allocation8 + $0xdcc] sm:$0xf]  ;;  %v9174_v33 = vor.u32 %v11209_v47, %v9171_v30  ;;  %v8857_v30 = vld [vmem:[#allocation8 + $0x190] sm:$0xf] }
 0x2e1   :  { %v10419_v38 = vld [vmem:[#allocation8 + $0xde8] sm:$0xf0] }
 0x2e2   :  { %6569 = vmatpush.bf16.msrb.mxu1 %v10134_v54  ;;  %6494 = vmatpush.bf16.msrb.mxu3 %v10546_v13  ;;  %v11353_v45 = vld [vmem:[#allocation8 + $0x88c] sm:$0xf]  ;;  %v10422_v51 = vor.u32 %v11521_v36, %v10419_v38  ;;  %v9145_v13 = vld [vmem:[#allocation8 + $0x3d0] sm:$0xf] }
 0x2e3   :  { %v9747_v42 = vld [vmem:[#allocation8 + $0x8a8] sm:$0xf0]  ;;  %v9146_v43 = vor.u32 %v11206_v4, %v9145_v13  ;;  %v9113_v36 = vld [vmem:[#allocation8 + $0x390] sm:$0xf] }
 0x2e4   :  { %6534 = vmatpush.bf16.msra.mxu2 %v9238_v17  ;;  %6558 = vmatpush.bf16.msrb.mxu0 %v9814_v12  ;;  %v11417_v14 = vld [vmem:[#allocation8 + $0xa8c] sm:$0xf]  ;;  %v9750_v52 = vor.u32 %v11353_v45, %v9747_v42  ;;  %v8889_v12 = vld [vmem:[#allocation8 + $0x1d0] sm:$0xf] }
 0x2e5   :  { %v10003_v37 = vld [vmem:[#allocation8 + $0xaa8] sm:$0xf0]  ;;  %v11174_v13 = vld [vmem:[#allocation8 + $0x2ec] sm:$0xf0] }
 0x2e6   :  { %6570 = vmatpush.bf16.msrb.mxu1 %v10102_v62  ;;  %v11513_v53 = vld [vmem:[#allocation8 + $0xd8c] sm:$0xf]  ;;  %6495 = vmatpush.bf16.msrb.mxu3 %v10514_v41  ;;  %v10006_v9 = vor.u32 %v11417_v14, %v10003_v37 }
 0x2e7   :  { %v10387_v54 = vld [vmem:[#allocation8 + $0xda8] sm:$0xf0] }
 0x2e8   :  { %6535 = vmatpush.bf16.msra.mxu2 %v9206_v23  ;;  %6559 = vmatpush.bf16.msrb.mxu0 %v9782_v31  ;;  %v11345_v56 = vld [vmem:[#allocation8 + $0x84c] sm:$0xf]  ;;  %v10390_v5 = vor.u32 %v11513_v53, %v10387_v54  ;;  %v11134_v31 = vld [vmem:[#allocation8 + $0x1ac] sm:$0xf0] }
 0x2e9   :  { %v9715_v57 = vld [vmem:[#allocation8 + $0x868] sm:$0xf0]  ;;  %v11190_v54 = vld [vmem:[#allocation8 + $0x36c] sm:$0xf0] }
 0x2ea   :  { %6571 = vmatpush.bf16.msrb.mxu1 %v10070_v32  ;;  %v11409_v58 = vld [vmem:[#allocation8 + $0xa4c] sm:$0xf]  ;;  %v9718_v22 = vor.u32 %v11345_v56, %v9715_v57  ;;  %6496 = vmatpush.bf16.msrb.mxu3 %v10482_v55  ;;  %v11142_v32 = vld [vmem:[#allocation8 + $0x1ec] sm:$0xf0]  ;;  %v6278_v56 = vpop.f32.mrf.mxu2 }
 0x2eb   :  { %v9971_v29 = vld [vmem:[#allocation8 + $0xa68] sm:$0xf0]  ;;  %v8890_v28 = vor.u32 %v11142_v32, %v8889_v12  ;;  %v12017_v39 = vadd.f32 %v6278_v56, %v12003_v24 }
 0x2ec   :  { %6536 = vmatpush.bf16.msra.mxu2 %v9174_v33  ;;  %v11329_v62 = vld [vmem:[#allocation8 + $0x7cc] sm:$0xf]  ;;  %6560 = vmatpush.bf16.msrb.mxu0 %v9750_v52  ;;  %v9974_v3 = vor.u32 %v11409_v58, %v9971_v29  ;;  %v8858_v33 = vor.u32 %v11134_v31, %v8857_v30  ;;  %v9081_v52 = vld [vmem:[#allocation8 + $0x350] sm:$0xf] }
 0x2ed   :  { %v9651_v18 = vld [vmem:[#allocation8 + $0x7e8] sm:$0xf0]  ;;  %v9082_v59 = vor.u32 %v11190_v54, %v9081_v52  ;;  %v8729_v30 = vld [vmem:[#allocation8 + $0x90] sm:$0xf] }
 0x2ee   :  { %6572 = vmatpush.bf16.msrb.mxu1 %v10038_v8  ;;  %v11337_v16 = vld [vmem:[#allocation8 + $0x80c] sm:$0xf]  ;;  %v9654_v11 = vor.u32 %v11329_v62, %v9651_v18  ;;  %6497 = vmatpush.bf16.msrb.mxu3 %v10450_v44  ;;  %v11198_v8 = vld [vmem:[#allocation8 + $0x3ac] sm:$0xf0] }
 0x2ef   :  { %v11505_v2 = vld [vmem:[#allocation8 + $0xd4c] sm:$0xf]  ;;  %6537 = vmatmul.bf16.vlgmr.msra.gmra.mxu2 %v11937_v1  ;;  %v9114_v37 = vor.u32 %v11198_v8, %v9113_v36  ;;  %v9049_v62 = vld [vmem:[#allocation8 + $0x310] sm:$0xf] }
 0x2f0   :  { %6581 = vmatpush.bf16.msrb.mxu2 %v10422_v51  ;;  %v10355_v17 = vld [vmem:[#allocation8 + $0xd68] sm:$0xf0]  ;;  %6561 = vmatpush.bf16.msrb.mxu0 %v9718_v22  ;;  %v11126_v51 = vld [vmem:[#allocation8 + $0x16c] sm:$0xf0] }
 0x2f1   :  { %v9683_v63 = vld [vmem:[#allocation8 + $0x828] sm:$0xf0]  ;;  %v10358_v15 = vor.u32 %v11505_v2, %v10355_v17  ;;  %6498 = vmatmul.bf16.vlgmr.msrb.gmra.mxu3 %v11987_v34  ;;  %v8826_v29 = vor.u32 %v11126_v51, %v8825_v50  ;;  %v11182_v22 = vld [vmem:[#allocation8 + $0x32c] sm:$0xf0] }
 0x2f2   :  { %6573 = vmatpush.bf16.msrb.mxu1 %v10006_v9  ;;  %v11401_v7 = vld [vmem:[#allocation8 + $0xa0c] sm:$0xf]  ;;  %v9686_v23 = vor.u32 %v11337_v16, %v9683_v63  ;;  %6542 = vmatpush.bf16.msra.mxu3 %v9654_v11  ;;  %v9050_v24 = vor.u32 %v11182_v22, %v9049_v62  ;;  %v9017_v11 = vld [vmem:[#allocation8 + $0x2d0] sm:$0xf] }
 0x2f3   :  { %v9939_v10 = vld [vmem:[#allocation8 + $0xa28] sm:$0xf0]  ;;  %v11102_v31 = vld [vmem:[#allocation8 + $0xac] sm:$0xf0] }
 0x2f4   :  { %6582 = vmatpush.bf16.msrb.mxu2 %v10390_v5  ;;  %v11321_v20 = vld [vmem:[#allocation8 + $0x78c] sm:$0xf]  ;;  %v9942_v26 = vor.u32 %v11401_v7, %v9939_v10  ;;  %6562 = vmatpush.bf16.msrb.mxu0 %v9686_v23  ;;  %v11118_v5 = vld [vmem:[#allocation8 + $0x12c] sm:$0xf0]  ;;  %v12019_v12 = vpop.f32.mrf.mxu0 }
 0x2f5   :  { %v9619_v21 = vld [vmem:[#allocation8 + $0x7a8] sm:$0xf0]  ;;  %v8794_v44 = vor.u32 %v11118_v5, %v8793_v61  ;;  %v8761_v7 = vld [vmem:[#allocation8 + $0xd0] sm:$0xf] }
 0x2f6   :  { %v11497_v25 = vld [vmem:[#allocation8 + $0xd0c] sm:$0xf]  ;;  %6574 = vmatpush.bf16.msrb.mxu1 %v9974_v3  ;;  %v9622_v47 = vor.u32 %v11321_v20, %v9619_v21  ;;  %v11110_v10 = vld [vmem:[#allocation8 + $0xec] sm:$0xf0]  ;;  %v6280_v21 = vpop.f32.mrf.mxu2 }
 0x2f7   :  { %v10323_v27 = vld [vmem:[#allocation8 + $0xd28] sm:$0xf0]  ;;  %6563 = vmatmul.bf16.vlgmr.msrb.gmra.mxu0 %v11952_v48  ;;  %v8985_v36 = vld [vmem:[#allocation8 + $0x290] sm:$0xf] }
 0x2f8   :  { %6583 = vmatpush.bf16.msrb.mxu2 %v10358_v15  ;;  %v10326_v38 = vor.u32 %v11497_v25, %v10323_v27  ;;  %v11313_v41 = vld [vmem:[#allocation8 + $0x74c] sm:$0xf]  ;;  %6607 = vmatpush.bf16.msra.mxu0 %v8890_v28  ;;  %v8762_v27 = vor.u32 %v11110_v10, %v8761_v7  ;;  %v11270_v28 = vld [vmem:[#allocation8 + $0x5ec] sm:$0xf0] }
 0x2f9   :  { %v9587_v45 = vld [vmem:[#allocation8 + $0x768] sm:$0xf0]  ;;  %6543 = vmatpush.bf16.msra.mxu3 %v9622_v47  ;;  %v11166_v8 = vld [vmem:[#allocation8 + $0x2ac] sm:$0xf0] }
 0x2fa   :  { %v11489_v42 = vld [vmem:[#allocation8 + $0xccc] sm:$0xf]  ;;  %6575 = vmatpush.bf16.msrb.mxu1 %v9942_v26  ;;  %v9590_v49 = vor.u32 %v11313_v41, %v9587_v45  ;;  %v12021_v20 = vpop.f32.mrf.mxu1  ;;  %v9401_v26 = vld [vmem:[#allocation8 + $0x5d0] sm:$0xf] }
 0x2fb   :  { %v10291_v14 = vld [vmem:[#allocation8 + $0xce8] sm:$0xf0]  ;;  %v8697_v51 = vld [vmem:[#allocation8 + $0x50] sm:$0xf] }
 0x2fc   :  { %6584 = vmatpush.bf16.msrb.mxu2 %v10326_v38  ;;  %v10294_v53 = vor.u32 %v11489_v42, %v10291_v14  ;;  %v11305_v9 = vld [vmem:[#allocation8 + $0x70c] sm:$0xf]  ;;  %6608 = vmatpush.bf16.msra.mxu0 %v8858_v33  ;;  %v9402_v42 = vor.u32 %v11270_v28, %v9401_v26  ;;  %v8730_v14 = vor.u32 %v11102_v31, %v8729_v30  ;;  %v9369_v33 = vld [vmem:[#allocation8 + $0x590] sm:$0xf]  ;;  %v6358_v54 = vpop.f32.mrf.mxu0 }
 0x2fd   :  { %v9555_v55 = vld [vmem:[#allocation8 + $0x728] sm:$0xf0]  ;;  %6576 = vmatmul.bf16.vlgmr.msrb.gmra.mxu1 %v11950_v46  ;;  %6544 = vmatpush.bf16.msra.mxu3 %v9590_v49  ;;  %v8986_v49 = vor.u32 %v11166_v8, %v8985_v36  ;;  %v11094_v52 = vld [vmem:[#allocation8 + $0x6c] sm:$0xf0] }
 0x2fe   :  { %6620 = vmatpush.bf16.msra.mxu1 %v9146_v43  ;;  %v11481_v57 = vld [vmem:[#allocation8 + $0xc8c] sm:$0xf]  ;;  %v9558_v19 = vor.u32 %v11305_v9, %v9555_v55  ;;  %v9018_v43 = vor.u32 %v11174_v13, %v9017_v11  ;;  %v11158_v9 = vld [vmem:[#allocation8 + $0x26c] sm:$0xf0]  ;;  %v8698_v5 = vor.u32 %v11094_v52, %v8697_v51 }
 0x2ff   :  { %v10259_v58 = vld [vmem:[#allocation8 + $0xca8] sm:$0xf0]  ;;  %v8665_v62 = vld [vmem:[#allocation8 + $0x10] sm:$0xf] }
 0x300   :  { %6585 = vmatpush.bf16.msrb.mxu2 %v10294_v53  ;;  %v10262_v18 = vor.u32 %v11481_v57, %v10259_v58  ;;  %v11297_v16 = vld [vmem:[#allocation8 + $0x6cc] sm:$0xf]  ;;  %6609 = vmatpush.bf16.msra.mxu0 %v8826_v29  ;;  %v8953_v53 = vld [vmem:[#allocation8 + $0x250] sm:$0xf]  ;;  %v6330_v58 = vpop.f32.mrf.mxu2 }
 0x301   :  { %v9523_v2 = vld [vmem:[#allocation8 + $0x6e8] sm:$0xf0]  ;;  %6545 = vmatpush.bf16.msra.mxu3 %v9558_v19  ;;  %v12024_v61 = vadd.f32 %v6330_v58, %v12010_v40  ;;  %v11254_v22 = vld [vmem:[#allocation8 + $0x56c] sm:$0xf0] }
 0x302   :  { %6621 = vmatpush.bf16.msra.mxu1 %v9114_v37  ;;  %v11473_v17 = vld [vmem:[#allocation8 + $0xc4c] sm:$0xf]  ;;  %v9526_v63 = vor.u32 %v11297_v16, %v9523_v2  ;;  %v11262_v37 = vld [vmem:[#allocation8 + $0x5ac] sm:$0xf0]  ;;  %v6371_v57 = vpop.f32.mrf.mxu1  ;;  %v8954_v16 = vor.u32 %v11158_v9, %v8953_v53 }
 0x303   :  { %v10227_v3 = vld [vmem:[#allocation8 + $0xc68] sm:$0xf0]  ;;  %v9370_v29 = vor.u32 %v11262_v37, %v9369_v33  ;;  %v11398_v7 = vld [vmem:[#allocation8 + $0x9ec] sm:$0xf0] }
 0x304   :  { %6586 = vmatpush.bf16.msrb.mxu2 %v10262_v18  ;;  %v10230_v32 = vor.u32 %v11473_v17, %v10227_v3  ;;  %v11289_v15 = vld [vmem:[#allocation8 + $0x68c] sm:$0xf]  ;;  %6610 = vmatpush.bf16.msra.mxu0 %v8794_v44  ;;  %v9337_v18 = vld [vmem:[#allocation8 + $0x550] sm:$0xf] }
 0x305   :  { %v9491_v4 = vld [vmem:[#allocation8 + $0x6a8] sm:$0xf0]  ;;  %6546 = vmatpush.bf16.msra.mxu3 %v9526_v63  ;;  %v11086_v17 = vld [vmem:[#allocation8 + $0x2c] sm:$0xf0]  ;;  %v9338_v40 = vor.u32 %v11254_v22, %v9337_v18 }
 0x306   :  { %6622 = vmatpush.bf16.msra.mxu1 %v9082_v59  ;;  %v11465_v23 = vld [vmem:[#allocation8 + $0xc0c] sm:$0xf]  ;;  %v9494_v47 = vor.u32 %v11289_v15, %v9491_v4  ;;  %v8921_v3 = vld [vmem:[#allocation8 + $0x210] sm:$0xf]  ;;  %v8666_v15 = vor.u32 %v11086_v17, %v8665_v62 }
 0x307   :  { %v10195_v25 = vld [vmem:[#allocation8 + $0xc28] sm:$0xf0]  ;;  %v11150_v44 = vld [vmem:[#allocation8 + $0x22c] sm:$0xf0] }
 0x308   :  { %6587 = vmatpush.bf16.msrb.mxu2 %v10230_v32  ;;  %v10198_v38 = vor.u32 %v11465_v23, %v10195_v25  ;;  %v11281_v41 = vld [vmem:[#allocation8 + $0x64c] sm:$0xf]  ;;  %6611 = vmatpush.bf16.msra.mxu0 %v8762_v27  ;;  %v9913_v63 = vld [vmem:[#allocation8 + $0x9d0] sm:$0xf]  ;;  %v8922_v23 = vor.u32 %v11150_v44, %v8921_v3  ;;  %v6332_v30 = vpop.f32.mrf.mxu2 }
 0x309   :  { %v9459_v45 = vld [vmem:[#allocation8 + $0x668] sm:$0xf0]  ;;  %6547 = vmatpush.bf16.msra.mxu3 %v9494_v47  ;;  %v10169_v10 = vld [vmem:[#allocation8 + $0xbd0] sm:$0xf]  ;;  %v9914_v25 = vor.u32 %v11398_v7, %v9913_v63 }
 0x30a   :  { %6623 = vmatpush.bf16.msra.mxu1 %v9050_v24  ;;  %v9462_v50 = vor.u32 %v11281_v41, %v9459_v45  ;;  %v11273_v55 = vld [vmem:[#allocation8 + $0x60c] sm:$0xf]  ;;  %v11462_v11 = vld [vmem:[#allocation8 + $0xbec] sm:$0xf0] }
 0x30b   :  { %v9427_v56 = vld [vmem:[#allocation8 + $0x628] sm:$0xf0]  ;;  %v9305_v4 = vld [vmem:[#allocation8 + $0x510] sm:$0xf]  ;;  %v10170_v27 = vor.u32 %v11462_v11, %v10169_v10 }
 0x30c   :  { %6588 = vmatpush.bf16.msrb.mxu2 %v10198_v38  ;;  %v11585_v59 = vld [vmem:[#allocation8 + $0xfcc] sm:$0xf]  ;;  %6612 = vmatpush.bf16.msra.mxu0 %v8730_v14  ;;  %v9430_v2 = vor.u32 %v11273_v55, %v9427_v56  ;;  %v11246_v21 = vld [vmem:[#allocation8 + $0x52c] sm:$0xf0] }
 0x30d   :  { %v10675_v19 = vld [vmem:[#allocation8 + $0xfe8] sm:$0xf0]  ;;  %6548 = vmatpush.bf16.msra.mxu3 %v9462_v50  ;;  %v9881_v28 = vld [vmem:[#allocation8 + $0x990] sm:$0xf]  ;;  %v9306_v31 = vor.u32 %v11246_v21, %v9305_v4 }
 0x30e   :  { %6624 = vmatpush.bf16.msra.mxu1 %v9018_v43  ;;  %v10678_v24 = vor.u32 %v11585_v59, %v10675_v19  ;;  %v11577_v32 = vld [vmem:[#allocation8 + $0xf8c] sm:$0xf]  ;;  %v11390_v43 = vld [vmem:[#allocation8 + $0x9ac] sm:$0xf0] }
 0x30f   :  { %6589 = vmatmul.bf16.vlgmr.msrb.gmra.mxu2 %v11973_v35  ;;  %v10643_v13 = vld [vmem:[#allocation8 + $0xfa8] sm:$0xf0]  ;;  %v10137_v47 = vld [vmem:[#allocation8 + $0xb90] sm:$0xf] }
 0x310   :  { %6633 = vmatpush.bf16.msra.mxu2 %v9402_v42  ;;  %6613 = vmatpush.bf16.msra.mxu0 %v8698_v5  ;;  %v10646_v26 = vor.u32 %v11577_v32, %v10643_v13  ;;  %v11454_v36 = vld [vmem:[#allocation8 + $0xbac] sm:$0xf0]  ;;  %v11569_v38 = vld [vmem:[#allocation8 + $0xf4c] sm:$0xf]  ;;  %v9882_v42 = vor.u32 %v11390_v43, %v9881_v28 }
 0x311   :  { %6549 = vmatpush.bf16.msra.mxu3 %v9430_v2  ;;  %v10611_v8 = vld [vmem:[#allocation8 + $0xf68] sm:$0xf0]  ;;  %v9273_v41 = vld [vmem:[#allocation8 + $0x4d0] sm:$0xf]  ;;  %v10138_v14 = vor.u32 %v11454_v36, %v10137_v47  ;;  %v12032_v2 = vld [vmem:[#allocation10] sm:$0xff] }
 0x312   :  { %6625 = vmatpush.bf16.msra.mxu1 %v8986_v49  ;;  %v11238_v45 = vld [vmem:[#allocation8 + $0x4ec] sm:$0xf0]  ;;  %v10614_v33 = vor.u32 %v11569_v38, %v10611_v8  ;;  %v11561_v53 = vld [vmem:[#allocation8 + $0xf0c] sm:$0xf]  ;;  %v12030_v5 = vpop.f32.mrf.mxu2  ;;  %v3617_v17 = vperm.slane %v12032_v2, 2 }
 0x313   :  { %v9849_v37 = vld [vmem:[#allocation8 + $0x950] sm:$0xf]  ;;  %v9274_v51 = vor.u32 %v11238_v45, %v9273_v41  ;;  %v10579_v54 = vld [vmem:[#allocation8 + $0xf28] sm:$0xf0] }
 0x314   :  { %6634 = vmatpush.bf16.msra.mxu2 %v9370_v29  ;;  %6550 = vmatmul.bf16.vlgmr.msra.gmra.mxu3 %v11939_v6  ;;  %v11382_v49 = vld [vmem:[#allocation8 + $0x96c] sm:$0xf0]  ;;  %v10582_v58 = vor.u32 %v11561_v53, %v10579_v54  ;;  %v11553_v22 = vld [vmem:[#allocation8 + $0xecc] sm:$0xf]  ;;  %v6408_v32 = vpop.f32.mrf.mxu0 }
 0x315   :  { %6594 = vmatpush.bf16.msrb.mxu3 %v10678_v24  ;;  %6614 = vmatpush.bf16.msra.mxu0 %v8666_v15  ;;  %v10105_v50 = vld [vmem:[#allocation8 + $0xb50] sm:$0xf]  ;;  %v9850_v56 = vor.u32 %v11382_v49, %v9849_v37  ;;  %v11545_v4 = vld [vmem:[#allocation8 + $0xe8c] sm:$0xf] }
 0x316   :  { %6626 = vmatpush.bf16.msra.mxu1 %v8954_v16  ;;  %v11446_v52 = vld [vmem:[#allocation8 + $0xb6c] sm:$0xf0]  ;;  %v10547_v16 = vld [vmem:[#allocation8 + $0xee8] sm:$0xf0] }
 0x317   :  { %v9241_v9 = vld [vmem:[#allocation8 + $0x490] sm:$0xf]  ;;  %v10106_v57 = vor.u32 %v11446_v52, %v10105_v50  ;;  %v10550_v7 = vor.u32 %v11553_v22, %v10547_v16  ;;  %v10515_v21 = vld [vmem:[#allocation8 + $0xea8] sm:$0xf0] }
 0x318   :  { %6635 = vmatpush.bf16.msra.mxu2 %v9338_v40  ;;  %6615 = vmatmul.bf16.vlgmr.msra.gmra.mxu0 %v11933_v0  ;;  %v11230_v55 = vld [vmem:[#allocation8 + $0x4ac] sm:$0xf0]  ;;  %v10518_v8 = vor.u32 %v11545_v4, %v10515_v21  ;;  %v11537_v49 = vld [vmem:[#allocation8 + $0xe4c] sm:$0xf]  ;;  %v8891_v4 = vld [vmem:[#allocation8 + $0x1f0] sm:$0xf0] }
 0x319   :  { %6659 = vmatpush.bf16.msrb.mxu0 %v9914_v25  ;;  %6595 = vmatpush.bf16.msrb.mxu3 %v10646_v26  ;;  %v9817_v29 = vld [vmem:[#allocation8 + $0x910] sm:$0xf]  ;;  %v9242_v62 = vor.u32 %v11230_v55, %v9241_v9  ;;  %v11202_v21 = vld [vmem:[#allocation8 + $0x3d4] sm:$0xf] }
 0x31a   :  { %6627 = vmatpush.bf16.msra.mxu1 %v8922_v23  ;;  %v11374_v59 = vld [vmem:[#allocation8 + $0x92c] sm:$0xf0]  ;;  %v6409_v23 = vadd.f32 %v6408_v32, %v3617_v17  ;;  %v6421_v25 = vpop.f32.mrf.mxu1 }
 0x31b   :  { %v10073_v19 = vld [vmem:[#allocation8 + $0xb10] sm:$0xf]  ;;  %v9818_v24 = vor.u32 %v11374_v59, %v9817_v29  ;;  %v11529_v59 = vld [vmem:[#allocation8 + $0xe0c] sm:$0xf] }
 0x31c   :  { %6636 = vmatpush.bf16.msra.mxu2 %v9306_v31  ;;  %v11438_v18 = vld [vmem:[#allocation8 + $0xb2c] sm:$0xf0]  ;;  %v12038_v36 = vadd.f32 %v6421_v25, %v6409_v23  ;;  %v9147_v25 = vld [vmem:[#allocation8 + $0x3f0] sm:$0xf0] }
 0x31d   :  { %6628 = vmatmul.bf16.vlgmr.msra.gmra.mxu1 %v11935_v60  ;;  %6660 = vmatpush.bf16.msrb.mxu0 %v9882_v42  ;;  %v9209_v3 = vld [vmem:[#allocation8 + $0x450] sm:$0xf]  ;;  %v10074_v63 = vor.u32 %v11438_v18, %v10073_v19  ;;  %v10451_v19 = vld [vmem:[#allocation8 + $0xe28] sm:$0xf0] }
 0x31e   :  { %6672 = vmatpush.bf16.msrb.mxu1 %v10170_v27  ;;  %6596 = vmatpush.bf16.msrb.mxu3 %v10614_v33  ;;  %v11222_v44 = vld [vmem:[#allocation8 + $0x46c] sm:$0xf0]  ;;  %v6291_v27 = vpop.f32.mrf.mxu3 }
 0x31f   :  { %v9785_v10 = vld [vmem:[#allocation8 + $0x8d0] sm:$0xf]  ;;  %v9210_v13 = vor.u32 %v11222_v44, %v9209_v3  ;;  %v12036_v43 = vadd.f32 %v6291_v27, %v12017_v39  ;;  %v10483_v39 = vld [vmem:[#allocation8 + $0xe68] sm:$0xf0] }
 0x320   :  { %6637 = vmatpush.bf16.msra.mxu2 %v9274_v51  ;;  %v11366_v40 = vld [vmem:[#allocation8 + $0x8ec] sm:$0xf0]  ;;  %v10486_v9 = vor.u32 %v11537_v49, %v10483_v39  ;;  %v9115_v49 = vld [vmem:[#allocation8 + $0x3b0] sm:$0xf0] }
 0x321   :  { %6661 = vmatpush.bf16.msrb.mxu0 %v9850_v56  ;;  %v10041_v11 = vld [vmem:[#allocation8 + $0xad0] sm:$0xf]  ;;  %v9786_v47 = vor.u32 %v11366_v40, %v9785_v10  ;;  %v10454_v10 = vor.u32 %v11529_v59, %v10451_v19  ;;  %v9083_v59 = vld [vmem:[#allocation8 + $0x370] sm:$0xf0] }
 0x322   :  { %6673 = vmatpush.bf16.msrb.mxu1 %v10138_v14  ;;  %6597 = vmatpush.bf16.msrb.mxu3 %v10582_v58  ;;  %v11430_v15 = vld [vmem:[#allocation8 + $0xaec] sm:$0xf0]  ;;  %v6384_v14 = vpop.f32.mrf.mxu2  ;;  %v6410_v58 = vpop.f32.mrf.mxu0 }
 0x323   :  { %v9177_v26 = vld [vmem:[#allocation8 + $0x410] sm:$0xf]  ;;  %v10042_v38 = vor.u32 %v11430_v15, %v10041_v11  ;;  %v11138_v15 = vld [vmem:[#allocation8 + $0x1d4] sm:$0xf] }
 0x324   :  { %6638 = vmatpush.bf16.msra.mxu2 %v9242_v62  ;;  %v11214_v28 = vld [vmem:[#allocation8 + $0x42c] sm:$0xf0]  ;;  %v6423_v62 = vpop.f32.mrf.mxu1  ;;  %v11194_v14 = vld [vmem:[#allocation8 + $0x394] sm:$0xf] }
 0x325   :  { %6662 = vmatpush.bf16.msrb.mxu0 %v9818_v24  ;;  %v10425_v30 = vld [vmem:[#allocation8 + $0xdd0] sm:$0xf]  ;;  %v9178_v33 = vor.u32 %v11214_v28, %v9177_v26  ;;  %v8827_v58 = vld [vmem:[#allocation8 + $0x170] sm:$0xf0] }
 0x326   :  { %6674 = vmatpush.bf16.msrb.mxu1 %v10106_v57  ;;  %v11526_v31 = vld [vmem:[#allocation8 + $0xdec] sm:$0xf0]  ;;  %6598 = vmatpush.bf16.msrb.mxu3 %v10550_v7  ;;  %v6293_v18 = vpop.f32.mrf.mxu3 }
 0x327   :  { %v9753_v41 = vld [vmem:[#allocation8 + $0x890] sm:$0xf]  ;;  %v10426_v50 = vor.u32 %v11526_v31, %v10425_v30 }
 0x328   :  { %v11358_v45 = vld [vmem:[#allocation8 + $0x8ac] sm:$0xf0]  ;;  %6639 = vmatpush.bf16.msra.mxu2 %v9210_v13 }
 0x329   :  { %v10009_v42 = vld [vmem:[#allocation8 + $0xa90] sm:$0xf]  ;;  %6663 = vmatpush.bf16.msrb.mxu0 %v9786_v47  ;;  %v9754_v51 = vor.u32 %v11358_v45, %v9753_v41  ;;  %v11130_v45 = vld [vmem:[#allocation8 + $0x194] sm:$0xf] }
 0x32a   :  { %6675 = vmatpush.bf16.msrb.mxu1 %v10074_v63  ;;  %v11422_v37 = vld [vmem:[#allocation8 + $0xaac] sm:$0xf0]  ;;  %6599 = vmatpush.bf16.msrb.mxu3 %v10518_v8  ;;  %v9150_v8 = vor.u32 %v11202_v21, %v9147_v25  ;;  %v12048_v21 = vld [vmem:[#allocation11] sm:$0xff] }
 0x32b   :  { %v10393_v52 = vld [vmem:[#allocation8 + $0xd90] sm:$0xf]  ;;  %v10010_v54 = vor.u32 %v11422_v37, %v10009_v42  ;;  %v8859_v42 = vld [vmem:[#allocation8 + $0x1b0] sm:$0xf0] }
 0x32c   :  { %v11518_v53 = vld [vmem:[#allocation8 + $0xdac] sm:$0xf0]  ;;  %6640 = vmatpush.bf16.msra.mxu2 %v9178_v33 }
 0x32d   :  { %v9721_v55 = vld [vmem:[#allocation8 + $0x850] sm:$0xf]  ;;  %v10394_v22 = vor.u32 %v11518_v53, %v10393_v52  ;;  %6664 = vmatpush.bf16.msrb.mxu0 %v9754_v51 }
 0x32e   :  { %6676 = vmatpush.bf16.msrb.mxu1 %v10042_v38  ;;  %v11350_v56 = vld [vmem:[#allocation8 + $0x86c] sm:$0xf0]  ;;  %6600 = vmatpush.bf16.msrb.mxu3 %v10486_v9  ;;  %v8894_v38 = vor.u32 %v11138_v15, %v8891_v4  ;;  %v6343_v33 = vpop.f32.mrf.mxu3 }
 0x32f   :  { %v9977_v57 = vld [vmem:[#allocation8 + $0xa50] sm:$0xf]  ;;  %v9722_v3 = vor.u32 %v11350_v56, %v9721_v55  ;;  %6641 = vmatmul.bf16.vlgmr.msra.gmra.mxu2 %v11937_v1  ;;  %v6344_v51 = vadd.f32 %v6343_v33, %v12024_v61  ;;  %v9118_v55 = vor.u32 %v11194_v14, %v9115_v49  ;;  %v7023_v14 = vmax.f32 %v12036_v43, 0.0  ;;  %v11266_v49 = vld [vmem:[#allocation8 + $0x5d4] sm:$0xf] }
 0x330   :  { %v11414_v29 = vld [vmem:[#allocation8 + $0xa6c] sm:$0xf0]  ;;  %6685 = vmatpush.bf16.msrb.mxu2 %v10426_v50  ;;  %v7033_v33 = vperm.slane %v12048_v21, 0 }
 0x331   :  { %v9657_v16 = vld [vmem:[#allocation8 + $0x7d0] sm:$0xf]  ;;  %v9978_v7 = vor.u32 %v11414_v29, %v9977_v57  ;;  %6665 = vmatpush.bf16.msrb.mxu0 %v9722_v3  ;;  %v6357_v9 = vadd.f32 %v12019_v12, %v6344_v51  ;;  %v11122_v57 = vld [vmem:[#allocation8 + $0x154] sm:$0xf] }
 0x332   :  { %v11334_v17 = vld [vmem:[#allocation8 + $0x7ec] sm:$0xf0]  ;;  %6677 = vmatpush.bf16.msrb.mxu1 %v10010_v54  ;;  %6601 = vmatpush.bf16.msrb.mxu3 %v10454_v10  ;;  %v8862_v54 = vor.u32 %v11130_v45, %v8859_v42  ;;  %v11186_v29 = vld [vmem:[#allocation8 + $0x354] sm:$0xf]  ;;  %v6434_v15 = vpop.f32.mrf.mxu2 }
 0x333   :  { %v9689_v44 = vld [vmem:[#allocation8 + $0x810] sm:$0xf]  ;;  %v9658_v13 = vor.u32 %v11334_v17, %v9657_v16  ;;  %v6370_v12 = vadd.f32 %v12021_v20, %v6357_v9  ;;  %v8830_v16 = vor.u32 %v11122_v57, %v8827_v58  ;;  %v9086_v17 = vor.u32 %v11186_v29, %v9083_v59 }
 0x334   :  { %v10361_v24 = vld [vmem:[#allocation8 + $0xd50] sm:$0xf]  ;;  %6686 = vmatpush.bf16.msrb.mxu2 %v10394_v22  ;;  %v7034_v29 = vperm.slane %v12048_v21, 1 }
 0x335   :  { %v11510_v63 = vld [vmem:[#allocation8 + $0xd6c] sm:$0xf0]  ;;  %6602 = vmatmul.bf16.vlgmr.msrb.gmra.mxu3 %v11987_v34 }
 0x336   :  { %v11342_v40 = vld [vmem:[#allocation8 + $0x82c] sm:$0xf0]  ;;  %v10362_v23 = vor.u32 %v11510_v63, %v10361_v24  ;;  %6678 = vmatpush.bf16.msrb.mxu1 %v9978_v7  ;;  %6646 = vmatpush.bf16.msra.mxu3 %v9658_v13  ;;  %v8795_v24 = vld [vmem:[#allocation8 + $0x130] sm:$0xf0]  ;;  %v6383_v7 = vadd.f32 %v12030_v5, %v6370_v12  ;;  %v6345_v10 = vpop.f32.mrf.mxu3  ;;  %v7049_v12 = vmul.f32 %v7033_v33, %v7023_v14 }
 0x337   :  { %v9945_v11 = vld [vmem:[#allocation8 + $0xa10] sm:$0xf]  ;;  %v9690_v28 = vor.u32 %v11342_v40, %v9689_v44  ;;  %v11114_v44 = vld [vmem:[#allocation8 + $0x114] sm:$0xf] }
 0x338   :  { %v11406_v32 = vld [vmem:[#allocation8 + $0xa2c] sm:$0xf0]  ;;  %6687 = vmatpush.bf16.msrb.mxu2 %v10362_v23  ;;  %v11178_v63 = vld [vmem:[#allocation8 + $0x314] sm:$0xf]  ;;  %v12051_v23 = vadd.f32 %v6434_v15, %v12038_v36  ;;  %v8798_v25 = vor.u32 %v11114_v44, %v8795_v24 }
 0x339   :  { %v9625_v27 = vld [vmem:[#allocation8 + $0x790] sm:$0xf]  ;;  %v9946_v31 = vor.u32 %v11406_v32, %v9945_v11  ;;  %6666 = vmatpush.bf16.msrb.mxu0 %v9690_v28  ;;  %v9051_v11 = vld [vmem:[#allocation8 + $0x330] sm:$0xf0] }
 0x33a   :  { %v11326_v26 = vld [vmem:[#allocation8 + $0x7ac] sm:$0xf0]  ;;  %v8763_v28 = vld [vmem:[#allocation8 + $0xf0] sm:$0xf0]  ;;  %v12055_v45 = vpop.f32.mrf.mxu1 }
 0x33b   :  { %v10329_v47 = vld [vmem:[#allocation8 + $0xd10] sm:$0xf]  ;;  %v9626_v41 = vor.u32 %v11326_v26, %v9625_v27  ;;  %6679 = vmatpush.bf16.msrb.mxu1 %v9946_v31  ;;  %v9054_v27 = vor.u32 %v11178_v63, %v9051_v11  ;;  %v11106_v26 = vld [vmem:[#allocation8 + $0xd4] sm:$0xf] }
 0x33c   :  { %v11502_v30 = vld [vmem:[#allocation8 + $0xd2c] sm:$0xf0]  ;;  %6667 = vmatmul.bf16.vlgmr.msrb.gmra.mxu0 %v11952_v48  ;;  %v8699_v44 = vld [vmem:[#allocation8 + $0x70] sm:$0xf0] }
 0x33d   :  { %v10330_v37 = vor.u32 %v11502_v30, %v10329_v47  ;;  %v9593_v39 = vld [vmem:[#allocation8 + $0x750] sm:$0xf]  ;;  %6711 = vmatpush.bf16.msra.mxu0 %v8894_v38  ;;  %6647 = vmatpush.bf16.msra.mxu3 %v9626_v41  ;;  %v11170_v47 = vld [vmem:[#allocation8 + $0x2d4] sm:$0xf]  ;;  %v12053_v30 = vpop.f32.mrf.mxu0 }
 0x33e   :  { %v11318_v50 = vld [vmem:[#allocation8 + $0x76c] sm:$0xf0]  ;;  %6680 = vmatmul.bf16.vlgmr.msrb.gmra.mxu1 %v11950_v46  ;;  %v9019_v38 = vld [vmem:[#allocation8 + $0x2f0] sm:$0xf0]  ;;  %v6395_v9 = vpop.f32.mrf.mxu3 }
 0x33f   :  { %v10297_v52 = vld [vmem:[#allocation8 + $0xcd0] sm:$0xf]  ;;  %6724 = vmatpush.bf16.msra.mxu1 %v9150_v8  ;;  %v9594_v56 = vor.u32 %v11318_v50, %v9593_v39  ;;  %6688 = vmatpush.bf16.msrb.mxu2 %v10330_v37  ;;  %v8766_v37 = vor.u32 %v11106_v26, %v8763_v28  ;;  %v9403_v39 = vld [vmem:[#allocation8 + $0x5f0] sm:$0xf0]  ;;  %v9022_v50 = vor.u32 %v11170_v47, %v9019_v38  ;;  %v7058_v28 = vsel %vm7057_vm0, %v7049_v12, 0.0 }
 0x340   :  { %v11494_v53 = vld [vmem:[#allocation8 + $0xcec] sm:$0xf0]  ;;  %v6396_v43 = vadd.f32 %v6395_v9, %v6383_v7  ;;  %v9406_v59 = vor.u32 %v11266_v49, %v9403_v39  ;;  %v11154_v24 = vld [vmem:[#allocation8 + $0x254] sm:$0xf] }
 0x341   :  { %v10298_v61 = vor.u32 %v11494_v53, %v10297_v52  ;;  %v9561_v19 = vld [vmem:[#allocation8 + $0x710] sm:$0xf]  ;;  %6712 = vmatpush.bf16.msra.mxu0 %v8862_v54  ;;  %6648 = vmatpush.bf16.msra.mxu3 %v9594_v56  ;;  %v11098_v52 = vld [vmem:[#allocation8 + $0x94] sm:$0xf] }
 0x342   :  { %v11310_v62 = vld [vmem:[#allocation8 + $0x72c] sm:$0xf0]  ;;  %v8731_v53 = vld [vmem:[#allocation8 + $0xb0] sm:$0xf0] }
 0x343   :  { %v10265_v18 = vld [vmem:[#allocation8 + $0xc90] sm:$0xf]  ;;  %6725 = vmatpush.bf16.msra.mxu1 %v9118_v55  ;;  %v9562_v3 = vor.u32 %v11310_v62, %v9561_v19  ;;  %6689 = vmatpush.bf16.msrb.mxu2 %v10298_v61  ;;  %v11162_v54 = vld [vmem:[#allocation8 + $0x294] sm:$0xf]  ;;  %v6436_v61 = vpop.f32.mrf.mxu2  ;;  %v8734_v19 = vor.u32 %v11098_v52, %v8731_v53 }
 0x344   :  { %v11486_v22 = vld [vmem:[#allocation8 + $0xcac] sm:$0xf0]  ;;  %v8987_v56 = vld [vmem:[#allocation8 + $0x2b0] sm:$0xf0] }
 0x345   :  { %v10266_v40 = vor.u32 %v11486_v22, %v10265_v18  ;;  %v9529_v32 = vld [vmem:[#allocation8 + $0x6d0] sm:$0xf]  ;;  %6713 = vmatpush.bf16.msra.mxu0 %v8830_v16  ;;  %6649 = vmatpush.bf16.msra.mxu3 %v9562_v3  ;;  %v11090_v62 = vld [vmem:[#allocation8 + $0x54] sm:$0xf]  ;;  %v7024_v16 = vmax.f32 %v6396_v43, 0.0  ;;  %v6462_v63 = vpop.f32.mrf.mxu0 }
 0x346   :  { %v11302_v13 = vld [vmem:[#allocation8 + $0x6ec] sm:$0xf0]  ;;  %v11258_v18 = vld [vmem:[#allocation8 + $0x594] sm:$0xf] }
 0x347   :  { %v10233_v4 = vld [vmem:[#allocation8 + $0xc50] sm:$0xf]  ;;  %6726 = vmatpush.bf16.msra.mxu1 %v9086_v17  ;;  %v9530_v5 = vor.u32 %v11302_v13, %v9529_v32  ;;  %6690 = vmatpush.bf16.msrb.mxu2 %v10266_v40  ;;  %v9371_v22 = vld [vmem:[#allocation8 + $0x5b0] sm:$0xf0]  ;;  %v8990_v17 = vor.u32 %v11162_v54, %v8987_v56  ;;  %v7050_v11 = vmul.f32 %v7034_v29, %v7024_v16  ;;  %v6475_v32 = vpop.f32.mrf.mxu1 }
 0x348   :  { %v11478_v20 = vld [vmem:[#allocation8 + $0xc6c] sm:$0xf0]  ;;  %v8955_v7 = vld [vmem:[#allocation8 + $0x270] sm:$0xf0]  ;;  %v9374_v13 = vor.u32 %v11258_v18, %v9371_v22 }
 0x349   :  { %v10234_v31 = vor.u32 %v11478_v20, %v10233_v4  ;;  %v9497_v8 = vld [vmem:[#allocation8 + $0x690] sm:$0xf]  ;;  %6714 = vmatpush.bf16.msra.mxu0 %v8798_v25  ;;  %6650 = vmatpush.bf16.msra.mxu3 %v9530_v5  ;;  %v11082_v20 = vld [vmem:[#allocation8 + $0x14] sm:$0xf]  ;;  %v8702_v25 = vor.u32 %v11090_v62, %v8699_v44  ;;  %v7059_v47 = vsel %vm7057_vm0, %v7050_v11, 0.0 }
 0x34a   :  { %v11294_v41 = vld [vmem:[#allocation8 + $0x6ac] sm:$0xf0]  ;;  %v11250_v5 = vld [vmem:[#allocation8 + $0x554] sm:$0xf] }
 0x34b   :  { %v10201_v36 = vld [vmem:[#allocation8 + $0xc10] sm:$0xf]  ;;  %6727 = vmatpush.bf16.msra.mxu1 %v9054_v27  ;;  %v9498_v51 = vor.u32 %v11294_v41, %v9497_v8  ;;  %6691 = vmatpush.bf16.msrb.mxu2 %v10234_v31  ;;  %v8667_v27 = vld [vmem:[#allocation8 + $0x30] sm:$0xf0]  ;;  %v8958_v31 = vor.u32 %v11154_v24, %v8955_v7 }
 0x34c   :  { %v11470_v42 = vld [vmem:[#allocation8 + $0xc2c] sm:$0xf0]  ;;  %v9339_v26 = vld [vmem:[#allocation8 + $0x570] sm:$0xf0]  ;;  %v8670_v53 = vor.u32 %v11082_v20, %v8667_v27 }
 0x34d   :  { %v10202_v55 = vor.u32 %v11470_v42, %v10201_v36  ;;  %v9465_v57 = vld [vmem:[#allocation8 + $0x650] sm:$0xf]  ;;  %6715 = vmatpush.bf16.msra.mxu0 %v8766_v37  ;;  %6651 = vmatpush.bf16.msra.mxu3 %v9498_v51  ;;  %v11146_v8 = vld [vmem:[#allocation8 + $0x214] sm:$0xf]  ;;  %v12062_v36 = vadd.f32 %v7059_v47, %v7058_v28  ;;  %v6397_v42 = vpop.f32.mrf.mxu3  ;;  %v9342_v39 = vor.u32 %v11250_v5, %v9339_v26 }
 0x34e   :  { %v11286_v58 = vld [vmem:[#allocation8 + $0x66c] sm:$0xf0]  ;;  %v8923_v41 = vld [vmem:[#allocation8 + $0x230] sm:$0xf0]  ;;  %v3618_v42 = vperm.slane %v12032_v2, 3 }
 0x34f   :  { %6728 = vmatpush.bf16.msra.mxu1 %v9022_v50  ;;  %v9466_v3 = vor.u32 %v11286_v58, %v9465_v57  ;;  %6692 = vmatpush.bf16.msrb.mxu2 %v10202_v55  ;;  %v9433_v10 = vld [vmem:[#allocation8 + $0x610] sm:$0xf]  ;;  %v11394_v33 = vld [vmem:[#allocation8 + $0x9d4] sm:$0xf]  ;;  %v8926_v55 = vor.u32 %v11146_v8, %v8923_v41 }
 0x350   :  { %v11278_v40 = vld [vmem:[#allocation8 + $0x62c] sm:$0xf0]  ;;  %v9915_v37 = vld [vmem:[#allocation8 + $0x9f0] sm:$0xf0] }
 0x351   :  { %v10681_v15 = vld [vmem:[#allocation8 + $0xfd0] sm:$0xf]  ;;  %6716 = vmatpush.bf16.msra.mxu0 %v8734_v19  ;;  %6652 = vmatpush.bf16.msra.mxu3 %v9466_v3  ;;  %v9434_v38 = vor.u32 %v11278_v40, %v9433_v10  ;;  %v11458_v49 = vld [vmem:[#allocation8 + $0xbd4] sm:$0xf]  ;;  %v9918_v56 = vor.u32 %v11394_v33, %v9915_v37 }
 0x352   :  { %v11590_v4 = vld [vmem:[#allocation8 + $0xfec] sm:$0xf0]  ;;  %6693 = vmatmul.bf16.vlgmr.msrb.gmra.mxu2 %v11973_v35  ;;  %v10171_v50 = vld [vmem:[#allocation8 + $0xbf0] sm:$0xf0] }
 0x353   :  { %6737 = vmatpush.bf16.msra.mxu2 %v9406_v59  ;;  %6729 = vmatpush.bf16.msra.mxu1 %v8990_v17  ;;  %v10682_v14 = vor.u32 %v11590_v4, %v10681_v15  ;;  %v10649_v51 = vld [vmem:[#allocation8 + $0xf90] sm:$0xf]  ;;  %v11242_v54 = vld [vmem:[#allocation8 + $0x514] sm:$0xf]  ;;  %v10174_v57 = vor.u32 %v11458_v49, %v10171_v50 }
 0x354   :  { %v11582_v52 = vld [vmem:[#allocation8 + $0xfac] sm:$0xf0]  ;;  %v9307_v9 = vld [vmem:[#allocation8 + $0x530] sm:$0xf0] }
 0x355   :  { %6717 = vmatpush.bf16.msra.mxu0 %v8702_v25  ;;  %6653 = vmatpush.bf16.msra.mxu3 %v9434_v38  ;;  %v10650_v58 = vor.u32 %v11582_v52, %v10649_v51  ;;  %v11386_v43 = vld [vmem:[#allocation8 + $0x994] sm:$0xf]  ;;  %v9310_v59 = vor.u32 %v11242_v54, %v9307_v9  ;;  %v10617_v62 = vld [vmem:[#allocation8 + $0xf50] sm:$0xf]  ;;  %v12068_v38 = vpop.f32.mrf.mxu2  ;;  %v6512_v9 = vpop.f32.mrf.mxu0 }
 0x356   :  { %v9883_v29 = vld [vmem:[#allocation8 + $0x9b0] sm:$0xf0]  ;;  %v11574_v18 = vld [vmem:[#allocation8 + $0xf6c] sm:$0xf0] }
 0x357   :  { %6738 = vmatpush.bf16.msra.mxu2 %v9374_v13  ;;  %6730 = vmatpush.bf16.msra.mxu1 %v8958_v31  ;;  %v11450_v61 = vld [vmem:[#allocation8 + $0xb94] sm:$0xf]  ;;  %v9886_v16 = vor.u32 %v11386_v43, %v9883_v29  ;;  %v10618_v3 = vor.u32 %v11574_v18, %v10617_v62  ;;  %v10585_v40 = vld [vmem:[#allocation8 + $0xf10] sm:$0xf] }
 0x358   :  { %v10139_v19 = vld [vmem:[#allocation8 + $0xbb0] sm:$0xf0]  ;;  %6654 = vmatmul.bf16.vlgmr.msra.gmra.mxu3 %v11939_v6  ;;  %v11566_v11 = vld [vmem:[#allocation8 + $0xf2c] sm:$0xf0] }
 0x359   :  { %6698 = vmatpush.bf16.msrb.mxu3 %v10682_v14  ;;  %6718 = vmatpush.bf16.msra.mxu0 %v8670_v53  ;;  %v11234_v22 = vld [vmem:[#allocation8 + $0x4d4] sm:$0xf]  ;;  %v10142_v17 = vor.u32 %v11450_v61, %v10139_v19  ;;  %v10586_v20 = vor.u32 %v11566_v11, %v10585_v40  ;;  %v10553_v47 = vld [vmem:[#allocation8 + $0xed0] sm:$0xf] }
 0x35a   :  { %v9275_v12 = vld [vmem:[#allocation8 + $0x4f0] sm:$0xf0]  ;;  %v11558_v31 = vld [vmem:[#allocation8 + $0xeec] sm:$0xf0] }
 0x35b   :  { %6739 = vmatpush.bf16.msra.mxu2 %v9342_v39  ;;  %6731 = vmatpush.bf16.msra.mxu1 %v8926_v55  ;;  %v11378_v44 = vld [vmem:[#allocation8 + $0x954] sm:$0xf]  ;;  %v9278_v7 = vor.u32 %v11234_v22, %v9275_v12  ;;  %v10554_v37 = vor.u32 %v11558_v31, %v10553_v47  ;;  %v10521_v53 = vld [vmem:[#allocation8 + $0xe90] sm:$0xf]  ;;  %v6447_v12 = vpop.f32.mrf.mxu3 }
 0x35c   :  { %v9851_v24 = vld [vmem:[#allocation8 + $0x970] sm:$0xf0]  ;;  %6719 = vmatmul.bf16.vlgmr.msra.gmra.mxu0 %v11933_v0  ;;  %v11550_v54 = vld [vmem:[#allocation8 + $0xeac] sm:$0xf0] }
 0x35d   :  { %6763 = vmatpush.bf16.msrb.mxu0 %v9918_v56  ;;  %6699 = vmatpush.bf16.msrb.mxu3 %v10650_v58  ;;  %v11442_v63 = vld [vmem:[#allocation8 + $0xb54] sm:$0xf]  ;;  %v9854_v15 = vor.u32 %v11378_v44, %v9851_v24  ;;  %v6525_v58 = vpop.f32.mrf.mxu1  ;;  %v11542_v44 = vld [vmem:[#allocation8 + $0xe6c] sm:$0xf0]  ;;  %v6448_v24 = vadd.f32 %v6447_v12, %v12051_v23  ;;  %v6514_v23 = vpop.f32.mrf.mxu0  ;;  %v11135_v12 = vld [vmem:[#allocation8 + $0x1b4] sm:$0xf0] }
 0x35e   :  { %v10107_v10 = vld [vmem:[#allocation8 + $0xb70] sm:$0xf0]  ;;  %6732 = vmatmul.bf16.vlgmr.msra.gmra.mxu1 %v11935_v60 }
 0x35f   :  { %6776 = vmatpush.bf16.msrb.mxu1 %v10174_v57  ;;  %6740 = vmatpush.bf16.msra.mxu2 %v9310_v59  ;;  %v11226_v32 = vld [vmem:[#allocation8 + $0x494] sm:$0xf]  ;;  %v10110_v4 = vor.u32 %v11442_v63, %v10107_v10  ;;  %v6513_v57 = vadd.f32 %v6512_v9, %v3618_v42  ;;  %v10522_v59 = vor.u32 %v11550_v54, %v10521_v53  ;;  %v6488_v63 = vpop.f32.mrf.mxu2  ;;  %v8897_v54 = vld [vmem:[#allocation8 + $0x1d8] sm:$0xf] }
 0x360   :  { %v9243_v13 = vld [vmem:[#allocation8 + $0x4b0] sm:$0xf0]  ;;  %v11143_v9 = vld [vmem:[#allocation8 + $0x1f4] sm:$0xf0] }
 0x361   :  { %6764 = vmatpush.bf16.msrb.mxu0 %v9886_v16  ;;  %6700 = vmatpush.bf16.msrb.mxu3 %v10618_v3  ;;  %v11370_v25 = vld [vmem:[#allocation8 + $0x914] sm:$0xf]  ;;  %v9246_v26 = vor.u32 %v11226_v32, %v9243_v13  ;;  %v12071_v22 = vadd.f32 %v6525_v58, %v6513_v57  ;;  %v10489_v3 = vld [vmem:[#allocation8 + $0xe50] sm:$0xf]  ;;  %v6461_v32 = vadd.f32 %v12053_v30, %v6448_v24  ;;  %v11207_v57 = vld [vmem:[#allocation8 + $0x3f4] sm:$0xf0] }
 0x362   :  { %v9819_v27 = vld [vmem:[#allocation8 + $0x930] sm:$0xf0] }
 0x363   :  { %6777 = vmatpush.bf16.msrb.mxu1 %v10142_v17  ;;  %v11434_v5 = vld [vmem:[#allocation8 + $0xb14] sm:$0xf]  ;;  %6741 = vmatpush.bf16.msra.mxu2 %v9278_v7  ;;  %v9822_v14 = vor.u32 %v11370_v25, %v9819_v27  ;;  %v6449_v53 = vpop.f32.mrf.mxu3 }
 0x364   :  { %v10075_v28 = vld [vmem:[#allocation8 + $0xb30] sm:$0xf0] }
 0x365   :  { %v11218_v8 = vld [vmem:[#allocation8 + $0x454] sm:$0xf]  ;;  %6765 = vmatpush.bf16.msrb.mxu0 %v9854_v15  ;;  %6701 = vmatpush.bf16.msrb.mxu3 %v10586_v20  ;;  %v10078_v33 = vor.u32 %v11434_v5, %v10075_v28  ;;  %v10490_v15 = vor.u32 %v11542_v44, %v10489_v3  ;;  %v10457_v5 = vld [vmem:[#allocation8 + $0xe10] sm:$0xf]  ;;  %v11199_v3 = vld [vmem:[#allocation8 + $0x3b4] sm:$0xf0] }
 0x366   :  { %v9211_v41 = vld [vmem:[#allocation8 + $0x470] sm:$0xf0] }
 0x367   :  { %6778 = vmatpush.bf16.msrb.mxu1 %v10110_v4  ;;  %v11362_v49 = vld [vmem:[#allocation8 + $0x8d4] sm:$0xf]  ;;  %6742 = vmatpush.bf16.msra.mxu2 %v9246_v26  ;;  %v9214_v51 = vor.u32 %v11218_v8, %v9211_v41  ;;  %v11534_v26 = vld [vmem:[#allocation8 + $0xe2c] sm:$0xf0]  ;;  %v6474_v8 = vadd.f32 %v12055_v45, %v6461_v32  ;;  %v6527_v41 = vpop.f32.mrf.mxu1  ;;  %v8833_v32 = vld [vmem:[#allocation8 + $0x158] sm:$0xf] }
 0x368   :  { %v9787_v39 = vld [vmem:[#allocation8 + $0x8f0] sm:$0xf0]  ;;  %v9057_v41 = vld [vmem:[#allocation8 + $0x318] sm:$0xf] }
 0x369   :  { %v11426_v50 = vld [vmem:[#allocation8 + $0xad4] sm:$0xf]  ;;  %6766 = vmatpush.bf16.msrb.mxu0 %v9822_v14  ;;  %v9790_v2 = vor.u32 %v11362_v49, %v9787_v39  ;;  %6702 = vmatpush.bf16.msrb.mxu3 %v10554_v37  ;;  %v10458_v49 = vor.u32 %v11534_v26, %v10457_v5 }
 0x36a   :  { %v10043_v52 = vld [vmem:[#allocation8 + $0xaf0] sm:$0xf0] }
 0x36b   :  { %v11210_v55 = vld [vmem:[#allocation8 + $0x414] sm:$0xf]  ;;  %6779 = vmatpush.bf16.msrb.mxu1 %v10078_v33  ;;  %v10046_v61 = vor.u32 %v11426_v50, %v10043_v52  ;;  %6743 = vmatpush.bf16.msra.mxu2 %v9214_v51  ;;  %v12077_v52 = vadd.f32 %v12068_v38, %v6474_v8  ;;  %v11119_v8 = vld [vmem:[#allocation8 + $0x134] sm:$0xf0] }
 0x36c   :  { %v9179_v56 = vld [vmem:[#allocation8 + $0x430] sm:$0xf0] }
 0x36d   :  { %v11522_v43 = vld [vmem:[#allocation8 + $0xdd4] sm:$0xf]  ;;  %v9182_v16 = vor.u32 %v11210_v55, %v9179_v56  ;;  %6767 = vmatpush.bf16.msrb.mxu0 %v9790_v2  ;;  %6703 = vmatpush.bf16.msrb.mxu3 %v10522_v59  ;;  %v9153_v55 = vld [vmem:[#allocation8 + $0x3d8] sm:$0xf]  ;;  %v8898_v59 = vor.u32 %v11143_v9, %v8897_v54 }
 0x36e   :  { %v10427_v29 = vld [vmem:[#allocation8 + $0xdf0] sm:$0xf0]  ;;  %v8769_v54 = vld [vmem:[#allocation8 + $0xd8] sm:$0xf] }
 0x36f   :  { %v11354_v19 = vld [vmem:[#allocation8 + $0x894] sm:$0xf]  ;;  %v10430_v7 = vor.u32 %v11522_v43, %v10427_v29  ;;  %6780 = vmatpush.bf16.msrb.mxu1 %v10046_v61  ;;  %6744 = vmatpush.bf16.msra.mxu2 %v9182_v16  ;;  %v9121_v16 = vld [vmem:[#allocation8 + $0x398] sm:$0xf] }
 0x370   :  { %v9755_v62 = vld [vmem:[#allocation8 + $0x8b0] sm:$0xf0]  ;;  %v11111_v9 = vld [vmem:[#allocation8 + $0xf4] sm:$0xf0] }
 0x371   :  { %v11418_v18 = vld [vmem:[#allocation8 + $0xa94] sm:$0xf]  ;;  %v9758_v10 = vor.u32 %v11354_v19, %v9755_v62  ;;  %6704 = vmatpush.bf16.msrb.mxu3 %v10490_v15  ;;  %v9154_v19 = vor.u32 %v11207_v57, %v9153_v55  ;;  %v9089_v15 = vld [vmem:[#allocation8 + $0x358] sm:$0xf] }
 0x372   :  { %v10011_v17 = vld [vmem:[#allocation8 + $0xab0] sm:$0xf0]  ;;  %6745 = vmatmul.bf16.vlgmr.msra.gmra.mxu2 %v11937_v1  ;;  %v9025_v55 = vld [vmem:[#allocation8 + $0x2d8] sm:$0xf] }
 0x373   :  { %v11514_v40 = vld [vmem:[#allocation8 + $0xd94] sm:$0xf]  ;;  %v10014_v13 = vor.u32 %v11418_v18, %v10011_v17  ;;  %6789 = vmatpush.bf16.msrb.mxu2 %v10430_v7  ;;  %6768 = vmatpush.bf16.msrb.mxu0 %v9758_v10  ;;  %v8865_v18 = vld [vmem:[#allocation8 + $0x198] sm:$0xf] }
 0x374   :  { %v10395_v11 = vld [vmem:[#allocation8 + $0xdb0] sm:$0xf0]  ;;  %v8866_v10 = vor.u32 %v11135_v12, %v8865_v18  ;;  %v11175_v57 = vld [vmem:[#allocation8 + $0x2f4] sm:$0xf0] }
 0x375   :  { %v11346_v4 = vld [vmem:[#allocation8 + $0x854] sm:$0xf]  ;;  %v10398_v28 = vor.u32 %v11514_v40, %v10395_v11  ;;  %6781 = vmatpush.bf16.msrb.mxu1 %v10014_v13  ;;  %6705 = vmatpush.bf16.msrb.mxu3 %v10458_v49  ;;  %v9122_v40 = vor.u32 %v11199_v3, %v9121_v16  ;;  %v11127_v13 = vld [vmem:[#allocation8 + $0x174] sm:$0xf0]  ;;  %v6499_v3 = vpop.f32.mrf.mxu3 }
 0x376   :  { %v9723_v20 = vld [vmem:[#allocation8 + $0x870] sm:$0xf0]  ;;  %v8834_v23 = vor.u32 %v11127_v13, %v8833_v32  ;;  %v8737_v12 = vld [vmem:[#allocation8 + $0x98] sm:$0xf] }
 0x377   :  { %v11410_v25 = vld [vmem:[#allocation8 + $0xa54] sm:$0xf]  ;;  %v9726_v30 = vor.u32 %v11346_v4, %v9723_v20  ;;  %6790 = vmatpush.bf16.msrb.mxu2 %v10398_v28  ;;  %v11191_v20 = vld [vmem:[#allocation8 + $0x374] sm:$0xf0] }
 0x378   :  { %v9979_v27 = vld [vmem:[#allocation8 + $0xa70] sm:$0xf0]  ;;  %6706 = vmatmul.bf16.vlgmr.msrb.gmra.mxu3 %v11987_v34  ;;  %v9090_v28 = vor.u32 %v11191_v20, %v9089_v15  ;;  %v11103_v16 = vld [vmem:[#allocation8 + $0xb4] sm:$0xf0] }
 0x379   :  { %v11330_v47 = vld [vmem:[#allocation8 + $0x7d4] sm:$0xf]  ;;  %v9982_v37 = vor.u32 %v11410_v25, %v9979_v27  ;;  %6769 = vmatpush.bf16.msrb.mxu0 %v9726_v30  ;;  %v8738_v13 = vor.u32 %v11103_v16, %v8737_v12  ;;  %v8705_v15 = vld [vmem:[#allocation8 + $0x58] sm:$0xf] }
 0x37a   :  { %v9659_v31 = vld [vmem:[#allocation8 + $0x7f0] sm:$0xf0]  ;;  %v11263_v20 = vld [vmem:[#allocation8 + $0x5b4] sm:$0xf0] }
 0x37b   :  { %v11338_v42 = vld [vmem:[#allocation8 + $0x814] sm:$0xf]  ;;  %v9662_v45 = vor.u32 %v11330_v47, %v9659_v31  ;;  %6782 = vmatpush.bf16.msrb.mxu1 %v9982_v37  ;;  %v8801_v31 = vld [vmem:[#allocation8 + $0x118] sm:$0xf] }
 0x37c   :  { %v11506_v14 = vld [vmem:[#allocation8 + $0xd54] sm:$0xf]  ;;  %v11247_v12 = vld [vmem:[#allocation8 + $0x534] sm:$0xf0] }
 0x37d   :  { %v10363_v33 = vld [vmem:[#allocation8 + $0xd70] sm:$0xf0]  ;;  %6750 = vmatpush.bf16.msra.mxu3 %v9662_v45 }
 0x37e   :  { %v9691_v39 = vld [vmem:[#allocation8 + $0x830] sm:$0xf0]  ;;  %v10366_v56 = vor.u32 %v11506_v14, %v10363_v33 }
 0x37f   :  { %v11402_v50 = vld [vmem:[#allocation8 + $0xa14] sm:$0xf]  ;;  %v9694_v43 = vor.u32 %v11338_v42, %v9691_v39  ;;  %v11183_v42 = vld [vmem:[#allocation8 + $0x334] sm:$0xf0]  ;;  %v6538_v39 = vpop.f32.mrf.mxu2 }
 0x380   :  { %v9947_v51 = vld [vmem:[#allocation8 + $0xa30] sm:$0xf0]  ;;  %6791 = vmatpush.bf16.msrb.mxu2 %v10366_v56  ;;  %v9058_v53 = vor.u32 %v11183_v42, %v9057_v41  ;;  %v8673_v42 = vld [vmem:[#allocation8 + $0x18] sm:$0xf] }
 0x381   :  { %v11322_v58 = vld [vmem:[#allocation8 + $0x794] sm:$0xf]  ;;  %v9950_v38 = vor.u32 %v11402_v50, %v9947_v51  ;;  %6770 = vmatpush.bf16.msrb.mxu0 %v9694_v43  ;;  %v8802_v50 = vor.u32 %v11119_v8, %v8801_v31  ;;  %v12084_v51 = vadd.f32 %v6538_v39, %v12071_v22  ;;  %v12086_v43 = vpop.f32.mrf.mxu0  ;;  %v8770_v22 = vor.u32 %v11111_v9, %v8769_v54  ;;  %v11255_v39 = vld [vmem:[#allocation8 + $0x574] sm:$0xf0] }
 0x382   :  { %v9627_v2 = vld [vmem:[#allocation8 + $0x7b0] sm:$0xf0]  ;;  %v8929_v54 = vld [vmem:[#allocation8 + $0x218] sm:$0xf] }
 0x383   :  { %v11498_v29 = vld [vmem:[#allocation8 + $0xd14] sm:$0xf]  ;;  %v9630_v62 = vor.u32 %v11322_v58, %v9627_v2  ;;  %6783 = vmatpush.bf16.msrb.mxu1 %v9950_v38  ;;  %v12088_v38 = vpop.f32.mrf.mxu1  ;;  %v11151_v9 = vld [vmem:[#allocation8 + $0x234] sm:$0xf0] }
 0x384   :  { %v10331_v61 = vld [vmem:[#allocation8 + $0xd30] sm:$0xf0]  ;;  %6771 = vmatmul.bf16.vlgmr.msrb.gmra.mxu0 %v11952_v48 }
 0x385   :  { %v10334_v17 = vor.u32 %v11498_v29, %v10331_v61  ;;  %v11314_v44 = vld [vmem:[#allocation8 + $0x754] sm:$0xf]  ;;  %6815 = vmatpush.bf16.msra.mxu0 %v8898_v59  ;;  %6751 = vmatpush.bf16.msra.mxu3 %v9630_v62  ;;  %v9409_v59 = vld [vmem:[#allocation8 + $0x5d8] sm:$0xf]  ;;  %v9026_v62 = vor.u32 %v11175_v57, %v9025_v55 }
 0x386   :  { %v9595_v24 = vld [vmem:[#allocation8 + $0x770] sm:$0xf0]  ;;  %6784 = vmatmul.bf16.vlgmr.msrb.gmra.mxu1 %v11950_v46 }
 0x387   :  { %v11490_v63 = vld [vmem:[#allocation8 + $0xcd4] sm:$0xf]  ;;  %6828 = vmatpush.bf16.msra.mxu1 %v9154_v19  ;;  %v9598_v11 = vor.u32 %v11314_v44, %v9595_v24  ;;  %6792 = vmatpush.bf16.msrb.mxu2 %v10334_v17  ;;  %v11271_v19 = vld [vmem:[#allocation8 + $0x5f4] sm:$0xf0]  ;;  %v6540_v32 = vpop.f32.mrf.mxu2 }
 0x388   :  { %v10299_v7 = vld [vmem:[#allocation8 + $0xcf0] sm:$0xf0]  ;;  %v8993_v17 = vld [vmem:[#allocation8 + $0x298] sm:$0xf] }
 0x389   :  { %v10302_v4 = vor.u32 %v11490_v63, %v10299_v7  ;;  %v11306_v25 = vld [vmem:[#allocation8 + $0x714] sm:$0xf]  ;;  %6816 = vmatpush.bf16.msra.mxu0 %v8866_v10  ;;  %6752 = vmatpush.bf16.msra.mxu3 %v9598_v11  ;;  %v11167_v24 = vld [vmem:[#allocation8 + $0x2b4] sm:$0xf0]  ;;  %v6500_v10 = vadd.f32 %v6499_v3, %v12077_v52  ;;  %v9410_v11 = vor.u32 %v11271_v19, %v9409_v59 }
 0x38a   :  { %v9563_v27 = vld [vmem:[#allocation8 + $0x730] sm:$0xf0]  ;;  %v9281_v32 = vld [vmem:[#allocation8 + $0x4d8] sm:$0xf] }
 0x38b   :  { %v11482_v5 = vld [vmem:[#allocation8 + $0xc94] sm:$0xf]  ;;  %6829 = vmatpush.bf16.msra.mxu1 %v9122_v40  ;;  %v9566_v47 = vor.u32 %v11306_v25, %v9563_v27  ;;  %6793 = vmatpush.bf16.msrb.mxu2 %v10302_v4  ;;  %v7035_v40 = vperm.slane %v12048_v21, 2  ;;  %v9377_v4 = vld [vmem:[#allocation8 + $0x598] sm:$0xf]  ;;  %v7025_v25 = vmax.f32 %v6500_v10, 0.0  ;;  %v8994_v27 = vor.u32 %v11167_v24, %v8993_v17  ;;  %v6566_v21 = vpop.f32.mrf.mxu0 }
 0x38c   :  { %v10267_v26 = vld [vmem:[#allocation8 + $0xcb0] sm:$0xf0]  ;;  %v9378_v8 = vor.u32 %v11263_v20, %v9377_v4  ;;  %v11391_v24 = vld [vmem:[#allocation8 + $0x9b4] sm:$0xf0] }
 0x38d   :  { %v10270_v30 = vor.u32 %v11482_v5, %v10267_v26  ;;  %v11298_v14 = vld [vmem:[#allocation8 + $0x6d4] sm:$0xf]  ;;  %6817 = vmatpush.bf16.msra.mxu0 %v8834_v23  ;;  %6753 = vmatpush.bf16.msra.mxu3 %v9566_v47  ;;  %v11095_v26 = vld [vmem:[#allocation8 + $0x74] sm:$0xf0]  ;;  %v7051_v31 = vmul.f32 %v7035_v40, %v7025_v25 }
 0x38e   :  { %v9531_v33 = vld [vmem:[#allocation8 + $0x6f0] sm:$0xf0]  ;;  %v8961_v23 = vld [vmem:[#allocation8 + $0x258] sm:$0xf] }
 0x38f   :  { %v11474_v37 = vld [vmem:[#allocation8 + $0xc54] sm:$0xf]  ;;  %6830 = vmatpush.bf16.msra.mxu1 %v9090_v28  ;;  %v9534_v45 = vor.u32 %v11298_v14, %v9531_v33  ;;  %6794 = vmatpush.bf16.msrb.mxu2 %v10270_v30  ;;  %v11159_v28 = vld [vmem:[#allocation8 + $0x274] sm:$0xf0]  ;;  %v6579_v14 = vpop.f32.mrf.mxu1  ;;  %v8706_v33 = vor.u32 %v11095_v26, %v8705_v15 }
 0x390   :  { %v10235_v49 = vld [vmem:[#allocation8 + $0xc70] sm:$0xf0]  ;;  %v11455_v10 = vld [vmem:[#allocation8 + $0xbb4] sm:$0xf0] }
 0x391   :  { %v10238_v56 = vor.u32 %v11474_v37, %v10235_v49  ;;  %v11290_v58 = vld [vmem:[#allocation8 + $0x694] sm:$0xf]  ;;  %6818 = vmatpush.bf16.msra.mxu0 %v8802_v50  ;;  %6754 = vmatpush.bf16.msra.mxu3 %v9534_v45  ;;  %v11087_v37 = vld [vmem:[#allocation8 + $0x34] sm:$0xf0]  ;;  %v7061_v50 = vsel %vm7057_vm0, %v7051_v31, 0.0 }
 0x392   :  { %v9499_v2 = vld [vmem:[#allocation8 + $0x6b0] sm:$0xf0]  ;;  %v9345_v49 = vld [vmem:[#allocation8 + $0x558] sm:$0xf]  ;;  %v12094_v55 = vadd.f32 %v7061_v50, %v12062_v36  ;;  %v8930_v36 = vor.u32 %v11151_v9, %v8929_v54  ;;  %v12102_v54 = vld [vmem:[#allocation10] sm:$0xff] }
 0x393   :  { %v11466_v29 = vld [vmem:[#allocation8 + $0xc14] sm:$0xf]  ;;  %6831 = vmatpush.bf16.msra.mxu1 %v9058_v53  ;;  %v9502_v18 = vor.u32 %v11290_v58, %v9499_v2  ;;  %6795 = vmatpush.bf16.msrb.mxu2 %v10238_v56  ;;  %v8962_v53 = vor.u32 %v11159_v28, %v8961_v23  ;;  %v6501_v56 = vpop.f32.mrf.mxu3  ;;  %v9921_v58 = vld [vmem:[#allocation8 + $0x9d8] sm:$0xf]  ;;  %v3619_v9 = vperm.slane %v12102_v54, 4 }
 0x394   :  { %v10203_v61 = vld [vmem:[#allocation8 + $0xc30] sm:$0xf0]  ;;  %v11399_v2 = vld [vmem:[#allocation8 + $0x9f4] sm:$0xf0] }
 0x395   :  { %v10206_v44 = vor.u32 %v11466_v29, %v10203_v61  ;;  %v11282_v63 = vld [vmem:[#allocation8 + $0x654] sm:$0xf]  ;;  %6819 = vmatpush.bf16.msra.mxu0 %v8770_v22  ;;  %6755 = vmatpush.bf16.msra.mxu3 %v9502_v18  ;;  %v10177_v29 = vld [vmem:[#allocation8 + $0xbd8] sm:$0xf]  ;;  %v9346_v61 = vor.u32 %v11255_v39, %v9345_v49  ;;  %v9922_v16 = vor.u32 %v11399_v2, %v9921_v58 }
 0x396   :  { %v9467_v7 = vld [vmem:[#allocation8 + $0x670] sm:$0xf0]  ;;  %v11463_v22 = vld [vmem:[#allocation8 + $0xbf4] sm:$0xf0] }
 0x397   :  { %6832 = vmatpush.bf16.msra.mxu1 %v9026_v62  ;;  %v9470_v5 = vor.u32 %v11282_v63, %v9467_v7  ;;  %6796 = vmatpush.bf16.msrb.mxu2 %v10206_v44  ;;  %v11274_v47 = vld [vmem:[#allocation8 + $0x614] sm:$0xf]  ;;  %v8674_v62 = vor.u32 %v11087_v37, %v8673_v42  ;;  %v9313_v18 = vld [vmem:[#allocation8 + $0x518] sm:$0xf]  ;;  %v10178_v17 = vor.u32 %v11463_v22, %v10177_v29 }
 0x398   :  { %v9435_v52 = vld [vmem:[#allocation8 + $0x630] sm:$0xf0]  ;;  %v9889_v44 = vld [vmem:[#allocation8 + $0x998] sm:$0xf]  ;;  %v9314_v7 = vor.u32 %v11247_v12, %v9313_v18  ;;  %v6616_v18 = vpop.f32.mrf.mxu0 }
 0x399   :  { %v11586_v41 = vld [vmem:[#allocation8 + $0xfd4] sm:$0xf]  ;;  %6820 = vmatpush.bf16.msra.mxu0 %v8738_v13  ;;  %6756 = vmatpush.bf16.msra.mxu3 %v9470_v5  ;;  %v9438_v45 = vor.u32 %v11274_v47, %v9435_v52  ;;  %v10145_v63 = vld [vmem:[#allocation8 + $0xb98] sm:$0xf]  ;;  %v9890_v15 = vor.u32 %v11391_v24, %v9889_v44 }
 0x39a   :  { %v10683_v30 = vld [vmem:[#allocation8 + $0xff0] sm:$0xf0]  ;;  %6797 = vmatmul.bf16.vlgmr.msrb.gmra.mxu2 %v11973_v35  ;;  %v11239_v13 = vld [vmem:[#allocation8 + $0x4f4] sm:$0xf0]  ;;  %v10146_v4 = vor.u32 %v11455_v10, %v10145_v63 }
 0x39b   :  { %6841 = vmatpush.bf16.msra.mxu2 %v9410_v11  ;;  %6833 = vmatpush.bf16.msra.mxu1 %v8994_v27  ;;  %v10686_v57 = vor.u32 %v11586_v41, %v10683_v30  ;;  %v11578_v59 = vld [vmem:[#allocation8 + $0xf94] sm:$0xf]  ;;  %v9857_v25 = vld [vmem:[#allocation8 + $0x958] sm:$0xf]  ;;  %v9282_v26 = vor.u32 %v11239_v13, %v9281_v32  ;;  %v6551_v13 = vpop.f32.mrf.mxu3 }
 0x39c   :  { %v10651_v19 = vld [vmem:[#allocation8 + $0xfb0] sm:$0xf0]  ;;  %v11383_v27 = vld [vmem:[#allocation8 + $0x974] sm:$0xf0] }
 0x39d   :  { %6821 = vmatpush.bf16.msra.mxu0 %v8706_v33  ;;  %6757 = vmatpush.bf16.msra.mxu3 %v9438_v45  ;;  %v10654_v3 = vor.u32 %v11578_v59, %v10651_v19  ;;  %v11570_v40 = vld [vmem:[#allocation8 + $0xf54] sm:$0xf]  ;;  %v10113_v5 = vld [vmem:[#allocation8 + $0xb58] sm:$0xf]  ;;  %v9858_v21 = vor.u32 %v11383_v27, %v9857_v25  ;;  %v12100_v45 = vpop.f32.mrf.mxu2  ;;  %v6552_v27 = vadd.f32 %v6551_v13, %v12084_v51  ;;  %v8867_v13 = vld [vmem:[#allocation8 + $0x1b8] sm:$0xf0] }
 0x39e   :  { %v10619_v11 = vld [vmem:[#allocation8 + $0xf70] sm:$0xf0]  ;;  %v11447_v23 = vld [vmem:[#allocation8 + $0xb74] sm:$0xf0] }
 0x39f   :  { %6842 = vmatpush.bf16.msra.mxu2 %v9378_v8  ;;  %6834 = vmatpush.bf16.msra.mxu1 %v8962_v53  ;;  %v10622_v20 = vor.u32 %v11570_v40, %v10619_v11  ;;  %v11562_v28 = vld [vmem:[#allocation8 + $0xf14] sm:$0xf]  ;;  %v9249_v52 = vld [vmem:[#allocation8 + $0x498] sm:$0xf]  ;;  %v10114_v8 = vor.u32 %v11447_v23, %v10113_v5 }
 0x3a0   :  { %6758 = vmatmul.bf16.vlgmr.msra.gmra.mxu3 %v11939_v6  ;;  %v10587_v47 = vld [vmem:[#allocation8 + $0xf30] sm:$0xf0]  ;;  %v11231_v31 = vld [vmem:[#allocation8 + $0x4b4] sm:$0xf0]  ;;  %v6618_v51 = vpop.f32.mrf.mxu0 }
 0x3a1   :  { %6802 = vmatpush.bf16.msrb.mxu3 %v10686_v57  ;;  %6822 = vmatpush.bf16.msra.mxu0 %v8674_v62  ;;  %v10590_v41 = vor.u32 %v11562_v28, %v10587_v47  ;;  %v9825_v30 = vld [vmem:[#allocation8 + $0x918] sm:$0xf]  ;;  %v9250_v33 = vor.u32 %v11231_v31, %v9249_v52  ;;  %v11554_v49 = vld [vmem:[#allocation8 + $0xed4] sm:$0xf]  ;;  %v6565_v52 = vadd.f32 %v12086_v43, %v6552_v27 }
 0x3a2   :  { %v11375_v42 = vld [vmem:[#allocation8 + $0x934] sm:$0xf0]  ;;  %v10555_v39 = vld [vmem:[#allocation8 + $0xef0] sm:$0xf0] }
 0x3a3   :  { %6843 = vmatpush.bf16.msra.mxu2 %v9346_v61  ;;  %6835 = vmatpush.bf16.msra.mxu1 %v8930_v36  ;;  %v10081_v14 = vld [vmem:[#allocation8 + $0xb18] sm:$0xf]  ;;  %v9826_v56 = vor.u32 %v11375_v42, %v9825_v30  ;;  %v10558_v58 = vor.u32 %v11554_v49, %v10555_v39  ;;  %v11546_v19 = vld [vmem:[#allocation8 + $0xe94] sm:$0xf] }
 0x3a4   :  { %6823 = vmatmul.bf16.vlgmr.msra.gmra.mxu0 %v11933_v0  ;;  %v11439_v37 = vld [vmem:[#allocation8 + $0xb34] sm:$0xf0]  ;;  %v10523_v62 = vld [vmem:[#allocation8 + $0xeb0] sm:$0xf0] }
 0x3a5   :  { %6867 = vmatpush.bf16.msrb.mxu0 %v9922_v16  ;;  %6803 = vmatpush.bf16.msrb.mxu3 %v10654_v3  ;;  %v9217_v50 = vld [vmem:[#allocation8 + $0x458] sm:$0xf]  ;;  %v10082_v57 = vor.u32 %v11439_v37, %v10081_v14  ;;  %v6617_v16 = vadd.f32 %v6616_v18, %v3619_v9  ;;  %v10491_v25 = vld [vmem:[#allocation8 + $0xe70] sm:$0xf0]  ;;  %v8899_v18 = vld [vmem:[#allocation8 + $0x1f8] sm:$0xf0] }
 0x3a6   :  { %6836 = vmatmul.bf16.vlgmr.msra.gmra.mxu1 %v11935_v60  ;;  %v11223_v53 = vld [vmem:[#allocation8 + $0x474] sm:$0xf0]  ;;  %v11530_v14 = vld [vmem:[#allocation8 + $0xe14] sm:$0xf] }
 0x3a7   :  { %6880 = vmatpush.bf16.msrb.mxu1 %v10178_v17  ;;  %6844 = vmatpush.bf16.msra.mxu2 %v9314_v7  ;;  %v9793_v2 = vld [vmem:[#allocation8 + $0x8d8] sm:$0xf]  ;;  %v9218_v22 = vor.u32 %v11223_v53, %v9217_v50  ;;  %v6629_v17 = vpop.f32.mrf.mxu1  ;;  %v10526_v7 = vor.u32 %v11546_v19, %v10523_v62  ;;  %v6578_v50 = vadd.f32 %v12088_v38, %v6565_v52  ;;  %v6553_v19 = vpop.f32.mrf.mxu3  ;;  %v11139_v62 = vld [vmem:[#allocation8 + $0x1dc] sm:$0xf] }
 0x3a8   :  { %v11367_v29 = vld [vmem:[#allocation8 + $0x8f4] sm:$0xf0]  ;;  %v12105_v32 = vadd.f32 %v6629_v17, %v6617_v16  ;;  %v9155_v16 = vld [vmem:[#allocation8 + $0x3f8] sm:$0xf0] }
 0x3a9   :  { %6868 = vmatpush.bf16.msrb.mxu0 %v9890_v15  ;;  %6804 = vmatpush.bf16.msrb.mxu3 %v10622_v20  ;;  %v10049_v61 = vld [vmem:[#allocation8 + $0xad8] sm:$0xf]  ;;  %v9794_v3 = vor.u32 %v11367_v29, %v9793_v2  ;;  %v11538_v20 = vld [vmem:[#allocation8 + $0xe54] sm:$0xf]  ;;  %v11123_v52 = vld [vmem:[#allocation8 + $0x15c] sm:$0xf] }
 0x3aa   :  { %v11431_v59 = vld [vmem:[#allocation8 + $0xaf4] sm:$0xf0] }
 0x3ab   :  { %6881 = vmatpush.bf16.msrb.mxu1 %v10146_v4  ;;  %6845 = vmatpush.bf16.msra.mxu2 %v9282_v26  ;;  %v9185_v12 = vld [vmem:[#allocation8 + $0x418] sm:$0xf]  ;;  %v10050_v63 = vor.u32 %v11431_v59, %v10049_v61  ;;  %v6592_v26 = vpop.f32.mrf.mxu2  ;;  %v12111_v59 = vadd.f32 %v12100_v45, %v6578_v50  ;;  %v8803_v50 = vld [vmem:[#allocation8 + $0x138] sm:$0xf0] }
 0x3ac   :  { %v11215_v36 = vld [vmem:[#allocation8 + $0x434] sm:$0xf0] }
 0x3ad   :  { %6869 = vmatpush.bf16.msrb.mxu0 %v9858_v21  ;;  %6805 = vmatpush.bf16.msrb.mxu3 %v10590_v41  ;;  %v10433_v44 = vld [vmem:[#allocation8 + $0xdd8] sm:$0xf]  ;;  %v9186_v15 = vor.u32 %v11215_v36, %v9185_v12  ;;  %v10494_v21 = vor.u32 %v11538_v20, %v10491_v25  ;;  %v11203_v12 = vld [vmem:[#allocation8 + $0x3dc] sm:$0xf] }
 0x3ae   :  { %v11527_v24 = vld [vmem:[#allocation8 + $0xdf4] sm:$0xf0]  ;;  %v9123_v20 = vld [vmem:[#allocation8 + $0x3b8] sm:$0xf0] }
 0x3af   :  { %6882 = vmatpush.bf16.msrb.mxu1 %v10114_v8  ;;  %6846 = vmatpush.bf16.msra.mxu2 %v9250_v33  ;;  %v9761_v10 = vld [vmem:[#allocation8 + $0x898] sm:$0xf]  ;;  %v10434_v5 = vor.u32 %v11527_v24, %v10433_v44  ;;  %v10459_v33 = vld [vmem:[#allocation8 + $0xe30] sm:$0xf0]  ;;  %v6631_v53 = vpop.f32.mrf.mxu1 }
 0x3b0   :  { %v11359_v40 = vld [vmem:[#allocation8 + $0x8b4] sm:$0xf0]  ;;  %v10462_v2 = vor.u32 %v11530_v14, %v10459_v33  ;;  %v11179_v53 = vld [vmem:[#allocation8 + $0x31c] sm:$0xf] }
 0x3b1   :  { %6870 = vmatpush.bf16.msrb.mxu0 %v9826_v56  ;;  %6806 = vmatpush.bf16.msrb.mxu3 %v10558_v58  ;;  %v10017_v11 = vld [vmem:[#allocation8 + $0xa98] sm:$0xf]  ;;  %v9762_v23 = vor.u32 %v11359_v40, %v9761_v10  ;;  %v9158_v10 = vor.u32 %v11203_v12, %v9155_v16  ;;  %v11171_v12 = vld [vmem:[#allocation8 + $0x2dc] sm:$0xf] }
 0x3b2   :  { %v11423_v4 = vld [vmem:[#allocation8 + $0xab4] sm:$0xf0]  ;;  %v9027_v16 = vld [vmem:[#allocation8 + $0x2f8] sm:$0xf0] }
 0x3b3   :  { %6883 = vmatpush.bf16.msrb.mxu1 %v10082_v57  ;;  %6847 = vmatpush.bf16.msra.mxu2 %v9218_v22  ;;  %v10401_v28 = vld [vmem:[#allocation8 + $0xd98] sm:$0xf]  ;;  %v10018_v31 = vor.u32 %v11423_v4, %v10017_v11  ;;  %v11131_v11 = vld [vmem:[#allocation8 + $0x19c] sm:$0xf] }
 0x3b4   :  { %v11519_v47 = vld [vmem:[#allocation8 + $0xdb4] sm:$0xf0] }
 0x3b5   :  { %6871 = vmatpush.bf16.msrb.mxu0 %v9794_v3  ;;  %6807 = vmatpush.bf16.msrb.mxu3 %v10526_v7  ;;  %v9729_v8 = vld [vmem:[#allocation8 + $0x858] sm:$0xf]  ;;  %v10402_v37 = vor.u32 %v11519_v47, %v10401_v28  ;;  %v8902_v7 = vor.u32 %v11139_v62, %v8899_v18  ;;  %v11107_v62 = vld [vmem:[#allocation8 + $0xdc] sm:$0xf] }
 0x3b6   :  { %v11351_v41 = vld [vmem:[#allocation8 + $0x874] sm:$0xf0]  ;;  %v8771_v18 = vld [vmem:[#allocation8 + $0xf8] sm:$0xf0] }
 0x3b7   :  { %6884 = vmatpush.bf16.msrb.mxu1 %v10050_v63  ;;  %v9985_v30 = vld [vmem:[#allocation8 + $0xa58] sm:$0xf]  ;;  %6848 = vmatpush.bf16.msra.mxu2 %v9186_v15  ;;  %v9730_v43 = vor.u32 %v11351_v41, %v9729_v8  ;;  %v11195_v15 = vld [vmem:[#allocation8 + $0x39c] sm:$0xf] }
 0x3b8   :  { %v11415_v42 = vld [vmem:[#allocation8 + $0xa74] sm:$0xf0]  ;;  %v9126_v28 = vor.u32 %v11195_v15, %v9123_v20  ;;  %v9091_v41 = vld [vmem:[#allocation8 + $0x378] sm:$0xf0]  ;;  %v6603_v20 = vpop.f32.mrf.mxu3 }
 0x3b9   :  { %v9665_v49 = vld [vmem:[#allocation8 + $0x7d8] sm:$0xf]  ;;  %6872 = vmatpush.bf16.msrb.mxu0 %v9762_v23  ;;  %6808 = vmatpush.bf16.msrb.mxu3 %v10494_v21  ;;  %v9986_v58 = vor.u32 %v11415_v42, %v9985_v30  ;;  %v8870_v23 = vor.u32 %v11131_v11, %v8867_v13  ;;  %v11187_v21 = vld [vmem:[#allocation8 + $0x35c] sm:$0xf] }
 0x3ba   :  { %v11335_v39 = vld [vmem:[#allocation8 + $0x7f4] sm:$0xf0]  ;;  %6849 = vmatmul.bf16.vlgmr.msra.gmra.mxu2 %v11937_v1  ;;  %v11099_v13 = vld [vmem:[#allocation8 + $0x9c] sm:$0xf] }
 0x3bb   :  { %6893 = vmatpush.bf16.msrb.mxu2 %v10434_v5  ;;  %v9697_v9 = vld [vmem:[#allocation8 + $0x818] sm:$0xf]  ;;  %6885 = vmatpush.bf16.msrb.mxu1 %v10018_v31  ;;  %v9666_v38 = vor.u32 %v11335_v39, %v9665_v49  ;;  %v8835_v31 = vld [vmem:[#allocation8 + $0x178] sm:$0xf0] }
 0x3bc   :  { %v10369_v56 = vld [vmem:[#allocation8 + $0xd58] sm:$0xf]  ;;  %v8838_v51 = vor.u32 %v11123_v52, %v8835_v31  ;;  %v11115_v39 = vld [vmem:[#allocation8 + $0x11c] sm:$0xf] }
 0x3bd   :  { %v11511_v57 = vld [vmem:[#allocation8 + $0xd74] sm:$0xf0]  ;;  %6873 = vmatpush.bf16.msrb.mxu0 %v9730_v43  ;;  %6809 = vmatpush.bf16.msrb.mxu3 %v10462_v2  ;;  %v8739_v15 = vld [vmem:[#allocation8 + $0xb8] sm:$0xf0] }
 0x3be   :  { %v11343_v29 = vld [vmem:[#allocation8 + $0x834] sm:$0xf0]  ;;  %v10370_v36 = vor.u32 %v11511_v57, %v10369_v56 }
 0x3bf   :  { %v9953_v61 = vld [vmem:[#allocation8 + $0xa18] sm:$0xf]  ;;  %6894 = vmatpush.bf16.msrb.mxu2 %v10402_v37  ;;  %v9698_v44 = vor.u32 %v11343_v29, %v9697_v9  ;;  %6886 = vmatpush.bf16.msrb.mxu1 %v9986_v58  ;;  %v9094_v37 = vor.u32 %v11187_v21, %v9091_v41  ;;  %v9059_v9 = vld [vmem:[#allocation8 + $0x338] sm:$0xf0]  ;;  %v6642_v29 = vpop.f32.mrf.mxu2  ;;  %v8742_v21 = vor.u32 %v11099_v13, %v8739_v15 }
 0x3c0   :  { %v11407_v22 = vld [vmem:[#allocation8 + $0xa34] sm:$0xf0]  ;;  %6810 = vmatmul.bf16.vlgmr.msrb.gmra.mxu3 %v11987_v34  ;;  %v9062_v19 = vor.u32 %v11179_v53, %v9059_v9  ;;  %v11259_v41 = vld [vmem:[#allocation8 + $0x59c] sm:$0xf] }
 0x3c1   :  { %v9633_v17 = vld [vmem:[#allocation8 + $0x798] sm:$0xf]  ;;  %v9954_v45 = vor.u32 %v11407_v22, %v9953_v61  ;;  %6854 = vmatpush.bf16.msra.mxu3 %v9666_v38  ;;  %6874 = vmatpush.bf16.msrb.mxu0 %v9698_v44  ;;  %v8806_v61 = vor.u32 %v11115_v39, %v8803_v50  ;;  %v12118_v22 = vadd.f32 %v6642_v29, %v12105_v32  ;;  %v12120_v44 = vpop.f32.mrf.mxu0  ;;  %v8675_v29 = vld [vmem:[#allocation8 + $0x38] sm:$0xf0] }
 0x3c2   :  { %v11327_v3 = vld [vmem:[#allocation8 + $0x7b4] sm:$0xf0]  ;;  %v8774_v32 = vor.u32 %v11107_v62, %v8771_v18  ;;  %v11243_v15 = vld [vmem:[#allocation8 + $0x51c] sm:$0xf] }
 0x3c3   :  { %v10337_v24 = vld [vmem:[#allocation8 + $0xd18] sm:$0xf]  ;;  %v9634_v40 = vor.u32 %v11327_v3, %v9633_v17  ;;  %6895 = vmatpush.bf16.msrb.mxu2 %v10370_v36  ;;  %6887 = vmatpush.bf16.msrb.mxu1 %v9954_v45  ;;  %v12122_v45 = vpop.f32.mrf.mxu1 }
 0x3c4   :  { %v11503_v63 = vld [vmem:[#allocation8 + $0xd34] sm:$0xf0]  ;;  %6875 = vmatmul.bf16.vlgmr.msrb.gmra.mxu0 %v11952_v48 }
 0x3c5   :  { %v10338_v4 = vor.u32 %v11503_v63, %v10337_v24  ;;  %v9601_v25 = vld [vmem:[#allocation8 + $0x758] sm:$0xf]  ;;  %6919 = vmatpush.bf16.msra.mxu0 %v8902_v7  ;;  %6855 = vmatpush.bf16.msra.mxu3 %v9634_v40  ;;  %v11267_v7 = vld [vmem:[#allocation8 + $0x5dc] sm:$0xf]  ;;  %v9030_v40 = vor.u32 %v11171_v12, %v9027_v16 }
 0x3c6   :  { %v11319_v27 = vld [vmem:[#allocation8 + $0x774] sm:$0xf0]  ;;  %6888 = vmatmul.bf16.vlgmr.msrb.gmra.mxu1 %v11950_v46  ;;  %v11147_v12 = vld [vmem:[#allocation8 + $0x21c] sm:$0xf] }
 0x3c7   :  { %v10305_v5 = vld [vmem:[#allocation8 + $0xcd8] sm:$0xf]  ;;  %6932 = vmatpush.bf16.msra.mxu1 %v9158_v10  ;;  %v9602_v47 = vor.u32 %v11319_v27, %v9601_v25  ;;  %6896 = vmatpush.bf16.msrb.mxu2 %v10338_v4  ;;  %v9411_v10 = vld [vmem:[#allocation8 + $0x5f8] sm:$0xf0]  ;;  %v6644_v31 = vpop.f32.mrf.mxu2 }
 0x3c8   :  { %v11495_v26 = vld [vmem:[#allocation8 + $0xcf4] sm:$0xf0]  ;;  %v11163_v4 = vld [vmem:[#allocation8 + $0x29c] sm:$0xf]  ;;  %v9414_v52 = vor.u32 %v11267_v7, %v9411_v10 }
 0x3c9   :  { %v10306_v8 = vor.u32 %v11495_v26, %v10305_v5  ;;  %v9569_v30 = vld [vmem:[#allocation8 + $0x718] sm:$0xf]  ;;  %6920 = vmatpush.bf16.msra.mxu0 %v8870_v23  ;;  %6856 = vmatpush.bf16.msra.mxu3 %v9602_v47  ;;  %v8995_v27 = vld [vmem:[#allocation8 + $0x2b8] sm:$0xf0]  ;;  %v6604_v23 = vadd.f32 %v6603_v20, %v12111_v59  ;;  %v6670_v53 = vpop.f32.mrf.mxu0 }
 0x3ca   :  { %v11311_v42 = vld [vmem:[#allocation8 + $0x734] sm:$0xf0]  ;;  %v8963_v59 = vld [vmem:[#allocation8 + $0x278] sm:$0xf0] }
 0x3cb   :  { %v10273_v14 = vld [vmem:[#allocation8 + $0xc98] sm:$0xf]  ;;  %6933 = vmatpush.bf16.msra.mxu1 %v9126_v28  ;;  %v9570_v49 = vor.u32 %v11311_v42, %v9569_v30  ;;  %6897 = vmatpush.bf16.msrb.mxu2 %v10306_v8  ;;  %v12125_v28 = vld [vmem:[#allocation11] sm:$0xff]  ;;  %v11091_v8 = vld [vmem:[#allocation8 + $0x5c] sm:$0xf]  ;;  %v7026_v42 = vmax.f32 %v6604_v23, 0.0 }
 0x3cc   :  { %v11487_v33 = vld [vmem:[#allocation8 + $0xcb4] sm:$0xf0]  ;;  %v7036_v47 = vperm.slane %v12125_v28, 3  ;;  %v9379_v30 = vld [vmem:[#allocation8 + $0x5b8] sm:$0xf0] }
 0x3cd   :  { %v10274_v43 = vor.u32 %v11487_v33, %v10273_v14  ;;  %v9537_v56 = vld [vmem:[#allocation8 + $0x6d8] sm:$0xf]  ;;  %6921 = vmatpush.bf16.msra.mxu0 %v8838_v51  ;;  %6857 = vmatpush.bf16.msra.mxu3 %v9570_v49  ;;  %v8998_v14 = vor.u32 %v11163_v4, %v8995_v27  ;;  %v8707_v51 = vld [vmem:[#allocation8 + $0x78] sm:$0xf0] }
 0x3ce   :  { %v11303_v57 = vld [vmem:[#allocation8 + $0x6f4] sm:$0xf0]  ;;  %v7052_v50 = vmul.f32 %v7036_v47, %v7026_v42  ;;  %v10179_v10 = vld [vmem:[#allocation8 + $0xbf8] sm:$0xf0] }
 0x3cf   :  { %v10241_v58 = vld [vmem:[#allocation8 + $0xc58] sm:$0xf]  ;;  %6934 = vmatpush.bf16.msra.mxu1 %v9094_v37  ;;  %v9538_v38 = vor.u32 %v11303_v57, %v9537_v56  ;;  %6898 = vmatpush.bf16.msrb.mxu2 %v10274_v43  ;;  %v11155_v37 = vld [vmem:[#allocation8 + $0x25c] sm:$0xf]  ;;  %v9382_v43 = vor.u32 %v11259_v41, %v9379_v30 }
 0x3d0   :  { %v11479_v2 = vld [vmem:[#allocation8 + $0xc74] sm:$0xf0]  ;;  %v11083_v57 = vld [vmem:[#allocation8 + $0x1c] sm:$0xf]  ;;  %v8966_v62 = vor.u32 %v11155_v37, %v8963_v59 }
 0x3d1   :  { %v10242_v36 = vor.u32 %v11479_v2, %v10241_v58  ;;  %v9505_v17 = vld [vmem:[#allocation8 + $0x698] sm:$0xf]  ;;  %6922 = vmatpush.bf16.msra.mxu0 %v8806_v61  ;;  %6858 = vmatpush.bf16.msra.mxu3 %v9538_v38  ;;  %v6683_v58 = vpop.f32.mrf.mxu1  ;;  %v8710_v2 = vor.u32 %v11091_v8, %v8707_v51  ;;  %v11251_v61 = vld [vmem:[#allocation8 + $0x55c] sm:$0xf]  ;;  %v7063_v38 = vsel %vm7057_vm0, %v7052_v50, 0.0  ;;  %v8678_v13 = vor.u32 %v11083_v57, %v8675_v29 }
 0x3d2   :  { %v11295_v3 = vld [vmem:[#allocation8 + $0x6b4] sm:$0xf0]  ;;  %v12130_v16 = vadd.f32 %v7063_v38, %v12094_v55  ;;  %v9315_v4 = vld [vmem:[#allocation8 + $0x538] sm:$0xf0] }
 0x3d3   :  { %v10209_v24 = vld [vmem:[#allocation8 + $0xc18] sm:$0xf]  ;;  %6935 = vmatpush.bf16.msra.mxu1 %v9062_v19  ;;  %v9506_v11 = vor.u32 %v11295_v3, %v9505_v17  ;;  %6899 = vmatpush.bf16.msrb.mxu2 %v10242_v36  ;;  %v9347_v19 = vld [vmem:[#allocation8 + $0x578] sm:$0xf0]  ;;  %v6605_v17 = vpop.f32.mrf.mxu3  ;;  %v9318_v47 = vor.u32 %v11243_v15, %v9315_v4 }
 0x3d4   :  { %v11471_v63 = vld [vmem:[#allocation8 + $0xc34] sm:$0xf0]  ;;  %v8931_v36 = vld [vmem:[#allocation8 + $0x238] sm:$0xf0]  ;;  %v9350_v7 = vor.u32 %v11251_v61, %v9347_v19 }
 0x3d5   :  { %v10210_v25 = vor.u32 %v11471_v63, %v10209_v24  ;;  %v9473_v5 = vld [vmem:[#allocation8 + $0x658] sm:$0xf]  ;;  %6923 = vmatpush.bf16.msra.mxu0 %v8774_v32  ;;  %6859 = vmatpush.bf16.msra.mxu3 %v9506_v11  ;;  %v11395_v24 = vld [vmem:[#allocation8 + $0x9dc] sm:$0xf]  ;;  %v8934_v55 = vor.u32 %v11147_v12, %v8931_v36  ;;  %v12136_v12 = vpop.f32.mrf.mxu2 }
 0x3d6   :  { %v11287_v26 = vld [vmem:[#allocation8 + $0x674] sm:$0xf0]  ;;  %v9923_v63 = vld [vmem:[#allocation8 + $0x9f8] sm:$0xf0] }
 0x3d7   :  { %6936 = vmatpush.bf16.msra.mxu1 %v9030_v40  ;;  %v9474_v33 = vor.u32 %v11287_v26, %v9473_v5  ;;  %6900 = vmatpush.bf16.msrb.mxu2 %v10210_v25  ;;  %v9441_v49 = vld [vmem:[#allocation8 + $0x618] sm:$0xf]  ;;  %v11459_v32 = vld [vmem:[#allocation8 + $0xbdc] sm:$0xf]  ;;  %v9926_v20 = vor.u32 %v11395_v24, %v9923_v63 }
 0x3d8   :  { %v11279_v39 = vld [vmem:[#allocation8 + $0x634] sm:$0xf0]  ;;  %v10182_v25 = vor.u32 %v11459_v32, %v10179_v10  ;;  %v11387_v5 = vld [vmem:[#allocation8 + $0x99c] sm:$0xf] }
 0x3d9   :  { %v10689_v9 = vld [vmem:[#allocation8 + $0xfd8] sm:$0xf]  ;;  %6924 = vmatpush.bf16.msra.mxu0 %v8742_v21  ;;  %6860 = vmatpush.bf16.msra.mxu3 %v9474_v33  ;;  %v9442_v18 = vor.u32 %v11279_v39, %v9441_v49  ;;  %v9891_v26 = vld [vmem:[#allocation8 + $0x9b8] sm:$0xf0] }
 0x3da   :  { %v11591_v56 = vld [vmem:[#allocation8 + $0xff4] sm:$0xf0]  ;;  %6901 = vmatmul.bf16.vlgmr.msrb.gmra.mxu2 %v11973_v35  ;;  %v11451_v23 = vld [vmem:[#allocation8 + $0xb9c] sm:$0xf]  ;;  %v9894_v30 = vor.u32 %v11387_v5, %v9891_v26 }
 0x3db   :  { %6945 = vmatpush.bf16.msra.mxu2 %v9414_v52  ;;  %6937 = vmatpush.bf16.msra.mxu1 %v8998_v14  ;;  %v10690_v3 = vor.u32 %v11591_v56, %v10689_v9  ;;  %v10657_v40 = vld [vmem:[#allocation8 + $0xf98] sm:$0xf]  ;;  %v10147_v52 = vld [vmem:[#allocation8 + $0xbb8] sm:$0xf0] }
 0x3dc   :  { %v11583_v11 = vld [vmem:[#allocation8 + $0xfb4] sm:$0xf0]  ;;  %v11235_v8 = vld [vmem:[#allocation8 + $0x4dc] sm:$0xf]  ;;  %v10150_v42 = vor.u32 %v11451_v23, %v10147_v52 }
 0x3dd   :  { %6925 = vmatpush.bf16.msra.mxu0 %v8710_v2  ;;  %6861 = vmatpush.bf16.msra.mxu3 %v9442_v18  ;;  %v10658_v27 = vor.u32 %v11583_v11, %v10657_v40  ;;  %v10625_v31 = vld [vmem:[#allocation8 + $0xf58] sm:$0xf]  ;;  %v9283_v41 = vld [vmem:[#allocation8 + $0x4f8] sm:$0xf0] }
 0x3de   :  { %v11575_v21 = vld [vmem:[#allocation8 + $0xf74] sm:$0xf0]  ;;  %v11379_v33 = vld [vmem:[#allocation8 + $0x95c] sm:$0xf]  ;;  %v9286_v59 = vor.u32 %v11235_v8, %v9283_v41  ;;  %v6655_v8 = vpop.f32.mrf.mxu3 }
 0x3df   :  { %6946 = vmatpush.bf16.msra.mxu2 %v9382_v43  ;;  %6938 = vmatpush.bf16.msra.mxu1 %v8966_v62  ;;  %v10626_v14 = vor.u32 %v11575_v21, %v10625_v31  ;;  %v9859_v51 = vld [vmem:[#allocation8 + $0x978] sm:$0xf0]  ;;  %v10593_v39 = vld [vmem:[#allocation8 + $0xf18] sm:$0xf] }
 0x3e0   :  { %6862 = vmatmul.bf16.vlgmr.msra.gmra.mxu3 %v11939_v6  ;;  %v11443_v37 = vld [vmem:[#allocation8 + $0xb5c] sm:$0xf]  ;;  %v11567_v50 = vld [vmem:[#allocation8 + $0xf34] sm:$0xf0]  ;;  %v9862_v9 = vor.u32 %v11379_v33, %v9859_v51  ;;  %v6656_v33 = vadd.f32 %v6655_v8, %v12118_v22 }
 0x3e1   :  { %6906 = vmatpush.bf16.msrb.mxu3 %v10690_v3  ;;  %6926 = vmatpush.bf16.msra.mxu0 %v8678_v13  ;;  %v10115_v49 = vld [vmem:[#allocation8 + $0xb78] sm:$0xf0]  ;;  %v10594_v57 = vor.u32 %v11567_v50, %v10593_v39  ;;  %v10561_v19 = vld [vmem:[#allocation8 + $0xed8] sm:$0xf]  ;;  %v6720_v13 = vpop.f32.mrf.mxu0 }
 0x3e2   :  { %v11227_v53 = vld [vmem:[#allocation8 + $0x49c] sm:$0xf]  ;;  %v10118_v56 = vor.u32 %v11443_v37, %v10115_v49  ;;  %v11559_v38 = vld [vmem:[#allocation8 + $0xef4] sm:$0xf0]  ;;  %v6696_v37 = vpop.f32.mrf.mxu2  ;;  %v6669_v50 = vadd.f32 %v12120_v44, %v6656_v33 }
 0x3e3   :  { %6947 = vmatpush.bf16.msra.mxu2 %v9350_v7  ;;  %6939 = vmatpush.bf16.msra.mxu1 %v8934_v55  ;;  %v9251_v43 = vld [vmem:[#allocation8 + $0x4b8] sm:$0xf0]  ;;  %v10562_v3 = vor.u32 %v11559_v38, %v10561_v19  ;;  %v10529_v40 = vld [vmem:[#allocation8 + $0xe98] sm:$0xf] }
 0x3e4   :  { %6927 = vmatmul.bf16.vlgmr.msra.gmra.mxu0 %v11933_v0  ;;  %v11371_v58 = vld [vmem:[#allocation8 + $0x91c] sm:$0xf]  ;;  %v9254_v0 = vor.u32 %v11227_v53, %v9251_v43  ;;  %v11551_v11 = vld [vmem:[#allocation8 + $0xeb4] sm:$0xf0]  ;;  %v6682_v38 = vadd.f32 %v12122_v45, %v6669_v50 }
 0x3e5   :  { %6971 = vmatpush.bf16.msrb.mxu0 %v9926_v20  ;;  %6907 = vmatpush.bf16.msrb.mxu3 %v10658_v27  ;;  %v9827_v2 = vld [vmem:[#allocation8 + $0x938] sm:$0xf0]  ;;  %v6733_v20 = vpop.f32.mrf.mxu1  ;;  %v10530_v23 = vor.u32 %v11551_v11, %v10529_v40 }
 0x3e6   :  { %6940 = vmatmul.bf16.vlgmr.msra.gmra.mxu1 %v11935_v60  ;;  %v11435_v29 = vld [vmem:[#allocation8 + $0xb1c] sm:$0xf]  ;;  %v3620_v60 = vperm.slane %v12102_v54, 5  ;;  %v9830_v36 = vor.u32 %v11371_v58, %v9827_v2  ;;  %v10465_v2 = vld [vmem:[#allocation8 + $0xe18] sm:$0xf] }
 0x3e7   :  { %6984 = vmatpush.bf16.msrb.mxu1 %v10182_v25  ;;  %6948 = vmatpush.bf16.msra.mxu2 %v9318_v47  ;;  %v10083_v61 = vld [vmem:[#allocation8 + $0xb38] sm:$0xf0] }
 0x3e8   :  { %v11219_v62 = vld [vmem:[#allocation8 + $0x45c] sm:$0xf]  ;;  %v10086_v17 = vor.u32 %v11435_v29, %v10083_v61  ;;  %v6721_v55 = vadd.f32 %v6720_v13, %v3620_v60  ;;  %v11535_v29 = vld [vmem:[#allocation8 + $0xe34] sm:$0xf0] }
 0x3e9   :  { %6972 = vmatpush.bf16.msrb.mxu0 %v9894_v30  ;;  %6908 = vmatpush.bf16.msrb.mxu3 %v10626_v14  ;;  %v9219_v18 = vld [vmem:[#allocation8 + $0x478] sm:$0xf0]  ;;  %v11543_v14 = vld [vmem:[#allocation8 + $0xe74] sm:$0xf0]  ;;  %v6722_v22 = vpop.f32.mrf.mxu0 }
 0x3ea   :  { %v11363_v24 = vld [vmem:[#allocation8 + $0x8dc] sm:$0xf]  ;;  %v9222_v7 = vor.u32 %v11219_v62, %v9219_v18  ;;  %v12139_v21 = vadd.f32 %v6733_v20, %v6721_v55 }
 0x3eb   :  { %6985 = vmatpush.bf16.msrb.mxu1 %v10150_v42  ;;  %6949 = vmatpush.bf16.msra.mxu2 %v9286_v59  ;;  %v9795_v63 = vld [vmem:[#allocation8 + $0x8f8] sm:$0xf0]  ;;  %v10497_v42 = vld [vmem:[#allocation8 + $0xe58] sm:$0xf] }
 0x3ec   :  { %v11427_v32 = vld [vmem:[#allocation8 + $0xadc] sm:$0xf]  ;;  %v9798_v25 = vor.u32 %v11363_v24, %v9795_v63  ;;  %v10498_v43 = vor.u32 %v11543_v14, %v10497_v42  ;;  %v12145_v63 = vadd.f32 %v12136_v12, %v6682_v38 }
 0x3ed   :  { %6973 = vmatpush.bf16.msrb.mxu0 %v9862_v9  ;;  %6909 = vmatpush.bf16.msrb.mxu3 %v10594_v57  ;;  %v10051_v10 = vld [vmem:[#allocation8 + $0xaf8] sm:$0xf0]  ;;  %v6735_v62 = vpop.f32.mrf.mxu1 }
 0x3ee   :  { %v11211_v15 = vld [vmem:[#allocation8 + $0x41c] sm:$0xf]  ;;  %v10054_v26 = vor.u32 %v11427_v32, %v10051_v10  ;;  %v6657_v32 = vpop.f32.mrf.mxu3 }
 0x3ef   :  { %6986 = vmatpush.bf16.msrb.mxu1 %v10118_v56  ;;  %6950 = vmatpush.bf16.msra.mxu2 %v9254_v0  ;;  %v9187_v4 = vld [vmem:[#allocation8 + $0x438] sm:$0xf0] }
 0x3f0   :  { %v11523_v27 = vld [vmem:[#allocation8 + $0xddc] sm:$0xf]  ;;  %v9190_v41 = vor.u32 %v11211_v15, %v9187_v4 }
 0x3f1   :  { %6974 = vmatpush.bf16.msrb.mxu0 %v9830_v36  ;;  %v10435_v5 = vld [vmem:[#allocation8 + $0xdf8] sm:$0xf0]  ;;  %6910 = vmatpush.bf16.msrb.mxu3 %v10562_v3 }
 0x3f2   :  { %v11355_v47 = vld [vmem:[#allocation8 + $0x89c] sm:$0xf]  ;;  %v10438_v51 = vor.u32 %v11523_v27, %v10435_v5 }
 0x3f3   :  { %6987 = vmatpush.bf16.msrb.mxu1 %v10086_v17  ;;  %v9763_v52 = vld [vmem:[#allocation8 + $0x8b8] sm:$0xf0]  ;;  %6951 = vmatpush.bf16.msra.mxu2 %v9222_v7  ;;  %v10466_v17 = vor.u32 %v11535_v29, %v10465_v2 }
 0x3f4   :  { %v11419_v31 = vld [vmem:[#allocation8 + $0xa9c] sm:$0xf]  ;;  %v9766_v59 = vor.u32 %v11355_v47, %v9763_v52 }
 0x3f5   :  { %v10019_v30 = vld [vmem:[#allocation8 + $0xab8] sm:$0xf0]  ;;  %6975 = vmatpush.bf16.msrb.mxu0 %v9798_v25  ;;  %6911 = vmatpush.bf16.msrb.mxu3 %v10530_v23 }
 0x3f6   :  { %v11515_v49 = vld [vmem:[#allocation8 + $0xd9c] sm:$0xf]  ;;  %v10022_v53 = vor.u32 %v11419_v31, %v10019_v30 }
 0x3f7   :  { %v10403_v39 = vld [vmem:[#allocation8 + $0xdb8] sm:$0xf0]  ;;  %6988 = vmatpush.bf16.msrb.mxu1 %v10054_v26  ;;  %6952 = vmatpush.bf16.msra.mxu2 %v9190_v41 }
 0x3f8   :  { %v11347_v9 = vld [vmem:[#allocation8 + $0x85c] sm:$0xf]  ;;  %v10406_v0 = vor.u32 %v11515_v49, %v10403_v39 }
 0x3f9   :  { %v9731_v56 = vld [vmem:[#allocation8 + $0x878] sm:$0xf0]  ;;  %6976 = vmatpush.bf16.msrb.mxu0 %v9766_v59  ;;  %6912 = vmatpush.bf16.msrb.mxu3 %v10498_v43  ;;  %v6746_v59 = vpop.f32.mrf.mxu2 }
 0x3fa   :  { %v11411_v57 = vld [vmem:[#allocation8 + $0xa5c] sm:$0xf]  ;;  %v9734_v44 = vor.u32 %v11347_v9, %v9731_v56  ;;  %6953 = vmatmul.bf16.vlgmr.msra.gmra.mxu2 %v11937_v1  ;;  %v12152_v49 = vadd.f32 %v6746_v59, %v12139_v21 }
 0x3fb   :  { %v9987_v58 = vld [vmem:[#allocation8 + $0xa78] sm:$0xf0]  ;;  %6997 = vmatpush.bf16.msrb.mxu2 %v10438_v51  ;;  %6989 = vmatpush.bf16.msrb.mxu1 %v10022_v53 }
 0x3fc   :  { %v11331_v61 = vld [vmem:[#allocation8 + $0x7dc] sm:$0xf]  ;;  %v9990_v36 = vor.u32 %v11411_v57, %v9987_v58  ;;  %v6707_v58 = vpop.f32.mrf.mxu3 }
 0x3fd   :  { %v9667_v19 = vld [vmem:[#allocation8 + $0x7f8] sm:$0xf0]  ;;  %6977 = vmatpush.bf16.msrb.mxu0 %v9734_v44  ;;  %6913 = vmatpush.bf16.msrb.mxu3 %v10466_v17  ;;  %v6708_v22 = vadd.f32 %v6707_v58, %v12145_v63 }
 0x3fe   :  { %v11507_v18 = vld [vmem:[#allocation8 + $0xd5c] sm:$0xf]  ;;  %v9670_v7 = vor.u32 %v11331_v61, %v9667_v19 }
 0x3ff   :  { %v10371_v60 = vld [vmem:[#allocation8 + $0xd78] sm:$0xf0]  ;;  %6998 = vmatpush.bf16.msrb.mxu2 %v10406_v0  ;;  %6990 = vmatpush.bf16.msrb.mxu1 %v9990_v36  ;;  %v7037_v0 = vperm.slane %v12125_v28, 4  ;;  %v7027_v19 = vmax.f32 %v6708_v22, 0.0 }
 0x400   :  { %v11339_v3 = vld [vmem:[#allocation8 + $0x81c] sm:$0xf]  ;;  %v10374_v40 = vor.u32 %v11507_v18, %v10371_v60  ;;  %6914 = vmatmul.bf16.vlgmr.msrb.gmra.mxu3 %v11987_v34 }
 0x401   :  { %v9699_v24 = vld [vmem:[#allocation8 + $0x838] sm:$0xf0]  ;;  %6958 = vmatpush.bf16.msra.mxu3 %v9670_v7  ;;  %v12154_v53 = vpop.f32.mrf.mxu0  ;;  %v6748_v61 = vpop.f32.mrf.mxu2  ;;  %v7053_v18 = vmul.f32 %v7037_v0, %v7027_v19 }
 0x402   :  { %v11403_v10 = vld [vmem:[#allocation8 + $0xa1c] sm:$0xf]  ;;  %v9702_v15 = vor.u32 %v11339_v3, %v9699_v24 }
 0x403   :  { %v9955_v45 = vld [vmem:[#allocation8 + $0xa38] sm:$0xf0]  ;;  %6999 = vmatpush.bf16.msrb.mxu2 %v10374_v40  ;;  %v12156_v56 = vpop.f32.mrf.mxu1  ;;  %v7065_v24 = vsel %vm7057_vm0, %v7053_v18, 0.0  ;;  %v11610_v18 = vld [vmem:[#allocation10] sm:$0xff] }
 0x404   :  { %v11323_v11 = vld [vmem:[#allocation8 + $0x79c] sm:$0xf]  ;;  %v9958_v20 = vor.u32 %v11403_v10, %v9955_v45  ;;  %6978 = vmatpush.bf16.msrb.mxu0 %v9702_v15  ;;  %v6709_v32 = vpop.f32.mrf.mxu3  ;;  %v7066_v10 = vadd.f32 %v7065_v24, %v12130_v16  ;;  %v3621_v16 = vperm.slane %v12102_v54, 6 }
 0x405   :  { %v9635_v13 = vld [vmem:[#allocation8 + $0x7b8] sm:$0xf0] }
 0x406   :  { %v11499_v4 = vld [vmem:[#allocation8 + $0xd1c] sm:$0xf]  ;;  %v9638_v12 = vor.u32 %v11323_v11, %v9635_v13  ;;  %6991 = vmatpush.bf16.msrb.mxu1 %v9958_v20 }
 0x407   :  { %v10339_v55 = vld [vmem:[#allocation8 + $0xd38] sm:$0xf0]  ;;  %6979 = vmatmul.bf16.vlgmr.msrb.gmra.mxu0 %v11952_v48 }
 0x408   :  { %v10342_v25 = vor.u32 %v11499_v4, %v10339_v55  ;;  %v11315_v27 = vld [vmem:[#allocation8 + $0x75c] sm:$0xf]  ;;  %6959 = vmatpush.bf16.msra.mxu3 %v9638_v12 }
 0x409   :  { %v9603_v1 = vld [vmem:[#allocation8 + $0x778] sm:$0xf0]  ;;  %6992 = vmatmul.bf16.vlgmr.msrb.gmra.mxu1 %v11950_v46  ;;  %v6774_v60 = vpop.f32.mrf.mxu0 }
 0x40a   :  { %v11491_v5 = vld [vmem:[#allocation8 + $0xcdc] sm:$0xf]  ;;  %v9606_v23 = vor.u32 %v11315_v27, %v9603_v1  ;;  %7000 = vmatpush.bf16.msrb.mxu2 %v10342_v25 }
 0x40b   :  { %v10307_v26 = vld [vmem:[#allocation8 + $0xcf8] sm:$0xf0]  ;;  %v6787_v3 = vpop.f32.mrf.mxu1 }
 0x40c   :  { %v10310_v47 = vor.u32 %v11491_v5, %v10307_v26  ;;  %v11307_v52 = vld [vmem:[#allocation8 + $0x71c] sm:$0xf]  ;;  %6960 = vmatpush.bf16.msra.mxu3 %v9606_v23 }
 0x40d   :  { %v9571_v31 = vld [vmem:[#allocation8 + $0x738] sm:$0xf0] }
 0x40e   :  { %v11483_v8 = vld [vmem:[#allocation8 + $0xc9c] sm:$0xf]  ;;  %v9574_v30 = vor.u32 %v11307_v52, %v9571_v31  ;;  %7001 = vmatpush.bf16.msrb.mxu2 %v10310_v47 }
 0x40f   :  { %v10275_v41 = vld [vmem:[#allocation8 + $0xcb8] sm:$0xf0] }
 0x410   :  { %v10278_v42 = vor.u32 %v11483_v8, %v10275_v41  ;;  %v11299_v14 = vld [vmem:[#allocation8 + $0x6dc] sm:$0xf]  ;;  %6961 = vmatpush.bf16.msra.mxu3 %v9574_v30 }
 0x411   :  { %v9539_v33 = vld [vmem:[#allocation8 + $0x6f8] sm:$0xf0] }
 0x412   :  { %v11475_v51 = vld [vmem:[#allocation8 + $0xc5c] sm:$0xf]  ;;  %v9542_v48 = vor.u32 %v11299_v14, %v9539_v33  ;;  %7002 = vmatpush.bf16.msrb.mxu2 %v10278_v42 }
 0x413   :  { %v10243_v37 = vld [vmem:[#allocation8 + $0xc78] sm:$0xf0] }
 0x414   :  { %v10246_v39 = vor.u32 %v11475_v51, %v10243_v37  ;;  %v11291_v50 = vld [vmem:[#allocation8 + $0x69c] sm:$0xf]  ;;  %6962 = vmatpush.bf16.msra.mxu3 %v9542_v48 }
 0x415   :  { %v9507_v46 = vld [vmem:[#allocation8 + $0x6b8] sm:$0xf0] }
 0x416   :  { %v11467_v43 = vld [vmem:[#allocation8 + $0xc1c] sm:$0xf]  ;;  %v9510_v57 = vor.u32 %v11291_v50, %v9507_v46  ;;  %7003 = vmatpush.bf16.msrb.mxu2 %v10246_v39 }
 0x417   :  { %v10211_v9 = vld [vmem:[#allocation8 + $0xc38] sm:$0xf0] }
 0x418   :  { %v10214_v2 = vor.u32 %v11467_v43, %v10211_v9  ;;  %v11283_v29 = vld [vmem:[#allocation8 + $0x65c] sm:$0xf]  ;;  %6963 = vmatpush.bf16.msra.mxu3 %v9510_v57 }
 0x419   :  { %v9475_v21 = vld [vmem:[#allocation8 + $0x678] sm:$0xf0] }
 0x41a   :  { %v9478_v38 = vor.u32 %v11283_v29, %v9475_v21  ;;  %7004 = vmatpush.bf16.msrb.mxu2 %v10214_v2  ;;  %v11275_v62 = vld [vmem:[#allocation8 + $0x61c] sm:$0xf]  ;;  %v7038_v29 = vperm.slane %v12125_v28, 5 }
 0x41b   :  { %v9443_v44 = vld [vmem:[#allocation8 + $0x638] sm:$0xf0] }
 0x41c   :  { %v11587_v36 = vld [vmem:[#allocation8 + $0xfdc] sm:$0xf]  ;;  %6964 = vmatpush.bf16.msra.mxu3 %v9478_v38  ;;  %v9446_v63 = vor.u32 %v11275_v62, %v9443_v44 }
 0x41d   :  { %v10691_v17 = vld [vmem:[#allocation8 + $0xff8] sm:$0xf0]  ;;  %7005 = vmatmul.bf16.vlgmr.msrb.gmra.mxu2 %v11973_v35  ;;  %v6798_v27 = vpop.f32.mrf.mxu2 }
 0x41e   :  { %v10694_v7 = vor.u32 %v11587_v36, %v10691_v17  ;;  %v11579_v45 = vld [vmem:[#allocation8 + $0xf9c] sm:$0xf] }
 0x41f   :  { %v10659_v40 = vld [vmem:[#allocation8 + $0xfb8] sm:$0xf0] }
 0x420   :  { %6965 = vmatpush.bf16.msra.mxu3 %v9446_v63  ;;  %v10662_v11 = vor.u32 %v11579_v45, %v10659_v40  ;;  %v11571_v13 = vld [vmem:[#allocation8 + $0xf5c] sm:$0xf] }
 0x421   :  { %v10627_v15 = vld [vmem:[#allocation8 + $0xf78] sm:$0xf0]  ;;  %v6824_v23 = vpop.f32.mrf.mxu0 }
 0x422   :  { %v10630_v4 = vor.u32 %v11571_v13, %v10627_v15  ;;  %v11563_v55 = vld [vmem:[#allocation8 + $0xf1c] sm:$0xf]  ;;  %v6825_v47 = vadd.f32 %v6824_v23, %v3621_v16 }
 0x423   :  { %6966 = vmatmul.bf16.vlgmr.msra.gmra.mxu3 %v11939_v6  ;;  %v10595_v20 = vld [vmem:[#allocation8 + $0xf38] sm:$0xf0]  ;;  %v6837_v52 = vpop.f32.mrf.mxu1  ;;  %v6759_v8 = vpop.f32.mrf.mxu3 }
 0x424   :  { %7010 = vmatpush.bf16.msrb.mxu3 %v10694_v7  ;;  %v10598_v35 = vor.u32 %v11563_v55, %v10595_v20  ;;  %v11555_v12 = vld [vmem:[#allocation8 + $0xedc] sm:$0xf]  ;;  %v6838_v31 = vadd.f32 %v6837_v52, %v6825_v47  ;;  %v6760_v42 = vadd.f32 %v6759_v8, %v12152_v49 }
 0x425   :  { %v10563_v25 = vld [vmem:[#allocation8 + $0xef8] sm:$0xf0]  ;;  %v6800_v14 = vpop.f32.mrf.mxu2 }
 0x426   :  { %v10566_v1 = vor.u32 %v11555_v12, %v10563_v25  ;;  %v11547_v5 = vld [vmem:[#allocation8 + $0xe9c] sm:$0xf]  ;;  %v6773_v33 = vadd.f32 %v12154_v53, %v6760_v42  ;;  %v7039_v12 = vperm.slane %v12125_v28, 6 }
 0x427   :  { %v10531_v26 = vld [vmem:[#allocation8 + $0xeb8] sm:$0xf0] }
 0x428   :  { %7011 = vmatpush.bf16.msrb.mxu3 %v10662_v11  ;;  %v10534_v6 = vor.u32 %v11547_v5, %v10531_v26  ;;  %v11539_v41 = vld [vmem:[#allocation8 + $0xe5c] sm:$0xf]  ;;  %v6786_v48 = vadd.f32 %v12156_v56, %v6773_v33 }
 0x429   :  { %v10499_v30 = vld [vmem:[#allocation8 + $0xe78] sm:$0xf0]  ;;  %v6826_v59 = vpop.f32.mrf.mxu0 }
 0x42a   :  { %v10502_v54 = vor.u32 %v11539_v41, %v10499_v30  ;;  %v11531_v51 = vld [vmem:[#allocation8 + $0xe1c] sm:$0xf]  ;;  %v6799_v46 = vadd.f32 %v6798_v27, %v6786_v48 }
 0x42b   :  { %v10467_v37 = vld [vmem:[#allocation8 + $0xe38] sm:$0xf0]  ;;  %v6839_v39 = vpop.f32.mrf.mxu1  ;;  %v6761_v43 = vpop.f32.mrf.mxu3 }
 0x42c   :  { %7012 = vmatpush.bf16.msrb.mxu3 %v10630_v4  ;;  %v10470_v50 = vor.u32 %v11531_v51, %v10467_v37  ;;  %v7040_v37 = vperm.slane %v12125_v28, 7  ;;  %v11600_v43 = vld [vmem:[#allocation2] ss:$0 sm:$0xff] }
 0x430   :  { %7013 = vmatpush.bf16.msrb.mxu3 %v10598_v35 }
 0x434   :  { %7014 = vmatpush.bf16.msrb.mxu3 %v10566_v1 }
 0x438   :  { %7015 = vmatpush.bf16.msrb.mxu3 %v10534_v6 }
 0x43c   :  { %7016 = vmatpush.bf16.msrb.mxu3 %v10502_v54 }
 0x43d   :  { %v6850_v9 = vpop.f32.mrf.mxu2 }
 0x43e   :  { %v6851_v49 = vadd.f32 %v6850_v9, %v6838_v31 }
 0x440   :  { %7017 = vmatpush.bf16.msrb.mxu3 %v10470_v50 }
 0x441   :  { %v6876_v57 = vpop.f32.mrf.mxu0 }
 0x443   :  { %7018 = vmatmul.bf16.vlgmr.msrb.gmra.mxu3 %v11987_v34  ;;  %v6889_v58 = vpop.f32.mrf.mxu1  ;;  %v6811_v53 = vpop.f32.mrf.mxu3  ;;  %v3622_v34 = vperm.slane %v11610_v18, 7 }
 0x444   :  { %v6812_v2 = vadd.f32 %v6811_v53, %v6799_v46 }
 0x445   :  { %v6852_v21 = vpop.f32.mrf.mxu2 }
 0x446   :  { %v7028_v22 = vmax.f32 %v6812_v2, 0.0 }
 0x448   :  { %v7054_v0 = vmul.f32 %v7038_v29, %v7028_v22 }
 0x449   :  { %v6878_v56 = vpop.f32.mrf.mxu0 }
 0x44a   :  { %v7067_v19 = vsel %vm7057_vm0, %v7054_v0, 0.0 }
 0x44b   :  { %v6891_v61 = vpop.f32.mrf.mxu1  ;;  %v6813_v38 = vpop.f32.mrf.mxu3  ;;  %v7068_v62 = vadd.f32 %v7067_v19, %v7066_v10 }
 0x45d   :  { %v6902_v44 = vpop.f32.mrf.mxu2 }
 0x461   :  { %v6928_v60 = vpop.f32.mrf.mxu0 }
 0x462   :  { %v6929_v36 = vadd.f32 %v6928_v60, %v3622_v34 }
 0x463   :  { %v6941_v17 = vpop.f32.mrf.mxu1  ;;  %v6863_v24 = vpop.f32.mrf.mxu3 }
 0x464   :  { %v6942_v3 = vadd.f32 %v6941_v17, %v6929_v36  ;;  %v6864_v63 = vadd.f32 %v6863_v24, %v6851_v49 }
 0x465   :  { %v6904_v32 = vpop.f32.mrf.mxu2 }
 0x466   :  { %v6877_v7 = vadd.f32 %v6876_v57, %v6864_v63 }
 0x468   :  { %v6890_v40 = vadd.f32 %v6889_v58, %v6877_v7 }
 0x469   :  { %v6930_v45 = vpop.f32.mrf.mxu0 }
 0x46a   :  { %v6903_v13 = vadd.f32 %v6902_v44, %v6890_v40 }
 0x46b   :  { %v6943_v11 = vpop.f32.mrf.mxu1  ;;  %v6865_v15 = vpop.f32.mrf.mxu3 }
 0x47d   :  { %v6954_v4 = vpop.f32.mrf.mxu2 }
 0x47e   :  { %v6955_v41 = vadd.f32 %v6954_v4, %v6942_v3 }
 0x483   :  { %v6915_v10 = vpop.f32.mrf.mxu3 }
 0x484   :  { %v6980_v55 = vpop.f32.mrf.mxu0  ;;  %v6916_v35 = vadd.f32 %v6915_v10, %v6903_v13 }
 0x485   :  { %v6956_v25 = vpop.f32.mrf.mxu2 }
 0x486   :  { %v6993_v20 = vpop.f32.mrf.mxu1  ;;  %v7029_v27 = vmax.f32 %v6916_v35, 0.0 }
 0x488   :  { %v7055_v16 = vmul.f32 %v7039_v12, %v7029_v27 }
 0x48a   :  { %v7069_v26 = vsel %vm7057_vm0, %v7055_v16, 0.0 }
 0x48b   :  { %v6917_v23 = vpop.f32.mrf.mxu3  ;;  %v7070_v47 = vadd.f32 %v7069_v26, %v7068_v62 }
 0x48c   :  { %v6982_v1 = vpop.f32.mrf.mxu0 }
 0x48e   :  { %v6995_v5 = vpop.f32.mrf.mxu1 }
 0x4a0   :  { %v7006_v52 = vpop.f32.mrf.mxu2 }
 0x4a6   :  { %v6967_v6 = vpop.f32.mrf.mxu3 }
 0x4a7   :  { %v6968_v30 = vadd.f32 %v6967_v6, %v6955_v41 }
 0x4a8   :  { %v7008_v31 = vpop.f32.mrf.mxu2 }
 0x4a9   :  { %v6981_v42 = vadd.f32 %v6980_v55, %v6968_v30 }
 0x4ab   :  { %v6994_v14 = vadd.f32 %v6993_v20, %v6981_v42 }
 0x4ad   :  { %v7007_v33 = vadd.f32 %v7006_v52, %v6994_v14 }
 0x4ae   :  { %v6969_v8 = vpop.f32.mrf.mxu3 }
 0x4c6   :  { %v7019_v54 = vpop.f32.mrf.mxu3 }
 0x4c7   :  { %v7020_v51 = vadd.f32 %v7019_v54, %v7007_v33 }
 0x4c9   :  { %v7030_v59 = vmax.f32 %v7020_v51, 0.0 }
 0x4cb   :  { %v7056_v48 = vmul.f32 %v7040_v37, %v7030_v59 }
 0x4cd   :  { %v7071_v39 = vsel %vm7057_vm0, %v7056_v48, 0.0 }
 0x4ce   :  { %v7021_v50 = vpop.f32.mrf.mxu3  ;;  %v7072_v46 = vadd.f32 %v7071_v39, %v7070_v47 }
 0x4d0   :  { %7073 = vadd.xlane.f32.xlu0 %v7072_v46 }
 0x543   :  { %v7074_v9 = vpop.xlane.xlu0 %7073 }
 0x544   :  { %v7079_v49 = vadd.f32 %v11600_v43, %v7074_v9 }
 0x546   :  { %v10695_v57 = vmul.f32 -1.442695, %v7079_v49 }
 0x548   :  { %11601 = vpow2.f32 %v10695_v57 }
 0x54e   :  { %v11602_v58 = vpop.eup %11601 }
 0x54f   :  { %v7083_v53 = vadd.f32 1.0, %v11602_v58 }
 0x551   :  { %11603 = vrcp.f32 %v7083_v53  ;;  %v7095_v22 = vand.u32 2147483648, %v7083_v53  ;;  %v7093_v0 = vand.u32 2147483647, %v7083_v53  ;;  %vm7089_vm2 = vweird.f32 %v7083_v53 }
 0x553   :  { %v7096_v61 = vor.u32 1.1754944e-38, %v7095_v22  ;;  %vm7094_vm4 = vcmp.eq.f32.partialorder %v7093_v0, 8.507059e+37 }
 0x557   :  { %v11604_v2 = vpop.eup %11603 }
 0x558   :  { %v7085_v29 = vmul.f32 %v11604_v2, %v7083_v53  ;;  %vm7090_vm1 = vweird.f32 %v11604_v2 }
 0x559   :  { %vm7091_vm3 = vmor %vm7089_vm2, %vm7090_vm1 }
 0x55a   :  { %v7086_v21 = vsub.f32 1.0, %v7085_v29 }
 0x55c   :  { %v7087_v28 = vmul.f32 %v11604_v2, %v7086_v21 }
 0x55e   :  { %v7088_v56 = vadd.f32 %v11604_v2, %v7087_v28 }
 0x560   :  { %v7092_v19 = vsel %vm7091_vm3, %v11604_v2, %v7088_v56 }
 0x561   :  { %v7097_v38 = vsel %vm7094_vm4, %v7096_v61, %v7092_v19 }
 0x562   :  { %v7099_v62 = vmul.f32 999.0, %v7097_v38 }
 0x564   :  { %v7100_v44 = vadd.f32 1.0, %v7099_v62 }
 0x566   :  { %7102 = vst.msk [vmem:[%s12185_s7] sm:$0x3] %vm7101_vm5, %v7100_v44 }
 0x567   :  { %7107 = vsyncpa [#allocation4], 1 }
 0x568   :  { %7108 = vsyncpa [#allocation6], 1 }
 0x569   :  { %7109 = vsyncpa [#allocation9], 1 }
 0x56a   :  { %7110 = vsyncpa [#allocation12], 1 }

</bundles_post_ra>
